<compile_context>
chip_gen: v6e
topology: v6e:2x2x1
jax: 0.10.0
libtpu: 0.0.40
codegen_flags: <defaults>
</compile_context>

<pallas_src>
import functools
import math

import jax
import jax.numpy as jnp
from jax.experimental import pallas as pl
from jax.experimental.pallas import tpu as pltpu


def feat_attn_kernel(x_ref, we_ref, be_ref, wp_ref, bp_ref, o_ref, *,
                     n_head, head_size):
    """One batch tile of Feat_Attn_1h.

    x_ref : [TB, input_dim]
    we_ref: [input_dim, n_embd],  be_ref: [1, n_embd]
    wp_ref: [n_embd, output_dim], bp_ref: [1, output_dim]
    o_ref : [TB, output_dim]
    """
    hs = head_size
    inv_sqrt_hs = 1.0 / math.sqrt(hs)

    # ---- embed: h = x @ We + be  (f32 accumulation on the MXU) ----
    h = jnp.dot(x_ref[...], we_ref[...], preferred_element_type=jnp.float32)
    h = h + be_ref[...].astype(jnp.float32)                     # [TB, n_embd]

    # Per-head views along the lane axis (static slices of a VMEM value).
    heads = [h[:, i * hs:(i + 1) * hs] for i in range(n_head)]  # each [TB, hs]
    # Fold the 1/sqrt(hs) scale into the query heads once (n_head muls).
    q = [heads[i] * inv_sqrt_hs for i in range(n_head)]

    # ---- between-feature attention: the heads are the "sequence" axis ----
    # scores[i][j] = <q_i, head_j>, per batch row -> [TB, 1]
    scores = [
        [(q[i] * heads[j]).sum(axis=-1, keepdims=True) for j in range(n_head)]
        for i in range(n_head)
    ]

    wp = wp_ref[...].astype(jnp.float32)                        # [n_embd, out]
    acc = jnp.zeros(o_ref.shape, dtype=jnp.float32)

    # n_head is tiny & static -> fully unrolled.
    for i in range(n_head):
        row = scores[i]
        # numerically-stable softmax over j
        m = row[0]
        for j in range(1, n_head):
            m = jnp.maximum(m, row[j])
        e = [jnp.exp(row[j] - m) for j in range(n_head)]
        l = e[0]
        for j in range(1, n_head):
            l = l + e[j]
        inv_l = pl.reciprocal(l, approx=True)                   # EUP, off the VALU
        # attended head i: (sum_j e_ij * head_j) * (1 / l)
        a_i = e[0] * heads[0]
        for j in range(1, n_head):
            a_i = a_i + e[j] * heads[j]
        a_i = a_i * inv_l                                       # [TB, hs]
        # Fold the output projection per head (avoids concatenating heads):
        #   acc += a_i @ Wp[i*hs:(i+1)*hs, :]
        acc = acc + jnp.dot(a_i, wp[i * hs:(i + 1) * hs, :],
                            preferred_element_type=jnp.float32)

    o_ref[...] = (acc + bp_ref[...].astype(jnp.float32)).astype(o_ref.dtype)


def _pick_batch_tile(B, input_dim, n_embd, output_dim, itemsize, vmem_budget):
    """Largest power-of-two batch tile that divides B and fits the VMEM budget."""
    # Rough per-row footprint: double-buffered x/out tiles + f32 hidden/per-head
    # intermediates live during compute. Weights are tiny and counted separately.
    per_row = 2 * (input_dim + output_dim) * itemsize + 8 * n_embd * 4
    cap = max(8, vmem_budget // max(per_row, 1))
    cap = min(cap, 1024)            # 512-1024 rows already reach ~85% HBM roofline
    t = 16 if itemsize < 4 else 8   # bf16 sublane packing wants multiples of 16
    best = None
    while t <= min(B, cap):
        if B % t == 0:
            best = t
        t *= 2
    return best if best is not None else B   # full-array block is always legal


def feat_attn_1h(x, we, be, wp, bp, *, n_head, block_b=None, interpret=False):
    B, input_dim = x.shape
    n_embd = we.shape[1]
    output_dim = wp.shape[1]
    assert n_embd % n_head == 0
    hs = n_embd // n_head
    itemsize = jnp.dtype(x.dtype).itemsize

    # Scoped VMEM: stay inside the current generation's physical ceiling
    # (v7x: 64 MiB/TC vs 128 MiB on v5e/v6e) -> tile size re-derives per chip.
    try:
        phys_vmem = pltpu.get_tpu_info().vmem_capacity_bytes
    except Exception:
        phys_vmem = 64 * 1024 * 1024
    vmem_limit = int(min(phys_vmem // 2, 64 * 1024 * 1024))

    if block_b is None:
        block_b = _pick_batch_tile(B, input_dim, n_embd, output_dim,
                                   itemsize, vmem_limit // 2)
    assert B % block_b == 0, "batch tile must divide B (pad B in the caller)"
    grid = (B // block_b,)

    kernel = functools.partial(feat_attn_kernel, n_head=n_head, head_size=hs)

    flops = 2 * B * (input_dim * n_embd            # embed
                     + 2 * n_head * n_head * hs    # scores + attend
                     + n_embd * output_dim)        # pred
    cost = pl.CostEstimate(
        flops=int(flops),
        transcendentals=int(B * n_head * n_head),  # exp in the softmax
        bytes_accessed=int((x.size + we.size + be.size + wp.size + bp.size
                            + B * output_dim) * itemsize),
    )

    return pl.pallas_call(
        kernel,
        out_shape=jax.ShapeDtypeStruct((B, output_dim), x.dtype),
        grid_spec=pltpu.PrefetchScalarGridSpec(
            num_scalar_prefetch=0,
            grid=grid,
            in_specs=[
                pl.BlockSpec((block_b, input_dim), lambda i: (i, 0)),
                # Weights / biases: constant index_map -> fetched once, VMEM-resident.
                pl.BlockSpec((input_dim, n_embd), lambda i: (0, 0)),
                pl.BlockSpec((1, n_embd), lambda i: (0, 0)),
                pl.BlockSpec((n_embd, output_dim), lambda i: (0, 0)),
                pl.BlockSpec((1, output_dim), lambda i: (0, 0)),
            ],
            out_specs=pl.BlockSpec((block_b, output_dim), lambda i: (i, 0)),
        ),
        compiler_params=pltpu.CompilerParams(
            dimension_semantics=("parallel",),   # independent batch tiles
            vmem_limit_bytes=vmem_limit,
        ),
        cost_estimate=cost,
        interpret=interpret,
    )(x, we, be, wp, bp)


def feat_attn_1h_ref(x, we, be, wp, bp, *, n_head):
    """Pure-JAX reference (highest matmul precision)."""
    hp = jax.lax.Precision.HIGHEST
    B = x.shape[0]
    n_embd = we.shape[1]
    hs = n_embd // n_head
    h = jnp.dot(x, we, precision=hp) + be
    y = h.reshape(B, n_head, hs)
    s = jnp.einsum('bid,bjd->bij', y, y, precision=hp) / jnp.sqrt(jnp.float32(hs))
    p = jax.nn.softmax(s, axis=-1)
    a = jnp.einsum('bij,bjd->bid', p, y, precision=hp).reshape(B, n_embd)
    return jnp.dot(a, wp, precision=hp) + bp


if __name__ == "__main__":
    # Small shapes implied by Feat_Attn_1h(input_dim, n_embd, n_head, output_dim).
    batch, input_dim, n_embd, n_head, output_dim = 128, 16, 32, 4, 8

    key = jax.random.PRNGKey(0)
    kx, kwe, kbe, kwp, kbp = jax.random.split(key, 5)

    x = jax.random.normal(kx, (batch, input_dim), dtype=jnp.float32)
    # Params stored transposed vs. nn.Linear ([in, out]); biases as [1, out].
    we = jax.random.normal(kwe, (input_dim, n_embd), dtype=jnp.float32) * 0.1
    be = jax.random.normal(kbe, (1, n_embd), dtype=jnp.float32) * 0.1
    wp = jax.random.normal(kwp, (n_embd, output_dim), dtype=jnp.float32) * 0.1
    bp = jax.random.normal(kbp, (1, output_dim), dtype=jnp.float32) * 0.1

    ref = feat_attn_1h_ref(x, we, be, wp, bp, n_head=n_head)

    # f32 run (tolerance covers MXU f32 matmul passes + approx reciprocal).
    out = jax.block_until_ready(feat_attn_1h(x, we, be, wp, bp, n_head=n_head))
    assert out.shape == (batch, output_dim)
    assert jnp.allclose(out, ref, atol=5e-3, rtol=1e-2), "f32 mismatch vs reference"

    # bf16 weights/activations with f32 accumulation (the perf configuration).
    xb, web, beb, wpb, bpb = (a.astype(jnp.bfloat16) for a in (x, we, be, wp, bp))
    out_bf16 = jax.block_until_ready(
        feat_attn_1h(xb, web, beb, wpb, bpb, n_head=n_head))
    assert out_bf16.shape == (batch, output_dim)
    assert jnp.allclose(out_bf16.astype(jnp.float32), ref, atol=5e-2, rtol=5e-2), \
        "bf16 run diverged from f32 reference"

    print("KERNEL_OK")
</pallas_src>

<mosaic_0001>
module attributes {stable_mosaic.version = 11 : i64} {
  func.func @feat_attn_kernel(%arg0: i32, %arg1: memref<128x16xf32, #tpu.memory_space<vmem>>, %arg2: memref<16x32xf32, #tpu.memory_space<vmem>>, %arg3: memref<1x32xf32, #tpu.memory_space<vmem>>, %arg4: memref<32x8xf32, #tpu.memory_space<vmem>>, %arg5: memref<1x8xf32, #tpu.memory_space<vmem>>, %arg6: memref<128x8xf32, #tpu.memory_space<vmem>>) attributes {dimension_semantics = [#tpu.dimension_semantics<parallel>], iteration_bounds = array<i64: 1>, scalar_prefetch = 0 : i64, scratch_operands = 0 : i64, tpu.core_type = #tpu.core_type<tc>, window_params = [{transform_indices = @transform_0, window_bounds = array<i64: 128, 16>}, {pipeline_mode = #tpu.pipeline_mode<synchronous>, transform_indices = @transform_1, window_bounds = array<i64: 16, 32>}, {pipeline_mode = #tpu.pipeline_mode<synchronous>, transform_indices = @transform_2, window_bounds = array<i64: 1, 32>}, {pipeline_mode = #tpu.pipeline_mode<synchronous>, transform_indices = @transform_3, window_bounds = array<i64: 32, 8>}, {pipeline_mode = #tpu.pipeline_mode<synchronous>, transform_indices = @transform_4, window_bounds = array<i64: 1, 8>}, {transform_indices = @transform_5, window_bounds = array<i64: 128, 8>}]} {
    %c0 = arith.constant 0 : index
    %c0_0 = arith.constant 0 : index
    %0 = vector.load %arg1[%c0, %c0_0] : memref<128x16xf32, #tpu.memory_space<vmem>>, vector<128x16xf32>
    %c0_1 = arith.constant 0 : index
    %c0_2 = arith.constant 0 : index
    %1 = vector.load %arg2[%c0_1, %c0_2] : memref<16x32xf32, #tpu.memory_space<vmem>>, vector<16x32xf32>
    %cst = arith.constant dense<0.000000e+00> : vector<128x32xf32>
    %2 = tpu.matmul %0, %1, %cst {dimension_numbers = #tpu.dot_dimension_numbers<[1], [0], [0], [1], [0, 0, 1, 1], [], []>} : vector<128x16xf32>, vector<16x32xf32>, vector<128x32xf32> -> vector<128x32xf32>
    %c0_3 = arith.constant 0 : index
    %c0_4 = arith.constant 0 : index
    %3 = vector.load %arg3[%c0_3, %c0_4] : memref<1x32xf32, #tpu.memory_space<vmem>>, vector<1x32xf32>
    %4 = vector.broadcast %3 : vector<1x32xf32> to vector<128x32xf32>
    %5 = arith.addf %2, %4 : vector<128x32xf32>
    %6 = vector.extract_strided_slice %5 {offsets = [0, 0], sizes = [128, 8], strides = [1, 1]} : vector<128x32xf32> to vector<128x8xf32>
    %7 = vector.extract_strided_slice %5 {offsets = [0, 8], sizes = [128, 8], strides = [1, 1]} : vector<128x32xf32> to vector<128x8xf32>
    %8 = vector.extract_strided_slice %5 {offsets = [0, 16], sizes = [128, 8], strides = [1, 1]} : vector<128x32xf32> to vector<128x8xf32>
    %9 = vector.extract_strided_slice %5 {offsets = [0, 24], sizes = [128, 8], strides = [1, 1]} : vector<128x32xf32> to vector<128x8xf32>
    %cst_5 = arith.constant 0.353553385 : f32
    %10 = vector.broadcast %cst_5 : f32 to vector<128x8xf32>
    %11 = arith.mulf %6, %10 : vector<128x8xf32>
    %cst_6 = arith.constant 0.353553385 : f32
    %12 = vector.broadcast %cst_6 : f32 to vector<128x8xf32>
    %13 = arith.mulf %7, %12 : vector<128x8xf32>
    %cst_7 = arith.constant 0.353553385 : f32
    %14 = vector.broadcast %cst_7 : f32 to vector<128x8xf32>
    %15 = arith.mulf %8, %14 : vector<128x8xf32>
    %cst_8 = arith.constant 0.353553385 : f32
    %16 = vector.broadcast %cst_8 : f32 to vector<128x8xf32>
    %17 = arith.mulf %9, %16 : vector<128x8xf32>
    %18 = arith.mulf %11, %6 : vector<128x8xf32>
    %cst_9 = arith.constant dense<0.000000e+00> : vector<128xf32>
    %19 = vector.multi_reduction <add>, %18, %cst_9 [1] : vector<128x8xf32> to vector<128xf32>
    %20 = vector.shape_cast %19 : vector<128xf32> to vector<128x1xf32>
    %21 = arith.mulf %11, %7 : vector<128x8xf32>
    %cst_10 = arith.constant dense<0.000000e+00> : vector<128xf32>
    %22 = vector.multi_reduction <add>, %21, %cst_10 [1] : vector<128x8xf32> to vector<128xf32>
    %23 = vector.shape_cast %22 : vector<128xf32> to vector<128x1xf32>
    %24 = arith.mulf %11, %8 : vector<128x8xf32>
    %cst_11 = arith.constant dense<0.000000e+00> : vector<128xf32>
    %25 = vector.multi_reduction <add>, %24, %cst_11 [1] : vector<128x8xf32> to vector<128xf32>
    %26 = vector.shape_cast %25 : vector<128xf32> to vector<128x1xf32>
    %27 = arith.mulf %11, %9 : vector<128x8xf32>
    %cst_12 = arith.constant dense<0.000000e+00> : vector<128xf32>
    %28 = vector.multi_reduction <add>, %27, %cst_12 [1] : vector<128x8xf32> to vector<128xf32>
    %29 = vector.shape_cast %28 : vector<128xf32> to vector<128x1xf32>
    %30 = arith.mulf %13, %6 : vector<128x8xf32>
    %cst_13 = arith.constant dense<0.000000e+00> : vector<128xf32>
    %31 = vector.multi_reduction <add>, %30, %cst_13 [1] : vector<128x8xf32> to vector<128xf32>
    %32 = vector.shape_cast %31 : vector<128xf32> to vector<128x1xf32>
    %33 = arith.mulf %13, %7 : vector<128x8xf32>
    %cst_14 = arith.constant dense<0.000000e+00> : vector<128xf32>
    %34 = vector.multi_reduction <add>, %33, %cst_14 [1] : vector<128x8xf32> to vector<128xf32>
    %35 = vector.shape_cast %34 : vector<128xf32> to vector<128x1xf32>
    %36 = arith.mulf %13, %8 : vector<128x8xf32>
    %cst_15 = arith.constant dense<0.000000e+00> : vector<128xf32>
    %37 = vector.multi_reduction <add>, %36, %cst_15 [1] : vector<128x8xf32> to vector<128xf32>
    %38 = vector.shape_cast %37 : vector<128xf32> to vector<128x1xf32>
    %39 = arith.mulf %13, %9 : vector<128x8xf32>
    %cst_16 = arith.constant dense<0.000000e+00> : vector<128xf32>
    %40 = vector.multi_reduction <add>, %39, %cst_16 [1] : vector<128x8xf32> to vector<128xf32>
    %41 = vector.shape_cast %40 : vector<128xf32> to vector<128x1xf32>
    %42 = arith.mulf %15, %6 : vector<128x8xf32>
    %cst_17 = arith.constant dense<0.000000e+00> : vector<128xf32>
    %43 = vector.multi_reduction <add>, %42, %cst_17 [1] : vector<128x8xf32> to vector<128xf32>
    %44 = vector.shape_cast %43 : vector<128xf32> to vector<128x1xf32>
    %45 = arith.mulf %15, %7 : vector<128x8xf32>
    %cst_18 = arith.constant dense<0.000000e+00> : vector<128xf32>
    %46 = vector.multi_reduction <add>, %45, %cst_18 [1] : vector<128x8xf32> to vector<128xf32>
    %47 = vector.shape_cast %46 : vector<128xf32> to vector<128x1xf32>
    %48 = arith.mulf %15, %8 : vector<128x8xf32>
    %cst_19 = arith.constant dense<0.000000e+00> : vector<128xf32>
    %49 = vector.multi_reduction <add>, %48, %cst_19 [1] : vector<128x8xf32> to vector<128xf32>
    %50 = vector.shape_cast %49 : vector<128xf32> to vector<128x1xf32>
    %51 = arith.mulf %15, %9 : vector<128x8xf32>
    %cst_20 = arith.constant dense<0.000000e+00> : vector<128xf32>
    %52 = vector.multi_reduction <add>, %51, %cst_20 [1] : vector<128x8xf32> to vector<128xf32>
    %53 = vector.shape_cast %52 : vector<128xf32> to vector<128x1xf32>
    %54 = arith.mulf %17, %6 : vector<128x8xf32>
    %cst_21 = arith.constant dense<0.000000e+00> : vector<128xf32>
    %55 = vector.multi_reduction <add>, %54, %cst_21 [1] : vector<128x8xf32> to vector<128xf32>
    %56 = vector.shape_cast %55 : vector<128xf32> to vector<128x1xf32>
    %57 = arith.mulf %17, %7 : vector<128x8xf32>
    %cst_22 = arith.constant dense<0.000000e+00> : vector<128xf32>
    %58 = vector.multi_reduction <add>, %57, %cst_22 [1] : vector<128x8xf32> to vector<128xf32>
    %59 = vector.shape_cast %58 : vector<128xf32> to vector<128x1xf32>
    %60 = arith.mulf %17, %8 : vector<128x8xf32>
    %cst_23 = arith.constant dense<0.000000e+00> : vector<128xf32>
    %61 = vector.multi_reduction <add>, %60, %cst_23 [1] : vector<128x8xf32> to vector<128xf32>
    %62 = vector.shape_cast %61 : vector<128xf32> to vector<128x1xf32>
    %63 = arith.mulf %17, %9 : vector<128x8xf32>
    %cst_24 = arith.constant dense<0.000000e+00> : vector<128xf32>
    %64 = vector.multi_reduction <add>, %63, %cst_24 [1] : vector<128x8xf32> to vector<128xf32>
    %65 = vector.shape_cast %64 : vector<128xf32> to vector<128x1xf32>
    %c0_25 = arith.constant 0 : index
    %c0_26 = arith.constant 0 : index
    %66 = vector.load %arg4[%c0_25, %c0_26] : memref<32x8xf32, #tpu.memory_space<vmem>>, vector<32x8xf32>
    %cst_27 = arith.constant 0.000000e+00 : f32
    %67 = vector.broadcast %cst_27 : f32 to vector<128x8xf32>
    %68 = arith.maximumf %20, %23 : vector<128x1xf32>
    %69 = arith.maximumf %68, %26 : vector<128x1xf32>
    %70 = arith.maximumf %69, %29 : vector<128x1xf32>
    %71 = arith.subf %20, %70 : vector<128x1xf32>
    %72 = math.exp %71 : vector<128x1xf32>
    %73 = arith.subf %23, %70 : vector<128x1xf32>
    %74 = math.exp %73 : vector<128x1xf32>
    %75 = arith.subf %26, %70 : vector<128x1xf32>
    %76 = math.exp %75 : vector<128x1xf32>
    %77 = arith.subf %29, %70 : vector<128x1xf32>
    %78 = math.exp %77 : vector<128x1xf32>
    %79 = arith.addf %72, %74 : vector<128x1xf32>
    %80 = arith.addf %79, %76 : vector<128x1xf32>
    %81 = arith.addf %80, %78 : vector<128x1xf32>
    %82 = tpu.reciprocal %81 {approx = true} : vector<128x1xf32> -> vector<128x1xf32>
    %83 = vector.broadcast %72 : vector<128x1xf32> to vector<128x8xf32>
    %84 = arith.mulf %83, %6 : vector<128x8xf32>
    %85 = vector.broadcast %74 : vector<128x1xf32> to vector<128x8xf32>
    %86 = arith.mulf %85, %7 : vector<128x8xf32>
    %87 = arith.addf %84, %86 : vector<128x8xf32>
    %88 = vector.broadcast %76 : vector<128x1xf32> to vector<128x8xf32>
    %89 = arith.mulf %88, %8 : vector<128x8xf32>
    %90 = arith.addf %87, %89 : vector<128x8xf32>
    %91 = vector.broadcast %78 : vector<128x1xf32> to vector<128x8xf32>
    %92 = arith.mulf %91, %9 : vector<128x8xf32>
    %93 = arith.addf %90, %92 : vector<128x8xf32>
    %94 = vector.broadcast %82 : vector<128x1xf32> to vector<128x8xf32>
    %95 = arith.mulf %93, %94 : vector<128x8xf32>
    %96 = vector.extract_strided_slice %66 {offsets = [0, 0], sizes = [8, 8], strides = [1, 1]} : vector<32x8xf32> to vector<8x8xf32>
    %cst_28 = arith.constant dense<0.000000e+00> : vector<128x8xf32>
    %97 = tpu.matmul %95, %96, %cst_28 {dimension_numbers = #tpu.dot_dimension_numbers<[1], [0], [0], [1], [0, 0, 1, 1], [], []>} : vector<128x8xf32>, vector<8x8xf32>, vector<128x8xf32> -> vector<128x8xf32>
    %98 = arith.addf %67, %97 : vector<128x8xf32>
    %99 = arith.maximumf %32, %35 : vector<128x1xf32>
    %100 = arith.maximumf %99, %38 : vector<128x1xf32>
    %101 = arith.maximumf %100, %41 : vector<128x1xf32>
    %102 = arith.subf %32, %101 : vector<128x1xf32>
    %103 = math.exp %102 : vector<128x1xf32>
    %104 = arith.subf %35, %101 : vector<128x1xf32>
    %105 = math.exp %104 : vector<128x1xf32>
    %106 = arith.subf %38, %101 : vector<128x1xf32>
    %107 = math.exp %106 : vector<128x1xf32>
    %108 = arith.subf %41, %101 : vector<128x1xf32>
    %109 = math.exp %108 : vector<128x1xf32>
    %110 = arith.addf %103, %105 : vector<128x1xf32>
    %111 = arith.addf %110, %107 : vector<128x1xf32>
    %112 = arith.addf %111, %109 : vector<128x1xf32>
    %113 = tpu.reciprocal %112 {approx = true} : vector<128x1xf32> -> vector<128x1xf32>
    %114 = vector.broadcast %103 : vector<128x1xf32> to vector<128x8xf32>
    %115 = arith.mulf %114, %6 : vector<128x8xf32>
    %116 = vector.broadcast %105 : vector<128x1xf32> to vector<128x8xf32>
    %117 = arith.mulf %116, %7 : vector<128x8xf32>
    %118 = arith.addf %115, %117 : vector<128x8xf32>
    %119 = vector.broadcast %107 : vector<128x1xf32> to vector<128x8xf32>
    %120 = arith.mulf %119, %8 : vector<128x8xf32>
    %121 = arith.addf %118, %120 : vector<128x8xf32>
    %122 = vector.broadcast %109 : vector<128x1xf32> to vector<128x8xf32>
    %123 = arith.mulf %122, %9 : vector<128x8xf32>
    %124 = arith.addf %121, %123 : vector<128x8xf32>
    %125 = vector.broadcast %113 : vector<128x1xf32> to vector<128x8xf32>
    %126 = arith.mulf %124, %125 : vector<128x8xf32>
    %127 = vector.extract_strided_slice %66 {offsets = [8, 0], sizes = [8, 8], strides = [1, 1]} : vector<32x8xf32> to vector<8x8xf32>
    %cst_29 = arith.constant dense<0.000000e+00> : vector<128x8xf32>
    %128 = tpu.matmul %126, %127, %cst_29 {dimension_numbers = #tpu.dot_dimension_numbers<[1], [0], [0], [1], [0, 0, 1, 1], [], []>} : vector<128x8xf32>, vector<8x8xf32>, vector<128x8xf32> -> vector<128x8xf32>
    %129 = arith.addf %98, %128 : vector<128x8xf32>
    %130 = arith.maximumf %44, %47 : vector<128x1xf32>
    %131 = arith.maximumf %130, %50 : vector<128x1xf32>
    %132 = arith.maximumf %131, %53 : vector<128x1xf32>
    %133 = arith.subf %44, %132 : vector<128x1xf32>
    %134 = math.exp %133 : vector<128x1xf32>
    %135 = arith.subf %47, %132 : vector<128x1xf32>
    %136 = math.exp %135 : vector<128x1xf32>
    %137 = arith.subf %50, %132 : vector<128x1xf32>
    %138 = math.exp %137 : vector<128x1xf32>
    %139 = arith.subf %53, %132 : vector<128x1xf32>
    %140 = math.exp %139 : vector<128x1xf32>
    %141 = arith.addf %134, %136 : vector<128x1xf32>
    %142 = arith.addf %141, %138 : vector<128x1xf32>
    %143 = arith.addf %142, %140 : vector<128x1xf32>
    %144 = tpu.reciprocal %143 {approx = true} : vector<128x1xf32> -> vector<128x1xf32>
    %145 = vector.broadcast %134 : vector<128x1xf32> to vector<128x8xf32>
    %146 = arith.mulf %145, %6 : vector<128x8xf32>
    %147 = vector.broadcast %136 : vector<128x1xf32> to vector<128x8xf32>
    %148 = arith.mulf %147, %7 : vector<128x8xf32>
    %149 = arith.addf %146, %148 : vector<128x8xf32>
    %150 = vector.broadcast %138 : vector<128x1xf32> to vector<128x8xf32>
    %151 = arith.mulf %150, %8 : vector<128x8xf32>
    %152 = arith.addf %149, %151 : vector<128x8xf32>
    %153 = vector.broadcast %140 : vector<128x1xf32> to vector<128x8xf32>
    %154 = arith.mulf %153, %9 : vector<128x8xf32>
    %155 = arith.addf %152, %154 : vector<128x8xf32>
    %156 = vector.broadcast %144 : vector<128x1xf32> to vector<128x8xf32>
    %157 = arith.mulf %155, %156 : vector<128x8xf32>
    %158 = vector.extract_strided_slice %66 {offsets = [16, 0], sizes = [8, 8], strides = [1, 1]} : vector<32x8xf32> to vector<8x8xf32>
    %cst_30 = arith.constant dense<0.000000e+00> : vector<128x8xf32>
    %159 = tpu.matmul %157, %158, %cst_30 {dimension_numbers = #tpu.dot_dimension_numbers<[1], [0], [0], [1], [0, 0, 1, 1], [], []>} : vector<128x8xf32>, vector<8x8xf32>, vector<128x8xf32> -> vector<128x8xf32>
    %160 = arith.addf %129, %159 : vector<128x8xf32>
    %161 = arith.maximumf %56, %59 : vector<128x1xf32>
    %162 = arith.maximumf %161, %62 : vector<128x1xf32>
    %163 = arith.maximumf %162, %65 : vector<128x1xf32>
    %164 = arith.subf %56, %163 : vector<128x1xf32>
    %165 = math.exp %164 : vector<128x1xf32>
    %166 = arith.subf %59, %163 : vector<128x1xf32>
    %167 = math.exp %166 : vector<128x1xf32>
    %168 = arith.subf %62, %163 : vector<128x1xf32>
    %169 = math.exp %168 : vector<128x1xf32>
    %170 = arith.subf %65, %163 : vector<128x1xf32>
    %171 = math.exp %170 : vector<128x1xf32>
    %172 = arith.addf %165, %167 : vector<128x1xf32>
    %173 = arith.addf %172, %169 : vector<128x1xf32>
    %174 = arith.addf %173, %171 : vector<128x1xf32>
    %175 = tpu.reciprocal %174 {approx = true} : vector<128x1xf32> -> vector<128x1xf32>
    %176 = vector.broadcast %165 : vector<128x1xf32> to vector<128x8xf32>
    %177 = arith.mulf %176, %6 : vector<128x8xf32>
    %178 = vector.broadcast %167 : vector<128x1xf32> to vector<128x8xf32>
    %179 = arith.mulf %178, %7 : vector<128x8xf32>
    %180 = arith.addf %177, %179 : vector<128x8xf32>
    %181 = vector.broadcast %169 : vector<128x1xf32> to vector<128x8xf32>
    %182 = arith.mulf %181, %8 : vector<128x8xf32>
    %183 = arith.addf %180, %182 : vector<128x8xf32>
    %184 = vector.broadcast %171 : vector<128x1xf32> to vector<128x8xf32>
    %185 = arith.mulf %184, %9 : vector<128x8xf32>
    %186 = arith.addf %183, %185 : vector<128x8xf32>
    %187 = vector.broadcast %175 : vector<128x1xf32> to vector<128x8xf32>
    %188 = arith.mulf %186, %187 : vector<128x8xf32>
    %189 = vector.extract_strided_slice %66 {offsets = [24, 0], sizes = [8, 8], strides = [1, 1]} : vector<32x8xf32> to vector<8x8xf32>
    %cst_31 = arith.constant dense<0.000000e+00> : vector<128x8xf32>
    %190 = tpu.matmul %188, %189, %cst_31 {dimension_numbers = #tpu.dot_dimension_numbers<[1], [0], [0], [1], [0, 0, 1, 1], [], []>} : vector<128x8xf32>, vector<8x8xf32>, vector<128x8xf32> -> vector<128x8xf32>
    %191 = arith.addf %160, %190 : vector<128x8xf32>
    %c0_32 = arith.constant 0 : index
    %c0_33 = arith.constant 0 : index
    %192 = vector.load %arg5[%c0_32, %c0_33] : memref<1x8xf32, #tpu.memory_space<vmem>>, vector<1x8xf32>
    %193 = vector.broadcast %192 : vector<1x8xf32> to vector<128x8xf32>
    %194 = arith.addf %191, %193 : vector<128x8xf32>
    %c0_34 = arith.constant 0 : index
    %c0_35 = arith.constant 0 : index
    %195 = vector.load %arg6[%c0_34, %c0_35] : memref<128x8xf32, #tpu.memory_space<vmem>>, vector<128x8xf32>
    tpu.vector_store %arg6[%c0_34, %c0_35], %194 {strides = array<i32>} : memref<128x8xf32, #tpu.memory_space<vmem>>, vector<128x8xf32>,
    return
  }
  func.func @transform_0(%arg0: i32) -> (i32, i32) {
    %c0_i32 = arith.constant 0 : i32
    %c0_i32_0 = arith.constant 0 : i32
    return %arg0, %c0_i32 : i32, i32
  }
  func.func @transform_1(%arg0: i32) -> (i32, i32) {
    %c0_i32 = arith.constant 0 : i32
    %c0_i32_0 = arith.constant 0 : i32
    %c0_i32_1 = arith.constant 0 : i32
    return %c0_i32, %c0_i32_0 : i32, i32
  }
  func.func @transform_2(%arg0: i32) -> (i32, i32) {
    %c0_i32 = arith.constant 0 : i32
    %c0_i32_0 = arith.constant 0 : i32
    %c0_i32_1 = arith.constant 0 : i32
    return %c0_i32, %c0_i32_0 : i32, i32
  }
  func.func @transform_3(%arg0: i32) -> (i32, i32) {
    %c0_i32 = arith.constant 0 : i32
    %c0_i32_0 = arith.constant 0 : i32
    %c0_i32_1 = arith.constant 0 : i32
    return %c0_i32, %c0_i32_0 : i32, i32
  }
  func.func @transform_4(%arg0: i32) -> (i32, i32) {
    %c0_i32 = arith.constant 0 : i32
    %c0_i32_0 = arith.constant 0 : i32
    %c0_i32_1 = arith.constant 0 : i32
    return %c0_i32, %c0_i32_0 : i32, i32
  }
  func.func @transform_5(%arg0: i32) -> (i32, i32) {
    %c0_i32 = arith.constant 0 : i32
    %c0_i32_0 = arith.constant 0 : i32
    return %arg0, %c0_i32 : i32, i32
  }
}

</mosaic_0001>

<bundles_post_ra>
// kernel: tpu_custom_call.1
= control target key start
LH: loop header
LB: loop body
LE: loop exit
PB: predicated region body
PF: predicated region fallthrough
CT: control target
= control target key end

     0   :  { %vm45_vm0 = vcmask 130048   ;;  %s6408_s29 = smov 112   ;;  %vm271_vm1 = vcmask 64512   ;;  %s6410_s30 = smov 8   ;;  %s10813_s1 = inlined_call_operand.vmem [shape: f32[16,32], index: 1, kind: input, shape index: {}]   ;;  %s10814_s0 = inlined_call_operand.vmem [shape: f32[128,16], index: 0, kind: input, shape index: {}]   ;;  %s10815_s2 = inlined_call_operand.vmem [shape: f32[1,32], index: 2, kind: input, shape index: {}]   ;;  %s10816_s3 = inlined_call_operand.vmem [shape: f32[32,8], index: 3, kind: input, shape index: {}]   ;;  %s10817_s4 = inlined_call_operand.vmem [shape: f32[1,8], index: 4, kind: input, shape index: {}]   ;;  %s10818_s5 = inlined_call_operand.vmem [shape: f32[128,8], index: 5, kind: output, shape index: {}]  }
   0x1   :  { %v37_v0 = vld [vmem:[%s10813_s1 + $0x8] sm:$0xff]  ;;  %v36_v1 = vld [vmem:[%s10813_s1] sm:$0xff]  ;;  %v22_v4 = vld [vmem:[%s10814_s0 + $0x10] sm:$0xff]  ;;  %s6411_s6 = smov 16   ;;  %s6412_s7 = smov 24  }
   0x2   :  { %v20_v2 = vld [vmem:[%s10814_s0] sm:$0xff]  ;;  %5627 = vmatprep.subr.mxu0 %v37_v0  ;;  %v21_v3 = vld [vmem:[%s10814_s0 + $0x8] sm:$0xff]  ;;  %v23_v5 = vld [vmem:[%s10814_s0 + $0x18] sm:$0xff] }
   0x3   :  { %5631 = vmatprep.mubr.msk.f32.mxu0 %vm45_vm0, %v20_v2  ;;  %5628 = vmatpush3.msra.mxu0 %v37_v0  ;;  %v24_v6 = vld [vmem:[%s10814_s0 + $0x20] sm:$0xff]  ;;  %v25_v7 = vld [vmem:[%s10814_s0 + $0x28] sm:$0xff]  ;;  %v26_v8 = vld [vmem:[%s10814_s0 + $0x30] sm:$0xff] }
   0x4   :  { %5629 = vmatprep.subr.mxu0 %v36_v1  ;;  %v27_v9 = vld [vmem:[%s10814_s0 + $0x38] sm:$0xff]  ;;  %v28_v10 = vld [vmem:[%s10814_s0 + $0x40] sm:$0xff]  ;;  %v29_v11 = vld [vmem:[%s10814_s0 + $0x48] sm:$0xff] }
   0x5   :  { %5630 = vmatpush3.msra.mxu0 %v36_v1  ;;  %v30_v12 = vld [vmem:[%s10814_s0 + $0x50] sm:$0xff]  ;;  %v31_v13 = vld [vmem:[%s10814_s0 + $0x58] sm:$0xff]  ;;  %v32_v14 = vld [vmem:[%s10814_s0 + $0x60] sm:$0xff] }
   0x6   :  { %5632 = vmatmul.mubr.msk.f32.vlgmr.msra.gmra.mxu0 %vm45_vm0, %v21_v3  ;;  %v33_v15 = vld [vmem:[%s10814_s0 + $0x68] sm:$0xff]  ;;  %v6508_v16 = vld [vmem:[%s10815_s2] ss:$0 sm:$0xff]  ;;  %v34_v17 = vld [vmem:[%s10814_s0 + $0x70] sm:$0xff]  ;;  %s6407_s2 = smov 120  }
   0x7   :  { %5634 = vmatprep.mubr.msk.f32.mxu0 %vm45_vm0, %v22_v4  ;;  %v35_v19 = vld [vmem:[%s10814_s0 + $0x78] sm:$0xff]  ;;  %s6409_s0 = smov 104  }
   0xa   :  { %5635 = vmatmul.mubr.msk.f32.gmra.mxu0 %vm45_vm0, %v23_v5 }
   0xb   :  { %5637 = vmatprep.mubr.msk.f32.mxu0 %vm45_vm0, %v24_v6 }
   0xe   :  { %5638 = vmatmul.mubr.msk.f32.gmra.mxu0 %vm45_vm0, %v25_v7 }
   0xf   :  { %5640 = vmatprep.mubr.msk.f32.mxu0 %vm45_vm0, %v26_v8 }
  0x12   :  { %5641 = vmatmul.mubr.msk.f32.gmra.mxu0 %vm45_vm0, %v27_v9 }
  0x13   :  { %5643 = vmatprep.mubr.msk.f32.mxu0 %vm45_vm0, %v28_v10 }
  0x16   :  { %5644 = vmatmul.mubr.msk.f32.gmra.mxu0 %vm45_vm0, %v29_v11 }
  0x17   :  { %5646 = vmatprep.mubr.msk.f32.mxu0 %vm45_vm0, %v30_v12 }
  0x1a   :  { %5647 = vmatmul.mubr.msk.f32.gmra.mxu0 %vm45_vm0, %v31_v13 }
  0x1b   :  { %5649 = vmatprep.mubr.msk.f32.mxu0 %vm45_vm0, %v32_v14 }
  0x1e   :  { %5650 = vmatmul.mubr.msk.f32.gmra.mxu0 %vm45_vm0, %v33_v15 }
  0x1f   :  { %5652 = vmatprep.mubr.msk.f32.mxu0 %vm45_vm0, %v34_v17 }
  0x22   :  { %5653 = vmatmul.mubr.msk.f32.gmra.mxu0 %vm45_vm0, %v35_v19 }
  0xc6   :  { %v5633_v18 = vpop.f32.mrf.mxu0 }
  0xc7   :  { %v6518_v20 = vadd.f32 %v5633_v18, %v6508_v16 }
  0xc8   :  { %v160_v21 = vpop.f32.mrf.mxu0 }
  0xc9   :  { %11285 = vst [vmem:[#allocation2_spill] sm:$0xff] %v6518_v20  ;;  %v6522_v22 = vadd.f32 %v6508_v16, %v160_v21  ;;  %338 = vrot.lane.b32.xlu1 %v6518_v20, %s6407_s2  ;;  %v6555_v27 = vmul.f32 0.35355338, %v6518_v20 }
  0xca   :  { %v5636_v23 = vpop.f32.mrf.mxu0 }
  0xcb   :  { %11286 = vst [vmem:[#allocation3_spill] sm:$0xff] %v6522_v22  ;;  %336 = vrot.lane.b32.xlu0 %v6522_v22, %s6407_s2  ;;  %v6535_v24 = vadd.f32 %v5636_v23, %v6508_v16  ;;  %11289 = vst [vmem:[#allocation6_spill] sm:$0xff] %v6555_v27  ;;  %v6564_v30 = vmul.f32 %v6555_v27, %v6518_v20  ;;  %v6567_v31 = vmul.f32 0.35355338, %v6522_v22 }
  0xcc   :  { %v170_v25 = vpop.f32.mrf.mxu0 }
  0xcd   :  { %450 = vrot.lane.b32.xlu1 %v6518_v20, %s6408_s29  ;;  %11287 = vst [vmem:[#allocation4_spill] sm:$0xff] %v6535_v24  ;;  %v6546_v26 = vadd.f32 %v6508_v16, %v170_v25  ;;  %11291 = vst [vmem:[#allocation8_spill] sm:$0xff] %v6564_v30  ;;  %v275_v32 = vsel %vm271_vm1, %v6564_v30, 0.0  ;;  %v6575_v33 = vmul.f32 %v6567_v31, %v6522_v22  ;;  %v6589_v38 = vmul.f32 0.35355338, %v6535_v24 }
  0xce   :  { %v5639_v28 = vpop.f32.mrf.mxu0  ;;  %11292 = vst [vmem:[#allocation9_spill] sm:$0xff] %v6567_v31 }
  0xcf   :  { %448 = vrot.lane.b32.xlu0 %v6522_v22, %s6408_s29  ;;  %11288 = vst [vmem:[#allocation5_spill] sm:$0xff] %v6546_v26  ;;  %v6558_v29 = vadd.f32 %v5639_v28, %v6508_v16  ;;  %11293 = vst [vmem:[#allocation10_spill] sm:$0xff] %v6575_v33  ;;  %v272_v34 = vsel %vm271_vm1, %v6575_v33, 0.0  ;;  %v6598_v41 = vmul.f32 %v6589_v38, %v6535_v24  ;;  %v6601_v42 = vmul.f32 0.35355338, %v6546_v26 }
  0xd0   :  { %v180_v35 = vpop.f32.mrf.mxu0  ;;  %11295 = vst [vmem:[#allocation12_spill] sm:$0xff] %v6589_v38 }
  0xd1   :  { %562 = vrot.lane.b32.xlu1 %v6518_v20, %s6409_s0  ;;  %11290 = vst [vmem:[#allocation7_spill] sm:$0xff] %v6558_v29  ;;  %v6582_v36 = vadd.f32 %v6508_v16, %v180_v35  ;;  %11297 = vst [vmem:[#allocation14_spill] sm:$0xff] %v6598_v41  ;;  %v281_v43 = vsel %vm271_vm1, %v6598_v41, 0.0  ;;  %v6609_v44 = vmul.f32 %v6601_v42, %v6546_v26  ;;  %v6639_v53 = vmul.f32 0.35355338, %v6558_v29 }
  0xd2   :  { %v5642_v37 = vpop.f32.mrf.mxu0  ;;  %11298 = vst [vmem:[#allocation15_spill] sm:$0xff] %v6601_v42 }
  0xd3   :  { %560 = vrot.lane.b32.xlu0 %v6522_v22, %s6409_s0  ;;  %11294 = vst [vmem:[#allocation11_spill] sm:$0xff] %v6582_v36  ;;  %11299 = vst [vmem:[#allocation16_spill] sm:$0xff] %v6609_v44  ;;  %v278_v45 = vsel %vm271_vm1, %v6609_v44, 0.0  ;;  %v6618_v46 = vadd.f32 %v5642_v37, %v6508_v16  ;;  %v6627_v47 = vmul.f32 0.35355338, %v6582_v36  ;;  %v6645_v54 = vmul.f32 %v6639_v53, %v6558_v29 }
  0xd4   :  { %v190_v39 = vpop.f32.mrf.mxu0  ;;  %11304 = vst [vmem:[#allocation21_spill] sm:$0xff] %v6639_v53 }
  0xd5   :  { %342 = vrot.lane.b32.xlu1 %v6535_v24, %s6407_s2  ;;  %v6594_v40 = vadd.f32 %v6508_v16, %v190_v39  ;;  %11300 = vst [vmem:[#allocation17_spill] sm:$0xff] %v6618_v46  ;;  %11301 = vst [vmem:[#allocation18_spill] sm:$0xff] %v6627_v47  ;;  %v6631_v48 = vmul.f32 %v6627_v47, %v6582_v36  ;;  %v287_v55 = vsel %vm271_vm1, %v6645_v54, 0.0  ;;  %v6675_v63 = vmul.f32 0.35355338, %v6618_v46 }
  0xd6   :  { %v5645_v50 = vpop.f32.mrf.mxu0  ;;  %11305 = vst [vmem:[#allocation22_spill] sm:$0xff] %v6645_v54 }
  0xd7   :  { %11296 = vst [vmem:[#allocation13_spill] sm:$0xff] %v6594_v40  ;;  %11302 = vst [vmem:[#allocation19_spill] sm:$0xff] %v6631_v48  ;;  %v284_v49 = vsel %vm271_vm1, %v6631_v48, 0.0  ;;  %v6654_v56 = vadd.f32 %v5645_v50, %v6508_v16  ;;  %v6663_v57 = vmul.f32 0.35355338, %v6594_v40  ;;  %v6681_v0 = vmul.f32 %v6675_v63, %v6618_v46 }
  0xd8   :  { %v200_v51 = vpop.f32.mrf.mxu0  ;;  %11310 = vst [vmem:[#allocation27_spill] sm:$0xff] %v6675_v63 }
  0xd9   :  { %454 = vrot.lane.b32.xlu1 %v6535_v24, %s6408_s29  ;;  %v6636_v52 = vadd.f32 %v6508_v16, %v200_v51  ;;  %11306 = vst [vmem:[#allocation23_spill] sm:$0xff] %v6654_v56  ;;  %11307 = vst [vmem:[#allocation24_spill] sm:$0xff] %v6663_v57  ;;  %v6667_v58 = vmul.f32 %v6663_v57, %v6594_v40  ;;  %v293_v1 = vsel %vm271_vm1, %v6681_v0, 0.0  ;;  %v6711_v9 = vmul.f32 0.35355338, %v6654_v56 }
  0xda   :  { %v5648_v60 = vpop.f32.mrf.mxu0  ;;  %11311 = vst [vmem:[#allocation28_spill] sm:$0xff] %v6681_v0 }
  0xdb   :  { %11303 = vst [vmem:[#allocation20_spill] sm:$0xff] %v6636_v52  ;;  %11308 = vst [vmem:[#allocation25_spill] sm:$0xff] %v6667_v58  ;;  %v290_v59 = vsel %vm271_vm1, %v6667_v58, 0.0  ;;  %v6690_v2 = vadd.f32 %v5648_v60, %v6508_v16  ;;  %v6699_v3 = vmul.f32 0.35355338, %v6636_v52  ;;  %v6717_v10 = vmul.f32 %v6711_v9, %v6654_v56 }
  0xdc   :  { %v210_v61 = vpop.f32.mrf.mxu0  ;;  %11316 = vst [vmem:[#allocation33_spill] sm:$0xff] %v6711_v9 }
  0xdd   :  { %566 = vrot.lane.b32.xlu1 %v6535_v24, %s6409_s0  ;;  %v6672_v62 = vadd.f32 %v6508_v16, %v210_v61  ;;  %11312 = vst [vmem:[#allocation29_spill] sm:$0xff] %v6690_v2  ;;  %11313 = vst [vmem:[#allocation30_spill] sm:$0xff] %v6699_v3  ;;  %v6703_v4 = vmul.f32 %v6699_v3, %v6636_v52  ;;  %v299_v11 = vsel %vm271_vm1, %v6717_v10, 0.0 }
  0xde   :  { %v5651_v6 = vpop.f32.mrf.mxu0  ;;  %11317 = vst [vmem:[#allocation34_spill] sm:$0xff] %v6717_v10 }
  0xdf   :  { %11309 = vst [vmem:[#allocation26_spill] sm:$0xff] %v6672_v62  ;;  %11314 = vst [vmem:[#allocation31_spill] sm:$0xff] %v6703_v4  ;;  %v296_v5 = vsel %vm271_vm1, %v6703_v4, 0.0  ;;  %v6726_v12 = vadd.f32 %v5651_v6, %v6508_v16  ;;  %v6735_v13 = vmul.f32 0.35355338, %v6672_v62 }
  0xe0   :  { %v220_v7 = vpop.f32.mrf.mxu0 }
  0xe1   :  { %340 = vrot.lane.b32.xlu1 %v6546_v26, %s6407_s2  ;;  %v6708_v8 = vadd.f32 %v6508_v16, %v220_v7  ;;  %11318 = vst [vmem:[#allocation35_spill] sm:$0xff] %v6726_v12  ;;  %11319 = vst [vmem:[#allocation36_spill] sm:$0xff] %v6735_v13  ;;  %v6739_v14 = vmul.f32 %v6735_v13, %v6672_v62 }
  0xe2   :  { %v5654_v21 = vpop.f32.mrf.mxu0 }
  0xe3   :  { %11315 = vst [vmem:[#allocation32_spill] sm:$0xff] %v6708_v8  ;;  %11320 = vst [vmem:[#allocation37_spill] sm:$0xff] %v6739_v14  ;;  %v302_v17 = vsel %vm271_vm1, %v6739_v14, 0.0  ;;  %v6772_v60 = vadd.f32 %v5654_v21, %v6508_v16  ;;  %v6787_v7 = vmul.f32 0.35355338, %v6708_v8 }
  0xe4   :  { %v230_v23 = vpop.f32.mrf.mxu0 }
  0xe5   :  { %452 = vrot.lane.b32.xlu1 %v6546_v26, %s6408_s29  ;;  %11324 = vst [vmem:[#allocation41_spill] sm:$0xff] %v6772_v60  ;;  %11325 = vst [vmem:[#allocation42_spill] sm:$0xff] %v6787_v7 }
  0xe9   :  { %564 = vrot.lane.b32.xlu1 %v6546_v26, %s6409_s0 }
  0xed   :  { %346 = vrot.lane.b32.xlu1 %v6558_v29, %s6407_s2 }
  0xf1   :  { %458 = vrot.lane.b32.xlu1 %v6558_v29, %s6408_s29 }
  0xf2   :  { %276 = vadd.xlane.f32.xlu0 %v275_v32  ;;  %v6750_v32 = vadd.f32 %v6508_v16, %v230_v23  ;;  %v6791_v16 = vmul.f32 %v6787_v7, %v6708_v8 }
  0xf4   :  { %11321 = vst [vmem:[#allocation38_spill] sm:$0xff] %v6750_v32  ;;  %11326 = vst [vmem:[#allocation43_spill] sm:$0xff] %v6791_v16  ;;  %v308_v23 = vsel %vm271_vm1, %v6791_v16, 0.0 }
  0xf5   :  { %570 = vrot.lane.b32.xlu1 %v6558_v29, %s6409_s0 }
  0xf6   :  { %273 = vadd.xlane.f32.xlu0 %v272_v34  ;;  %v6753_v34 = vmul.f32 0.35355338, %v6690_v2 }
  0xf8   :  { %11322 = vst [vmem:[#allocation39_spill] sm:$0xff] %v6753_v34  ;;  %v6759_v37 = vmul.f32 %v6753_v34, %v6690_v2 }
  0xfa   :  { %11323 = vst [vmem:[#allocation40_spill] sm:$0xff] %v6759_v37 }
 0x10c   :  { %344 = vrot.lane.b32.xlu0 %v6582_v36, %s6407_s2 }
 0x110   :  { %456 = vrot.lane.b32.xlu0 %v6582_v36, %s6408_s29 }
 0x114   :  { %568 = vrot.lane.b32.xlu0 %v6582_v36, %s6409_s0 }
 0x118   :  { %348 = vrot.lane.b32.xlu0 %v6594_v40, %s6407_s2 }
 0x119   :  { %282 = vadd.xlane.f32.xlu1 %v281_v43  ;;  %v305_v43 = vsel %vm271_vm1, %v6759_v37, 0.0 }
 0x11c   :  { %460 = vrot.lane.b32.xlu0 %v6594_v40, %s6408_s29 }
 0x11d   :  { %279 = vadd.xlane.f32.xlu1 %v278_v45 }
 0x120   :  { %572 = vrot.lane.b32.xlu0 %v6594_v40, %s6409_s0 }
 0x12e   :  { %350 = vrot.lane.b32.xlu1 %v6618_v46, %s6407_s2 }
 0x132   :  { %462 = vrot.lane.b32.xlu1 %v6618_v46, %s6408_s29 }
 0x136   :  { %574 = vrot.lane.b32.xlu1 %v6618_v46, %s6409_s0 }
 0x13b   :  { %v6741_v15 = vpop.permute.xlu1 %338 }
 0x13d   :  { %v337_v28 = vpop.permute.xlu0 %336 }
 0x13e   :  { %v6809_v14 = vmul.f32 %v337_v28, %v6567_v31 }
 0x13f   :  { %285 = vadd.xlane.f32.xlu0 %v284_v49  ;;  %v6745_v18 = vpop.permute.xlu1 %450 }
 0x140   :  { %11329 = vst [vmem:[#allocation46_spill] sm:$0xff] %v6809_v14  ;;  %v400_v58 = vsel %vm271_vm1, %v6809_v14, 0.0 }
 0x141   :  { %v449_v39 = vpop.permute.xlu0 %448 }
 0x142   :  { %v6816_v0 = vmul.f32 %v449_v39, %v6567_v31 }
 0x143   :  { %v6747_v19 = vpop.permute.xlu1 %562 }
 0x144   :  { %11330 = vst [vmem:[#allocation47_spill] sm:$0xff] %v6816_v0  ;;  %v512_v54 = vsel %vm271_vm1, %v6816_v0, 0.0 }
 0x145   :  { %v561_v49 = vpop.permute.xlu0 %560 }
 0x146   :  { %v608_v28 = vmul.f32 %v561_v49, %v6567_v31 }
 0x147   :  { %v343_v25 = vpop.permute.xlu1 %342 }
 0x148   :  { %v6832_v39 = vmul.f32 %v343_v25, %v6589_v38 }
 0x14a   :  { %11331 = vst [vmem:[#allocation48_spill] sm:$0xff] %v6832_v39 }
 0x14b   :  { %v455_v35 = vpop.permute.xlu1 %454 }
 0x14c   :  { %v6841_v49 = vmul.f32 %v455_v35, %v6589_v38 }
 0x14e   :  { %11333 = vst [vmem:[#allocation50_spill] sm:$0xff] %v6841_v49  ;;  %v521_v41 = vsel %vm271_vm1, %v6841_v49, 0.0  ;;  %v6869_v49 = vmul.f32 %v6741_v15, %v6555_v27 }
 0x14f   :  { %v567_v45 = vpop.permute.xlu1 %566 }
 0x150   :  { %11338 = vst [vmem:[#allocation55_spill] sm:$0xff] %v6869_v49  ;;  %v403_v15 = vsel %vm271_vm1, %v6869_v49, 0.0 }
 0x153   :  { %v341_v51 = vpop.permute.xlu1 %340 }
 0x154   :  { %v6864_v44 = vmul.f32 %v341_v51, %v6601_v42 }
 0x155   :  { %352 = vrot.lane.b32.xlu0 %v6636_v52, %s6407_s2 }
 0x156   :  { %11337 = vst [vmem:[#allocation54_spill] sm:$0xff] %v6864_v44  ;;  %v406_v51 = vsel %vm271_vm1, %v6864_v44, 0.0 }
 0x159   :  { %464 = vrot.lane.b32.xlu0 %v6636_v52, %s6408_s29 }
 0x15a   :  { %288 = vadd.xlane.f32.xlu1 %v287_v55 }
 0x15d   :  { %576 = vrot.lane.b32.xlu0 %v6636_v52, %s6409_s0 }
 0x16b   :  { %354 = vrot.lane.b32.xlu1 %v6654_v56, %s6407_s2 }
 0x16f   :  { %466 = vrot.lane.b32.xlu1 %v6654_v56, %s6408_s29 }
 0x173   :  { %578 = vrot.lane.b32.xlu1 %v6654_v56, %s6409_s0 }
 0x17b   :  { %v6767_v50 = vpop.xlane.xlu0 %276 }
 0x17c   :  { %291 = vadd.xlane.f32.xlu0 %v290_v59  ;;  %v453_v59 = vpop.permute.xlu1 %452 }
 0x17d   :  { %v6876_v30 = vmul.f32 %v453_v59, %v6601_v42 }
 0x17f   :  { %v6769_v55 = vpop.xlane.xlu0 %273  ;;  %11339 = vst [vmem:[#allocation56_spill] sm:$0xff] %v6876_v30  ;;  %v518_v59 = vsel %vm271_vm1, %v6876_v30, 0.0 }
 0x183   :  { %v6776_v61 = vpop.permute.xlu0 %344 }
 0x184   :  { %v6899_v44 = vmul.f32 %v6776_v61, %v6627_v47 }
 0x186   :  { %11341 = vst [vmem:[#allocation58_spill] sm:$0xff] %v6899_v44  ;;  %v412_v61 = vsel %vm271_vm1, %v6899_v44, 0.0 }
 0x192   :  { %356 = vrot.lane.b32.xlu0 %v6672_v62, %s6407_s2 }
 0x196   :  { %468 = vrot.lane.b32.xlu0 %v6672_v62, %s6408_s29 }
 0x197   :  { %294 = vadd.xlane.f32.xlu1 %v293_v1  ;;  %v565_v1 = vpop.permute.xlu1 %564 }
 0x19a   :  { %580 = vrot.lane.b32.xlu0 %v6672_v62, %s6409_s0 }
 0x19b   :  { %v6782_v6 = vpop.permute.xlu1 %346 }
 0x19f   :  { %v6798_v21 = vpop.permute.xlu1 %458 }
 0x1a3   :  { %v6811_v10 = vpop.permute.xlu1 %570 }
 0x1a7   :  { %v6818_v16 = vpop.xlane.xlu1 %282 }
 0x1a8   :  { %358 = vrot.lane.b32.xlu1 %v6690_v2, %s6407_s2 }
 0x1ab   :  { %v6827_v48 = vpop.xlane.xlu1 %279 }
 0x1ac   :  { %470 = vrot.lane.b32.xlu1 %v6690_v2, %s6408_s29 }
 0x1af   :  { %v351_v0 = vpop.permute.xlu1 %350 }
 0x1b0   :  { %582 = vrot.lane.b32.xlu1 %v6690_v2, %s6409_s0  ;;  %v6935_v44 = vmul.f32 %v351_v0, %v6675_v63 }
 0x1b2   :  { %11346 = vst [vmem:[#allocation63_spill] sm:$0xff] %v6935_v44  ;;  %v421_v0 = vsel %vm271_vm1, %v6935_v44, 0.0 }
 0x1b3   :  { %v463_v35 = vpop.permute.xlu1 %462 }
 0x1b9   :  { %297 = vadd.xlane.f32.xlu0 %v296_v5  ;;  %v6780_v5 = vpop.permute.xlu0 %456 }
 0x1cf   :  { %360 = vrot.lane.b32.xlu0 %v6708_v8, %s6407_s2 }
 0x1d3   :  { %472 = vrot.lane.b32.xlu0 %v6708_v8, %s6408_s29 }
 0x1d4   :  { %300 = vadd.xlane.f32.xlu1 %v299_v11  ;;  %v6794_v11 = vmul.f32 0.35355338, %v6750_v32 }
 0x1d6   :  { %11327 = vst [vmem:[#allocation44_spill] sm:$0xff] %v6794_v11 }
 0x1d7   :  { %584 = vrot.lane.b32.xlu0 %v6708_v8, %s6409_s0 }
 0x1e5   :  { %362 = vrot.lane.b32.xlu1 %v6726_v12, %s6407_s2 }
 0x1e9   :  { %474 = vrot.lane.b32.xlu1 %v6726_v12, %s6408_s29 }
 0x1ed   :  { %586 = vrot.lane.b32.xlu1 %v6726_v12, %s6409_s0 }
 0x1f6   :  { %303 = vadd.xlane.f32.xlu0 %v302_v17  ;;  %v6796_v17 = vpop.permute.xlu0 %568 }
 0x1fa   :  { %v6806_v37 = vpop.permute.xlu0 %348 }
 0x20c   :  { %364 = vrot.lane.b32.xlu0 %v6750_v32, %s6407_s2 }
 0x210   :  { %476 = vrot.lane.b32.xlu0 %v6750_v32, %s6408_s29 }
 0x211   :  { %306 = vadd.xlane.f32.xlu1 %v305_v43  ;;  %v6804_v43 = vmul.f32 %v6794_v11, %v6750_v32 }
 0x213   :  { %11328 = vst [vmem:[#allocation45_spill] sm:$0xff] %v6804_v43  ;;  %v314_v4 = vsel %vm271_vm1, %v6804_v43, 0.0  ;;  %v624_v43 = vsel %vm271_vm1, %v608_v28, 0.0  ;;  %v6850_v28 = vmul.f32 0.35355338, %v6772_v60 }
 0x214   :  { %588 = vrot.lane.b32.xlu0 %v6750_v32, %s6409_s0 }
 0x215   :  { %11335 = vst [vmem:[#allocation52_spill] sm:$0xff] %v6850_v28 }
 0x222   :  { %366 = vrot.lane.b32.xlu1 %v6772_v60, %s6407_s2 }
 0x226   :  { %478 = vrot.lane.b32.xlu1 %v6772_v60, %s6408_s29 }
 0x22a   :  { %590 = vrot.lane.b32.xlu1 %v6772_v60, %s6409_s0 }
 0x233   :  { %309 = vadd.xlane.f32.xlu0 %v308_v23  ;;  %v6822_v23 = vpop.permute.xlu0 %460 }
 0x237   :  { %315 = vadd.xlane.f32.xlu0 %v314_v4  ;;  %v6829_v4 = vpop.permute.xlu0 %572 }
 0x23b   :  { %401 = vadd.xlane.f32.xlu0 %v400_v58  ;;  %v6835_v14 = vpop.xlane.xlu0 %285  ;;  %v6838_v58 = vmul.f32 0.35355338, %v6726_v12 }
 0x23d   :  { %11332 = vst [vmem:[#allocation49_spill] sm:$0xff] %v6838_v58  ;;  %v6847_v25 = vmul.f32 %v6838_v58, %v6726_v12 }
 0x23f   :  { %513 = vadd.xlane.f32.xlu0 %v512_v54  ;;  %v409_v54 = vsel %vm271_vm1, %v6832_v39, 0.0  ;;  %11334 = vst [vmem:[#allocation51_spill] sm:$0xff] %v6847_v25  ;;  %v6855_v33 = vpop.permute.xlu0 %352  ;;  %v311_v39 = vsel %vm271_vm1, %v6847_v25, 0.0 }
 0x243   :  { %625 = vadd.xlane.f32.xlu0 %v624_v43  ;;  %v611_v43 = vmul.f32 %v567_v45, %v6589_v38  ;;  %v575_v38 = vpop.permute.xlu1 %574 }
 0x245   :  { %v633_v45 = vsel %vm271_vm1, %v611_v43, 0.0  ;;  %v610_v43 = vmul.f32 %v565_v1, %v6601_v42 }
 0x247   :  { %410 = vadd.xlane.f32.xlu0 %v409_v54  ;;  %v6861_v54 = vmul.f32 %v6850_v28, %v6772_v60  ;;  %v630_v1 = vsel %vm271_vm1, %v610_v43, 0.0  ;;  %v6917_v43 = vmul.f32 %v6798_v21, %v6639_v53 }
 0x249   :  { %11336 = vst [vmem:[#allocation53_spill] sm:$0xff] %v6861_v54  ;;  %v317_v25 = vsel %vm271_vm1, %v6861_v54, 0.0  ;;  %11344 = vst [vmem:[#allocation61_spill] sm:$0xff] %v6917_v43  ;;  %v527_v21 = vsel %vm271_vm1, %v6917_v43, 0.0  ;;  %v6962_v43 = vmul.f32 %v6855_v33, %v6699_v3 }
 0x24b   :  { %522 = vadd.xlane.f32.xlu0 %v521_v41  ;;  %v6871_v41 = vpop.permute.xlu0 %464  ;;  %11349 = vst [vmem:[#allocation66_spill] sm:$0xff] %v6962_v43 }
 0x24e   :  { %312 = vadd.xlane.f32.xlu1 %v311_v39  ;;  %v6882_v39 = vmul.f32 %v6745_v18, %v6555_v27 }
 0x24f   :  { %634 = vadd.xlane.f32.xlu0 %v633_v45  ;;  %v6887_v45 = vpop.xlane.xlu1 %288 }
 0x250   :  { %11340 = vst [vmem:[#allocation57_spill] sm:$0xff] %v6882_v39  ;;  %v515_v18 = vsel %vm271_vm1, %v6882_v39, 0.0  ;;  %v6911_v39 = vmul.f32 %v6780_v5, %v6627_v47 }
 0x252   :  { %318 = vadd.xlane.f32.xlu1 %v317_v25  ;;  %v6891_v25 = vpop.permute.xlu0 %576  ;;  %11343 = vst [vmem:[#allocation60_spill] sm:$0xff] %v6911_v39  ;;  %v524_v5 = vsel %vm271_vm1, %v6911_v39, 0.0 }
 0x253   :  { %407 = vadd.xlane.f32.xlu0 %v406_v51  ;;  %v609_v51 = vmul.f32 %v6747_v19, %v6555_v27  ;;  %v355_v30 = vpop.permute.xlu1 %354 }
 0x255   :  { %v627_v19 = vsel %vm271_vm1, %v609_v51, 0.0  ;;  %v612_v51 = vmul.f32 %v6796_v17, %v6627_v47 }
 0x256   :  { %404 = vadd.xlane.f32.xlu1 %v403_v15  ;;  %v6902_v15 = vpop.xlane.xlu0 %291 }
 0x257   :  { %519 = vadd.xlane.f32.xlu0 %v518_v59  ;;  %v6906_v59 = vmul.f32 %v6782_v6, %v6639_v53 }
 0x259   :  { %11342 = vst [vmem:[#allocation59_spill] sm:$0xff] %v6906_v59  ;;  %v415_v6 = vsel %vm271_vm1, %v6906_v59, 0.0  ;;  %v636_v59 = vsel %vm271_vm1, %v612_v51, 0.0  ;;  %v6947_v51 = vmul.f32 %v463_v35, %v6675_v63 }
 0x25a   :  { %516 = vadd.xlane.f32.xlu1 %v515_v18  ;;  %v357_v18 = vpop.permute.xlu0 %356 }
 0x25b   :  { %631 = vadd.xlane.f32.xlu0 %v630_v1  ;;  %v467_v1 = vpop.permute.xlu1 %466  ;;  %11348 = vst [vmem:[#allocation65_spill] sm:$0xff] %v6947_v51  ;;  %v533_v35 = vsel %vm271_vm1, %v6947_v51, 0.0  ;;  %v424_v51 = vsel %vm271_vm1, %v6962_v43, 0.0 }
 0x25e   :  { %628 = vadd.xlane.f32.xlu1 %v627_v19  ;;  %v613_v19 = vmul.f32 %v6811_v10, %v6639_v53  ;;  %v469_v17 = vpop.permute.xlu0 %468  ;;  %v6940_v10 = vmul.f32 %v6822_v23, %v6663_v57 }
 0x25f   :  { %413 = vadd.xlane.f32.xlu0 %v412_v61  ;;  %v6931_v61 = vmul.f32 %v6806_v37, %v6663_v57 }
 0x260   :  { %11347 = vst [vmem:[#allocation64_spill] sm:$0xff] %v6940_v10  ;;  %v530_v23 = vsel %vm271_vm1, %v6940_v10, 0.0 }
 0x261   :  { %11345 = vst [vmem:[#allocation62_spill] sm:$0xff] %v6931_v61  ;;  %v418_v37 = vsel %vm271_vm1, %v6931_v61, 0.0 }
 0x262   :  { %416 = vadd.xlane.f32.xlu1 %v415_v6  ;;  %v579_v6 = vpop.permute.xlu1 %578 }
 0x263   :  { %525 = vadd.xlane.f32.xlu0 %v524_v5  ;;  %v639_v5 = vsel %vm271_vm1, %v613_v19, 0.0  ;;  %v614_v19 = vmul.f32 %v6829_v4, %v6663_v57 }
 0x265   :  { %v642_v4 = vsel %vm271_vm1, %v614_v19, 0.0  ;;  %v616_v19 = vmul.f32 %v6891_v25, %v6699_v3 }
 0x266   :  { %528 = vadd.xlane.f32.xlu1 %v527_v21  ;;  %v6944_v21 = vpop.xlane.xlu1 %294 }
 0x267   :  { %637 = vadd.xlane.f32.xlu0 %v636_v59  ;;  %v581_v59 = vpop.permute.xlu0 %580 }
 0x26a   :  { %640 = vadd.xlane.f32.xlu1 %v639_v5  ;;  %v615_v5 = vmul.f32 %v575_v38, %v6675_v63  ;;  %v359_v39 = vpop.permute.xlu1 %358  ;;  %v6971_v38 = vmul.f32 %v6871_v41, %v6699_v3 }
 0x26b   :  { %419 = vadd.xlane.f32.xlu0 %v418_v37  ;;  %v6956_v37 = vpop.xlane.xlu0 %297  ;;  %v6992_v25 = vmul.f32 %v359_v39, %v6753_v34 }
 0x26c   :  { %11351 = vst [vmem:[#allocation68_spill] sm:$0xff] %v6971_v38  ;;  %v536_v41 = vsel %vm271_vm1, %v6971_v38, 0.0 }
 0x26d   :  { %11354 = vst [vmem:[#allocation71_spill] sm:$0xff] %v6992_v25  ;;  %v433_v39 = vsel %vm271_vm1, %v6992_v25, 0.0 }
 0x26e   :  { %422 = vadd.xlane.f32.xlu1 %v421_v0  ;;  %v6966_v0 = vmul.f32 %v355_v30, %v6711_v9  ;;  %v471_v10 = vpop.permute.xlu1 %470 }
 0x26f   :  { %531 = vadd.xlane.f32.xlu0 %v530_v23  ;;  %v645_v23 = vsel %vm271_vm1, %v615_v5, 0.0  ;;  %v361_v33 = vpop.permute.xlu0 %360  ;;  %v617_v5 = vmul.f32 %v579_v6, %v6711_v9 }
 0x270   :  { %11350 = vst [vmem:[#allocation67_spill] sm:$0xff] %v6966_v0  ;;  %v427_v30 = vsel %vm271_vm1, %v6966_v0, 0.0  ;;  %v648_v0 = vsel %vm271_vm1, %v616_v19, 0.0 }
 0x272   :  { %534 = vadd.xlane.f32.xlu1 %v533_v35  ;;  %v6976_v35 = vmul.f32 %v467_v1, %v6711_v9  ;;  %v6988_v1 = vmul.f32 %v357_v18, %v6735_v13 }
 0x273   :  { %643 = vadd.xlane.f32.xlu0 %v642_v4  ;;  %v473_v4 = vpop.permute.xlu0 %472 }
 0x274   :  { %11352 = vst [vmem:[#allocation69_spill] sm:$0xff] %v6976_v35  ;;  %11353 = vst [vmem:[#allocation70_spill] sm:$0xff] %v6988_v1  ;;  %v430_v18 = vsel %vm271_vm1, %v6988_v1, 0.0 }
 0x276   :  { %646 = vadd.xlane.f32.xlu1 %v645_v23  ;;  %v583_v23 = vpop.permute.xlu1 %582 }
 0x277   :  { %425 = vadd.xlane.f32.xlu0 %v424_v51  ;;  %v539_v51 = vsel %vm271_vm1, %v6976_v35, 0.0  ;;  %v585_v35 = vpop.permute.xlu0 %584 }
 0x27a   :  { %428 = vadd.xlane.f32.xlu1 %v427_v30  ;;  %v651_v30 = vsel %vm271_vm1, %v617_v5, 0.0  ;;  %v6998_v6 = vpop.xlane.xlu1 %300 }
 0x27b   :  { %537 = vadd.xlane.f32.xlu0 %v536_v41  ;;  %v6996_v41 = vmul.f32 %v469_v17, %v6735_v13 }
 0x27d   :  { %11355 = vst [vmem:[#allocation72_spill] sm:$0xff] %v6996_v41  ;;  %v542_v17 = vsel %vm271_vm1, %v6996_v41, 0.0 }
 0x27e   :  { %540 = vadd.xlane.f32.xlu1 %v539_v51  ;;  %v7003_v51 = vmul.f32 %v471_v10, %v6753_v34  ;;  %v363_v5 = vpop.permute.xlu1 %362  ;;  %v7016_v10 = vmul.f32 %v361_v33, %v6787_v7 }
 0x27f   :  { %649 = vadd.xlane.f32.xlu0 %v648_v0  ;;  %v618_v0 = vmul.f32 %v581_v59, %v6735_v13  ;;  %v7010_v19 = vpop.xlane.xlu0 %303  ;;  %v7020_v59 = vmul.f32 %v363_v5, %v6838_v58 }
 0x280   :  { %11356 = vst [vmem:[#allocation73_spill] sm:$0xff] %v7003_v51  ;;  %11357 = vst [vmem:[#allocation74_spill] sm:$0xff] %v7016_v10 }
 0x281   :  { %v654_v38 = vsel %vm271_vm1, %v618_v0, 0.0  ;;  %11358 = vst [vmem:[#allocation75_spill] sm:$0xff] %v7020_v59 }
 0x282   :  { %652 = vadd.xlane.f32.xlu1 %v651_v30  ;;  %v619_v30 = vmul.f32 %v583_v23, %v6753_v34  ;;  %v475_v23 = vpop.permute.xlu1 %474 }
 0x283   :  { %431 = vadd.xlane.f32.xlu0 %v430_v18  ;;  %v545_v18 = vsel %vm271_vm1, %v7003_v51, 0.0  ;;  %v436_v51 = vsel %vm271_vm1, %v7016_v10, 0.0  ;;  %v7029_v33 = vmul.f32 %v475_v23, %v6838_v58 }
 0x284   :  { %v657_v41 = vsel %vm271_vm1, %v619_v30, 0.0 }
 0x285   :  { %11360 = vst [vmem:[#allocation77_spill] sm:$0xff] %v7029_v33 }
 0x286   :  { %434 = vadd.xlane.f32.xlu1 %v433_v39  ;;  %v365_v39 = vpop.permute.xlu0 %364  ;;  %v587_v30 = vpop.permute.xlu1 %586 }
 0x287   :  { %543 = vadd.xlane.f32.xlu0 %v542_v17  ;;  %v7024_v17 = vmul.f32 %v473_v4, %v6787_v7  ;;  %v7034_v0 = vmul.f32 %v365_v39, %v6794_v11  ;;  %v620_v39 = vmul.f32 %v585_v35, %v6787_v7 }
 0x289   :  { %11359 = vst [vmem:[#allocation76_spill] sm:$0xff] %v7024_v17  ;;  %11361 = vst [vmem:[#allocation78_spill] sm:$0xff] %v7034_v0  ;;  %v548_v4 = vsel %vm271_vm1, %v7024_v17, 0.0 }
 0x28a   :  { %546 = vadd.xlane.f32.xlu1 %v545_v18  ;;  %v477_v5 = vpop.permute.xlu0 %476  ;;  %v442_v18 = vsel %vm271_vm1, %v7034_v0, 0.0 }
 0x28b   :  { %655 = vadd.xlane.f32.xlu0 %v654_v38  ;;  %v439_v38 = vsel %vm271_vm1, %v7020_v59, 0.0 }
 0x28e   :  { %658 = vadd.xlane.f32.xlu1 %v657_v41  ;;  %v551_v41 = vsel %vm271_vm1, %v7029_v33, 0.0 }
 0x28f   :  { %437 = vadd.xlane.f32.xlu0 %v436_v51  ;;  %v7041_v51 = vmul.f32 %v477_v5, %v6794_v11  ;;  %v660_v5 = vsel %vm271_vm1, %v620_v39, 0.0 }
 0x291   :  { %11362 = vst [vmem:[#allocation79_spill] sm:$0xff] %v7041_v51 }
 0x292   :  { %440 = vadd.xlane.f32.xlu1 %v439_v38  ;;  %v554_v38 = vsel %vm271_vm1, %v7041_v51, 0.0 }
 0x293   :  { %549 = vadd.xlane.f32.xlu0 %v548_v4  ;;  %v589_v4 = vpop.permute.xlu0 %588 }
 0x294   :  { %v622_v33 = vmul.f32 %v589_v4, %v6794_v11 }
 0x296   :  { %552 = vadd.xlane.f32.xlu1 %v551_v41  ;;  %v666_v0 = vsel %vm271_vm1, %v622_v33, 0.0 }
 0x297   :  { %443 = vadd.xlane.f32.xlu0 %v442_v18 }
 0x29a   :  { %v7046_v23 = vpop.xlane.xlu1 %306 }
 0x29b   :  { %555 = vadd.xlane.f32.xlu0 %v554_v38  ;;  %v621_v38 = vmul.f32 %v587_v30, %v6838_v58 }
 0x29e   :  { %v367_v17 = vpop.permute.xlu1 %366 }
 0x29f   :  { %v7053_v41 = vmul.f32 %v367_v17, %v6850_v28  ;;  %661 = vadd.xlane.f32.xlu0 %v660_v5  ;;  %v663_v5 = vsel %vm271_vm1, %v621_v38, 0.0 }
 0x2a1   :  { %11363 = vst [vmem:[#allocation80_spill] sm:$0xff] %v7053_v41  ;;  %v445_v18 = vsel %vm271_vm1, %v7053_v41, 0.0 }
 0x2a2   :  { %446 = vadd.xlane.f32.xlu1 %v445_v18  ;;  %v479_v35 = vpop.permute.xlu1 %478 }
 0x2a3   :  { %v7059_v51 = vmul.f32 %v479_v35, %v6850_v28  ;;  %667 = vadd.xlane.f32.xlu0 %v666_v0 }
 0x2a5   :  { %11364 = vst [vmem:[#allocation81_spill] sm:$0xff] %v7059_v51  ;;  %v557_v39 = vsel %vm271_vm1, %v7059_v51, 0.0 }
 0x2a6   :  { %558 = vadd.xlane.f32.xlu1 %v557_v39  ;;  %v591_v17 = vpop.permute.xlu1 %590 }
 0x2a7   :  { %v623_v4 = vmul.f32 %v591_v17, %v6850_v28 }
 0x2a9   :  { %v669_v18 = vsel %vm271_vm1, %v623_v4, 0.0 }
 0x2aa   :  { %664 = vadd.xlane.f32.xlu1 %v663_v5 }
 0x2ae   :  { %670 = vadd.xlane.f32.xlu1 %v669_v18 }
 0x2b9   :  { %672 = vrot.lane.b32.xlu0 %v6522_v22, %s6410_s30 }
 0x2bc   :  { %v7069_v33 = vpop.xlane.xlu0 %309 }
 0x2bd   :  { %680 = vrot.lane.b32.xlu0 %v6582_v36, %s6410_s30 }
 0x2bf   :  { %674 = vrot.lane.b32.xlu1 %v6518_v20, %s6410_s30 }
 0x2c0   :  { %v7075_v0 = vpop.xlane.xlu0 %315 }
 0x2c1   :  { %684 = vrot.lane.b32.xlu0 %v6594_v40, %s6410_s30 }
 0x2c3   :  { %676 = vrot.lane.b32.xlu1 %v6546_v26, %s6410_s30 }
 0x2c4   :  { %v402_v30 = vpop.xlane.xlu0 %401 }
 0x2c5   :  { %688 = vrot.lane.b32.xlu0 %v6636_v52, %s6410_s30  ;;  %v2116_v38 = vmax.f32 %v6769_v55, %v402_v30 }
 0x2c7   :  { %678 = vrot.lane.b32.xlu1 %v6535_v24, %s6410_s30 }
 0x2c8   :  { %v514_v35 = vpop.xlane.xlu0 %513 }
 0x2c9   :  { %692 = vrot.lane.b32.xlu0 %v6672_v62, %s6410_s30  ;;  %v2132_v39 = vmax.f32 %v2116_v38, %v514_v35 }
 0x2cb   :  { %682 = vrot.lane.b32.xlu1 %v6558_v29, %s6410_s30 }
 0x2cc   :  { %v626_v17 = vpop.xlane.xlu0 %625 }
 0x2cd   :  { %v2148_v4 = vmax.f32 %v2132_v39, %v626_v17  ;;  %696 = vrot.lane.b32.xlu0 %v6708_v8, %s6410_s30 }
 0x2cf   :  { %v2164_v5 = vsub.f32 %v6769_v55, %v2148_v4  ;;  %v2212_v18 = vsub.f32 %v402_v30, %v2148_v4  ;;  %v2260_v52 = vsub.f32 %v514_v35, %v2148_v4  ;;  %686 = vrot.lane.b32.xlu1 %v6618_v46, %s6410_s30  ;;  %v2308_v40 = vsub.f32 %v626_v17, %v2148_v4 }
 0x2d0   :  { %v411_v36 = vpop.xlane.xlu0 %410 }
 0x2d1   :  { %v2180_v24 = vmul.f32 1.442695, %v2164_v5  ;;  %v2228_v62 = vmul.f32 1.442695, %v2212_v18  ;;  %700 = vrot.lane.b32.xlu0 %v6750_v32, %s6410_s30  ;;  %v2276_v38 = vmul.f32 1.442695, %v2260_v52  ;;  %v2119_v30 = vmax.f32 %v6818_v16, %v411_v36 }
 0x2d2   :  { %v2324_v39 = vmul.f32 1.442695, %v2308_v40 }
 0x2d3   :  { %5767 = vpow2.f32 %v2180_v24  ;;  %690 = vrot.lane.b32.xlu1 %v6654_v56, %s6410_s30 }
 0x2d4   :  { %5769 = vpow2.f32 %v2228_v62  ;;  %v523_v55 = vpop.xlane.xlu0 %522 }
 0x2d5   :  { %5771 = vpow2.f32 %v2276_v38  ;;  %v2135_v35 = vmax.f32 %v2119_v30, %v523_v55 }
 0x2d6   :  { %5773 = vpow2.f32 %v2324_v39 }
 0x2d7   :  { %694 = vrot.lane.b32.xlu1 %v6690_v2, %s6410_s30  ;;  %v7102_v17 = vpop.xlane.xlu1 %312 }
 0x2d8   :  { %v635_v4 = vpop.xlane.xlu0 %634 }
 0x2d9   :  { %v2151_v5 = vmax.f32 %v2135_v35, %v635_v4 }
 0x2db   :  { %v2167_v24 = vsub.f32 %v6818_v16, %v2151_v5  ;;  %v2215_v52 = vsub.f32 %v411_v36, %v2151_v5  ;;  %v2263_v18 = vsub.f32 %v523_v55, %v2151_v5  ;;  %698 = vrot.lane.b32.xlu1 %v6726_v12, %s6410_s30  ;;  %v7107_v40 = vpop.xlane.xlu1 %318  ;;  %v2311_v62 = vsub.f32 %v635_v4, %v2151_v5 }
 0x2dc   :  { %v408_v38 = vpop.xlane.xlu0 %407 }
 0x2dd   :  { %v2186_v30 = vmul.f32 1.442695, %v2167_v24  ;;  %v2234_v32 = vmul.f32 1.442695, %v2215_v52  ;;  %v2282_v8 = vmul.f32 1.442695, %v2263_v18  ;;  %v2118_v12 = vmax.f32 %v6827_v48, %v408_v38 }
 0x2de   :  { %v2330_v36 = vmul.f32 1.442695, %v2311_v62 }
 0x2df   :  { %5775 = vpow2.f32 %v2186_v30  ;;  %702 = vrot.lane.b32.xlu1 %v6772_v60, %s6410_s30  ;;  %v405_v39 = vpop.xlane.xlu1 %404 }
 0x2e0   :  { %v7111_v35 = vpop.eup %5767  ;;  %5777 = vpow2.f32 %v2234_v32  ;;  %v520_v16 = vpop.xlane.xlu0 %519  ;;  %v2117_v18 = vmax.f32 %v6767_v50, %v405_v39 }
 0x2e1   :  { %11365 = vst [vmem:[#allocation82_spill] sm:$0xff] %v7111_v35  ;;  %v7113_v55 = vpop.eup %5769  ;;  %5779 = vpow2.f32 %v2282_v8  ;;  %v2134_v24 = vmax.f32 %v2118_v12, %v520_v16 }
 0x2e2   :  { %11366 = vst [vmem:[#allocation83_spill] sm:$0xff] %v7113_v55  ;;  %v2356_v4 = vadd.f32 %v7113_v55, %v7111_v35  ;;  %v7118_v5 = vpop.eup %5771  ;;  %5781 = vpow2.f32 %v2330_v36 }
 0x2e3   :  { %11367 = vst [vmem:[#allocation84_spill] sm:$0xff] %v7118_v5  ;;  %v517_v52 = vpop.xlane.xlu1 %516  ;;  %v7122_v62 = vpop.eup %5773 }
 0x2e4   :  { %v632_v30 = vpop.xlane.xlu0 %631  ;;  %v2372_v32 = vadd.f32 %v7118_v5, %v2356_v4  ;;  %11368 = vst [vmem:[#allocation85_spill] sm:$0xff] %v7122_v62  ;;  %v2133_v2 = vmax.f32 %v2117_v18, %v517_v52 }
 0x2e5   :  { %v2150_v60 = vmax.f32 %v2134_v24, %v632_v30 }
 0x2e6   :  { %v7125_v56 = vadd.f32 %v7122_v62, %v2372_v32 }
 0x2e7   :  { %v2166_v8 = vsub.f32 %v6827_v48, %v2150_v60  ;;  %v2214_v35 = vsub.f32 %v408_v38, %v2150_v60  ;;  %v2262_v55 = vsub.f32 %v520_v16, %v2150_v60  ;;  %v2310_v46 = vsub.f32 %v632_v30, %v2150_v60  ;;  %v629_v12 = vpop.xlane.xlu1 %628 }
 0x2e8   :  { %11369 = vst [vmem:[#allocation86_spill] sm:$0xff] %v7125_v56  ;;  %v2149_v29 = vmax.f32 %v2133_v2, %v629_v12  ;;  %v414_v36 = vpop.xlane.xlu0 %413 }
 0x2e9   :  { %v2184_v22 = vmul.f32 1.442695, %v2166_v8  ;;  %v2232_v26 = vmul.f32 1.442695, %v2214_v35  ;;  %v2280_v20 = vmul.f32 1.442695, %v2262_v55  ;;  %v2120_v35 = vmax.f32 %v6835_v14, %v414_v36 }
 0x2ea   :  { %v2328_v51 = vmul.f32 1.442695, %v2310_v46  ;;  %v2165_v4 = vsub.f32 %v6767_v50, %v2149_v29  ;;  %v2213_v5 = vsub.f32 %v405_v39, %v2149_v29  ;;  %v2261_v24 = vsub.f32 %v517_v52, %v2149_v29 }
 0x2eb   :  { %5783 = vpow2.f32 %v2184_v22  ;;  %v417_v18 = vpop.xlane.xlu1 %416  ;;  %v2309_v2 = vsub.f32 %v629_v12, %v2149_v29 }
 0x2ec   :  { %v7129_v32 = vpop.eup %5775  ;;  %5785 = vpow2.f32 %v2232_v26  ;;  %v2182_v48 = vmul.f32 1.442695, %v2165_v4  ;;  %v2230_v38 = vmul.f32 1.442695, %v2213_v5  ;;  %v526_v16 = vpop.xlane.xlu0 %525  ;;  %v2278_v46 = vmul.f32 1.442695, %v2261_v24 }
 0x2ed   :  { %11370 = vst [vmem:[#allocation87_spill] sm:$0xff] %v7129_v32  ;;  %v7131_v60 = vpop.eup %5777  ;;  %5787 = vpow2.f32 %v2280_v20  ;;  %v2136_v22 = vmax.f32 %v2120_v35, %v526_v16  ;;  %v2121_v26 = vmax.f32 %v6887_v45, %v417_v18  ;;  %v2326_v29 = vmul.f32 1.442695, %v2309_v2 }
 0x2ee   :  { %11371 = vst [vmem:[#allocation88_spill] sm:$0xff] %v7131_v60  ;;  %5789 = vpow2.f32 %v2328_v51  ;;  %v2359_v50 = vadd.f32 %v7131_v60, %v7129_v32  ;;  %v7136_v39 = vpop.eup %5779 }
 0x2ef   :  { %11372 = vst [vmem:[#allocation89_spill] sm:$0xff] %v7136_v39  ;;  %5791 = vpow2.f32 %v2182_v48  ;;  %v529_v55 = vpop.xlane.xlu1 %528  ;;  %v7140_v20 = vpop.eup %5781 }
 0x2f0   :  { %5793 = vpow2.f32 %v2230_v38  ;;  %v638_v5 = vpop.xlane.xlu0 %637  ;;  %v2375_v52 = vadd.f32 %v7136_v39, %v2359_v50  ;;  %11373 = vst [vmem:[#allocation90_spill] sm:$0xff] %v7140_v20  ;;  %v2137_v51 = vmax.f32 %v2121_v26, %v529_v55 }
 0x2f1   :  { %v2152_v30 = vmax.f32 %v2136_v22, %v638_v5  ;;  %5795 = vpow2.f32 %v2278_v46 }
 0x2f2   :  { %v7143_v8 = vadd.f32 %v7140_v20, %v2375_v52  ;;  %5797 = vpow2.f32 %v2326_v29 }
 0x2f3   :  { %v2168_v12 = vsub.f32 %v6835_v14, %v2152_v30  ;;  %v2216_v4 = vsub.f32 %v414_v36, %v2152_v30  ;;  %v2264_v24 = vsub.f32 %v526_v16, %v2152_v30  ;;  %v2312_v48 = vsub.f32 %v638_v5, %v2152_v30  ;;  %v641_v38 = vpop.xlane.xlu1 %640 }
 0x2f4   :  { %11374 = vst [vmem:[#allocation91_spill] sm:$0xff] %v7143_v8  ;;  %v2153_v35 = vmax.f32 %v2137_v51, %v641_v38  ;;  %v420_v32 = vpop.xlane.xlu0 %419 }
 0x2f5   :  { %v2188_v56 = vmul.f32 1.442695, %v2168_v12  ;;  %v2236_v50 = vmul.f32 1.442695, %v2216_v4  ;;  %v2284_v39 = vmul.f32 1.442695, %v2264_v24  ;;  %v2122_v29 = vmax.f32 %v6902_v15, %v420_v32 }
 0x2f6   :  { %v2332_v62 = vmul.f32 1.442695, %v2312_v48  ;;  %v2169_v2 = vsub.f32 %v6887_v45, %v2153_v35  ;;  %v2217_v46 = vsub.f32 %v417_v18, %v2153_v35  ;;  %v2265_v52 = vsub.f32 %v529_v55, %v2153_v35 }
 0x2f7   :  { %5799 = vpow2.f32 %v2188_v56  ;;  %v423_v22 = vpop.xlane.xlu1 %422  ;;  %v2313_v51 = vsub.f32 %v641_v38, %v2153_v35 }
 0x2f8   :  { %v7147_v26 = vpop.eup %5783  ;;  %5801 = vpow2.f32 %v2236_v50  ;;  %v2190_v14 = vmul.f32 1.442695, %v2169_v2  ;;  %v2238_v36 = vmul.f32 1.442695, %v2217_v46  ;;  %v532_v16 = vpop.xlane.xlu0 %531 }
 0x2f9   :  { %11375 = vst [vmem:[#allocation92_spill] sm:$0xff] %v7147_v26  ;;  %v7149_v5 = vpop.eup %5785  ;;  %5803 = vpow2.f32 %v2284_v39  ;;  %v2138_v18 = vmax.f32 %v2122_v29, %v532_v16  ;;  %v2123_v39 = vmax.f32 %v6944_v21, %v423_v22  ;;  %v2334_v35 = vmul.f32 1.442695, %v2313_v51 }
 0x2fa   :  { %11376 = vst [vmem:[#allocation93_spill] sm:$0xff] %v7149_v5  ;;  %v7152_v30 = vpop.eup %5787  ;;  %5805 = vpow2.f32 %v2332_v62  ;;  %v2358_v56 = vadd.f32 %v7149_v5, %v7147_v26  ;;  %v2286_v62 = vmul.f32 1.442695, %v2265_v52 }
 0x2fb   :  { %11377 = vst [vmem:[#allocation94_spill] sm:$0xff] %v7152_v30  ;;  %v7156_v45 = vpop.eup %5789  ;;  %5807 = vpow2.f32 %v2190_v14  ;;  %v535_v12 = vpop.xlane.xlu1 %534 }
 0x2fc   :  { %11378 = vst [vmem:[#allocation95_spill] sm:$0xff] %v7156_v45  ;;  %v7158_v4 = vpop.eup %5791  ;;  %5809 = vpow2.f32 %v2238_v36  ;;  %v644_v55 = vpop.xlane.xlu0 %643  ;;  %v2374_v24 = vadd.f32 %v7152_v30, %v2358_v56  ;;  %v2139_v50 = vmax.f32 %v2123_v39, %v535_v12 }
 0x2fd   :  { %11379 = vst [vmem:[#allocation96_spill] sm:$0xff] %v7158_v4  ;;  %v7162_v48 = vpop.eup %5793  ;;  %v2154_v38 = vmax.f32 %v2138_v18, %v644_v55  ;;  %5811 = vpow2.f32 %v2286_v62 }
 0x2fe   :  { %11380 = vst [vmem:[#allocation97_spill] sm:$0xff] %v7162_v48  ;;  %v2357_v2 = vadd.f32 %v7162_v48, %v7158_v4  ;;  %v7167_v46 = vadd.f32 %v7156_v45, %v2374_v24  ;;  %v7169_v14 = vpop.eup %5795  ;;  %5813 = vpow2.f32 %v2334_v35 }
 0x2ff   :  { %11382 = vst [vmem:[#allocation99_spill] sm:$0xff] %v7169_v14  ;;  %v2170_v36 = vsub.f32 %v6902_v15, %v2154_v38  ;;  %v2218_v29 = vsub.f32 %v420_v32, %v2154_v38  ;;  %v2266_v26 = vsub.f32 %v532_v16, %v2154_v38  ;;  %v647_v8 = vpop.xlane.xlu1 %646  ;;  %v7173_v39 = vpop.eup %5797  ;;  %v2314_v45 = vsub.f32 %v644_v55, %v2154_v38 }
 0x300   :  { %11381 = vst [vmem:[#allocation98_spill] sm:$0xff] %v7167_v46  ;;  %v2155_v56 = vmax.f32 %v2139_v50, %v647_v8  ;;  %v426_v20 = vpop.xlane.xlu0 %425  ;;  %v2373_v52 = vadd.f32 %v7169_v14, %v2357_v2  ;;  %11383 = vst [vmem:[#allocation100_spill] sm:$0xff] %v7173_v39 }
 0x301   :  { %v2192_v51 = vmul.f32 1.442695, %v2170_v36  ;;  %v2240_v18 = vmul.f32 1.442695, %v2218_v29  ;;  %v2288_v4 = vmul.f32 1.442695, %v2266_v26  ;;  %v2124_v26 = vmax.f32 %v6956_v37, %v426_v20 }
 0x302   :  { %v2171_v24 = vsub.f32 %v6944_v21, %v2155_v56  ;;  %v2219_v46 = vsub.f32 %v423_v22, %v2155_v56  ;;  %v7177_v32 = vadd.f32 %v7173_v39, %v2373_v52  ;;  %v2267_v2 = vsub.f32 %v535_v12, %v2155_v56 }
 0x303   :  { %5815 = vpow2.f32 %v2192_v51  ;;  %v429_v15 = vpop.xlane.xlu1 %428  ;;  %v2315_v35 = vsub.f32 %v647_v8, %v2155_v56  ;;  %v2336_v38 = vmul.f32 1.442695, %v2314_v45 }
 0x304   :  { %11384 = vst [vmem:[#allocation101_spill] sm:$0xff] %v7177_v32  ;;  %v7179_v16 = vpop.eup %5799  ;;  %5817 = vpow2.f32 %v2240_v18  ;;  %v2194_v50 = vmul.f32 1.442695, %v2171_v24  ;;  %v2242_v62 = vmul.f32 1.442695, %v2219_v46  ;;  %v538_v36 = vpop.xlane.xlu0 %537  ;;  %v2125_v8 = vmax.f32 %v6998_v6, %v429_v15 }
 0x305   :  { %11385 = vst [vmem:[#allocation102_spill] sm:$0xff] %v7179_v16  ;;  %v7181_v29 = vpop.eup %5801  ;;  %5819 = vpow2.f32 %v2288_v4  ;;  %v2140_v52 = vmax.f32 %v2124_v26, %v538_v36  ;;  %v2290_v12 = vmul.f32 1.442695, %v2267_v2  ;;  %v2338_v4 = vmul.f32 1.442695, %v2315_v35 }
 0x306   :  { %11386 = vst [vmem:[#allocation103_spill] sm:$0xff] %v7181_v29  ;;  %v7184_v21 = vpop.eup %5803  ;;  %v2360_v22 = vadd.f32 %v7181_v29, %v7179_v16  ;;  %5821 = vpow2.f32 %v2194_v50 }
 0x307   :  { %11387 = vst [vmem:[#allocation104_spill] sm:$0xff] %v7184_v21  ;;  %v7188_v55 = vpop.eup %5805  ;;  %v541_v51 = vpop.xlane.xlu1 %540  ;;  %5823 = vpow2.f32 %v2242_v62 }
 0x308   :  { %11388 = vst [vmem:[#allocation105_spill] sm:$0xff] %v7188_v55  ;;  %v7190_v46 = vpop.eup %5807  ;;  %v650_v56 = vpop.xlane.xlu0 %649  ;;  %v2376_v18 = vadd.f32 %v7184_v21, %v2360_v22  ;;  %v2141_v16 = vmax.f32 %v2125_v8, %v541_v51  ;;  %5825 = vpow2.f32 %v2336_v38 }
 0x309   :  { %11389 = vst [vmem:[#allocation106_spill] sm:$0xff] %v7190_v46  ;;  %v7194_v24 = vpop.eup %5809  ;;  %v2156_v32 = vmax.f32 %v2140_v52, %v650_v56  ;;  %5827 = vpow2.f32 %v2290_v12 }
 0x30a   :  { %11390 = vst [vmem:[#allocation107_spill] sm:$0xff] %v7194_v24  ;;  %v7197_v39 = vadd.f32 %v7188_v55, %v2376_v18  ;;  %v2361_v45 = vadd.f32 %v7194_v24, %v7190_v46  ;;  %5829 = vpow2.f32 %v2338_v4  ;;  %v7202_v8 = vpop.eup %5811 }
 0x30b   :  { %v2172_v50 = vsub.f32 %v6956_v37, %v2156_v32  ;;  %v2220_v62 = vsub.f32 %v426_v20, %v2156_v32  ;;  %v2268_v2 = vsub.f32 %v538_v36, %v2156_v32  ;;  %v653_v26 = vpop.xlane.xlu1 %652  ;;  %v2316_v52 = vsub.f32 %v650_v56, %v2156_v32  ;;  %11392 = vst [vmem:[#allocation109_spill] sm:$0xff] %v7202_v8  ;;  %v7205_v38 = vpop.eup %5813 }
 0x30c   :  { %11391 = vst [vmem:[#allocation108_spill] sm:$0xff] %v7197_v39  ;;  %v2157_v30 = vmax.f32 %v2141_v16, %v653_v26  ;;  %v432_v22 = vpop.xlane.xlu0 %431  ;;  %11393 = vst [vmem:[#allocation110_spill] sm:$0xff] %v7205_v38  ;;  %v2377_v20 = vadd.f32 %v7202_v8, %v2361_v45 }
 0x30d   :  { %v2196_v21 = vmul.f32 1.442695, %v2172_v50  ;;  %v2244_v35 = vmul.f32 1.442695, %v2220_v62  ;;  %v2292_v18 = vmul.f32 1.442695, %v2268_v2 }
 0x30e   :  { %v2173_v39 = vsub.f32 %v6998_v6, %v2157_v30  ;;  %v2221_v55 = vsub.f32 %v429_v15, %v2157_v30  ;;  %v2269_v46 = vsub.f32 %v541_v51, %v2157_v30  ;;  %v2317_v4 = vsub.f32 %v653_v26, %v2157_v30 }
 0x30f   :  { %5831 = vpow2.f32 %v2196_v21  ;;  %v435_v37 = vpop.xlane.xlu1 %434  ;;  %v2340_v50 = vmul.f32 1.442695, %v2316_v52  ;;  %v2126_v6 = vmax.f32 %v7010_v19, %v432_v22  ;;  %v7214_v51 = vadd.f32 %v7205_v38, %v2377_v20 }
 0x310   :  { %v7208_v36 = vpop.eup %5815  ;;  %5833 = vpow2.f32 %v2244_v35  ;;  %v2198_v16 = vmul.f32 1.442695, %v2173_v39  ;;  %v2246_v12 = vmul.f32 1.442695, %v2221_v55  ;;  %v544_v32 = vpop.xlane.xlu0 %543  ;;  %v2294_v15 = vmul.f32 1.442695, %v2269_v46 }
 0x311   :  { %11394 = vst [vmem:[#allocation111_spill] sm:$0xff] %v7208_v36  ;;  %v7210_v56 = vpop.eup %5817  ;;  %5835 = vpow2.f32 %v2292_v18  ;;  %11396 = vst [vmem:[#allocation113_spill] sm:$0xff] %v7214_v51  ;;  %v2142_v45 = vmax.f32 %v2126_v6, %v544_v32  ;;  %v2342_v55 = vmul.f32 1.442695, %v2317_v4  ;;  %v2127_v2 = vmax.f32 %v7046_v23, %v435_v37 }
 0x312   :  { %11395 = vst [vmem:[#allocation112_spill] sm:$0xff] %v7210_v56  ;;  %v7216_v21 = vpop.eup %5819  ;;  %5837 = vpow2.f32 %v2198_v16  ;;  %v2362_v39 = vadd.f32 %v7210_v56, %v7208_v36 }
 0x313   :  { %11397 = vst [vmem:[#allocation114_spill] sm:$0xff] %v7216_v21  ;;  %v547_v62 = vpop.xlane.xlu1 %546  ;;  %v7220_v30 = vpop.eup %5821  ;;  %5839 = vpow2.f32 %v2246_v12 }
 0x314   :  { %11398 = vst [vmem:[#allocation115_spill] sm:$0xff] %v7220_v30  ;;  %v656_v26 = vpop.xlane.xlu0 %655  ;;  %v7223_v35 = vpop.eup %5823  ;;  %5841 = vpow2.f32 %v2340_v50  ;;  %v2378_v52 = vadd.f32 %v7216_v21, %v2362_v39  ;;  %v2143_v18 = vmax.f32 %v2127_v2, %v547_v62 }
 0x315   :  { %11399 = vst [vmem:[#allocation116_spill] sm:$0xff] %v7223_v35  ;;  %v2158_v46 = vmax.f32 %v2142_v45, %v656_v26  ;;  %5843 = vpow2.f32 %v2294_v15  ;;  %v2363_v20 = vadd.f32 %v7223_v35, %v7220_v30  ;;  %v7229_v4 = vpop.eup %5825 }
 0x316   :  { %11400 = vst [vmem:[#allocation117_spill] sm:$0xff] %v7229_v4  ;;  %5845 = vpow2.f32 %v2342_v55  ;;  %v7233_v50 = vpop.eup %5827 }
 0x317   :  { %v2174_v16 = vsub.f32 %v7010_v19, %v2158_v46  ;;  %v2222_v6 = vsub.f32 %v432_v22, %v2158_v46  ;;  %v2270_v36 = vsub.f32 %v544_v32, %v2158_v46  ;;  %v659_v12 = vpop.xlane.xlu1 %658  ;;  %v2318_v51 = vsub.f32 %v656_v26, %v2158_v46  ;;  %11401 = vst [vmem:[#allocation118_spill] sm:$0xff] %v7233_v50  ;;  %v7235_v39 = vpop.eup %5829 }
 0x318   :  { %v2159_v38 = vmax.f32 %v2143_v18, %v659_v12  ;;  %v7231_v8 = vpop.xlane.xlu0 %437  ;;  %11402 = vst [vmem:[#allocation119_spill] sm:$0xff] %v7235_v39  ;;  %v7239_v22 = vadd.f32 %v7229_v4, %v2378_v52  ;;  %v2379_v32 = vadd.f32 %v7233_v50, %v2363_v20 }
 0x319   :  { %v2200_v45 = vmul.f32 1.442695, %v2174_v16  ;;  %v2248_v15 = vmul.f32 1.442695, %v2222_v6  ;;  %v2296_v2 = vmul.f32 1.442695, %v2270_v36 }
 0x31a   :  { %v2175_v30 = vsub.f32 %v7046_v23, %v2159_v38  ;;  %v2223_v19 = vsub.f32 %v435_v37, %v2159_v38  ;;  %11403 = vst [vmem:[#allocation120_spill] sm:$0xff] %v7239_v22  ;;  %v2344_v26 = vmul.f32 1.442695, %v2318_v51  ;;  %v7247_v36 = vadd.f32 %v7235_v39, %v2379_v32 }
 0x31b   :  { %5847 = vpow2.f32 %v2200_v45  ;;  %v2271_v6 = vsub.f32 %v547_v62, %v2159_v38  ;;  %v7257_v22 = vpop.xlane.xlu1 %440 }
 0x31c   :  { %v7242_v55 = vpop.eup %5831  ;;  %5849 = vpow2.f32 %v2248_v15  ;;  %v550_v46 = vpop.xlane.xlu0 %549  ;;  %v2202_v16 = vmul.f32 1.442695, %v2175_v30  ;;  %11406 = vst [vmem:[#allocation123_spill] sm:$0xff] %v7247_v36  ;;  %v2250_v37 = vmul.f32 1.442695, %v2223_v19  ;;  %v2319_v15 = vsub.f32 %v659_v12, %v2159_v38 }
 0x31d   :  { %11404 = vst [vmem:[#allocation121_spill] sm:$0xff] %v7242_v55  ;;  %v7244_v18 = vpop.eup %5833  ;;  %5851 = vpow2.f32 %v2296_v2  ;;  %v2298_v32 = vmul.f32 1.442695, %v2271_v6 }
 0x31e   :  { %11405 = vst [vmem:[#allocation122_spill] sm:$0xff] %v7244_v18  ;;  %v7249_v23 = vpop.eup %5835  ;;  %v2364_v52 = vadd.f32 %v7244_v18, %v7242_v55  ;;  %5853 = vpow2.f32 %v2344_v26  ;;  %v2346_v36 = vmul.f32 1.442695, %v2319_v15  ;;  %v11475_v18 = vld [vmem:[#allocation51_spill] sm:$0xff] }
 0x31f   :  { %11407 = vst [vmem:[#allocation124_spill] sm:$0xff] %v7249_v23  ;;  %v7253_v20 = vpop.eup %5837  ;;  %5855 = vpow2.f32 %v2202_v16 }
 0x320   :  { %11408 = vst [vmem:[#allocation125_spill] sm:$0xff] %v7253_v20  ;;  %v444_v45 = vpop.xlane.xlu0 %443  ;;  %v7255_v51 = vpop.eup %5839  ;;  %v2380_v30 = vadd.f32 %v7249_v23, %v2364_v52  ;;  %5857 = vpow2.f32 %v2250_v37  ;;  %v2128_v52 = vmax.f32 %v7069_v33, %v7231_v8 }
 0x321   :  { %11409 = vst [vmem:[#allocation126_spill] sm:$0xff] %v7255_v51  ;;  %v7260_v2 = vpop.eup %5841  ;;  %v2365_v62 = vadd.f32 %v7255_v51, %v7253_v20  ;;  %5859 = vpow2.f32 %v2298_v32  ;;  %v7277_v23 = vpop.xlane.xlu1 %552  ;;  %v2130_v6 = vmax.f32 %v7075_v0, %v444_v45  ;;  %v11476_v51 = vld [vmem:[#allocation45_spill] sm:$0xff] }
 0x322   :  { %11410 = vst [vmem:[#allocation127_spill] sm:$0xff] %v7260_v2  ;;  %v7264_v19 = vpop.eup %5843  ;;  %v7267_v26 = vadd.f32 %v7260_v2, %v2380_v30  ;;  %v2144_v20 = vmax.f32 %v2128_v52, %v550_v46  ;;  %5861 = vpow2.f32 %v2346_v36 }
 0x323   :  { %11411 = vst [vmem:[#allocation128_spill] sm:$0xff] %v7264_v19  ;;  %v2381_v38 = vadd.f32 %v7264_v19, %v2365_v62  ;;  %v7270_v12 = vpop.eup %5845 }
 0x324   :  { %11412 = vst [vmem:[#allocation129_spill] sm:$0xff] %v7267_v26  ;;  %v556_v55 = vpop.xlane.xlu0 %555  ;;  %11413 = vst [vmem:[#allocation130_spill] sm:$0xff] %v7270_v12 }
 0x325   :  { %v7275_v16 = vadd.f32 %v7270_v12, %v2381_v38  ;;  %v2146_v15 = vmax.f32 %v2130_v6, %v556_v55 }
 0x327   :  { %11414 = vst [vmem:[#allocation131_spill] sm:$0xff] %v7275_v16 }
 0x328   :  { %v7279_v37 = vpop.eup %5847  ;;  %v662_v30 = vpop.xlane.xlu0 %661 }
 0x329   :  { %11415 = vst [vmem:[#allocation132_spill] sm:$0xff] %v7279_v37  ;;  %v7282_v26 = vpop.eup %5849  ;;  %v2160_v62 = vmax.f32 %v2144_v20, %v662_v30 }
 0x32a   :  { %11416 = vst [vmem:[#allocation133_spill] sm:$0xff] %v7282_v26  ;;  %v2366_v2 = vadd.f32 %v7282_v26, %v7279_v37  ;;  %v7286_v19 = vpop.eup %5851 }
 0x32b   :  { %11417 = vst [vmem:[#allocation134_spill] sm:$0xff] %v7286_v19  ;;  %v2176_v32 = vsub.f32 %v7069_v33, %v2160_v62  ;;  %v2224_v38 = vsub.f32 %v7231_v8, %v2160_v62  ;;  %v2272_v52 = vsub.f32 %v550_v46, %v2160_v62  ;;  %v2320_v16 = vsub.f32 %v662_v30, %v2160_v62  ;;  %v7290_v12 = vpop.xlane.xlu1 %446  ;;  %v7293_v50 = vpop.eup %5853 }
 0x32c   :  { %v668_v39 = vpop.xlane.xlu0 %667  ;;  %v2382_v4 = vadd.f32 %v7286_v19, %v2366_v2  ;;  %11418 = vst [vmem:[#allocation135_spill] sm:$0xff] %v7293_v50  ;;  %v7298_v33 = vpop.eup %5855  ;;  %v2129_v2 = vmax.f32 %v7102_v17, %v7257_v22 }
 0x32d   :  { %v2204_v36 = vmul.f32 1.442695, %v2176_v32  ;;  %v2252_v20 = vmul.f32 1.442695, %v2224_v38  ;;  %v2300_v6 = vmul.f32 1.442695, %v2272_v52  ;;  %v2162_v21 = vmax.f32 %v2146_v15, %v668_v39  ;;  %v7301_v26 = vpop.eup %5857 }
 0x32e   :  { %v2348_v37 = vmul.f32 1.442695, %v2320_v16  ;;  %v7296_v14 = vadd.f32 %v7293_v50, %v2382_v4  ;;  %11420 = vst [vmem:[#allocation137_spill] sm:$0xff] %v7298_v33  ;;  %11421 = vst [vmem:[#allocation138_spill] sm:$0xff] %v7301_v26  ;;  %v2145_v38 = vmax.f32 %v2129_v2, %v7277_v23 }
 0x32f   :  { %5863 = vpow2.f32 %v2204_v36  ;;  %v2178_v8 = vsub.f32 %v7075_v0, %v2162_v21  ;;  %v2226_v46 = vsub.f32 %v444_v45, %v2162_v21  ;;  %v2274_v30 = vsub.f32 %v556_v55, %v2162_v21  ;;  %v559_v62 = vpop.xlane.xlu1 %558 }
 0x330   :  { %11419 = vst [vmem:[#allocation136_spill] sm:$0xff] %v7296_v14  ;;  %5865 = vpow2.f32 %v2252_v20  ;;  %v2322_v32 = vsub.f32 %v668_v39, %v2162_v21  ;;  %v673_v15 = vpop.permute.xlu0 %672  ;;  %v2131_v55 = vmax.f32 %v7107_v40, %v7290_v12  ;;  %v2367_v21 = vadd.f32 %v7301_v26, %v7298_v33  ;;  %v7313_v39 = vpop.eup %5859 }
 0x331   :  { %5867 = vpow2.f32 %v2300_v6  ;;  %v2208_v16 = vmul.f32 1.442695, %v2178_v8  ;;  %v2256_v4 = vmul.f32 1.442695, %v2226_v46  ;;  %v2304_v52 = vmul.f32 1.442695, %v2274_v30  ;;  %v7318_v8 = vpop.eup %5861 }
 0x332   :  { %5869 = vpow2.f32 %v2348_v37  ;;  %v7307_v0 = vmul.f32 %v673_v15, %v6567_v31  ;;  %v2352_v45 = vmul.f32 1.442695, %v2322_v32  ;;  %11423 = vst [vmem:[#allocation140_spill] sm:$0xff] %v7313_v39  ;;  %v2147_v37 = vmax.f32 %v2131_v55, %v559_v62  ;;  %11424 = vst [vmem:[#allocation141_spill] sm:$0xff] %v7318_v8 }
 0x333   :  { %5871 = vpow2.f32 %v2208_v16  ;;  %v665_v36 = vpop.xlane.xlu1 %664  ;;  %v2383_v6 = vadd.f32 %v7313_v39, %v2367_v21 }
 0x334   :  { %11422 = vst [vmem:[#allocation139_spill] sm:$0xff] %v7307_v0  ;;  %5873 = vpow2.f32 %v2256_v4  ;;  %v2161_v20 = vmax.f32 %v2145_v38, %v665_v36  ;;  %752 = vrot.lane.b32.xlu0 %v7307_v0, %s6407_s2  ;;  %v681_v15 = vpop.permute.xlu0 %680 }
 0x335   :  { %5875 = vpow2.f32 %v2304_v52  ;;  %v7324_v4 = vadd.f32 %v7318_v8, %v2383_v6 }
 0x336   :  { %v2177_v46 = vsub.f32 %v7102_v17, %v2161_v20  ;;  %v2225_v30 = vsub.f32 %v7257_v22, %v2161_v20  ;;  %v2273_v2 = vsub.f32 %v7277_v23, %v2161_v20  ;;  %5877 = vpow2.f32 %v2352_v45 }
 0x337   :  { %v2321_v32 = vsub.f32 %v665_v36, %v2161_v20  ;;  %v671_v16 = vpop.xlane.xlu1 %670  ;;  %11425 = vst [vmem:[#allocation142_spill] sm:$0xff] %v7324_v4 }
 0x338   :  { %v2206_v38 = vmul.f32 1.442695, %v2177_v46  ;;  %v2254_v55 = vmul.f32 1.442695, %v2225_v30  ;;  %v2302_v33 = vmul.f32 1.442695, %v2273_v2  ;;  %v2163_v21 = vmax.f32 %v2147_v37, %v671_v16  ;;  %v685_v37 = vpop.permute.xlu0 %684 }
 0x339   :  { %v2350_v14 = vmul.f32 1.442695, %v2321_v32 }
 0x33a   :  { %5879 = vpow2.f32 %v2206_v38  ;;  %v2179_v52 = vsub.f32 %v7107_v40, %v2163_v21  ;;  %v2227_v17 = vsub.f32 %v7290_v12, %v2163_v21  ;;  %v2275_v22 = vsub.f32 %v559_v62, %v2163_v21 }
 0x33b   :  { %5881 = vpow2.f32 %v2254_v55  ;;  %v2323_v23 = vsub.f32 %v671_v16, %v2163_v21  ;;  %v675_v45 = vpop.permute.xlu1 %674 }
 0x33c   :  { %v7328_v36 = vpop.eup %5863  ;;  %5883 = vpow2.f32 %v2302_v33  ;;  %v2210_v20 = vmul.f32 1.442695, %v2179_v52  ;;  %v2258_v6 = vmul.f32 1.442695, %v2227_v17  ;;  %v2306_v46 = vmul.f32 1.442695, %v2275_v22  ;;  %v689_v17 = vpop.permute.xlu0 %688 }
 0x33d   :  { %11426 = vst [vmem:[#allocation143_spill] sm:$0xff] %v7328_v36  ;;  %v7330_v4 = vpop.eup %5865  ;;  %5885 = vpow2.f32 %v2350_v14  ;;  %v7333_v30 = vmul.f32 %v675_v45, %v6555_v27  ;;  %v2354_v33 = vmul.f32 1.442695, %v2323_v23  ;;  %v7363_v45 = vmul.f32 %v681_v15, %v6627_v47 }
 0x33e   :  { %11427 = vst [vmem:[#allocation144_spill] sm:$0xff] %v7330_v4  ;;  %v7335_v40 = vpop.eup %5867  ;;  %5887 = vpow2.f32 %v2210_v20  ;;  %v2368_v12 = vadd.f32 %v7330_v4, %v7328_v36  ;;  %v11438_v20 = vld [vmem:[#allocation12_spill] sm:$0xff]  ;;  %v7381_v15 = vmul.f32 %v685_v37, %v6663_v57 }
 0x33f   :  { %11428 = vst [vmem:[#allocation145_spill] sm:$0xff] %v7333_v30  ;;  %11429 = vst [vmem:[#allocation146_spill] sm:$0xff] %v7335_v40  ;;  %v7339_v62 = vpop.eup %5869  ;;  %5889 = vpow2.f32 %v2258_v6  ;;  %754 = vrot.lane.b32.xlu1 %v7333_v30, %s6407_s2  ;;  %v677_v2 = vpop.permute.xlu1 %676 }
 0x340   :  { %11430 = vst [vmem:[#allocation147_spill] sm:$0xff] %v7339_v62  ;;  %v7343_v14 = vpop.eup %5871  ;;  %v7346_v32 = vmul.f32 %v677_v2, %v6601_v42  ;;  %v2384_v16 = vadd.f32 %v7335_v40, %v2368_v12  ;;  %5891 = vpow2.f32 %v2306_v46  ;;  %11437 = vst [vmem:[#allocation154_spill] sm:$0xff] %v7363_v45 }
 0x341   :  { %11431 = vst [vmem:[#allocation148_spill] sm:$0xff] %v7343_v14  ;;  %v7349_v38 = vpop.eup %5873  ;;  %5893 = vpow2.f32 %v2354_v33  ;;  %11443 = vst [vmem:[#allocation159_spill] sm:$0xff] %v7381_v15 }
 0x342   :  { %11432 = vst [vmem:[#allocation149_spill] sm:$0xff] %v7346_v32  ;;  %11433 = vst [vmem:[#allocation150_spill] sm:$0xff] %v7349_v38  ;;  %756 = vrot.lane.b32.xlu0 %v7346_v32, %s6407_s2  ;;  %v7354_v55 = vadd.f32 %v7339_v62, %v2384_v16  ;;  %v2370_v21 = vadd.f32 %v7349_v38, %v7343_v14  ;;  %v7358_v52 = vpop.eup %5875  ;;  %v693_v14 = vpop.permute.xlu0 %692 }
 0x343   :  { %11435 = vst [vmem:[#allocation152_spill] sm:$0xff] %v7358_v52  ;;  %v679_v22 = vpop.permute.xlu1 %678  ;;  %v7360_v23 = vpop.eup %5877 }
 0x344   :  { %11434 = vst [vmem:[#allocation151_spill] sm:$0xff] %v7354_v55  ;;  %11436 = vst [vmem:[#allocation153_spill] sm:$0xff] %v7360_v23  ;;  %v7366_v6 = vmul.f32 %v679_v22, %v11438_v20  ;;  %v2386_v46 = vadd.f32 %v7358_v52, %v2370_v21 }
 0x346   :  { %11439 = vst [vmem:[#allocation155_spill] sm:$0xff] %v7366_v6  ;;  %758 = vrot.lane.b32.xlu1 %v7366_v6, %s6407_s2  ;;  %760 = vrot.lane.b32.xlu0 %v7363_v45, %s6407_s2  ;;  %v7374_v12 = vadd.f32 %v7360_v23, %v2386_v46  ;;  %v7402_v23 = vmul.f32 %v689_v17, %v6699_v3 }
 0x347   :  { %v7376_v33 = vpop.eup %5879  ;;  %v683_v2 = vpop.permute.xlu1 %682 }
 0x348   :  { %11440 = vst [vmem:[#allocation156_spill] sm:$0xff] %v7374_v12  ;;  %11441 = vst [vmem:[#allocation157_spill] sm:$0xff] %v7376_v33  ;;  %v7378_v16 = vpop.eup %5881  ;;  %v7384_v22 = vmul.f32 %v683_v2, %v6639_v53 }
 0x349   :  { %11442 = vst [vmem:[#allocation158_spill] sm:$0xff] %v7378_v16  ;;  %v7386_v21 = vpop.eup %5883  ;;  %v2369_v36 = vadd.f32 %v7378_v16, %v7376_v33  ;;  %11449 = vst [vmem:[#allocation165_spill] sm:$0xff] %v7402_v23 }
 0x34a   :  { %11444 = vst [vmem:[#allocation160_spill] sm:$0xff] %v7384_v22  ;;  %11445 = vst [vmem:[#allocation161_spill] sm:$0xff] %v7386_v21  ;;  %v7390_v55 = vpop.eup %5885  ;;  %762 = vrot.lane.b32.xlu1 %v7384_v22, %s6407_s2  ;;  %764 = vrot.lane.b32.xlu0 %v7381_v15, %s6407_s2 }
 0x34b   :  { %11446 = vst [vmem:[#allocation162_spill] sm:$0xff] %v7390_v55  ;;  %v7396_v46 = vpop.eup %5887  ;;  %v687_v37 = vpop.permute.xlu1 %686  ;;  %v2385_v2 = vadd.f32 %v7386_v21, %v2369_v36 }
 0x34c   :  { %11447 = vst [vmem:[#allocation163_spill] sm:$0xff] %v7396_v46  ;;  %v7399_v12 = vpop.eup %5889  ;;  %v7405_v33 = vmul.f32 %v687_v37, %v6675_v63  ;;  %v697_v36 = vpop.permute.xlu0 %696 }
 0x34d   :  { %11448 = vst [vmem:[#allocation164_spill] sm:$0xff] %v7399_v12  ;;  %v7408_v52 = vadd.f32 %v7390_v55, %v2385_v2  ;;  %v2371_v62 = vadd.f32 %v7399_v12, %v7396_v46  ;;  %v7412_v40 = vpop.eup %5891  ;;  %v7422_v2 = vmul.f32 %v693_v14, %v6735_v13 }
 0x34e   :  { %11450 = vst [vmem:[#allocation166_spill] sm:$0xff] %v7405_v33  ;;  %11452 = vst [vmem:[#allocation168_spill] sm:$0xff] %v7412_v40  ;;  %766 = vrot.lane.b32.xlu1 %v7405_v33, %s6407_s2  ;;  %768 = vrot.lane.b32.xlu0 %v7402_v23, %s6407_s2  ;;  %v7419_v37 = vpop.eup %5893 }
 0x34f   :  { %11451 = vst [vmem:[#allocation167_spill] sm:$0xff] %v7408_v52  ;;  %v691_v17 = vpop.permute.xlu1 %690  ;;  %v2387_v21 = vadd.f32 %v7412_v40, %v2371_v62  ;;  %11453 = vst [vmem:[#allocation169_spill] sm:$0xff] %v7419_v37  ;;  %v7435_v62 = vmul.f32 %v697_v36, %v6787_v7 }
 0x350   :  { %11454 = vst [vmem:[#allocation170_spill] sm:$0xff] %v7422_v2  ;;  %v7425_v52 = vmul.f32 %v691_v17, %v6711_v9  ;;  %v701_v14 = vpop.permute.xlu0 %700 }
 0x351   :  { %v7428_v46 = vadd.f32 %v7419_v37, %v2387_v21  ;;  %11457 = vst [vmem:[#allocation173_spill] sm:$0xff] %v7435_v62  ;;  %v7445_v17 = vmul.f32 %v701_v14, %v6794_v11 }
 0x352   :  { %11455 = vst [vmem:[#allocation171_spill] sm:$0xff] %v7425_v52  ;;  %770 = vrot.lane.b32.xlu1 %v7425_v52, %s6407_s2  ;;  %772 = vrot.lane.b32.xlu0 %v7422_v2, %s6407_s2 }
 0x353   :  { %11456 = vst [vmem:[#allocation172_spill] sm:$0xff] %v7428_v46  ;;  %v695_v55 = vpop.permute.xlu1 %694  ;;  %11459 = vst [vmem:[#allocation175_spill] sm:$0xff] %v7445_v17 }
 0x354   :  { %v7438_v40 = vmul.f32 %v695_v55, %v6753_v34 }
 0x356   :  { %11458 = vst [vmem:[#allocation174_spill] sm:$0xff] %v7438_v40  ;;  %774 = vrot.lane.b32.xlu1 %v7438_v40, %s6407_s2  ;;  %776 = vrot.lane.b32.xlu0 %v7435_v62, %s6407_s2 }
 0x357   :  { %v699_v21 = vpop.permute.xlu1 %698 }
 0x358   :  { %v7448_v46 = vmul.f32 %v699_v21, %v6838_v58 }
 0x35a   :  { %11460 = vst [vmem:[#allocation176_spill] sm:$0xff] %v7448_v46  ;;  %778 = vrot.lane.b32.xlu1 %v7448_v46, %s6407_s2  ;;  %780 = vrot.lane.b32.xlu0 %v7445_v17, %s6407_s2 }
 0x35b   :  { %v703_v55 = vpop.permute.xlu1 %702 }
 0x35c   :  { %v7455_v36 = vmul.f32 %v703_v55, %v6850_v28 }
 0x35e   :  { %11461 = vst [vmem:[#allocation177_spill] sm:$0xff] %v7455_v36  ;;  %782 = vrot.lane.b32.xlu1 %v7455_v36, %s6407_s2 }
 0x3a6   :  { %v753_v37 = vpop.permute.xlu0 %752 }
 0x3a7   :  { %v800_v14 = vsel %vm271_vm1, %v753_v37, 0.0 }
 0x3a8   :  { %801 = vadd.xlane.f32.xlu0 %v800_v14 }
 0x3b1   :  { %v755_v8 = vpop.permute.xlu1 %754 }
 0x3b2   :  { %v803_v21 = vsel %vm271_vm1, %v755_v8, 0.0 }
 0x3b3   :  { %804 = vadd.xlane.f32.xlu1 %v803_v21 }
 0x3b4   :  { %v757_v39 = vpop.permute.xlu0 %756 }
 0x3b5   :  { %v806_v50 = vsel %vm271_vm1, %v757_v39, 0.0 }
 0x3b6   :  { %807 = vadd.xlane.f32.xlu0 %v806_v50 }
 0x3b8   :  { %v759_v19 = vpop.permute.xlu1 %758  ;;  %v761_v38 = vpop.permute.xlu0 %760 }
 0x3b9   :  { %v809_v55 = vsel %vm271_vm1, %v759_v19, 0.0  ;;  %v812_v37 = vsel %vm271_vm1, %v761_v38, 0.0 }
 0x3ba   :  { %810 = vadd.xlane.f32.xlu0 %v809_v55 }
 0x3bc   :  { %v763_v12 = vpop.permute.xlu1 %762  ;;  %v765_v4 = vpop.permute.xlu0 %764 }
 0x3bd   :  { %v815_v16 = vsel %vm271_vm1, %v763_v12, 0.0  ;;  %v818_v39 = vsel %vm271_vm1, %v765_v4, 0.0 }
 0x3be   :  { %816 = vadd.xlane.f32.xlu1 %v815_v16  ;;  %813 = vadd.xlane.f32.xlu0 %v812_v37 }
 0x3c0   :  { %v767_v14 = vpop.permute.xlu1 %766  ;;  %v769_v8 = vpop.permute.xlu0 %768 }
 0x3c1   :  { %v821_v21 = vsel %vm271_vm1, %v767_v14, 0.0  ;;  %v824_v55 = vsel %vm271_vm1, %v769_v8, 0.0 }
 0x3c2   :  { %822 = vadd.xlane.f32.xlu1 %v821_v21  ;;  %819 = vadd.xlane.f32.xlu0 %v818_v39 }
 0x3c4   :  { %v771_v50 = vpop.permute.xlu1 %770  ;;  %v773_v26 = vpop.permute.xlu0 %772 }
 0x3c5   :  { %v827_v19 = vsel %vm271_vm1, %v771_v50, 0.0  ;;  %v830_v37 = vsel %vm271_vm1, %v773_v26, 0.0  ;;  %v11463_v26 = vld [vmem:[#allocation16_spill] sm:$0xff] }
 0x3c6   :  { %828 = vadd.xlane.f32.xlu1 %v827_v19  ;;  %825 = vadd.xlane.f32.xlu0 %v824_v55  ;;  %v11462_v55 = vld [vmem:[#allocation8_spill] sm:$0xff] }
 0x3c8   :  { %v775_v12 = vpop.permute.xlu1 %774  ;;  %v777_v38 = vpop.permute.xlu0 %776 }
 0x3c9   :  { %v833_v16 = vsel %vm271_vm1, %v775_v12, 0.0  ;;  %v836_v21 = vsel %vm271_vm1, %v777_v38, 0.0  ;;  %v11464_v12 = vld [vmem:[#allocation10_spill] sm:$0xff] }
 0x3ca   :  { %834 = vadd.xlane.f32.xlu1 %v833_v16  ;;  %831 = vadd.xlane.f32.xlu0 %v830_v37  ;;  %v11465_v38 = vld [vmem:[#allocation14_spill] sm:$0xff]  ;;  %v11466_v16 = vld [vmem:[#allocation19_spill] sm:$0xff] }
 0x3cb   :  { %v11467_v37 = vld [vmem:[#allocation22_spill] sm:$0xff] }
 0x3cc   :  { %v779_v14 = vpop.permute.xlu1 %778  ;;  %v781_v39 = vpop.permute.xlu0 %780 }
 0x3cd   :  { %v839_v4 = vsel %vm271_vm1, %v779_v14, 0.0  ;;  %v842_v19 = vsel %vm271_vm1, %v781_v39, 0.0  ;;  %v11468_v14 = vld [vmem:[#allocation25_spill] sm:$0xff]  ;;  %v11471_v39 = vld [vmem:[#allocation34_spill] sm:$0xff] }
 0x3ce   :  { %840 = vadd.xlane.f32.xlu1 %v839_v4  ;;  %837 = vadd.xlane.f32.xlu0 %v836_v21  ;;  %v11469_v4 = vld [vmem:[#allocation28_spill] sm:$0xff]  ;;  %v11470_v21 = vld [vmem:[#allocation31_spill] sm:$0xff] }
 0x3d0   :  { %v783_v50 = vpop.permute.xlu1 %782 }
 0x3d1   :  { %v845_v8 = vsel %vm271_vm1, %v783_v50, 0.0  ;;  %v11472_v50 = vld [vmem:[#allocation37_spill] sm:$0xff] }
 0x3d2   :  { %846 = vadd.xlane.f32.xlu1 %v845_v8  ;;  %843 = vadd.xlane.f32.xlu0 %v842_v19  ;;  %v11473_v8 = vld [vmem:[#allocation40_spill] sm:$0xff]  ;;  %v11474_v19 = vld [vmem:[#allocation43_spill] sm:$0xff] }
 0x3e3   :  { %866 = vrot.lane.b32.xlu1 %v11462_v55, %s6407_s2 }
 0x3e7   :  { %868 = vrot.lane.b32.xlu1 %v11463_v26, %s6407_s2 }
 0x3e8   :  { %864 = vrot.lane.b32.xlu0 %v11464_v12, %s6407_s2 }
 0x3eb   :  { %870 = vrot.lane.b32.xlu1 %v11465_v38, %s6407_s2 }
 0x3ec   :  { %872 = vrot.lane.b32.xlu0 %v11466_v16, %s6407_s2 }
 0x3ef   :  { %874 = vrot.lane.b32.xlu1 %v11467_v37, %s6407_s2 }
 0x3f0   :  { %876 = vrot.lane.b32.xlu0 %v11468_v14, %s6407_s2 }
 0x3f3   :  { %878 = vrot.lane.b32.xlu1 %v11469_v4, %s6407_s2 }
 0x3f4   :  { %880 = vrot.lane.b32.xlu0 %v11470_v21, %s6407_s2 }
 0x3f7   :  { %882 = vrot.lane.b32.xlu1 %v11471_v39, %s6407_s2 }
 0x3f8   :  { %884 = vrot.lane.b32.xlu0 %v11472_v50, %s6407_s2 }
 0x3fb   :  { %886 = vrot.lane.b32.xlu1 %v11473_v8, %s6407_s2 }
 0x3fc   :  { %888 = vrot.lane.b32.xlu0 %v11474_v19, %s6407_s2 }
 0x3ff   :  { %890 = vrot.lane.b32.xlu1 %v11475_v18, %s6407_s2 }
 0x400   :  { %892 = vrot.lane.b32.xlu0 %v11476_v51, %s6407_s2 }
 0x403   :  { %894 = vrot.lane.b32.xlu1 %v6861_v54, %s6407_s2 }
 0x431   :  { %v7507_v56 = vpop.xlane.xlu0 %801 }
 0x43c   :  { %v7511_v29 = vpop.xlane.xlu1 %804 }
 0x43f   :  { %v7509_v35 = vpop.xlane.xlu0 %807 }
 0x443   :  { %v7513_v24 = vpop.xlane.xlu0 %810 }
 0x447   :  { %v7515_v60 = vpop.xlane.xlu1 %816  ;;  %v7517_v5 = vpop.xlane.xlu0 %813 }
 0x44b   :  { %v7519_v48 = vpop.xlane.xlu1 %822  ;;  %v7521_v19 = vpop.xlane.xlu0 %819 }
 0x44f   :  { %v7523_v51 = vpop.xlane.xlu1 %828  ;;  %v7525_v18 = vpop.xlane.xlu0 %825 }
 0x453   :  { %v7527_v54 = vpop.xlane.xlu1 %834  ;;  %v7529_v50 = vpop.xlane.xlu0 %831 }
 0x457   :  { %v7531_v8 = vpop.xlane.xlu1 %840  ;;  %v7533_v21 = vpop.xlane.xlu0 %837 }
 0x45b   :  { %v7535_v39 = vpop.xlane.xlu1 %846  ;;  %v7537_v14 = vpop.xlane.xlu0 %843 }
 0x45c   :  { %11477 = vst [vmem:[#allocation178_spill] sm:$0xff] %v7537_v14 }
 0x45f   :  { %v867_v4 = vpop.permute.xlu1 %866  ;;  %v865_v16 = vpop.permute.xlu0 %864 }
 0x460   :  { %v915_v37 = vsel %vm271_vm1, %v867_v4, 0.0  ;;  %v912_v12 = vsel %vm271_vm1, %v865_v16, 0.0 }
 0x461   :  { %916 = vadd.xlane.f32.xlu1 %v915_v37  ;;  %913 = vadd.xlane.f32.xlu0 %v912_v12 }
 0x463   :  { %v869_v38 = vpop.permute.xlu1 %868  ;;  %v873_v26 = vpop.permute.xlu0 %872 }
 0x464   :  { %v918_v55 = vsel %vm271_vm1, %v869_v38, 0.0  ;;  %v924_v4 = vsel %vm271_vm1, %v873_v26, 0.0 }
 0x465   :  { %919 = vadd.xlane.f32.xlu0 %v918_v55 }
 0x467   :  { %v871_v17 = vpop.permute.xlu1 %870  ;;  %v877_v36 = vpop.permute.xlu0 %876 }
 0x468   :  { %v921_v62 = vsel %vm271_vm1, %v871_v17, 0.0  ;;  %v930_v37 = vsel %vm271_vm1, %v877_v36, 0.0 }
 0x469   :  { %922 = vadd.xlane.f32.xlu0 %v921_v62 }
 0x46b   :  { %v875_v46 = vpop.permute.xlu1 %874  ;;  %v881_v2 = vpop.permute.xlu0 %880 }
 0x46c   :  { %v927_v40 = vsel %vm271_vm1, %v875_v46, 0.0  ;;  %v936_v62 = vsel %vm271_vm1, %v881_v2, 0.0 }
 0x46d   :  { %928 = vadd.xlane.f32.xlu1 %v927_v40  ;;  %925 = vadd.xlane.f32.xlu0 %v924_v4 }
 0x46f   :  { %v879_v16 = vpop.permute.xlu1 %878  ;;  %v885_v38 = vpop.permute.xlu0 %884 }
 0x470   :  { %v933_v12 = vsel %vm271_vm1, %v879_v16, 0.0  ;;  %v942_v26 = vsel %vm271_vm1, %v885_v38, 0.0  ;;  %v11479_v38 = vld [vmem:[#allocation46_spill] sm:$0xff] }
 0x471   :  { %934 = vadd.xlane.f32.xlu1 %v933_v12  ;;  %931 = vadd.xlane.f32.xlu0 %v930_v37 }
 0x473   :  { %v883_v55 = vpop.permute.xlu1 %882  ;;  %v889_v46 = vpop.permute.xlu0 %888 }
 0x474   :  { %v939_v17 = vsel %vm271_vm1, %v883_v55, 0.0  ;;  %v948_v16 = vsel %vm271_vm1, %v889_v46, 0.0  ;;  %v11482_v46 = vld [vmem:[#allocation59_spill] sm:$0xff] }
 0x475   :  { %940 = vadd.xlane.f32.xlu1 %v939_v17  ;;  %937 = vadd.xlane.f32.xlu0 %v936_v62  ;;  %v11480_v17 = vld [vmem:[#allocation48_spill] sm:$0xff]  ;;  %v11481_v62 = vld [vmem:[#allocation58_spill] sm:$0xff] }
 0x477   :  { %v887_v23 = vpop.permute.xlu1 %886  ;;  %v893_v12 = vpop.permute.xlu0 %892 }
 0x478   :  { %v945_v40 = vsel %vm271_vm1, %v887_v23, 0.0  ;;  %v954_v55 = vsel %vm271_vm1, %v893_v12, 0.0  ;;  %v11478_v23 = vld [vmem:[#allocation54_spill] sm:$0xff] }
 0x479   :  { %946 = vadd.xlane.f32.xlu1 %v945_v40  ;;  %943 = vadd.xlane.f32.xlu0 %v942_v26  ;;  %v11483_v40 = vld [vmem:[#allocation67_spill] sm:$0xff]  ;;  %v11484_v26 = vld [vmem:[#allocation78_spill] sm:$0xff] }
 0x47b   :  { %v891_v4 = vpop.permute.xlu1 %890 }
 0x47c   :  { %v951_v36 = vsel %vm271_vm1, %v891_v4, 0.0 }
 0x47d   :  { %952 = vadd.xlane.f32.xlu1 %v951_v36  ;;  %949 = vadd.xlane.f32.xlu0 %v948_v16 }
 0x47f   :  { %v895_v37 = vpop.permute.xlu1 %894 }
 0x480   :  { %v957_v2 = vsel %vm271_vm1, %v895_v37, 0.0 }
 0x481   :  { %958 = vadd.xlane.f32.xlu1 %v957_v2  ;;  %955 = vadd.xlane.f32.xlu0 %v954_v55 }
 0x492   :  { %978 = vrot.lane.b32.xlu1 %v6869_v49, %s6407_s2 }
 0x496   :  { %980 = vrot.lane.b32.xlu1 %v11478_v23, %s6407_s2 }
 0x497   :  { %976 = vrot.lane.b32.xlu0 %v11479_v38, %s6407_s2 }
 0x49a   :  { %982 = vrot.lane.b32.xlu1 %v11480_v17, %s6407_s2 }
 0x49b   :  { %984 = vrot.lane.b32.xlu0 %v11481_v62, %s6407_s2 }
 0x49e   :  { %986 = vrot.lane.b32.xlu1 %v11482_v46, %s6407_s2 }
 0x49f   :  { %988 = vrot.lane.b32.xlu0 %v6931_v61, %s6407_s2 }
 0x4a2   :  { %990 = vrot.lane.b32.xlu1 %v6935_v44, %s6407_s2 }
 0x4a3   :  { %992 = vrot.lane.b32.xlu0 %v6962_v43, %s6407_s2 }
 0x4a6   :  { %994 = vrot.lane.b32.xlu1 %v11483_v40, %s6407_s2 }
 0x4a7   :  { %996 = vrot.lane.b32.xlu0 %v6988_v1, %s6407_s2 }
 0x4aa   :  { %998 = vrot.lane.b32.xlu1 %v6992_v25, %s6407_s2 }
 0x4ab   :  { %1000 = vrot.lane.b32.xlu0 %v7016_v10, %s6407_s2 }
 0x4ae   :  { %1002 = vrot.lane.b32.xlu1 %v7020_v59, %s6407_s2 }
 0x4af   :  { %1004 = vrot.lane.b32.xlu0 %v11484_v26, %s6407_s2 }
 0x4b2   :  { %1006 = vrot.lane.b32.xlu1 %v7053_v41, %s6407_s2 }
 0x4ea   :  { %v7587_v4 = vpop.xlane.xlu0 %913  ;;  %v7591_v16 = vpop.xlane.xlu1 %916 }
 0x4ee   :  { %v7589_v36 = vpop.xlane.xlu0 %919 }
 0x4f2   :  { %v7593_v12 = vpop.xlane.xlu0 %922 }
 0x4f6   :  { %v7595_v37 = vpop.xlane.xlu1 %928  ;;  %v7597_v2 = vpop.xlane.xlu0 %925 }
 0x4f7   :  { %11485 = vst [vmem:[#allocation179_spill] sm:$0xff] %v7595_v37 }
 0x4fa   :  { %v7599_v55 = vpop.xlane.xlu1 %934  ;;  %v7601_v10 = vpop.xlane.xlu0 %931 }
 0x4fe   :  { %v7603_v26 = vpop.xlane.xlu1 %940  ;;  %v7605_v59 = vpop.xlane.xlu0 %937 }
 0x502   :  { %v7607_v41 = vpop.xlane.xlu1 %946  ;;  %v7609_v1 = vpop.xlane.xlu0 %943 }
 0x506   :  { %v7611_v25 = vpop.xlane.xlu1 %952  ;;  %v7613_v43 = vpop.xlane.xlu0 %949 }
 0x50a   :  { %v7615_v40 = vpop.xlane.xlu1 %958  ;;  %v7617_v61 = vpop.xlane.xlu0 %955 }
 0x50b   :  { %11486 = vst [vmem:[#allocation180_spill] sm:$0xff] %v7617_v61 }
 0x50e   :  { %v979_v44 = vpop.permute.xlu1 %978  ;;  %v977_v62 = vpop.permute.xlu0 %976 }
 0x50f   :  { %v1027_v46 = vsel %vm271_vm1, %v979_v44, 0.0  ;;  %v1024_v38 = vsel %vm271_vm1, %v977_v62, 0.0 }
 0x510   :  { %1028 = vadd.xlane.f32.xlu1 %v1027_v46  ;;  %1025 = vadd.xlane.f32.xlu0 %v1024_v38 }
 0x512   :  { %v981_v17 = vpop.permute.xlu1 %980  ;;  %v985_v23 = vpop.permute.xlu0 %984 }
 0x513   :  { %v1030_v49 = vsel %vm271_vm1, %v981_v17, 0.0  ;;  %v1036_v44 = vsel %vm271_vm1, %v985_v23, 0.0 }
 0x514   :  { %1031 = vadd.xlane.f32.xlu0 %v1030_v49 }
 0x516   :  { %v983_v52 = vpop.permute.xlu1 %982  ;;  %v989_v15 = vpop.permute.xlu0 %988 }
 0x517   :  { %v1033_v33 = vsel %vm271_vm1, %v983_v52, 0.0  ;;  %v1042_v46 = vsel %vm271_vm1, %v989_v15, 0.0 }
 0x518   :  { %1034 = vadd.xlane.f32.xlu0 %v1033_v33 }
 0x51a   :  { %v987_v45 = vpop.permute.xlu1 %986  ;;  %v993_v22 = vpop.permute.xlu0 %992 }
 0x51b   :  { %v1039_v0 = vsel %vm271_vm1, %v987_v45, 0.0  ;;  %v1048_v33 = vsel %vm271_vm1, %v993_v22, 0.0 }
 0x51c   :  { %1040 = vadd.xlane.f32.xlu1 %v1039_v0  ;;  %1037 = vadd.xlane.f32.xlu0 %v1036_v44 }
 0x51e   :  { %v991_v62 = vpop.permute.xlu1 %990  ;;  %v997_v17 = vpop.permute.xlu0 %996 }
 0x51f   :  { %v1045_v38 = vsel %vm271_vm1, %v991_v62, 0.0  ;;  %v1054_v23 = vsel %vm271_vm1, %v997_v17, 0.0  ;;  %v11488_v17 = vld [vmem:[#allocation56_spill] sm:$0xff] }
 0x520   :  { %1046 = vadd.xlane.f32.xlu1 %v1045_v38  ;;  %1043 = vadd.xlane.f32.xlu0 %v1042_v46 }
 0x522   :  { %v995_v49 = vpop.permute.xlu1 %994  ;;  %v1001_v45 = vpop.permute.xlu0 %1000 }
 0x523   :  { %v1051_v52 = vsel %vm271_vm1, %v995_v49, 0.0  ;;  %v1060_v62 = vsel %vm271_vm1, %v1001_v45, 0.0  ;;  %v11491_v45 = vld [vmem:[#allocation60_spill] sm:$0xff] }
 0x524   :  { %1052 = vadd.xlane.f32.xlu1 %v1051_v52  ;;  %1049 = vadd.xlane.f32.xlu0 %v1048_v33  ;;  %v11489_v52 = vld [vmem:[#allocation47_spill] sm:$0xff]  ;;  %v11490_v33 = vld [vmem:[#allocation50_spill] sm:$0xff] }
 0x526   :  { %v999_v6 = vpop.permute.xlu1 %998  ;;  %v1005_v38 = vpop.permute.xlu0 %1004 }
 0x527   :  { %v1057_v0 = vsel %vm271_vm1, %v999_v6, 0.0  ;;  %v1066_v49 = vsel %vm271_vm1, %v1005_v38, 0.0  ;;  %v11487_v6 = vld [vmem:[#allocation57_spill] sm:$0xff]  ;;  %v11497_v38 = vld [vmem:[#allocation72_spill] sm:$0xff] }
 0x528   :  { %1058 = vadd.xlane.f32.xlu1 %v1057_v0  ;;  %1055 = vadd.xlane.f32.xlu0 %v1054_v23  ;;  %v11492_v0 = vld [vmem:[#allocation61_spill] sm:$0xff]  ;;  %v11493_v23 = vld [vmem:[#allocation64_spill] sm:$0xff] }
 0x52a   :  { %v1003_v44 = vpop.permute.xlu1 %1002 }
 0x52b   :  { %v1063_v15 = vsel %vm271_vm1, %v1003_v44, 0.0  ;;  %v11494_v44 = vld [vmem:[#allocation65_spill] sm:$0xff] }
 0x52c   :  { %1064 = vadd.xlane.f32.xlu1 %v1063_v15  ;;  %1061 = vadd.xlane.f32.xlu0 %v1060_v62  ;;  %v11495_v15 = vld [vmem:[#allocation68_spill] sm:$0xff]  ;;  %v11496_v62 = vld [vmem:[#allocation69_spill] sm:$0xff] }
 0x52e   :  { %v1007_v46 = vpop.permute.xlu1 %1006 }
 0x52f   :  { %v1069_v22 = vsel %vm271_vm1, %v1007_v46, 0.0  ;;  %v11498_v46 = vld [vmem:[#allocation73_spill] sm:$0xff] }
 0x530   :  { %1070 = vadd.xlane.f32.xlu1 %v1069_v22  ;;  %1067 = vadd.xlane.f32.xlu0 %v1066_v49  ;;  %v11499_v22 = vld [vmem:[#allocation76_spill] sm:$0xff]  ;;  %v11500_v49 = vld [vmem:[#allocation77_spill] sm:$0xff] }
 0x541   :  { %1090 = vrot.lane.b32.xlu1 %v11487_v6, %s6407_s2  ;;  %v11501_v6 = vld [vmem:[#allocation79_spill] sm:$0xff] }
 0x545   :  { %1092 = vrot.lane.b32.xlu1 %v11488_v17, %s6407_s2  ;;  %v11502_v17 = vld [vmem:[#allocation81_spill] sm:$0xff] }
 0x546   :  { %1088 = vrot.lane.b32.xlu0 %v11489_v52, %s6407_s2 }
 0x549   :  { %1094 = vrot.lane.b32.xlu1 %v11490_v33, %s6407_s2 }
 0x54a   :  { %1096 = vrot.lane.b32.xlu0 %v11491_v45, %s6407_s2 }
 0x54d   :  { %1098 = vrot.lane.b32.xlu1 %v11492_v0, %s6407_s2 }
 0x54e   :  { %1100 = vrot.lane.b32.xlu0 %v11493_v23, %s6407_s2 }
 0x551   :  { %1102 = vrot.lane.b32.xlu1 %v11494_v44, %s6407_s2 }
 0x552   :  { %1104 = vrot.lane.b32.xlu0 %v11495_v15, %s6407_s2 }
 0x555   :  { %1106 = vrot.lane.b32.xlu1 %v11496_v62, %s6407_s2 }
 0x556   :  { %1108 = vrot.lane.b32.xlu0 %v11497_v38, %s6407_s2 }
 0x559   :  { %1110 = vrot.lane.b32.xlu1 %v11498_v46, %s6407_s2 }
 0x55a   :  { %1112 = vrot.lane.b32.xlu0 %v11499_v22, %s6407_s2 }
 0x55d   :  { %1114 = vrot.lane.b32.xlu1 %v11500_v49, %s6407_s2 }
 0x55e   :  { %1116 = vrot.lane.b32.xlu0 %v11501_v6, %s6407_s2 }
 0x561   :  { %1118 = vrot.lane.b32.xlu1 %v11502_v17, %s6407_s2 }
 0x599   :  { %v7667_v52 = vpop.xlane.xlu0 %1025  ;;  %v7671_v45 = vpop.xlane.xlu1 %1028 }
 0x59d   :  { %v7669_v33 = vpop.xlane.xlu0 %1031 }
 0x5a1   :  { %v7673_v0 = vpop.xlane.xlu0 %1034 }
 0x5a5   :  { %v7675_v23 = vpop.xlane.xlu1 %1040  ;;  %v7677_v44 = vpop.xlane.xlu0 %1037 }
 0x5a9   :  { %v7679_v15 = vpop.xlane.xlu1 %1046  ;;  %v7681_v62 = vpop.xlane.xlu0 %1043 }
 0x5ad   :  { %v7683_v38 = vpop.xlane.xlu1 %1052  ;;  %v7685_v46 = vpop.xlane.xlu0 %1049 }
 0x5b1   :  { %v7687_v22 = vpop.xlane.xlu1 %1058  ;;  %v7689_v49 = vpop.xlane.xlu0 %1055 }
 0x5b5   :  { %v7691_v6 = vpop.xlane.xlu1 %1064  ;;  %v7693_v17 = vpop.xlane.xlu0 %1061 }
 0x5b6   :  { %11503 = vst [vmem:[#allocation57_spill] sm:$0xff] %v7691_v6  ;;  %11504 = vst [vmem:[#allocation56_spill] sm:$0xff] %v7693_v17 }
 0x5b9   :  { %v7695_v32 = vpop.xlane.xlu1 %1070  ;;  %v7697_v30 = vpop.xlane.xlu0 %1067 }
 0x5ba   :  { %11505 = vst [vmem:[#allocation47_spill] sm:$0xff] %v7695_v32  ;;  %11506 = vst [vmem:[#allocation50_spill] sm:$0xff] %v7697_v30 }
 0x5bd   :  { %v1091_v11 = vpop.permute.xlu1 %1090  ;;  %v1089_v28 = vpop.permute.xlu0 %1088 }
 0x5be   :  { %v1139_v7 = vsel %vm271_vm1, %v1091_v11, 0.0  ;;  %v1136_v58 = vsel %vm271_vm1, %v1089_v28, 0.0 }
 0x5bf   :  { %1140 = vadd.xlane.f32.xlu1 %v1139_v7  ;;  %1137 = vadd.xlane.f32.xlu0 %v1136_v58 }
 0x5c1   :  { %v1093_v13 = vpop.permute.xlu1 %1092  ;;  %v1097_v34 = vpop.permute.xlu0 %1096 }
 0x5c2   :  { %v1142_v3 = vsel %vm271_vm1, %v1093_v13, 0.0  ;;  %v1148_v11 = vsel %vm271_vm1, %v1097_v34, 0.0 }
 0x5c3   :  { %1143 = vadd.xlane.f32.xlu0 %v1142_v3 }
 0x5c5   :  { %v1095_v9 = vpop.permute.xlu1 %1094  ;;  %v1101_v57 = vpop.permute.xlu0 %1100 }
 0x5c6   :  { %v1145_v63 = vsel %vm271_vm1, %v1095_v9, 0.0  ;;  %v1154_v28 = vsel %vm271_vm1, %v1101_v57, 0.0 }
 0x5c7   :  { %1146 = vadd.xlane.f32.xlu0 %v1145_v63 }
 0x5c9   :  { %v1099_v47 = vpop.permute.xlu1 %1098  ;;  %v1105_v53 = vpop.permute.xlu0 %1104 }
 0x5ca   :  { %v1151_v30 = vsel %vm271_vm1, %v1099_v47, 0.0  ;;  %v1160_v63 = vsel %vm271_vm1, %v1105_v53, 0.0 }
 0x5cb   :  { %1152 = vadd.xlane.f32.xlu1 %v1151_v30  ;;  %1149 = vadd.xlane.f32.xlu0 %v1148_v11 }
 0x5cd   :  { %v1103_v7 = vpop.permute.xlu1 %1102  ;;  %v1109_v13 = vpop.permute.xlu0 %1108 }
 0x5ce   :  { %v1157_v58 = vsel %vm271_vm1, %v1103_v7, 0.0  ;;  %v1166_v30 = vsel %vm271_vm1, %v1109_v13, 0.0  ;;  %v11508_v13 = vld [vmem:[#allocation5_spill] sm:$0xff] }
 0x5cf   :  { %1158 = vadd.xlane.f32.xlu1 %v1157_v58  ;;  %1155 = vadd.xlane.f32.xlu0 %v1154_v28 }
 0x5d1   :  { %v1107_v3 = vpop.permute.xlu1 %1106  ;;  %v1113_v47 = vpop.permute.xlu0 %1112 }
 0x5d2   :  { %v1163_v9 = vsel %vm271_vm1, %v1107_v3, 0.0  ;;  %v1172_v7 = vsel %vm271_vm1, %v1113_v47, 0.0  ;;  %v11511_v47 = vld [vmem:[#allocation11_spill] sm:$0xff] }
 0x5d3   :  { %1164 = vadd.xlane.f32.xlu1 %v1163_v9  ;;  %1161 = vadd.xlane.f32.xlu0 %v1160_v63  ;;  %v11509_v9 = vld [vmem:[#allocation3_spill] sm:$0xff]  ;;  %v11510_v63 = vld [vmem:[#allocation4_spill] sm:$0xff] }
 0x5d5   :  { %v1111_v20 = vpop.permute.xlu1 %1110  ;;  %v1117_v58 = vpop.permute.xlu0 %1116 }
 0x5d6   :  { %v1169_v34 = vsel %vm271_vm1, %v1111_v20, 0.0  ;;  %v1178_v3 = vsel %vm271_vm1, %v1117_v58, 0.0  ;;  %v11507_v20 = vld [vmem:[#allocation2_spill] sm:$0xff] }
 0x5d7   :  { %1170 = vadd.xlane.f32.xlu1 %v1169_v34  ;;  %1167 = vadd.xlane.f32.xlu0 %v1166_v30  ;;  %v11512_v34 = vld [vmem:[#allocation7_spill] sm:$0xff]  ;;  %v11513_v30 = vld [vmem:[#allocation13_spill] sm:$0xff]  ;;  %v11517_v58 = vld [vmem:[#allocation26_spill] sm:$0xff] }
 0x5d9   :  { %v1115_v11 = vpop.permute.xlu1 %1114 }
 0x5da   :  { %v1175_v57 = vsel %vm271_vm1, %v1115_v11, 0.0  ;;  %v11514_v11 = vld [vmem:[#allocation17_spill] sm:$0xff] }
 0x5db   :  { %1176 = vadd.xlane.f32.xlu1 %v1175_v57  ;;  %1173 = vadd.xlane.f32.xlu0 %v1172_v7  ;;  %v11515_v57 = vld [vmem:[#allocation20_spill] sm:$0xff]  ;;  %v11516_v7 = vld [vmem:[#allocation23_spill] sm:$0xff] }
 0x5dd   :  { %v1119_v28 = vpop.permute.xlu1 %1118 }
 0x5de   :  { %v1181_v53 = vsel %vm271_vm1, %v1119_v28, 0.0  ;;  %v11518_v28 = vld [vmem:[#allocation29_spill] sm:$0xff] }
 0x5df   :  { %1182 = vadd.xlane.f32.xlu1 %v1181_v53  ;;  %1179 = vadd.xlane.f32.xlu0 %v1178_v3  ;;  %v11519_v53 = vld [vmem:[#allocation32_spill] sm:$0xff]  ;;  %v11520_v3 = vld [vmem:[#allocation35_spill] sm:$0xff] }
 0x5f0   :  { %1186 = vrot.lane.b32.xlu1 %v11507_v20, %s6411_s6 }
 0x5f4   :  { %1188 = vrot.lane.b32.xlu1 %v11508_v13, %s6411_s6 }
 0x5f5   :  { %1184 = vrot.lane.b32.xlu0 %v11509_v9, %s6411_s6  ;;  %v11521_v9 = vld [vmem:[#allocation38_spill] sm:$0xff] }
 0x5f8   :  { %1190 = vrot.lane.b32.xlu1 %v11510_v63, %s6411_s6 }
 0x5f9   :  { %1192 = vrot.lane.b32.xlu0 %v11511_v47, %s6411_s6  ;;  %v11522_v47 = vld [vmem:[#allocation41_spill] sm:$0xff] }
 0x5fc   :  { %1194 = vrot.lane.b32.xlu1 %v11512_v34, %s6411_s6 }
 0x5fd   :  { %1196 = vrot.lane.b32.xlu0 %v11513_v30, %s6411_s6  ;;  %v2741_v30 = vmax.f32 %v7511_v29, %v7591_v16 }
 0x600   :  { %1198 = vrot.lane.b32.xlu1 %v11514_v11, %s6411_s6 }
 0x601   :  { %1200 = vrot.lane.b32.xlu0 %v11515_v57, %s6411_s6  ;;  %v2757_v57 = vmax.f32 %v2741_v30, %v7671_v45 }
 0x604   :  { %1202 = vrot.lane.b32.xlu1 %v11516_v7, %s6411_s6 }
 0x605   :  { %1204 = vrot.lane.b32.xlu0 %v11517_v58, %s6411_s6  ;;  %v2740_v58 = vmax.f32 %v7507_v56, %v7587_v4 }
 0x608   :  { %1206 = vrot.lane.b32.xlu1 %v11518_v28, %s6411_s6 }
 0x609   :  { %1208 = vrot.lane.b32.xlu0 %v11519_v53, %s6411_s6  ;;  %v2756_v53 = vmax.f32 %v2740_v58, %v7667_v52 }
 0x60c   :  { %1210 = vrot.lane.b32.xlu1 %v11520_v3, %s6411_s6  ;;  %v2742_v3 = vmax.f32 %v7509_v35, %v7589_v36 }
 0x60d   :  { %1212 = vrot.lane.b32.xlu0 %v11521_v9, %s6411_s6 }
 0x60e   :  { %v2758_v20 = vmax.f32 %v2742_v3, %v7669_v33 }
 0x610   :  { %1214 = vrot.lane.b32.xlu1 %v11522_v47, %s6411_s6 }
 0x648   :  { %v1141_v11 = vpop.xlane.xlu1 %1140  ;;  %v1138_v34 = vpop.xlane.xlu0 %1137 }
 0x649   :  { %v2773_v7 = vmax.f32 %v2757_v57, %v1141_v11  ;;  %v2772_v47 = vmax.f32 %v2756_v53, %v1138_v34  ;;  %v2743_v57 = vmax.f32 %v7513_v24, %v7593_v12 }
 0x64b   :  { %v2789_v9 = vsub.f32 %v7511_v29, %v2773_v7  ;;  %v2837_v63 = vsub.f32 %v7591_v16, %v2773_v7  ;;  %v2885_v30 = vsub.f32 %v7671_v45, %v2773_v7  ;;  %v2933_v42 = vsub.f32 %v1141_v11, %v2773_v7 }
 0x64c   :  { %v1144_v28 = vpop.xlane.xlu0 %1143  ;;  %v2788_v58 = vsub.f32 %v7507_v56, %v2772_v47  ;;  %v2745_v29 = vmax.f32 %v7515_v60, %v7595_v37  ;;  %v2836_v16 = vsub.f32 %v7587_v4, %v2772_v47  ;;  %v2744_v45 = vmax.f32 %v7517_v5, %v7597_v2 }
 0x64d   :  { %v2806_v31 = vmul.f32 1.442695, %v2789_v9  ;;  %v2774_v27 = vmax.f32 %v2758_v20, %v1144_v28  ;;  %v2854_v53 = vmul.f32 1.442695, %v2837_v63  ;;  %v2759_v11 = vmax.f32 %v2743_v57, %v7673_v0 }
 0x64e   :  { %v2902_v7 = vmul.f32 1.442695, %v2885_v30  ;;  %v2884_v9 = vsub.f32 %v7667_v52, %v2772_v47  ;;  %v2747_v56 = vmax.f32 %v7519_v48, %v7599_v55  ;;  %v2761_v20 = vmax.f32 %v2745_v29, %v7675_v23 }
 0x64f   :  { %v2950_v63 = vmul.f32 1.442695, %v2933_v42  ;;  %v2932_v3 = vsub.f32 %v1138_v34, %v2772_v47  ;;  %5895 = vpow2.f32 %v2806_v31  ;;  %v2804_v4 = vmul.f32 1.442695, %v2788_v58 }
 0x650   :  { %v7741_v13 = vpop.xlane.xlu0 %1146  ;;  %v2790_v37 = vsub.f32 %v7509_v35, %v2774_v27  ;;  %v2760_v14 = vmax.f32 %v2744_v45, %v7677_v44  ;;  %5897 = vpow2.f32 %v2854_v53  ;;  %v2852_v30 = vmul.f32 1.442695, %v2836_v16 }
 0x651   :  { %v7764_v6 = vmax.f32 %v2759_v11, %v7741_v13  ;;  %v2838_v52 = vsub.f32 %v7589_v36, %v2774_v27  ;;  %v2763_v42 = vmax.f32 %v2747_v56, %v7679_v15  ;;  %5899 = vpow2.f32 %v2902_v7 }
 0x652   :  { %v2900_v31 = vmul.f32 1.442695, %v2884_v9  ;;  %v2886_v47 = vsub.f32 %v7669_v33, %v2774_v27  ;;  %5901 = vpow2.f32 %v2950_v63  ;;  %v2948_v35 = vmul.f32 1.442695, %v2932_v3 }
 0x653   :  { %v2934_v34 = vsub.f32 %v1144_v28, %v2774_v27  ;;  %5903 = vpow2.f32 %v2804_v4  ;;  %v2808_v29 = vmul.f32 1.442695, %v2790_v37  ;;  %v2791_v36 = vsub.f32 %v7513_v24, %v7764_v6 }
 0x654   :  { %v7751_v32 = vpop.xlane.xlu1 %1152  ;;  %v7753_v17 = vpop.xlane.xlu0 %1149  ;;  %v2746_v16 = vmax.f32 %v7521_v19, %v7601_v10  ;;  %5905 = vpow2.f32 %v2852_v30  ;;  %v2856_v45 = vmul.f32 1.442695, %v2838_v52  ;;  %v2839_v33 = vsub.f32 %v7593_v12, %v7764_v6 }
 0x655   :  { %v7775_v58 = vmax.f32 %v2761_v20, %v7751_v32  ;;  %v7780_v53 = vmax.f32 %v2760_v14, %v7753_v17  ;;  %5907 = vpow2.f32 %v2900_v31  ;;  %v2904_v37 = vmul.f32 1.442695, %v2886_v47 }
 0x656   :  { %v2887_v24 = vsub.f32 %v7673_v0, %v7764_v6  ;;  %5909 = vpow2.f32 %v2948_v35  ;;  %v2952_v11 = vmul.f32 1.442695, %v2934_v34  ;;  %v2762_v9 = vmax.f32 %v2746_v16, %v7681_v62 }
 0x657   :  { %v2793_v7 = vsub.f32 %v7515_v60, %v7775_v58  ;;  %5911 = vpow2.f32 %v2808_v29  ;;  %v2810_v12 = vmul.f32 1.442695, %v2791_v36  ;;  %v2792_v56 = vsub.f32 %v7517_v5, %v7780_v53 }
 0x658   :  { %v7768_v57 = vpop.xlane.xlu1 %1158  ;;  %v7770_v61 = vpop.xlane.xlu0 %1155  ;;  %v2749_v20 = vmax.f32 %v7523_v51, %v7603_v26  ;;  %5913 = vpow2.f32 %v2856_v45  ;;  %v2858_v63 = vmul.f32 1.442695, %v2839_v33  ;;  %v2840_v0 = vsub.f32 %v7597_v2, %v7780_v53 }
 0x659   :  { %v2779_v14 = vmax.f32 %v2763_v42, %v7768_v57  ;;  %5915 = vpow2.f32 %v2904_v37  ;;  %v2906_v60 = vmul.f32 1.442695, %v2887_v24  ;;  %v2778_v52 = vmax.f32 %v2762_v9, %v7770_v61 }
 0x65a   :  { %5917 = vpow2.f32 %v2952_v11  ;;  %v2814_v5 = vmul.f32 1.442695, %v2793_v7  ;;  %v2765_v31 = vmax.f32 %v2749_v20, %v7683_v38  ;;  %v2812_v47 = vmul.f32 1.442695, %v2792_v56 }
 0x65b   :  { %v2795_v30 = vsub.f32 %v7519_v48, %v2779_v14  ;;  %v2843_v42 = vsub.f32 %v7599_v55, %v2779_v14  ;;  %5919 = vpow2.f32 %v2810_v12  ;;  %v2891_v2 = vsub.f32 %v7679_v15, %v2779_v14 }
 0x65c   :  { %v7786_v27 = vpop.xlane.xlu1 %1164  ;;  %v7788_v28 = vpop.xlane.xlu0 %1161  ;;  %v2748_v34 = vmax.f32 %v7525_v18, %v7605_v59  ;;  %5921 = vpow2.f32 %v2858_v63  ;;  %v2860_v29 = vmul.f32 1.442695, %v2840_v0  ;;  %v2939_v48 = vsub.f32 %v7768_v57, %v2779_v14 }
 0x65d   :  { %v7811_v35 = vpop.eup %5895  ;;  %5923 = vpow2.f32 %v2906_v60  ;;  %v2818_v45 = vmul.f32 1.442695, %v2795_v30  ;;  %v2794_v33 = vsub.f32 %v7521_v19, %v2778_v52  ;;  %v2781_v15 = vmax.f32 %v2765_v31, %v7786_v27 }
 0x65e   :  { %11523 = vst [vmem:[#allocation60_spill] sm:$0xff] %v7811_v35  ;;  %v7820_v55 = vpop.eup %5897  ;;  %5925 = vpow2.f32 %v2814_v5  ;;  %v2866_v24 = vmul.f32 1.442695, %v2843_v42  ;;  %v2842_v11 = vsub.f32 %v7601_v10, %v2778_v52  ;;  %v2764_v57 = vmax.f32 %v2748_v34, %v7685_v46 }
 0x65f   :  { %11524 = vst [vmem:[#allocation61_spill] sm:$0xff] %v7820_v55  ;;  %v7824_v37 = vpop.eup %5899  ;;  %5927 = vpow2.f32 %v2812_v47  ;;  %v2914_v14 = vmul.f32 1.442695, %v2891_v2  ;;  %v2890_v9 = vsub.f32 %v7681_v62, %v2778_v52  ;;  %v2751_v19 = vmax.f32 %v7527_v54, %v7607_v41 }
 0x660   :  { %v7802_v3 = vpop.xlane.xlu1 %1170  ;;  %v7804_v4 = vpop.xlane.xlu0 %1167  ;;  %11525 = vst [vmem:[#allocation64_spill] sm:$0xff] %v7824_v37  ;;  %5929 = vpow2.f32 %v2860_v29  ;;  %v2962_v56 = vmul.f32 1.442695, %v2939_v48  ;;  %v2938_v20 = vsub.f32 %v7770_v61, %v2778_v52  ;;  %v2816_v0 = vmul.f32 1.442695, %v2794_v33 }
 0x661   :  { %v7827_v7 = vpop.eup %5901  ;;  %5931 = vpow2.f32 %v2818_v45  ;;  %v2797_v60 = vsub.f32 %v7523_v51, %v2781_v15  ;;  %v2780_v30 = vmax.f32 %v2764_v57, %v7788_v28  ;;  %v2750_v42 = vmax.f32 %v7529_v50, %v7609_v1 }
 0x662   :  { %11526 = vst [vmem:[#allocation65_spill] sm:$0xff] %v7827_v7  ;;  %v7831_v12 = vpop.eup %5903  ;;  %5933 = vpow2.f32 %v2866_v24  ;;  %v2864_v31 = vmul.f32 1.442695, %v2842_v11  ;;  %v2845_v61 = vsub.f32 %v7603_v26, %v2781_v15  ;;  %v2767_v47 = vmax.f32 %v2751_v19, %v7687_v22  ;;  %v11541_v7 = vld [vmem:[#allocation57_spill] sm:$0xff] }
 0x663   :  { %11527 = vst [vmem:[#allocation68_spill] sm:$0xff] %v7831_v12  ;;  %v7838_v10 = vpop.eup %5905  ;;  %5935 = vpow2.f32 %v2914_v14  ;;  %v2912_v2 = vmul.f32 1.442695, %v2890_v9  ;;  %v2893_v51 = vsub.f32 %v7683_v38, %v2781_v15  ;;  %v2753_v29 = vmax.f32 %v7531_v8, %v7611_v25 }
 0x664   :  { %v7816_v36 = vpop.xlane.xlu1 %1176  ;;  %v7818_v16 = vpop.xlane.xlu0 %1173  ;;  %11528 = vst [vmem:[#allocation69_spill] sm:$0xff] %v7838_v10  ;;  %5937 = vpow2.f32 %v2962_v56  ;;  %v2960_v48 = vmul.f32 1.442695, %v2938_v20  ;;  %v2941_v45 = vsub.f32 %v7786_v27, %v2781_v15  ;;  %v2822_v24 = vmul.f32 1.442695, %v2797_v60 }
 0x665   :  { %v7844_v5 = vpop.eup %5907  ;;  %5939 = vpow2.f32 %v2816_v0  ;;  %v2796_v11 = vsub.f32 %v7525_v18, %v2780_v30  ;;  %v2783_v57 = vmax.f32 %v2767_v47, %v7802_v3  ;;  %v2766_v14 = vmax.f32 %v2750_v42, %v7689_v49 }
 0x666   :  { %11529 = vst [vmem:[#allocation72_spill] sm:$0xff] %v7844_v5  ;;  %v7849_v52 = vpop.eup %5909  ;;  %5941 = vpow2.f32 %v2864_v31  ;;  %v2870_v9 = vmul.f32 1.442695, %v2845_v61  ;;  %v2844_v19 = vsub.f32 %v7605_v59, %v2780_v30  ;;  %v2752_v27 = vmax.f32 %v7533_v21, %v7613_v43 }
 0x667   :  { %11530 = vst [vmem:[#allocation73_spill] sm:$0xff] %v7849_v52  ;;  %v7853_v34 = vpop.eup %5911  ;;  %5943 = vpow2.f32 %v2912_v2  ;;  %v2918_v15 = vmul.f32 1.442695, %v2893_v51  ;;  %v2892_v20 = vsub.f32 %v7685_v46, %v2780_v30  ;;  %v2966_v60 = vmul.f32 1.442695, %v2941_v45 }
 0x668   :  { %v7836_v63 = vpop.xlane.xlu1 %1182  ;;  %v7842_v62 = vpop.xlane.xlu0 %1179  ;;  %11531 = vst [vmem:[#allocation76_spill] sm:$0xff] %v7853_v34  ;;  %v2940_v42 = vsub.f32 %v7788_v28, %v2780_v30  ;;  %v2782_v31 = vmax.f32 %v2766_v14, %v7804_v4  ;;  %v2755_v47 = vmax.f32 %v7535_v39, %v7615_v40  ;;  %v2820_v2 = vmul.f32 1.442695, %v2796_v11 }
 0x669   :  { %v7860_v26 = vpop.eup %5913  ;;  %5945 = vpow2.f32 %v2960_v48  ;;  %v2799_v46 = vsub.f32 %v7527_v54, %v2783_v57  ;;  %v11539_v48 = vld [vmem:[#allocation178_spill] sm:$0xff]  ;;  %v2868_v28 = vmul.f32 1.442695, %v2844_v19  ;;  %v2847_v30 = vsub.f32 %v7607_v41, %v2783_v57 }
 0x66a   :  { %11532 = vst [vmem:[#allocation77_spill] sm:$0xff] %v7860_v26  ;;  %v7864_v38 = vpop.eup %5915  ;;  %5947 = vpow2.f32 %v2822_v24  ;;  %v2916_v52 = vmul.f32 1.442695, %v2892_v20  ;;  %v2895_v24 = vsub.f32 %v7687_v22, %v2783_v57  ;;  %v2964_v54 = vmul.f32 1.442695, %v2940_v42  ;;  %v11545_v20 = vld [vmem:[#allocation56_spill] sm:$0xff] }
 0x66b   :  { %11533 = vst [vmem:[#allocation79_spill] sm:$0xff] %v7864_v38  ;;  %v7868_v56 = vpop.eup %5917  ;;  %5949 = vpow2.f32 %v2870_v9  ;;  %v2769_v38 = vmax.f32 %v2753_v29, %v11541_v7  ;;  %v2826_v41 = vmul.f32 1.442695, %v2799_v46  ;;  %v11546_v42 = vld [vmem:[#allocation47_spill] sm:$0xff]  ;;  %v2894_v46 = vsub.f32 %v7689_v49, %v2782_v31 }
 0x66c   :  { %v7858_v33 = vpop.permute.xlu1 %1186  ;;  %11534 = vst [vmem:[#allocation81_spill] sm:$0xff] %v7868_v56  ;;  %v1185_v18 = vpop.permute.xlu0 %1184  ;;  %v11538_v56 = vld [vmem:[#allocation180_spill] sm:$0xff] }
 0x66d   :  { %v7873_v0 = vpop.eup %5919  ;;  %v2754_v45 = vmax.f32 %v11539_v48, %v11538_v56  ;;  %5951 = vpow2.f32 %v2918_v15  ;;  %v7901_v29 = vmax.f32 %v2769_v38, %v7816_v36 }
 0x66e   :  { %11535 = vst [vmem:[#allocation181_spill] sm:$0xff] %v7873_v0  ;;  %v7879_v59 = vpop.eup %5921  ;;  %5953 = vpow2.f32 %v2966_v60  ;;  %v2768_v60 = vmax.f32 %v2752_v27, %v11545_v20 }
 0x66f   :  { %11536 = vst [vmem:[#allocation182_spill] sm:$0xff] %v7879_v59  ;;  %v7884_v51 = vpop.eup %5923  ;;  %v2798_v59 = vsub.f32 %v7529_v50, %v2782_v31  ;;  %5955 = vpow2.f32 %v2820_v2  ;;  %v2874_v50 = vmul.f32 1.442695, %v2847_v30  ;;  %v2922_v2 = vmul.f32 1.442695, %v2895_v24  ;;  %v11553_v30 = vld [vmem:[#allocation9_spill] sm:$0xff] }
 0x670   :  { %v7877_v61 = vpop.permute.xlu1 %1188  ;;  %11537 = vst [vmem:[#allocation183_spill] sm:$0xff] %v7884_v51  ;;  %v7889_v14 = vpop.eup %5925  ;;  %v2943_v51 = vsub.f32 %v7802_v3, %v2783_v57  ;;  %v2771_v3 = vmax.f32 %v2755_v47, %v11546_v42  ;;  %5957 = vpow2.f32 %v2868_v28  ;;  %v7916_v0 = vmax.f32 %v2768_v60, %v7818_v16 }
 0x671   :  { %11540 = vst [vmem:[#allocation180_spill] sm:$0xff] %v7889_v14  ;;  %v7893_v11 = vpop.eup %5927  ;;  %v2846_v14 = vsub.f32 %v7609_v1, %v2782_v31  ;;  %v7903_v15 = vpop.permute.xlu0 %1192  ;;  %5959 = vpow2.f32 %v2916_v52  ;;  %v2942_v1 = vsub.f32 %v7804_v4, %v2782_v31  ;;  %v2801_v52 = vsub.f32 %v7531_v8, %v7901_v29 }
 0x672   :  { %11542 = vst [vmem:[#allocation178_spill] sm:$0xff] %v7893_v11  ;;  %v7897_v19 = vpop.eup %5929  ;;  %5961 = vpow2.f32 %v2964_v54  ;;  %v2824_v11 = vmul.f32 1.442695, %v2798_v59  ;;  %v7923_v49 = vmax.f32 %v2771_v3, %v7836_v63  ;;  %v2849_v31 = vsub.f32 %v7611_v25, %v7901_v29  ;;  %v11551_v59 = vld [vmem:[#allocation6_spill] sm:$0xff] }
 0x673   :  { %11543 = vst [vmem:[#allocation57_spill] sm:$0xff] %v7897_v19  ;;  %v7905_v22 = vpop.eup %5931  ;;  %v2970_v19 = vmul.f32 1.442695, %v2943_v51  ;;  %5963 = vpow2.f32 %v2826_v41  ;;  %v2872_v28 = vmul.f32 1.442695, %v2846_v14  ;;  %v7931_v51 = vmul.f32 %v7858_v33, %v11551_v59  ;;  %v11557_v33 = vld [vmem:[#allocation15_spill] sm:$0xff] }
 0x674   :  { %v1191_v9 = vpop.permute.xlu1 %1190  ;;  %11544 = vst [vmem:[#allocation184_spill] sm:$0xff] %v7905_v22  ;;  %v7909_v57 = vpop.eup %5933  ;;  %5965 = vpow2.f32 %v2874_v50  ;;  %v7934_v24 = vmul.f32 %v1185_v18, %v11553_v30  ;;  %v2920_v8 = vmul.f32 1.442695, %v2894_v46  ;;  %v2968_v54 = vmul.f32 1.442695, %v2942_v1  ;;  %v11559_v50 = vld [vmem:[#allocation12_spill] sm:$0xff] }
 0x675   :  { %11547 = vst [vmem:[#allocation56_spill] sm:$0xff] %v7909_v57  ;;  %v7913_v38 = vpop.eup %5935  ;;  %11552 = vst [vmem:[#allocation6_spill] sm:$0xff] %v7931_v51  ;;  %5967 = vpow2.f32 %v2922_v2  ;;  %v2897_v41 = vsub.f32 %v11541_v7, %v7901_v29  ;;  %v1197_v60 = vpop.permute.xlu0 %1196  ;;  %v2800_v25 = vsub.f32 %v7533_v21, %v7916_v0  ;;  %1266 = vrot.lane.b32.xlu1 %v7931_v51, %s6408_s29  ;;  %v2830_v21 = vmul.f32 1.442695, %v2801_v52 }
 0x676   :  { %11548 = vst [vmem:[#allocation47_spill] sm:$0xff] %v7913_v38  ;;  %v7918_v47 = vpop.eup %5937  ;;  %11554 = vst [vmem:[#allocation187_spill] sm:$0xff] %v7934_v24  ;;  %5969 = vpow2.f32 %v2970_v19  ;;  %1264 = vrot.lane.b32.xlu0 %v7934_v24, %s6408_s29  ;;  %v7950_v18 = vmul.f32 %v7877_v61, %v11557_v33  ;;  %v7953_v2 = vmul.f32 %v1191_v9, %v11559_v50  ;;  %v11562_v19 = vld [vmem:[#allocation50_spill] sm:$0xff]  ;;  %v2878_v24 = vmul.f32 1.442695, %v2849_v31 }
 0x677   :  { %11549 = vst [vmem:[#allocation185_spill] sm:$0xff] %v7918_v47  ;;  %v7925_v4 = vpop.eup %5939  ;;  %v2770_v1 = vmax.f32 %v2754_v45, %v11562_v19  ;;  %5971 = vpow2.f32 %v2824_v11  ;;  %v2848_v51 = vsub.f32 %v7613_v43, %v7916_v0  ;;  %v2945_v61 = vsub.f32 %v7816_v36, %v7901_v29  ;;  %v11566_v36 = vld [vmem:[#allocation21_spill] sm:$0xff] }
 0x678   :  { %v1195_v27 = vpop.permute.xlu1 %1194  ;;  %11550 = vst [vmem:[#allocation186_spill] sm:$0xff] %v7925_v4  ;;  %v7936_v14 = vpop.eup %5941  ;;  %11558 = vst [vmem:[#allocation190_spill] sm:$0xff] %v7950_v18  ;;  %5973 = vpow2.f32 %v2872_v28  ;;  %v2926_v9 = vmul.f32 1.442695, %v2897_v41  ;;  %v2896_v50 = vsub.f32 %v11545_v20, %v7916_v0  ;;  %v2828_v43 = vmul.f32 1.442695, %v2800_v25 }
 0x679   :  { %11555 = vst [vmem:[#allocation188_spill] sm:$0xff] %v7936_v14  ;;  %v7940_v3 = vpop.eup %5943  ;;  %11560 = vst [vmem:[#allocation191_spill] sm:$0xff] %v7953_v2  ;;  %5975 = vpow2.f32 %v2920_v8  ;;  %v7969_v45 = vmax.f32 %v2770_v1, %v7842_v62  ;;  %v2803_v28 = vsub.f32 %v7535_v39, %v7923_v49  ;;  %1270 = vrot.lane.b32.xlu1 %v7953_v2, %s6408_s29  ;;  %v2876_v31 = vmul.f32 1.442695, %v2848_v51  ;;  %v11570_v1 = vld [vmem:[#allocation18_spill] sm:$0xff] }
 0x67a   :  { %11556 = vst [vmem:[#allocation189_spill] sm:$0xff] %v7940_v3  ;;  %v7955_v46 = vpop.eup %5945  ;;  %5977 = vpow2.f32 %v2968_v54  ;;  %1268 = vrot.lane.b32.xlu0 %v7950_v18, %s6408_s29  ;;  %v7980_v29 = vmul.f32 %v1195_v27, %v11566_v36  ;;  %v2851_v8 = vsub.f32 %v7615_v40, %v7923_v49  ;;  %v1201_v54 = vpop.permute.xlu0 %1200  ;;  %v2974_v39 = vmul.f32 1.442695, %v2945_v61 }
 0x67b   :  { %11561 = vst [vmem:[#allocation192_spill] sm:$0xff] %v7955_v46  ;;  %v7960_v30 = vpop.eup %5947  ;;  %5979 = vpow2.f32 %v2830_v21  ;;  %v2944_v25 = vsub.f32 %v7818_v16, %v7916_v0  ;;  %v7992_v27 = vmul.f32 %v7903_v15, %v11570_v1  ;;  %v2924_v21 = vmul.f32 1.442695, %v2896_v50  ;;  %v11574_v16 = vld [vmem:[#allocation27_spill] sm:$0xff] }
 0x67c   :  { %v1199_v7 = vpop.permute.xlu1 %1198  ;;  %11563 = vst [vmem:[#allocation50_spill] sm:$0xff] %v7960_v30  ;;  %v7964_v33 = vpop.eup %5949  ;;  %11567 = vst [vmem:[#allocation195_spill] sm:$0xff] %v7980_v29  ;;  %5981 = vpow2.f32 %v2878_v24  ;;  %v2802_v51 = vsub.f32 %v11539_v48, %v7969_v45  ;;  %v2834_v18 = vmul.f32 1.442695, %v2803_v28  ;;  %v2850_v24 = vsub.f32 %v11538_v56, %v7969_v45 }
 0x67d   :  { %11564 = vst [vmem:[#allocation193_spill] sm:$0xff] %v7964_v33  ;;  %v7971_v11 = vpop.eup %5951  ;;  %11571 = vst [vmem:[#allocation198_spill] sm:$0xff] %v7992_v27  ;;  %5983 = vpow2.f32 %v2926_v9  ;;  %1274 = vrot.lane.b32.xlu1 %v7980_v29, %s6408_s29  ;;  %v8007_v0 = vmul.f32 %v1199_v7, %v11574_v16  ;;  %v2935_v48 = vsub.f32 %v7741_v13, %v7764_v6  ;;  %v2882_v50 = vmul.f32 1.442695, %v2851_v8  ;;  %v11578_v7 = vld [vmem:[#allocation24_spill] sm:$0xff] }
 0x67e   :  { %11565 = vst [vmem:[#allocation194_spill] sm:$0xff] %v7971_v11  ;;  %v7982_v52 = vpop.eup %5953  ;;  %5985 = vpow2.f32 %v2828_v43  ;;  %1272 = vrot.lane.b32.xlu0 %v7992_v27, %s6408_s29  ;;  %v2899_v61 = vsub.f32 %v11546_v42, %v7923_v49  ;;  %v2972_v43 = vmul.f32 1.442695, %v2944_v25  ;;  %v2898_v28 = vsub.f32 %v11562_v19, %v7969_v45 }
 0x67f   :  { %11568 = vst [vmem:[#allocation196_spill] sm:$0xff] %v7982_v52  ;;  %v7986_v41 = vpop.eup %5955  ;;  %11575 = vst [vmem:[#allocation201_spill] sm:$0xff] %v8007_v0  ;;  %5987 = vpow2.f32 %v2876_v31  ;;  %v8020_v27 = vmul.f32 %v1197_v60, %v11578_v7  ;;  %v2947_v6 = vsub.f32 %v7836_v63, %v7923_v49  ;;  %v2832_v13 = vmul.f32 1.442695, %v2802_v51  ;;  %v1205_v31 = vpop.permute.xlu0 %1204  ;;  %v11582_v60 = vld [vmem:[#allocation33_spill] sm:$0xff]  ;;  %v11585_v49 = vld [vmem:[#allocation179_spill] sm:$0xff] }
 0x680   :  { %v1203_v20 = vpop.permute.xlu1 %1202  ;;  %11569 = vst [vmem:[#allocation197_spill] sm:$0xff] %v7986_v41  ;;  %v7994_v2 = vpop.eup %5957  ;;  %5989 = vpow2.f32 %v2974_v39  ;;  %v2880_v8 = vmul.f32 1.442695, %v2850_v24  ;;  %v2946_v39 = vsub.f32 %v7842_v62, %v7969_v45  ;;  %v2954_v63 = vmul.f32 1.442695, %v2935_v48  ;;  %v11587_v24 = vld [vmem:[#allocation30_spill] sm:$0xff] }
 0x681   :  { %11572 = vst [vmem:[#allocation199_spill] sm:$0xff] %v7994_v2  ;;  %v7998_v40 = vpop.eup %5959  ;;  %11579 = vst [vmem:[#allocation204_spill] sm:$0xff] %v8020_v27  ;;  %5991 = vpow2.f32 %v2924_v21  ;;  %1278 = vrot.lane.b32.xlu1 %v8007_v0, %s6408_s29  ;;  %v8035_v19 = vmul.f32 %v1203_v20, %v11582_v60  ;;  %v2841_v21 = vsub.f32 %v11585_v49, %v7775_v58  ;;  %v2928_v45 = vmul.f32 1.442695, %v2898_v28 }
 0x682   :  { %11573 = vst [vmem:[#allocation200_spill] sm:$0xff] %v7998_v40  ;;  %v8009_v15 = vpop.eup %5961  ;;  %5993 = vpow2.f32 %v2834_v18  ;;  %1276 = vrot.lane.b32.xlu0 %v8020_v27, %s6408_s29  ;;  %v2930_v18 = vmul.f32 1.442695, %v2899_v61  ;;  %v2889_v62 = vsub.f32 %v7675_v23, %v7775_v58  ;;  %v8046_v27 = vmul.f32 %v1201_v54, %v11587_v24  ;;  %v11591_v54 = vld [vmem:[#allocation39_spill] sm:$0xff] }
 0x683   :  { %11576 = vst [vmem:[#allocation202_spill] sm:$0xff] %v8009_v15  ;;  %v8015_v9 = vpop.eup %5963  ;;  %11583 = vst [vmem:[#allocation207_spill] sm:$0xff] %v8035_v19  ;;  %5995 = vpow2.f32 %v2882_v50  ;;  %v2888_v48 = vsub.f32 %v7677_v44, %v7780_v53  ;;  %v2978_v0 = vmul.f32 1.442695, %v2947_v6  ;;  %v2987_v50 = vadd.f32 %v7909_v57, %v7905_v22 }
 0x684   :  { %v1207_v56 = vpop.permute.xlu1 %1206  ;;  %11577 = vst [vmem:[#allocation203_spill] sm:$0xff] %v8015_v9  ;;  %v8022_v29 = vpop.eup %5965  ;;  %5997 = vpow2.f32 %v2972_v43  ;;  %11588 = vst [vmem:[#allocation209_spill] sm:$0xff] %v8046_v27  ;;  %v2976_v23 = vmul.f32 1.442695, %v2946_v39  ;;  %v2986_v44 = vadd.f32 %v7936_v14, %v7925_v4  ;;  %v2862_v6 = vmul.f32 1.442695, %v2841_v21 }
 0x685   :  { %11580 = vst [vmem:[#allocation205_spill] sm:$0xff] %v8022_v29  ;;  %v8026_v42 = vpop.eup %5967  ;;  %5999 = vpow2.f32 %v2832_v13  ;;  %1282 = vrot.lane.b32.xlu1 %v8035_v19, %s6408_s29  ;;  %v8061_v43 = vmul.f32 %v1207_v56, %v11591_v54  ;;  %v2936_v13 = vsub.f32 %v7753_v17, %v7780_v53  ;;  %v3003_v39 = vadd.f32 %v7913_v38, %v2987_v50  ;;  %v11595_v56 = vld [vmem:[#allocation36_spill] sm:$0xff] }
 0x686   :  { %11581 = vst [vmem:[#allocation206_spill] sm:$0xff] %v8026_v42  ;;  %v8037_v25 = vpop.eup %5969  ;;  %6001 = vpow2.f32 %v2880_v8  ;;  %1280 = vrot.lane.b32.xlu0 %v8046_v27, %s6408_s29  ;;  %v1209_v8 = vpop.permute.xlu0 %1208  ;;  %v2937_v57 = vsub.f32 %v7751_v32, %v7775_v58  ;;  %v8075_v27 = vmul.f32 %v1205_v31, %v11595_v56  ;;  %v3002_v4 = vadd.f32 %v7940_v3, %v2986_v44  ;;  %v11600_v32 = vld [vmem:[#allocation49_spill] sm:$0xff] }
 0x687   :  { %11584 = vst [vmem:[#allocation208_spill] sm:$0xff] %v8037_v25  ;;  %v8041_v51 = vpop.eup %5971  ;;  %11592 = vst [vmem:[#allocation212_spill] sm:$0xff] %v8061_v43  ;;  %6003 = vpow2.f32 %v2930_v18  ;;  %v2910_v21 = vmul.f32 1.442695, %v2889_v62  ;;  %v8081_v17 = vadd.f32 %v7918_v47, %v3003_v39  ;;  %v2988_v53 = vadd.f32 %v7994_v2, %v7986_v41  ;;  %v11605_v39 = vld [vmem:[#allocation42_spill] sm:$0xff] }
 0x688   :  { %11586 = vst [vmem:[#allocation179_spill] sm:$0xff] %v8041_v51  ;;  %v8048_v20 = vpop.eup %5973  ;;  %v1211_v49 = vpop.permute.xlu1 %1210  ;;  %6005 = vpow2.f32 %v2928_v45  ;;  %11596 = vst [vmem:[#allocation215_spill] sm:$0xff] %v8075_v27  ;;  %v2908_v50 = vmul.f32 1.442695, %v2888_v48  ;;  %v2956_v62 = vmul.f32 1.442695, %v2936_v13  ;;  %v8105_v41 = vmul.f32 %v1209_v8, %v11605_v39 }
 0x689   :  { %11589 = vst [vmem:[#allocation210_spill] sm:$0xff] %v8048_v20  ;;  %v8054_v61 = vpop.eup %5975  ;;  %6007 = vpow2.f32 %v2978_v0  ;;  %11598 = vst [vmem:[#allocation217_spill] sm:$0xff] %v8081_v17  ;;  %1286 = vrot.lane.b32.xlu1 %v8061_v43, %s6408_s29  ;;  %v8092_v58 = vmul.f32 %v1211_v49, %v11600_v32  ;;  %v8095_v0 = vadd.f32 %v7955_v46, %v3002_v4 }
 0x68a   :  { %11590 = vst [vmem:[#allocation211_spill] sm:$0xff] %v8054_v61  ;;  %v8065_v28 = vpop.eup %5977  ;;  %6009 = vpow2.f32 %v2976_v23  ;;  %1284 = vrot.lane.b32.xlu0 %v8075_v27, %s6408_s29  ;;  %v3004_v48 = vadd.f32 %v7998_v40, %v2988_v53  ;;  %v2989_v23 = vadd.f32 %v7964_v33, %v7960_v30  ;;  %11606 = vst [vmem:[#allocation223_spill] sm:$0xff] %v8105_v41  ;;  %v1213_v13 = vpop.permute.xlu0 %1212 }
 0x68b   :  { %11593 = vst [vmem:[#allocation213_spill] sm:$0xff] %v8065_v28  ;;  %v8070_v22 = vpop.eup %5979  ;;  %11601 = vst [vmem:[#allocation219_spill] sm:$0xff] %v8092_v58  ;;  %6011 = vpow2.f32 %v2862_v6  ;;  %v2990_v4 = vadd.f32 %v8048_v20, %v8041_v51  ;;  %v2958_v6 = vmul.f32 1.442695, %v2937_v57 }
 0x68c   :  { %11594 = vst [vmem:[#allocation214_spill] sm:$0xff] %v8070_v22  ;;  %v8078_v14 = vpop.eup %5981  ;;  %11602 = vst [vmem:[#allocation220_spill] sm:$0xff] %v8095_v0  ;;  %v1215_v45 = vpop.permute.xlu1 %1214  ;;  %6013 = vpow2.f32 %v2954_v63  ;;  %v8112_v0 = vadd.f32 %v8009_v15, %v3004_v48  ;;  %v3005_v53 = vadd.f32 %v7971_v11, %v2989_v23  ;;  %v11610_v63 = vld [vmem:[#allocation52_spill] sm:$0xff] }
 0x68d   :  { %11597 = vst [vmem:[#allocation216_spill] sm:$0xff] %v8078_v14  ;;  %v8085_v18 = vpop.eup %5983  ;;  %6015 = vpow2.f32 %v2910_v21  ;;  %1290 = vrot.lane.b32.xlu1 %v8092_v58, %s6408_s29  ;;  %v8122_v8 = vmul.f32 %v1215_v45, %v11610_v63  ;;  %v3006_v57 = vadd.f32 %v8054_v61, %v2990_v4  ;;  %v2991_v21 = vadd.f32 %v8022_v29, %v8015_v9 }
 0x68e   :  { %11599 = vst [vmem:[#allocation218_spill] sm:$0xff] %v8085_v18  ;;  %v8097_v31 = vpop.eup %5985  ;;  %11608 = vst [vmem:[#allocation225_spill] sm:$0xff] %v8112_v0  ;;  %6017 = vpow2.f32 %v2908_v50  ;;  %1288 = vrot.lane.b32.xlu0 %v8105_v41, %s6408_s29  ;;  %v8130_v23 = vadd.f32 %v7982_v52, %v3005_v53  ;;  %v11615_v0 = vld [vmem:[#allocation44_spill] sm:$0xff]  ;;  %v2993_v9 = vadd.f32 %v8078_v14, %v8070_v22 }
 0x68f   :  { %11603 = vst [vmem:[#allocation221_spill] sm:$0xff] %v8097_v31  ;;  %v8102_v44 = vpop.eup %5987  ;;  %11611 = vst [vmem:[#allocation227_spill] sm:$0xff] %v8122_v8  ;;  %6019 = vpow2.f32 %v2956_v62  ;;  %v8137_v17 = vmul.f32 %v1213_v13, %v11615_v0  ;;  %v8140_v45 = vadd.f32 %v8065_v28, %v3006_v57  ;;  %v3007_v4 = vadd.f32 %v8026_v42, %v2991_v21 }
 0x690   :  { %11604 = vst [vmem:[#allocation222_spill] sm:$0xff] %v8102_v44  ;;  %v8109_v49 = vpop.eup %5989  ;;  %11613 = vst [vmem:[#allocation229_spill] sm:$0xff] %v8130_v23  ;;  %v2992_v50 = vadd.f32 %v8102_v44, %v8097_v31  ;;  %6021 = vpow2.f32 %v2958_v6  ;;  %v3009_v57 = vadd.f32 %v8085_v18, %v2993_v9 }
 0x691   :  { %11607 = vst [vmem:[#allocation224_spill] sm:$0xff] %v8109_v49  ;;  %v8115_v30 = vpop.eup %5991  ;;  %11616 = vst [vmem:[#allocation231_spill] sm:$0xff] %v8137_v17  ;;  %1294 = vrot.lane.b32.xlu1 %v8122_v8, %s6408_s29  ;;  %v8155_v13 = vadd.f32 %v8037_v25, %v3007_v4 }
 0x692   :  { %11609 = vst [vmem:[#allocation226_spill] sm:$0xff] %v8115_v30  ;;  %v8127_v48 = vpop.eup %5993  ;;  %11617 = vst [vmem:[#allocation232_spill] sm:$0xff] %v8140_v45  ;;  %v3008_v53 = vadd.f32 %v8115_v30, %v2992_v50  ;;  %1292 = vrot.lane.b32.xlu0 %v8137_v17, %s6408_s29  ;;  %v8168_v31 = vadd.f32 %v8109_v49, %v3009_v57  ;;  %v2981_v57 = vadd.f32 %v7820_v55, %v7811_v35  ;;  %v11635_v35 = vld [vmem:[#allocation73_spill] sm:$0xff]  ;;  %v11637_v49 = vld [vmem:[#allocation79_spill] sm:$0xff] }
 0x693   :  { %11612 = vst [vmem:[#allocation228_spill] sm:$0xff] %v8127_v48  ;;  %v8134_v51 = vpop.eup %5995  ;;  %11620 = vst [vmem:[#allocation235_spill] sm:$0xff] %v8155_v13 }
 0x694   :  { %11614 = vst [vmem:[#allocation230_spill] sm:$0xff] %v8134_v51  ;;  %v8145_v62 = vpop.eup %5997  ;;  %v2995_v6 = vadd.f32 %v8134_v51, %v8127_v48  ;;  %11624 = vst [vmem:[#allocation239_spill] sm:$0xff] %v8168_v31  ;;  %v11646_v51 = vld [vmem:[#allocation81_spill] sm:$0xff] }
 0x695   :  { %11618 = vst [vmem:[#allocation233_spill] sm:$0xff] %v8145_v62  ;;  %v8148_v23 = vpop.eup %5999  ;;  %v8161_v22 = vadd.f32 %v8145_v62, %v3008_v53 }
 0x696   :  { %11619 = vst [vmem:[#allocation234_spill] sm:$0xff] %v8148_v23  ;;  %v8158_v21 = vpop.eup %6001 }
 0x697   :  { %11621 = vst [vmem:[#allocation236_spill] sm:$0xff] %v8158_v21  ;;  %11622 = vst [vmem:[#allocation237_spill] sm:$0xff] %v8161_v22  ;;  %v8165_v50 = vpop.eup %6003  ;;  %v2994_v45 = vadd.f32 %v8158_v21, %v8148_v23  ;;  %v2980_v22 = vadd.f32 %v7838_v10, %v7831_v12  ;;  %v2997_v12 = vadd.f32 %v7824_v37, %v2981_v57  ;;  %v11632_v10 = vld [vmem:[#allocation181_spill] sm:$0xff]  ;;  %v11644_v37 = vld [vmem:[#allocation180_spill] sm:$0xff] }
 0x698   :  { %11623 = vst [vmem:[#allocation238_spill] sm:$0xff] %v8165_v50  ;;  %v8172_v4 = vpop.eup %6005  ;;  %v3011_v9 = vadd.f32 %v8165_v50, %v2995_v6 }
 0x699   :  { %11625 = vst [vmem:[#allocation240_spill] sm:$0xff] %v8172_v4  ;;  %v8175_v13 = vpop.eup %6007  ;;  %v3010_v53 = vadd.f32 %v8172_v4, %v2994_v45  ;;  %v2996_v6 = vadd.f32 %v7844_v5, %v2980_v22  ;;  %v2982_v45 = vadd.f32 %v7860_v26, %v7853_v34  ;;  %v11641_v34 = vld [vmem:[#allocation65_spill] sm:$0xff]  ;;  %v11643_v4 = vld [vmem:[#allocation183_spill] sm:$0xff] }
 0x69a   :  { %11626 = vst [vmem:[#allocation241_spill] sm:$0xff] %v8175_v13  ;;  %v8180_v48 = vpop.eup %6009  ;;  %v8183_v62 = vadd.f32 %v8175_v13, %v3011_v9  ;;  %v11633_v9 = vld [vmem:[#allocation182_spill] sm:$0xff]  ;;  %v8211_v26 = vadd.f32 %v11641_v34, %v2997_v12 }
 0x69b   :  { %11627 = vst [vmem:[#allocation242_spill] sm:$0xff] %v8180_v48  ;;  %v8187_v23 = vpop.eup %6011  ;;  %v8190_v31 = vadd.f32 %v8180_v48, %v3010_v53  ;;  %v8203_v55 = vadd.f32 %v11635_v35, %v2996_v6  ;;  %v2998_v53 = vadd.f32 %v11637_v49, %v2982_v45  ;;  %v11639_v48 = vld [vmem:[#allocation57_spill] sm:$0xff] }
 0x69c   :  { %11628 = vst [vmem:[#allocation243_spill] sm:$0xff] %v8183_v62  ;;  %11629 = vst [vmem:[#allocation244_spill] sm:$0xff] %v8187_v23  ;;  %v8195_v50 = vpop.eup %6013  ;;  %v2983_v62 = vadd.f32 %v11633_v9, %v11632_v10  ;;  %v2985_v10 = vadd.f32 %v8187_v23, %v11644_v37 }
 0x69d   :  { %11630 = vst [vmem:[#allocation245_spill] sm:$0xff] %v8190_v31  ;;  %11631 = vst [vmem:[#allocation246_spill] sm:$0xff] %v8195_v50  ;;  %v8200_v13 = vpop.eup %6015  ;;  %v11638_v31 = vld [vmem:[#allocation178_spill] sm:$0xff]  ;;  %v8219_v6 = vadd.f32 %v11646_v51, %v2998_v53 }
 0x69e   :  { %11634 = vst [vmem:[#allocation247_spill] sm:$0xff] %v8200_v13  ;;  %11636 = vst [vmem:[#allocation248_spill] sm:$0xff] %v8203_v55  ;;  %v2984_v22 = vadd.f32 %v11639_v48, %v11638_v31  ;;  %v8208_v5 = vpop.eup %6017  ;;  %v2999_v57 = vadd.f32 %v11643_v4, %v2983_v62  ;;  %v3001_v31 = vadd.f32 %v8200_v13, %v2985_v10  ;;  %v11666_v13 = vld [vmem:[#allocation177_spill] sm:$0xff] }
 0x69f   :  { %11640 = vst [vmem:[#allocation249_spill] sm:$0xff] %v8208_v5  ;;  %11642 = vst [vmem:[#allocation250_spill] sm:$0xff] %v8211_v26  ;;  %v8216_v9 = vpop.eup %6019 }
 0x6a0   :  { %11645 = vst [vmem:[#allocation251_spill] sm:$0xff] %v8216_v9  ;;  %11647 = vst [vmem:[#allocation252_spill] sm:$0xff] %v8219_v6  ;;  %v3000_v45 = vadd.f32 %v8208_v5, %v2984_v22  ;;  %v8223_v55 = vadd.f32 %v8195_v50, %v2999_v57  ;;  %v8226_v48 = vpop.eup %6021  ;;  %v11667_v5 = vld [vmem:[#allocation175_spill] sm:$0xff] }
 0x6a1   :  { %11649 = vst [vmem:[#allocation254_spill] sm:$0xff] %v8226_v48  ;;  %v8232_v62 = vadd.f32 %v8226_v48, %v3001_v31 }
 0x6a2   :  { %11648 = vst [vmem:[#allocation253_spill] sm:$0xff] %v8223_v55  ;;  %v8229_v12 = vadd.f32 %v8216_v9, %v3000_v45  ;;  %v11665_v9 = vld [vmem:[#allocation173_spill] sm:$0xff] }
 0x6a3   :  { %11651 = vst [vmem:[#allocation256_spill] sm:$0xff] %v8232_v62 }
 0x6a4   :  { %11650 = vst [vmem:[#allocation255_spill] sm:$0xff] %v8229_v12 }
 0x6e7   :  { %v1267_v37 = vpop.permute.xlu1 %1266 }
 0x6e8   :  { %v1265_v26 = vpop.permute.xlu0 %1264  ;;  %v1315_v53 = vsel %vm271_vm1, %v1267_v37, 0.0 }
 0x6e9   :  { %v1312_v6 = vsel %vm271_vm1, %v1265_v26, 0.0  ;;  %1316 = vadd.xlane.f32.xlu1 %v1315_v53 }
 0x6ea   :  { %1313 = vadd.xlane.f32.xlu0 %v1312_v6 }
 0x6eb   :  { %v1271_v57 = vpop.permute.xlu1 %1270 }
 0x6ec   :  { %v1269_v22 = vpop.permute.xlu0 %1268  ;;  %v1321_v55 = vsel %vm271_vm1, %v1271_v57, 0.0 }
 0x6ed   :  { %v1318_v10 = vsel %vm271_vm1, %v1269_v22, 0.0 }
 0x6ee   :  { %1319 = vadd.xlane.f32.xlu0 %v1318_v10 }
 0x6ef   :  { %v1275_v12 = vpop.permute.xlu1 %1274 }
 0x6f0   :  { %v1273_v45 = vpop.permute.xlu0 %1272  ;;  %v1327_v31 = vsel %vm271_vm1, %v1275_v12, 0.0 }
 0x6f1   :  { %1328 = vadd.xlane.f32.xlu1 %v1327_v31  ;;  %v1324_v37 = vsel %vm271_vm1, %v1273_v45, 0.0 }
 0x6f2   :  { %1322 = vadd.xlane.f32.xlu0 %v1321_v55 }
 0x6f3   :  { %v1279_v48 = vpop.permute.xlu1 %1278 }
 0x6f4   :  { %v1277_v62 = vpop.permute.xlu0 %1276  ;;  %v1333_v26 = vsel %vm271_vm1, %v1279_v48, 0.0 }
 0x6f5   :  { %1334 = vadd.xlane.f32.xlu1 %v1333_v26  ;;  %v1330_v22 = vsel %vm271_vm1, %v1277_v62, 0.0 }
 0x6f6   :  { %1325 = vadd.xlane.f32.xlu0 %v1324_v37 }
 0x6f7   :  { %v1283_v53 = vpop.permute.xlu1 %1282 }
 0x6f8   :  { %v1281_v6 = vpop.permute.xlu0 %1280  ;;  %v1339_v57 = vsel %vm271_vm1, %v1283_v53, 0.0 }
 0x6f9   :  { %1340 = vadd.xlane.f32.xlu1 %v1339_v57  ;;  %v1336_v55 = vsel %vm271_vm1, %v1281_v6, 0.0 }
 0x6fa   :  { %1331 = vadd.xlane.f32.xlu0 %v1330_v22 }
 0x6fb   :  { %v1287_v12 = vpop.permute.xlu1 %1286 }
 0x6fc   :  { %v1285_v10 = vpop.permute.xlu0 %1284  ;;  %v1345_v31 = vsel %vm271_vm1, %v1287_v12, 0.0  ;;  %v11652_v12 = vld [vmem:[#allocation145_spill] sm:$0xff] }
 0x6fd   :  { %1346 = vadd.xlane.f32.xlu1 %v1345_v31  ;;  %v1342_v37 = vsel %vm271_vm1, %v1285_v10, 0.0  ;;  %v11653_v10 = vld [vmem:[#allocation149_spill] sm:$0xff]  ;;  %v11655_v31 = vld [vmem:[#allocation139_spill] sm:$0xff] }
 0x6fe   :  { %1337 = vadd.xlane.f32.xlu0 %v1336_v55  ;;  %v11654_v55 = vld [vmem:[#allocation155_spill] sm:$0xff] }
 0x6ff   :  { %v1291_v48 = vpop.permute.xlu1 %1290 }
 0x700   :  { %v1289_v45 = vpop.permute.xlu0 %1288  ;;  %v1351_v26 = vsel %vm271_vm1, %v1291_v48, 0.0  ;;  %v11657_v48 = vld [vmem:[#allocation154_spill] sm:$0xff] }
 0x701   :  { %1352 = vadd.xlane.f32.xlu1 %v1351_v26  ;;  %v1348_v53 = vsel %vm271_vm1, %v1289_v45, 0.0  ;;  %v11656_v45 = vld [vmem:[#allocation160_spill] sm:$0xff]  ;;  %v11659_v26 = vld [vmem:[#allocation159_spill] sm:$0xff] }
 0x702   :  { %1343 = vadd.xlane.f32.xlu0 %v1342_v37  ;;  %v11658_v37 = vld [vmem:[#allocation166_spill] sm:$0xff] }
 0x703   :  { %v1295_v62 = vpop.permute.xlu1 %1294 }
 0x704   :  { %v1357_v22 = vsel %vm271_vm1, %v1295_v62, 0.0  ;;  %v1293_v57 = vpop.permute.xlu0 %1292  ;;  %v11660_v62 = vld [vmem:[#allocation171_spill] sm:$0xff] }
 0x705   :  { %1358 = vadd.xlane.f32.xlu1 %v1357_v22  ;;  %v1354_v6 = vsel %vm271_vm1, %v1293_v57, 0.0  ;;  %v11662_v22 = vld [vmem:[#allocation174_spill] sm:$0xff] }
 0x706   :  { %1349 = vadd.xlane.f32.xlu0 %v1348_v53  ;;  %v11661_v53 = vld [vmem:[#allocation165_spill] sm:$0xff]  ;;  %v11663_v57 = vld [vmem:[#allocation170_spill] sm:$0xff] }
 0x70a   :  { %1355 = vadd.xlane.f32.xlu0 %v1354_v6  ;;  %v11664_v6 = vld [vmem:[#allocation176_spill] sm:$0xff] }
 0x716   :  { %1362 = vrot.lane.b32.xlu1 %v11652_v12, %s6408_s29 }
 0x71a   :  { %1364 = vrot.lane.b32.xlu1 %v11653_v10, %s6408_s29 }
 0x71e   :  { %1366 = vrot.lane.b32.xlu1 %v11654_v55, %s6408_s29 }
 0x720   :  { %1360 = vrot.lane.b32.xlu0 %v11655_v31, %s6408_s29 }
 0x722   :  { %1370 = vrot.lane.b32.xlu1 %v11656_v45, %s6408_s29 }
 0x724   :  { %1368 = vrot.lane.b32.xlu0 %v11657_v48, %s6408_s29 }
 0x726   :  { %1374 = vrot.lane.b32.xlu1 %v11658_v37, %s6408_s29 }
 0x728   :  { %1372 = vrot.lane.b32.xlu0 %v11659_v26, %s6408_s29 }
 0x72a   :  { %1378 = vrot.lane.b32.xlu1 %v11660_v62, %s6408_s29 }
 0x72c   :  { %1376 = vrot.lane.b32.xlu0 %v11661_v53, %s6408_s29 }
 0x72e   :  { %1382 = vrot.lane.b32.xlu1 %v11662_v22, %s6408_s29 }
 0x730   :  { %1380 = vrot.lane.b32.xlu0 %v11663_v57, %s6408_s29 }
 0x732   :  { %1386 = vrot.lane.b32.xlu1 %v11664_v6, %s6408_s29 }
 0x734   :  { %1384 = vrot.lane.b32.xlu0 %v11665_v9, %s6408_s29 }
 0x736   :  { %1390 = vrot.lane.b32.xlu1 %v11666_v13, %s6408_s29 }
 0x738   :  { %1388 = vrot.lane.b32.xlu0 %v11667_v5, %s6408_s29 }
 0x772   :  { %v8284_v50 = vpop.xlane.xlu1 %1316 }
 0x773   :  { %v8282_v23 = vpop.xlane.xlu0 %1313 }
 0x777   :  { %v8286_v51 = vpop.xlane.xlu0 %1319 }
 0x77a   :  { %v8290_v49 = vpop.xlane.xlu1 %1328 }
 0x77b   :  { %v8288_v4 = vpop.xlane.xlu0 %1322 }
 0x77e   :  { %v8294_v35 = vpop.xlane.xlu1 %1334 }
 0x77f   :  { %v8292_v34 = vpop.xlane.xlu0 %1325 }
 0x782   :  { %v8298_v21 = vpop.xlane.xlu1 %1340 }
 0x783   :  { %v8296_v18 = vpop.xlane.xlu0 %1331 }
 0x786   :  { %v8302_v30 = vpop.xlane.xlu1 %1346 }
 0x787   :  { %v8300_v25 = vpop.xlane.xlu0 %1337 }
 0x78a   :  { %v8306_v14 = vpop.xlane.xlu1 %1352 }
 0x78b   :  { %v8304_v28 = vpop.xlane.xlu0 %1343 }
 0x78e   :  { %v8310_v44 = vpop.xlane.xlu1 %1358 }
 0x78f   :  { %v8308_v42 = vpop.xlane.xlu0 %1349 }
 0x792   :  { %v1363_v61 = vpop.permute.xlu1 %1362 }
 0x793   :  { %v8312_v52 = vpop.xlane.xlu0 %1355  ;;  %v1411_v15 = vsel %vm271_vm1, %v1363_v61, 0.0 }
 0x794   :  { %11668 = vst [vmem:[#allocation257_spill] sm:$0xff] %v8312_v52  ;;  %1412 = vadd.xlane.f32.xlu1 %v1411_v15 }
 0x796   :  { %v1365_v11 = vpop.permute.xlu1 %1364 }
 0x797   :  { %v1361_v29 = vpop.permute.xlu0 %1360  ;;  %v1414_v47 = vsel %vm271_vm1, %v1365_v11, 0.0 }
 0x798   :  { %v1408_v20 = vsel %vm271_vm1, %v1361_v29, 0.0 }
 0x799   :  { %1409 = vadd.xlane.f32.xlu0 %v1408_v20 }
 0x79a   :  { %v1367_v46 = vpop.permute.xlu1 %1366 }
 0x79b   :  { %v1369_v40 = vpop.permute.xlu0 %1368  ;;  %v1417_v33 = vsel %vm271_vm1, %v1367_v46, 0.0 }
 0x79c   :  { %v1420_v5 = vsel %vm271_vm1, %v1369_v40, 0.0 }
 0x79d   :  { %1415 = vadd.xlane.f32.xlu0 %v1414_v47 }
 0x79e   :  { %v1371_v2 = vpop.permute.xlu1 %1370 }
 0x79f   :  { %v1373_v38 = vpop.permute.xlu0 %1372  ;;  %v1423_v3 = vsel %vm271_vm1, %v1371_v2, 0.0 }
 0x7a0   :  { %1424 = vadd.xlane.f32.xlu1 %v1423_v3  ;;  %v1426_v20 = vsel %vm271_vm1, %v1373_v38, 0.0 }
 0x7a1   :  { %1418 = vadd.xlane.f32.xlu0 %v1417_v33 }
 0x7a2   :  { %v1375_v15 = vpop.permute.xlu1 %1374 }
 0x7a3   :  { %v1377_v61 = vpop.permute.xlu0 %1376  ;;  %v1429_v29 = vsel %vm271_vm1, %v1375_v15, 0.0 }
 0x7a4   :  { %1430 = vadd.xlane.f32.xlu1 %v1429_v29  ;;  %v1432_v33 = vsel %vm271_vm1, %v1377_v61, 0.0  ;;  %v11669_v61 = vld [vmem:[#allocation8_spill] sm:$0xff] }
 0x7a5   :  { %1421 = vadd.xlane.f32.xlu0 %v1420_v5 }
 0x7a6   :  { %v1379_v11 = vpop.permute.xlu1 %1378 }
 0x7a7   :  { %v1435_v47 = vsel %vm271_vm1, %v1379_v11, 0.0  ;;  %v1381_v46 = vpop.permute.xlu0 %1380 }
 0x7a8   :  { %1436 = vadd.xlane.f32.xlu1 %v1435_v47  ;;  %v1438_v5 = vsel %vm271_vm1, %v1381_v46, 0.0  ;;  %v11670_v47 = vld [vmem:[#allocation16_spill] sm:$0xff]  ;;  %v11671_v46 = vld [vmem:[#allocation14_spill] sm:$0xff] }
 0x7a9   :  { %1427 = vadd.xlane.f32.xlu0 %v1426_v20 }
 0x7aa   :  { %v1383_v13 = vpop.permute.xlu1 %1382 }
 0x7ab   :  { %v1441_v3 = vsel %vm271_vm1, %v1383_v13, 0.0  ;;  %v1385_v2 = vpop.permute.xlu0 %1384 }
 0x7ac   :  { %1442 = vadd.xlane.f32.xlu1 %v1441_v3  ;;  %v1444_v29 = vsel %vm271_vm1, %v1385_v2, 0.0  ;;  %v11673_v3 = vld [vmem:[#allocation22_spill] sm:$0xff]  ;;  %v11674_v2 = vld [vmem:[#allocation19_spill] sm:$0xff] }
 0x7ad   :  { %1433 = vadd.xlane.f32.xlu0 %v1432_v33  ;;  %v11672_v33 = vld [vmem:[#allocation10_spill] sm:$0xff] }
 0x7ae   :  { %v1387_v40 = vpop.permute.xlu1 %1386 }
 0x7af   :  { %v1447_v15 = vsel %vm271_vm1, %v1387_v40, 0.0  ;;  %v1389_v20 = vpop.permute.xlu0 %1388  ;;  %v11675_v40 = vld [vmem:[#allocation28_spill] sm:$0xff] }
 0x7b0   :  { %1448 = vadd.xlane.f32.xlu1 %v1447_v15  ;;  %v1450_v13 = vsel %vm271_vm1, %v1389_v20, 0.0  ;;  %v11677_v15 = vld [vmem:[#allocation34_spill] sm:$0xff]  ;;  %v11681_v20 = vld [vmem:[#allocation51_spill] sm:$0xff] }
 0x7b1   :  { %1439 = vadd.xlane.f32.xlu0 %v1438_v5  ;;  %v11676_v5 = vld [vmem:[#allocation25_spill] sm:$0xff] }
 0x7b2   :  { %v1391_v38 = vpop.permute.xlu1 %1390 }
 0x7b3   :  { %v1453_v11 = vsel %vm271_vm1, %v1391_v38, 0.0  ;;  %v11678_v38 = vld [vmem:[#allocation31_spill] sm:$0xff] }
 0x7b4   :  { %1454 = vadd.xlane.f32.xlu1 %v1453_v11  ;;  %v11680_v11 = vld [vmem:[#allocation37_spill] sm:$0xff] }
 0x7b5   :  { %1445 = vadd.xlane.f32.xlu0 %v1444_v29  ;;  %v11679_v29 = vld [vmem:[#allocation40_spill] sm:$0xff] }
 0x7b9   :  { %1451 = vadd.xlane.f32.xlu0 %v1450_v13  ;;  %v11682_v13 = vld [vmem:[#allocation43_spill] sm:$0xff] }
 0x7c5   :  { %1458 = vrot.lane.b32.xlu1 %v11669_v61, %s6408_s29 }
 0x7c9   :  { %1460 = vrot.lane.b32.xlu1 %v11670_v47, %s6408_s29 }
 0x7cd   :  { %1462 = vrot.lane.b32.xlu1 %v11671_v46, %s6408_s29 }
 0x7cf   :  { %1456 = vrot.lane.b32.xlu0 %v11672_v33, %s6408_s29 }
 0x7d1   :  { %1466 = vrot.lane.b32.xlu1 %v11673_v3, %s6408_s29 }
 0x7d3   :  { %1464 = vrot.lane.b32.xlu0 %v11674_v2, %s6408_s29 }
 0x7d5   :  { %1470 = vrot.lane.b32.xlu1 %v11675_v40, %s6408_s29 }
 0x7d7   :  { %1468 = vrot.lane.b32.xlu0 %v11676_v5, %s6408_s29  ;;  %v11683_v5 = vld [vmem:[#allocation53_spill] sm:$0xff] }
 0x7d9   :  { %1474 = vrot.lane.b32.xlu1 %v11677_v15, %s6408_s29  ;;  %v11684_v15 = vld [vmem:[#allocation45_spill] sm:$0xff] }
 0x7db   :  { %1472 = vrot.lane.b32.xlu0 %v11678_v38, %s6408_s29 }
 0x7dd   :  { %1478 = vrot.lane.b32.xlu1 %v11679_v29, %s6408_s29 }
 0x7df   :  { %1476 = vrot.lane.b32.xlu0 %v11680_v11, %s6408_s29 }
 0x7e1   :  { %1482 = vrot.lane.b32.xlu1 %v11681_v20, %s6408_s29 }
 0x7e3   :  { %1480 = vrot.lane.b32.xlu0 %v11682_v13, %s6408_s29 }
 0x7e5   :  { %1486 = vrot.lane.b32.xlu1 %v11683_v5, %s6408_s29 }
 0x7e7   :  { %1484 = vrot.lane.b32.xlu0 %v11684_v15, %s6408_s29 }
 0x81d   :  { %v8364_v38 = vpop.xlane.xlu1 %1412 }
 0x822   :  { %v8362_v40 = vpop.xlane.xlu0 %1409 }
 0x826   :  { %v8366_v29 = vpop.xlane.xlu0 %1415 }
 0x829   :  { %v8370_v11 = vpop.xlane.xlu1 %1424 }
 0x82a   :  { %v8368_v2 = vpop.xlane.xlu0 %1418 }
 0x82d   :  { %v8374_v3 = vpop.xlane.xlu1 %1430 }
 0x82e   :  { %v8372_v20 = vpop.xlane.xlu0 %1421 }
 0x831   :  { %v8378_v5 = vpop.xlane.xlu1 %1436 }
 0x832   :  { %v8376_v13 = vpop.xlane.xlu0 %1427 }
 0x835   :  { %v8382_v15 = vpop.xlane.xlu1 %1442 }
 0x836   :  { %v8380_v33 = vpop.xlane.xlu0 %1433 }
 0x839   :  { %v8386_v47 = vpop.xlane.xlu1 %1448 }
 0x83a   :  { %v8384_v46 = vpop.xlane.xlu0 %1439 }
 0x83d   :  { %v8390_v9 = vpop.xlane.xlu1 %1454 }
 0x83e   :  { %v8388_v61 = vpop.xlane.xlu0 %1445 }
 0x841   :  { %v1459_v57 = vpop.permute.xlu1 %1458 }
 0x842   :  { %v8392_v6 = vpop.xlane.xlu0 %1451  ;;  %v1507_v22 = vsel %vm271_vm1, %v1459_v57, 0.0 }
 0x843   :  { %11685 = vst [vmem:[#allocation258_spill] sm:$0xff] %v8392_v6  ;;  %1508 = vadd.xlane.f32.xlu1 %v1507_v22 }
 0x845   :  { %v1461_v62 = vpop.permute.xlu1 %1460 }
 0x846   :  { %v1457_v53 = vpop.permute.xlu0 %1456  ;;  %v1510_v37 = vsel %vm271_vm1, %v1461_v62, 0.0 }
 0x847   :  { %v1504_v26 = vsel %vm271_vm1, %v1457_v53, 0.0 }
 0x848   :  { %1505 = vadd.xlane.f32.xlu0 %v1504_v26 }
 0x849   :  { %v1463_v45 = vpop.permute.xlu1 %1462 }
 0x84a   :  { %v1465_v48 = vpop.permute.xlu0 %1464  ;;  %v1513_v31 = vsel %vm271_vm1, %v1463_v45, 0.0 }
 0x84b   :  { %v1516_v17 = vsel %vm271_vm1, %v1465_v48, 0.0 }
 0x84c   :  { %1511 = vadd.xlane.f32.xlu0 %v1510_v37 }
 0x84d   :  { %v1467_v10 = vpop.permute.xlu1 %1466 }
 0x84e   :  { %v1469_v55 = vpop.permute.xlu0 %1468  ;;  %v1519_v12 = vsel %vm271_vm1, %v1467_v10, 0.0 }
 0x84f   :  { %1520 = vadd.xlane.f32.xlu1 %v1519_v12  ;;  %v1522_v62 = vsel %vm271_vm1, %v1469_v55, 0.0 }
 0x850   :  { %1514 = vadd.xlane.f32.xlu0 %v1513_v31 }
 0x851   :  { %v1471_v22 = vpop.permute.xlu1 %1470 }
 0x852   :  { %v1473_v57 = vpop.permute.xlu0 %1472  ;;  %v1525_v53 = vsel %vm271_vm1, %v1471_v22, 0.0 }
 0x853   :  { %1526 = vadd.xlane.f32.xlu1 %v1525_v53  ;;  %v1528_v10 = vsel %vm271_vm1, %v1473_v57, 0.0  ;;  %v11686_v57 = vld [vmem:[#allocation55_spill] sm:$0xff] }
 0x854   :  { %1517 = vadd.xlane.f32.xlu0 %v1516_v17 }
 0x855   :  { %v1475_v26 = vpop.permute.xlu1 %1474 }
 0x856   :  { %v1531_v37 = vsel %vm271_vm1, %v1475_v26, 0.0  ;;  %v1477_v45 = vpop.permute.xlu0 %1476 }
 0x857   :  { %1532 = vadd.xlane.f32.xlu1 %v1531_v37  ;;  %v1534_v17 = vsel %vm271_vm1, %v1477_v45, 0.0  ;;  %v11687_v37 = vld [vmem:[#allocation54_spill] sm:$0xff]  ;;  %v11688_v45 = vld [vmem:[#allocation48_spill] sm:$0xff] }
 0x858   :  { %1523 = vadd.xlane.f32.xlu0 %v1522_v62 }
 0x859   :  { %v1479_v8 = vpop.permute.xlu1 %1478 }
 0x85a   :  { %v1537_v12 = vsel %vm271_vm1, %v1479_v8, 0.0  ;;  %v1481_v31 = vpop.permute.xlu0 %1480 }
 0x85b   :  { %1538 = vadd.xlane.f32.xlu1 %v1537_v12  ;;  %v1540_v53 = vsel %vm271_vm1, %v1481_v31, 0.0  ;;  %v11690_v12 = vld [vmem:[#allocation59_spill] sm:$0xff]  ;;  %v11691_v31 = vld [vmem:[#allocation58_spill] sm:$0xff] }
 0x85c   :  { %1529 = vadd.xlane.f32.xlu0 %v1528_v10  ;;  %v11689_v10 = vld [vmem:[#allocation46_spill] sm:$0xff] }
 0x85d   :  { %v1483_v48 = vpop.permute.xlu1 %1482 }
 0x85e   :  { %v1543_v22 = vsel %vm271_vm1, %v1483_v48, 0.0  ;;  %v1485_v62 = vpop.permute.xlu0 %1484  ;;  %v11692_v48 = vld [vmem:[#allocation63_spill] sm:$0xff] }
 0x85f   :  { %1544 = vadd.xlane.f32.xlu1 %v1543_v22  ;;  %v1546_v8 = vsel %vm271_vm1, %v1485_v62, 0.0  ;;  %v11694_v22 = vld [vmem:[#allocation67_spill] sm:$0xff] }
 0x860   :  { %1535 = vadd.xlane.f32.xlu0 %v1534_v17  ;;  %v11693_v17 = vld [vmem:[#allocation62_spill] sm:$0xff]  ;;  %v11698_v62 = vld [vmem:[#allocation75_spill] sm:$0xff] }
 0x861   :  { %v1487_v55 = vpop.permute.xlu1 %1486 }
 0x862   :  { %v1549_v26 = vsel %vm271_vm1, %v1487_v55, 0.0  ;;  %v11695_v55 = vld [vmem:[#allocation66_spill] sm:$0xff] }
 0x863   :  { %1550 = vadd.xlane.f32.xlu1 %v1549_v26  ;;  %v11697_v26 = vld [vmem:[#allocation70_spill] sm:$0xff] }
 0x864   :  { %1541 = vadd.xlane.f32.xlu0 %v1540_v53  ;;  %v11696_v53 = vld [vmem:[#allocation71_spill] sm:$0xff] }
 0x868   :  { %1547 = vadd.xlane.f32.xlu0 %v1546_v8  ;;  %v11699_v8 = vld [vmem:[#allocation74_spill] sm:$0xff] }
 0x874   :  { %1554 = vrot.lane.b32.xlu1 %v11686_v57, %s6408_s29  ;;  %v11700_v57 = vld [vmem:[#allocation80_spill] sm:$0xff] }
 0x878   :  { %1556 = vrot.lane.b32.xlu1 %v11687_v37, %s6408_s29  ;;  %v11701_v37 = vld [vmem:[#allocation78_spill] sm:$0xff] }
 0x87c   :  { %1558 = vrot.lane.b32.xlu1 %v11688_v45, %s6408_s29 }
 0x87e   :  { %1552 = vrot.lane.b32.xlu0 %v11689_v10, %s6408_s29 }
 0x880   :  { %1562 = vrot.lane.b32.xlu1 %v11690_v12, %s6408_s29 }
 0x882   :  { %1560 = vrot.lane.b32.xlu0 %v11691_v31, %s6408_s29 }
 0x884   :  { %1566 = vrot.lane.b32.xlu1 %v11692_v48, %s6408_s29 }
 0x886   :  { %1564 = vrot.lane.b32.xlu0 %v11693_v17, %s6408_s29 }
 0x888   :  { %1570 = vrot.lane.b32.xlu1 %v11694_v22, %s6408_s29 }
 0x88a   :  { %1568 = vrot.lane.b32.xlu0 %v11695_v55, %s6408_s29 }
 0x88c   :  { %1574 = vrot.lane.b32.xlu1 %v11696_v53, %s6408_s29 }
 0x88e   :  { %1572 = vrot.lane.b32.xlu0 %v11697_v26, %s6408_s29 }
 0x890   :  { %1578 = vrot.lane.b32.xlu1 %v11698_v62, %s6408_s29 }
 0x892   :  { %1576 = vrot.lane.b32.xlu0 %v11699_v8, %s6408_s29 }
 0x894   :  { %1582 = vrot.lane.b32.xlu1 %v11700_v57, %s6408_s29 }
 0x896   :  { %1580 = vrot.lane.b32.xlu0 %v11701_v37, %s6408_s29 }
 0x8cc   :  { %v8444_v10 = vpop.xlane.xlu1 %1508 }
 0x8d1   :  { %v8442_v45 = vpop.xlane.xlu0 %1505 }
 0x8d5   :  { %v8446_v12 = vpop.xlane.xlu0 %1511 }
 0x8d8   :  { %v8450_v48 = vpop.xlane.xlu1 %1520 }
 0x8d9   :  { %v8448_v31 = vpop.xlane.xlu0 %1514 }
 0x8dc   :  { %v8454_v22 = vpop.xlane.xlu1 %1526 }
 0x8dd   :  { %v8452_v17 = vpop.xlane.xlu0 %1517 }
 0x8e0   :  { %v8458_v53 = vpop.xlane.xlu1 %1532 }
 0x8e1   :  { %v8456_v55 = vpop.xlane.xlu0 %1523 }
 0x8e4   :  { %v8462_v62 = vpop.xlane.xlu1 %1538 }
 0x8e5   :  { %v8460_v26 = vpop.xlane.xlu0 %1529 }
 0x8e8   :  { %v8466_v57 = vpop.xlane.xlu1 %1544 }
 0x8e9   :  { %v8464_v8 = vpop.xlane.xlu0 %1535 }
 0x8ec   :  { %v8470_v41 = vpop.xlane.xlu1 %1550 }
 0x8ed   :  { %v8468_v37 = vpop.xlane.xlu0 %1541  ;;  %11703 = vst [vmem:[#allocation54_spill] sm:$0xff] %v8470_v41 }
 0x8ee   :  { %11702 = vst [vmem:[#allocation55_spill] sm:$0xff] %v8468_v37 }
 0x8f0   :  { %v1555_v27 = vpop.permute.xlu1 %1554 }
 0x8f1   :  { %v8472_v58 = vpop.xlane.xlu0 %1547  ;;  %v1603_v43 = vsel %vm271_vm1, %v1555_v27, 0.0 }
 0x8f2   :  { %11704 = vst [vmem:[#allocation48_spill] sm:$0xff] %v8472_v58  ;;  %1604 = vadd.xlane.f32.xlu1 %v1603_v43 }
 0x8f4   :  { %v1557_v0 = vpop.permute.xlu1 %1556 }
 0x8f5   :  { %v1553_v19 = vpop.permute.xlu0 %1552  ;;  %v1606_v63 = vsel %vm271_vm1, %v1557_v0, 0.0 }
 0x8f6   :  { %v1600_v39 = vsel %vm271_vm1, %v1553_v19, 0.0 }
 0x8f7   :  { %1601 = vadd.xlane.f32.xlu0 %v1600_v39 }
 0x8f8   :  { %v1559_v56 = vpop.permute.xlu1 %1558 }
 0x8f9   :  { %v1561_v32 = vpop.permute.xlu0 %1560  ;;  %v1609_v24 = vsel %vm271_vm1, %v1559_v56, 0.0 }
 0x8fa   :  { %v1612_v1 = vsel %vm271_vm1, %v1561_v32, 0.0 }
 0x8fb   :  { %1607 = vadd.xlane.f32.xlu0 %v1606_v63 }
 0x8fc   :  { %v1563_v7 = vpop.permute.xlu1 %1562 }
 0x8fd   :  { %v1565_v54 = vpop.permute.xlu0 %1564  ;;  %v1615_v60 = vsel %vm271_vm1, %v1563_v7, 0.0 }
 0x8fe   :  { %1616 = vadd.xlane.f32.xlu1 %v1615_v60  ;;  %v1618_v39 = vsel %vm271_vm1, %v1565_v54, 0.0 }
 0x8ff   :  { %1610 = vadd.xlane.f32.xlu0 %v1609_v24 }
 0x900   :  { %v1567_v43 = vpop.permute.xlu1 %1566 }
 0x901   :  { %v1569_v27 = vpop.permute.xlu0 %1568  ;;  %v1621_v19 = vsel %vm271_vm1, %v1567_v43, 0.0 }
 0x902   :  { %1622 = vadd.xlane.f32.xlu1 %v1621_v19  ;;  %v1624_v7 = vsel %vm271_vm1, %v1569_v27, 0.0  ;;  %v11705_v27 = vld [vmem:[#allocation2_spill] sm:$0xff] }
 0x903   :  { %1613 = vadd.xlane.f32.xlu0 %v1612_v1 }
 0x904   :  { %v1571_v0 = vpop.permute.xlu1 %1570 }
 0x905   :  { %v1627_v63 = vsel %vm271_vm1, %v1571_v0, 0.0  ;;  %v1573_v56 = vpop.permute.xlu0 %1572 }
 0x906   :  { %1628 = vadd.xlane.f32.xlu1 %v1627_v63  ;;  %v1630_v1 = vsel %vm271_vm1, %v1573_v56, 0.0  ;;  %v11706_v63 = vld [vmem:[#allocation5_spill] sm:$0xff]  ;;  %v11707_v56 = vld [vmem:[#allocation4_spill] sm:$0xff] }
 0x907   :  { %1619 = vadd.xlane.f32.xlu0 %v1618_v39 }
 0x908   :  { %v1575_v16 = vpop.permute.xlu1 %1574 }
 0x909   :  { %v1633_v60 = vsel %vm271_vm1, %v1575_v16, 0.0  ;;  %v1577_v24 = vpop.permute.xlu0 %1576 }
 0x90a   :  { %1634 = vadd.xlane.f32.xlu1 %v1633_v60  ;;  %v1636_v19 = vsel %vm271_vm1, %v1577_v24, 0.0  ;;  %v11709_v60 = vld [vmem:[#allocation7_spill] sm:$0xff] }
 0x90b   :  { %1625 = vadd.xlane.f32.xlu0 %v1624_v7  ;;  %v11708_v7 = vld [vmem:[#allocation3_spill] sm:$0xff] }
 0x90c   :  { %v1579_v32 = vpop.permute.xlu1 %1578  ;;  %v11710_v24 = vld [vmem:[#allocation11_spill] sm:$0xff] }
 0x90d   :  { %v1639_v43 = vsel %vm271_vm1, %v1579_v32, 0.0  ;;  %v1581_v39 = vpop.permute.xlu0 %1580  ;;  %v11711_v32 = vld [vmem:[#allocation17_spill] sm:$0xff] }
 0x90e   :  { %1640 = vadd.xlane.f32.xlu1 %v1639_v43  ;;  %v1642_v16 = vsel %vm271_vm1, %v1581_v39, 0.0  ;;  %v11713_v43 = vld [vmem:[#allocation23_spill] sm:$0xff] }
 0x90f   :  { %1631 = vadd.xlane.f32.xlu0 %v1630_v1  ;;  %v11712_v1 = vld [vmem:[#allocation13_spill] sm:$0xff]  ;;  %v11717_v39 = vld [vmem:[#allocation35_spill] sm:$0xff] }
 0x910   :  { %v1583_v54 = vpop.permute.xlu1 %1582 }
 0x911   :  { %v1645_v0 = vsel %vm271_vm1, %v1583_v54, 0.0  ;;  %v11714_v54 = vld [vmem:[#allocation20_spill] sm:$0xff] }
 0x912   :  { %1646 = vadd.xlane.f32.xlu1 %v1645_v0  ;;  %v11716_v0 = vld [vmem:[#allocation26_spill] sm:$0xff] }
 0x913   :  { %1637 = vadd.xlane.f32.xlu0 %v1636_v19  ;;  %v11715_v19 = vld [vmem:[#allocation29_spill] sm:$0xff] }
 0x917   :  { %1643 = vadd.xlane.f32.xlu0 %v1642_v16  ;;  %v11718_v16 = vld [vmem:[#allocation32_spill] sm:$0xff] }
 0x923   :  { %1650 = vrot.lane.b32.xlu1 %v11705_v27, %s6412_s7 }
 0x927   :  { %1652 = vrot.lane.b32.xlu1 %v11706_v63, %s6412_s7 }
 0x92b   :  { %1654 = vrot.lane.b32.xlu1 %v11707_v56, %s6412_s7 }
 0x92d   :  { %1648 = vrot.lane.b32.xlu0 %v11708_v7, %s6412_s7  ;;  %v11719_v7 = vld [vmem:[#allocation41_spill] sm:$0xff] }
 0x92f   :  { %1658 = vrot.lane.b32.xlu1 %v11709_v60, %s6412_s7  ;;  %v11720_v60 = vld [vmem:[#allocation38_spill] sm:$0xff] }
 0x931   :  { %1656 = vrot.lane.b32.xlu0 %v11710_v24, %s6412_s7 }
 0x933   :  { %1662 = vrot.lane.b32.xlu1 %v11711_v32, %s6412_s7  ;;  %v3751_v32 = vmax.f32 %v8284_v50, %v8364_v38 }
 0x935   :  { %1660 = vrot.lane.b32.xlu0 %v11712_v1, %s6412_s7 }
 0x937   :  { %1666 = vrot.lane.b32.xlu1 %v11713_v43, %s6412_s7  ;;  %v3767_v43 = vmax.f32 %v3751_v32, %v8444_v10 }
 0x939   :  { %1664 = vrot.lane.b32.xlu0 %v11714_v54, %s6412_s7  ;;  %v3750_v54 = vmax.f32 %v8282_v23, %v8362_v40 }
 0x93b   :  { %1670 = vrot.lane.b32.xlu1 %v11715_v19, %s6412_s7 }
 0x93d   :  { %1668 = vrot.lane.b32.xlu0 %v11716_v0, %s6412_s7  ;;  %v3766_v0 = vmax.f32 %v3750_v54, %v8442_v45 }
 0x93f   :  { %1674 = vrot.lane.b32.xlu1 %v11717_v39, %s6412_s7 }
 0x941   :  { %1672 = vrot.lane.b32.xlu0 %v11718_v16, %s6412_s7  ;;  %v3752_v16 = vmax.f32 %v8286_v51, %v8366_v29 }
 0x943   :  { %1678 = vrot.lane.b32.xlu1 %v11719_v7, %s6412_s7  ;;  %v3768_v63 = vmax.f32 %v3752_v16, %v8446_v12 }
 0x945   :  { %1676 = vrot.lane.b32.xlu0 %v11720_v60, %s6412_s7 }
 0x97b   :  { %v1605_v1 = vpop.xlane.xlu1 %1604 }
 0x97c   :  { %v3783_v19 = vmax.f32 %v3767_v43, %v1605_v1  ;;  %v3753_v43 = vmax.f32 %v8288_v4, %v8368_v2 }
 0x97e   :  { %v3799_v7 = vsub.f32 %v8284_v50, %v3783_v19  ;;  %v3847_v56 = vsub.f32 %v8364_v38, %v3783_v19  ;;  %v3895_v32 = vsub.f32 %v8444_v10, %v3783_v19  ;;  %v3943_v27 = vsub.f32 %v1605_v1, %v3783_v19 }
 0x97f   :  { %v3769_v38 = vmax.f32 %v3753_v43, %v8448_v31  ;;  %v3755_v10 = vmax.f32 %v8290_v49, %v8370_v11 }
 0x980   :  { %v1602_v24 = vpop.xlane.xlu0 %1601  ;;  %v3816_v58 = vmul.f32 1.442695, %v3799_v7  ;;  %v3864_v50 = vmul.f32 1.442695, %v3847_v56  ;;  %v3912_v52 = vmul.f32 1.442695, %v3895_v32 }
 0x981   :  { %v3782_v39 = vmax.f32 %v3766_v0, %v1602_v24  ;;  %v3960_v1 = vmul.f32 1.442695, %v3943_v27 }
 0x982   :  { %6023 = vpow2.f32 %v3816_v58  ;;  %v3754_v58 = vmax.f32 %v8292_v34, %v8372_v20 }
 0x983   :  { %v3798_v54 = vsub.f32 %v8282_v23, %v3782_v39  ;;  %v3846_v0 = vsub.f32 %v8362_v40, %v3782_v39  ;;  %v3894_v16 = vsub.f32 %v8442_v45, %v3782_v39  ;;  %v3942_v19 = vsub.f32 %v1602_v24, %v3782_v39 }
 0x984   :  { %v1608_v60 = vpop.xlane.xlu0 %1607  ;;  %6025 = vpow2.f32 %v3864_v50  ;;  %v3771_v45 = vmax.f32 %v3755_v10, %v8450_v48 }
 0x985   :  { %v3784_v36 = vmax.f32 %v3768_v63, %v1608_v60  ;;  %v3814_v7 = vmul.f32 1.442695, %v3798_v54  ;;  %v3862_v40 = vmul.f32 1.442695, %v3846_v0  ;;  %6027 = vpow2.f32 %v3912_v52 }
 0x986   :  { %v3910_v43 = vmul.f32 1.442695, %v3894_v16  ;;  %6029 = vpow2.f32 %v3960_v1 }
 0x987   :  { %v8521_v37 = vpop.xlane.xlu1 %1616  ;;  %v3800_v23 = vsub.f32 %v8286_v51, %v3784_v36  ;;  %v3848_v32 = vsub.f32 %v8366_v29, %v3784_v36  ;;  %v3896_v27 = vsub.f32 %v8446_v12, %v3784_v36  ;;  %v3958_v51 = vmul.f32 1.442695, %v3942_v19 }
 0x988   :  { %v1611_v41 = vpop.xlane.xlu0 %1610  ;;  %v3944_v24 = vsub.f32 %v1608_v60, %v3784_v36  ;;  %6031 = vpow2.f32 %v3814_v7  ;;  %v3787_v50 = vmax.f32 %v3771_v45, %v8521_v37  ;;  %v3757_v60 = vmax.f32 %v8294_v35, %v8374_v3 }
 0x989   :  { %v3785_v63 = vmax.f32 %v3769_v38, %v1611_v41  ;;  %v3818_v39 = vmul.f32 1.442695, %v3800_v23  ;;  %6033 = vpow2.f32 %v3862_v40  ;;  %v3866_v52 = vmul.f32 1.442695, %v3848_v32 }
 0x98a   :  { %v3770_v38 = vmax.f32 %v3754_v58, %v8452_v17  ;;  %6035 = vpow2.f32 %v3910_v43  ;;  %v3914_v16 = vmul.f32 1.442695, %v3896_v27  ;;  %v3803_v19 = vsub.f32 %v8290_v49, %v3787_v50 }
 0x98b   :  { %v8531_v56 = vpop.xlane.xlu1 %1622  ;;  %v3801_v54 = vsub.f32 %v8288_v4, %v3785_v63  ;;  %v3849_v12 = vsub.f32 %v8368_v2, %v3785_v63  ;;  %v3897_v36 = vsub.f32 %v8448_v31, %v3785_v63  ;;  %6037 = vpow2.f32 %v3958_v51 }
 0x98c   :  { %v8529_v6 = vpop.xlane.xlu0 %1613  ;;  %v3962_v4 = vmul.f32 1.442695, %v3944_v24  ;;  %v3945_v10 = vsub.f32 %v1611_v41, %v3785_v63  ;;  %6039 = vpow2.f32 %v3818_v39  ;;  %v3851_v31 = vsub.f32 %v8370_v11, %v3787_v50 }
 0x98d   :  { %v3820_v1 = vmul.f32 1.442695, %v3801_v54  ;;  %v3786_v7 = vmax.f32 %v3770_v38, %v8529_v6  ;;  %6041 = vpow2.f32 %v3866_v52  ;;  %v3868_v40 = vmul.f32 1.442695, %v3849_v12 }
 0x98e   :  { %v3773_v32 = vmax.f32 %v3757_v60, %v8454_v22  ;;  %6043 = vpow2.f32 %v3914_v16  ;;  %v3916_v45 = vmul.f32 1.442695, %v3897_v36  ;;  %v3899_v41 = vsub.f32 %v8450_v48, %v3787_v50 }
 0x98f   :  { %v8542_v29 = vpop.xlane.xlu1 %1628  ;;  %v3756_v63 = vmax.f32 %v8296_v18, %v8376_v13  ;;  %6045 = vpow2.f32 %v3962_v4  ;;  %v3964_v49 = vmul.f32 1.442695, %v3945_v10  ;;  %v3947_v43 = vsub.f32 %v8521_v37, %v3787_v50  ;;  %v8567_v39 = vpop.eup %6023 }
 0x990   :  { %v8540_v0 = vpop.xlane.xlu0 %1619  ;;  %6047 = vpow2.f32 %v3820_v1  ;;  %v3824_v27 = vmul.f32 1.442695, %v3803_v19  ;;  %v3802_v58 = vsub.f32 %v8292_v34, %v3786_v7  ;;  %v3789_v51 = vmax.f32 %v3773_v32, %v8531_v56  ;;  %11721 = vst [vmem:[#allocation46_spill] sm:$0xff] %v8567_v39 }
 0x991   :  { %6049 = vpow2.f32 %v3868_v40  ;;  %v3872_v48 = vmul.f32 1.442695, %v3851_v31  ;;  %v3850_v54 = vsub.f32 %v8372_v20, %v3786_v7  ;;  %v8570_v52 = vpop.eup %6025  ;;  %v3772_v37 = vmax.f32 %v3756_v63, %v8456_v55 }
 0x992   :  { %11722 = vst [vmem:[#allocation59_spill] sm:$0xff] %v8570_v52  ;;  %6051 = vpow2.f32 %v3916_v45  ;;  %v3920_v50 = vmul.f32 1.442695, %v3899_v41  ;;  %v3898_v34 = vsub.f32 %v8452_v17, %v3786_v7  ;;  %v8574_v12 = vpop.eup %6027  ;;  %v3759_v38 = vmax.f32 %v8298_v21, %v8378_v5 }
 0x993   :  { %v8553_v2 = vpop.xlane.xlu1 %1634  ;;  %11723 = vst [vmem:[#allocation58_spill] sm:$0xff] %v8574_v12  ;;  %6053 = vpow2.f32 %v3964_v49  ;;  %v3968_v16 = vmul.f32 1.442695, %v3947_v43  ;;  %v3946_v36 = vsub.f32 %v8529_v6, %v3786_v7  ;;  %v8579_v60 = vpop.eup %6029  ;;  %v3822_v20 = vmul.f32 1.442695, %v3802_v58 }
 0x994   :  { %v8551_v23 = vpop.xlane.xlu0 %1625  ;;  %11724 = vst [vmem:[#allocation63_spill] sm:$0xff] %v8579_v60  ;;  %6055 = vpow2.f32 %v3824_v27  ;;  %v3805_v4 = vsub.f32 %v8294_v35, %v3789_v51  ;;  %v3788_v10 = vmax.f32 %v3772_v37, %v8540_v0  ;;  %v3758_v40 = vmax.f32 %v8300_v25, %v8380_v33 }
 0x995   :  { %v8587_v19 = vpop.eup %6031  ;;  %6057 = vpow2.f32 %v3872_v48  ;;  %v3870_v31 = vmul.f32 1.442695, %v3850_v54  ;;  %v3853_v6 = vsub.f32 %v8374_v3, %v3789_v51  ;;  %v3775_v32 = vmax.f32 %v3759_v38, %v8458_v53 }
 0x996   :  { %11725 = vst [vmem:[#allocation62_spill] sm:$0xff] %v8587_v19  ;;  %v8592_v7 = vpop.eup %6033  ;;  %6059 = vpow2.f32 %v3920_v50  ;;  %v3918_v35 = vmul.f32 1.442695, %v3898_v34  ;;  %v3901_v45 = vsub.f32 %v8454_v22, %v3789_v51  ;;  %v3761_v63 = vmax.f32 %v8302_v30, %v8382_v15 }
 0x997   :  { %v8565_v24 = vpop.xlane.xlu1 %1640  ;;  %11726 = vst [vmem:[#allocation67_spill] sm:$0xff] %v8592_v7  ;;  %v8596_v41 = vpop.eup %6035  ;;  %6061 = vpow2.f32 %v3968_v16  ;;  %v3966_v49 = vmul.f32 1.442695, %v3946_v36  ;;  %v3949_v43 = vsub.f32 %v8531_v56, %v3789_v51  ;;  %v3828_v3 = vmul.f32 1.442695, %v3805_v4 }
 0x998   :  { %v8563_v11 = vpop.xlane.xlu0 %1631  ;;  %11727 = vst [vmem:[#allocation66_spill] sm:$0xff] %v8596_v41  ;;  %v8601_v27 = vpop.eup %6037  ;;  %6063 = vpow2.f32 %v3822_v20  ;;  %v3804_v58 = vsub.f32 %v8296_v18, %v3788_v10  ;;  %v3791_v48 = vmax.f32 %v3775_v32, %v8542_v29  ;;  %v3760_v22 = vmax.f32 %v8304_v28, %v8384_v46 }
 0x999   :  { %11728 = vst [vmem:[#allocation71_spill] sm:$0xff] %v8601_v27  ;;  %v8605_v37 = vpop.eup %6039  ;;  %6065 = vpow2.f32 %v3870_v31  ;;  %v3876_v50 = vmul.f32 1.442695, %v3853_v6  ;;  %v3852_v34 = vsub.f32 %v8376_v13, %v3788_v10  ;;  %v3774_v51 = vmax.f32 %v3758_v40, %v8460_v26 }
 0x99a   :  { %11729 = vst [vmem:[#allocation70_spill] sm:$0xff] %v8605_v37  ;;  %v8612_v56 = vpop.eup %6041  ;;  %6067 = vpow2.f32 %v3918_v35  ;;  %v3924_v18 = vmul.f32 1.442695, %v3901_v45  ;;  %v3900_v16 = vsub.f32 %v8456_v55, %v3788_v10  ;;  %v3763_v20 = vmax.f32 %v8306_v14, %v8386_v47 }
 0x99b   :  { %v8585_v17 = vpop.xlane.xlu1 %1646  ;;  %11730 = vst [vmem:[#allocation75_spill] sm:$0xff] %v8612_v56  ;;  %v8616_v36 = vpop.eup %6043  ;;  %6069 = vpow2.f32 %v3966_v49  ;;  %v3972_v4 = vmul.f32 1.442695, %v3949_v43  ;;  %v3948_v31 = vsub.f32 %v8540_v0, %v3788_v10  ;;  %v3826_v6 = vmul.f32 1.442695, %v3804_v58 }
 0x99c   :  { %v8583_v1 = vpop.xlane.xlu0 %1637  ;;  %11731 = vst [vmem:[#allocation74_spill] sm:$0xff] %v8616_v36  ;;  %v8621_v13 = vpop.eup %6045  ;;  %6071 = vpow2.f32 %v3828_v3  ;;  %v3807_v32 = vsub.f32 %v8298_v21, %v3791_v48  ;;  %v3790_v40 = vmax.f32 %v3774_v51, %v8551_v23  ;;  %v3762_v45 = vmax.f32 %v8308_v42, %v8388_v61 }
 0x99d   :  { %11732 = vst [vmem:[#allocation80_spill] sm:$0xff] %v8621_v13  ;;  %v8627_v55 = vpop.eup %6047  ;;  %6073 = vpow2.f32 %v3876_v50  ;;  %v3874_v49 = vmul.f32 1.442695, %v3852_v34  ;;  %v3855_v43 = vsub.f32 %v8378_v5, %v3791_v48  ;;  %v3777_v10 = vmax.f32 %v3761_v63, %v8462_v62 }
 0x99e   :  { %11733 = vst [vmem:[#allocation78_spill] sm:$0xff] %v8627_v55  ;;  %v8632_v0 = vpop.eup %6049  ;;  %6075 = vpow2.f32 %v3924_v18  ;;  %v3922_v3 = vmul.f32 1.442695, %v3900_v16  ;;  %v3903_v21 = vsub.f32 %v8458_v53, %v3791_v48  ;;  %v3765_v51 = vmax.f32 %v8310_v44, %v8390_v9 }
 0x99f   :  { %v1651_v54 = vpop.permute.xlu1 %1650  ;;  %11734 = vst [vmem:[#allocation259_spill] sm:$0xff] %v8632_v0  ;;  %v8636_v58 = vpop.eup %6051  ;;  %6077 = vpow2.f32 %v3972_v4  ;;  %v3970_v13 = vmul.f32 1.442695, %v3948_v31  ;;  %v3951_v50 = vsub.f32 %v8542_v29, %v3791_v48  ;;  %v3832_v5 = vmul.f32 1.442695, %v3807_v32 }
 0x9a0   :  { %v8610_v38 = vpop.xlane.xlu0 %1643  ;;  %11735 = vst [vmem:[#allocation260_spill] sm:$0xff] %v8636_v58  ;;  %v8641_v60 = vpop.eup %6053  ;;  %6079 = vpow2.f32 %v3826_v6  ;;  %v3806_v63 = vsub.f32 %v8300_v25, %v3790_v40  ;;  %v3793_v18 = vmax.f32 %v3777_v10, %v8553_v2  ;;  %v3880_v58 = vmul.f32 1.442695, %v3855_v43 }
 0x9a1   :  { %11736 = vst [vmem:[#allocation261_spill] sm:$0xff] %v8641_v60  ;;  %v8645_v53 = vpop.eup %6055  ;;  %6081 = vpow2.f32 %v3874_v49  ;;  %v3854_v27 = vsub.f32 %v8380_v33, %v3790_v40  ;;  %v1697_v4 = vmul.f32 %v1651_v54, %v11551_v59  ;;  %v3776_v29 = vmax.f32 %v3760_v22, %v8464_v8 }
 0x9a2   :  { %11737 = vst [vmem:[#allocation262_spill] sm:$0xff] %v8645_v53  ;;  %v8649_v31 = vpop.eup %6057  ;;  %6083 = vpow2.f32 %v3922_v3  ;;  %v3928_v48 = vmul.f32 1.442695, %v3903_v21  ;;  %v3902_v6 = vsub.f32 %v8460_v26, %v3790_v40  ;;  %v3779_v32 = vmax.f32 %v3763_v20, %v8466_v57  ;;  %v11743_v21 = vld [vmem:[#allocation258_spill] sm:$0xff] }
 0x9a3   :  { %v8625_v35 = vpop.permute.xlu1 %1652  ;;  %11738 = vst [vmem:[#allocation263_spill] sm:$0xff] %v8649_v31  ;;  %v8653_v25 = vpop.eup %6059  ;;  %6085 = vpow2.f32 %v3970_v13  ;;  %v3976_v10 = vmul.f32 1.442695, %v3951_v50  ;;  %v3950_v49 = vsub.f32 %v8551_v23, %v3790_v40  ;;  %1730 = vrot.lane.b32.xlu1 %v1697_v4, %s6409_s0  ;;  %v3830_v59 = vmul.f32 1.442695, %v3806_v63  ;;  %v11744_v50 = vld [vmem:[#allocation257_spill] sm:$0xff] }
 0x9a4   :  { %v1649_v34 = vpop.permute.xlu0 %1648  ;;  %11739 = vst [vmem:[#allocation264_spill] sm:$0xff] %v8653_v25  ;;  %v8658_v33 = vpop.eup %6061  ;;  %6087 = vpow2.f32 %v3832_v5  ;;  %v3809_v54 = vsub.f32 %v8302_v30, %v3793_v18  ;;  %v3792_v22 = vmax.f32 %v3776_v29, %v8563_v11  ;;  %v3878_v3 = vmul.f32 1.442695, %v3854_v27  ;;  %v11746_v29 = vld [vmem:[#allocation55_spill] sm:$0xff] }
 0x9a5   :  { %11740 = vst [vmem:[#allocation265_spill] sm:$0xff] %v8658_v33  ;;  %v8662_v26 = vpop.eup %6063  ;;  %6089 = vpow2.f32 %v3880_v58  ;;  %v3857_v20 = vsub.f32 %v8382_v15, %v3793_v18  ;;  %v3905_v13 = vsub.f32 %v8462_v62, %v3793_v18  ;;  %v3764_v5 = vmax.f32 %v11744_v50, %v11743_v21  ;;  %v11748_v33 = vld [vmem:[#allocation54_spill] sm:$0xff] }
 0x9a6   :  { %11741 = vst [vmem:[#allocation266_spill] sm:$0xff] %v8662_v26  ;;  %v8668_v40 = vpop.eup %6065  ;;  %6091 = vpow2.f32 %v3928_v48  ;;  %v3926_v30 = vmul.f32 1.442695, %v3902_v6  ;;  %v3953_v63 = vsub.f32 %v8553_v2, %v3793_v18  ;;  %v3778_v58 = vmax.f32 %v3762_v45, %v11746_v29 }
 0x9a7   :  { %v1655_v16 = vpop.permute.xlu1 %1654  ;;  %11742 = vst [vmem:[#allocation267_spill] sm:$0xff] %v8668_v40  ;;  %v8673_v4 = vpop.eup %6067  ;;  %6093 = vpow2.f32 %v3976_v10  ;;  %v3974_v27 = vmul.f32 1.442695, %v3950_v49  ;;  %v8677_v15 = vmax.f32 %v3779_v32, %v8565_v24  ;;  %v3781_v25 = vmax.f32 %v3765_v51, %v11748_v33 }
 0x9a8   :  { %v8666_v23 = vpop.permute.xlu0 %1656  ;;  %11745 = vst [vmem:[#allocation258_spill] sm:$0xff] %v8673_v4  ;;  %v8679_v62 = vpop.eup %6069  ;;  %6095 = vpow2.f32 %v3830_v59  ;;  %v3836_v60 = vmul.f32 1.442695, %v3809_v54  ;;  %v3808_v48 = vsub.f32 %v8304_v28, %v3792_v22  ;;  %v3884_v2 = vmul.f32 1.442695, %v3857_v20 }
 0x9a9   :  { %11747 = vst [vmem:[#allocation257_spill] sm:$0xff] %v8679_v62  ;;  %v8683_v31 = vpop.eup %6071  ;;  %6097 = vpow2.f32 %v3878_v3  ;;  %v3932_v18 = vmul.f32 1.442695, %v3905_v13  ;;  %v3856_v45 = vsub.f32 %v8384_v46, %v3792_v22  ;;  %v3980_v32 = vmul.f32 1.442695, %v3953_v63  ;;  %v11751_v62 = vld [vmem:[#allocation9_spill] sm:$0xff] }
 0x9aa   :  { %11749 = vst [vmem:[#allocation55_spill] sm:$0xff] %v8683_v31  ;;  %v8686_v10 = vpop.eup %6073  ;;  %6099 = vpow2.f32 %v3926_v30  ;;  %v3904_v49 = vsub.f32 %v8464_v8, %v3792_v22  ;;  %v1696_v51 = vmul.f32 %v1649_v34, %v11751_v62  ;;  %v3952_v28 = vsub.f32 %v8563_v11, %v3792_v22  ;;  %v11753_v3 = vld [vmem:[#allocation12_spill] sm:$0xff]  ;;  %v11755_v34 = vld [vmem:[#allocation15_spill] sm:$0xff]  ;;  %v11757_v22 = vld [vmem:[#allocation21_spill] sm:$0xff] }
 0x9ab   :  { %v1659_v43 = vpop.permute.xlu1 %1658  ;;  %11750 = vst [vmem:[#allocation54_spill] sm:$0xff] %v8686_v10  ;;  %v8690_v59 = vpop.eup %6075  ;;  %6101 = vpow2.f32 %v3974_v27  ;;  %v3811_v54 = vsub.f32 %v8306_v14, %v8677_v15  ;;  %v1699_v20 = vmul.f32 %v1655_v16, %v11753_v3  ;;  %v3834_v30 = vmul.f32 1.442695, %v3808_v48 }
 0x9ac   :  { %11752 = vst [vmem:[#allocation9_spill] sm:$0xff] %v8690_v59  ;;  %v8696_v13 = vpop.permute.xlu0 %1660  ;;  %v8698_v46 = vpop.eup %6077  ;;  %6103 = vpow2.f32 %v3836_v60  ;;  %v3794_v8 = vmax.f32 %v3778_v58, %v8583_v1  ;;  %1728 = vrot.lane.b32.xlu0 %v1696_v51, %s6409_s0  ;;  %v1698_v63 = vmul.f32 %v8625_v35, %v11755_v34  ;;  %v3882_v14 = vmul.f32 1.442695, %v3856_v45  ;;  %v11759_v58 = vld [vmem:[#allocation48_spill] sm:$0xff]  ;;  %v11765_v34 = vld [vmem:[#allocation18_spill] sm:$0xff] }
 0x9ad   :  { %11754 = vst [vmem:[#allocation12_spill] sm:$0xff] %v8698_v46  ;;  %v8704_v11 = vpop.eup %6079  ;;  %6105 = vpow2.f32 %v3884_v2  ;;  %v3859_v16 = vsub.f32 %v8386_v47, %v8677_v15  ;;  %1734 = vrot.lane.b32.xlu1 %v1699_v20, %s6409_s0  ;;  %v1701_v60 = vmul.f32 %v1659_v43, %v11757_v22  ;;  %v3780_v48 = vmax.f32 %v3764_v5, %v11759_v58 }
 0x9ae   :  { %11756 = vst [vmem:[#allocation15_spill] sm:$0xff] %v8704_v11  ;;  %v8710_v62 = vpop.eup %6081  ;;  %6107 = vpow2.f32 %v3932_v18  ;;  %v3930_v51 = vmul.f32 1.442695, %v3904_v49  ;;  %v3907_v35 = vsub.f32 %v8466_v57, %v8677_v15  ;;  %v3978_v2 = vmul.f32 1.442695, %v3952_v28 }
 0x9af   :  { %v1663_v6 = vpop.permute.xlu1 %1662  ;;  %11758 = vst [vmem:[#allocation21_spill] sm:$0xff] %v8710_v62  ;;  %v8715_v3 = vpop.eup %6083  ;;  %6109 = vpow2.f32 %v3980_v32  ;;  %v3840_v45 = vmul.f32 1.442695, %v3811_v54  ;;  %v3955_v47 = vsub.f32 %v8565_v24, %v8677_v15  ;;  %v3810_v43 = vsub.f32 %v8308_v42, %v3794_v8  ;;  %v11763_v15 = vld [vmem:[#allocation27_spill] sm:$0xff] }
 0x9b0   :  { %11760 = vst [vmem:[#allocation48_spill] sm:$0xff] %v8715_v3  ;;  %v8719_v20 = vpop.eup %6085  ;;  %6111 = vpow2.f32 %v3834_v30  ;;  %v8723_v5 = vmax.f32 %v3781_v25, %v8585_v17  ;;  %v8726_v18 = vmax.f32 %v3780_v48, %v8610_v38  ;;  %1732 = vrot.lane.b32.xlu0 %v1698_v63, %s6409_s0  ;;  %v3888_v32 = vmul.f32 1.442695, %v3859_v16  ;;  %v1665_v24 = vpop.permute.xlu0 %1664 }
 0x9b1   :  { %11761 = vst [vmem:[#allocation268_spill] sm:$0xff] %v8719_v20  ;;  %v8729_v57 = vpop.eup %6087  ;;  %6113 = vpow2.f32 %v3882_v14  ;;  %v3858_v49 = vsub.f32 %v8388_v61, %v3794_v8  ;;  %1738 = vrot.lane.b32.xlu1 %v1701_v60, %s6409_s0  ;;  %v1703_v28 = vmul.f32 %v1663_v6, %v11763_v15  ;;  %v3936_v25 = vmul.f32 1.442695, %v3907_v35 }
 0x9b2   :  { %11762 = vst [vmem:[#allocation269_spill] sm:$0xff] %v8729_v57  ;;  %v8734_v54 = vpop.eup %6089  ;;  %6115 = vpow2.f32 %v3930_v51  ;;  %v3906_v30 = vsub.f32 %v11746_v29, %v3794_v8  ;;  %v1700_v63 = vmul.f32 %v8666_v23, %v11765_v34  ;;  %v3984_v14 = vmul.f32 1.442695, %v3955_v47 }
 0x9b3   :  { %v1667_v27 = vpop.permute.xlu1 %1666  ;;  %11764 = vst [vmem:[#allocation27_spill] sm:$0xff] %v8734_v54  ;;  %v8739_v22 = vpop.eup %6091  ;;  %6117 = vpow2.f32 %v3978_v2  ;;  %v3954_v61 = vsub.f32 %v8583_v1, %v3794_v8  ;;  %v3838_v6 = vmul.f32 1.442695, %v3810_v43  ;;  %v3813_v60 = vsub.f32 %v8310_v44, %v8723_v5  ;;  %v11769_v1 = vld [vmem:[#allocation33_spill] sm:$0xff]  ;;  %v11771_v2 = vld [vmem:[#allocation24_spill] sm:$0xff] }
 0x9b4   :  { %11766 = vst [vmem:[#allocation18_spill] sm:$0xff] %v8739_v22  ;;  %v8742_v16 = vpop.eup %6093  ;;  %6119 = vpow2.f32 %v3840_v45  ;;  %v3812_v48 = vsub.f32 %v11744_v50, %v8726_v18  ;;  %1736 = vrot.lane.b32.xlu0 %v1700_v63, %s6409_s0  ;;  %v3886_v23 = vmul.f32 1.442695, %v3858_v49  ;;  %v3860_v51 = vsub.f32 %v11743_v21, %v8726_v18 }
 0x9b5   :  { %11767 = vst [vmem:[#allocation270_spill] sm:$0xff] %v8742_v16  ;;  %v8749_v29 = vpop.eup %6095  ;;  %6121 = vpow2.f32 %v3888_v32  ;;  %1742 = vrot.lane.b32.xlu1 %v1703_v28, %s6409_s0  ;;  %v1705_v8 = vmul.f32 %v1667_v27, %v11769_v1  ;;  %v3934_v44 = vmul.f32 1.442695, %v3906_v30  ;;  %v3861_v50 = vsub.f32 %v8390_v9, %v8723_v5  ;;  %v1669_v32 = vpop.permute.xlu0 %1668 }
 0x9b6   :  { %11768 = vst [vmem:[#allocation271_spill] sm:$0xff] %v8749_v29  ;;  %v8755_v35 = vpop.eup %6097  ;;  %6123 = vpow2.f32 %v3936_v25  ;;  %v1702_v45 = vmul.f32 %v8696_v13, %v11771_v2  ;;  %v3982_v43 = vmul.f32 1.442695, %v3954_v61  ;;  %v3909_v21 = vsub.f32 %v11748_v33, %v8723_v5  ;;  %v11775_v25 = vld [vmem:[#allocation39_spill] sm:$0xff] }
 0x9b7   :  { %v1671_v42 = vpop.permute.xlu1 %1670  ;;  %11770 = vst [vmem:[#allocation33_spill] sm:$0xff] %v8755_v35  ;;  %v8761_v47 = vpop.eup %6099  ;;  %6125 = vpow2.f32 %v3984_v14  ;;  %v3842_v15 = vmul.f32 1.442695, %v3812_v48  ;;  %v3908_v28 = vsub.f32 %v11759_v58, %v8726_v18  ;;  %v3890_v13 = vmul.f32 1.442695, %v3860_v51  ;;  %v11777_v14 = vld [vmem:[#allocation30_spill] sm:$0xff] }
 0x9b8   :  { %11772 = vst [vmem:[#allocation24_spill] sm:$0xff] %v8761_v47  ;;  %v8765_v27 = vpop.eup %6101  ;;  %6127 = vpow2.f32 %v3838_v6  ;;  %1740 = vrot.lane.b32.xlu0 %v1702_v45, %s6409_s0  ;;  %v1707_v30 = vmul.f32 %v1671_v42, %v11775_v25  ;;  %v3844_v34 = vmul.f32 1.442695, %v3813_v60  ;;  %v3892_v63 = vmul.f32 1.442695, %v3861_v50  ;;  %v11786_v25 = vld [vmem:[#allocation52_spill] sm:$0xff] }
 0x9b9   :  { %11773 = vst [vmem:[#allocation272_spill] sm:$0xff] %v8765_v27  ;;  %v8770_v9 = vpop.eup %6103  ;;  %6129 = vpow2.f32 %v3886_v23  ;;  %1746 = vrot.lane.b32.xlu1 %v1705_v8, %s6409_s0  ;;  %v1704_v61 = vmul.f32 %v1665_v24, %v11777_v14  ;;  %v3940_v58 = vmul.f32 1.442695, %v3909_v21  ;;  %v3957_v48 = vsub.f32 %v8585_v17, %v8723_v5  ;;  %v11781_v8 = vld [vmem:[#allocation36_spill] sm:$0xff]  ;;  %v1673_v5 = vpop.permute.xlu0 %1672 }
 0x9ba   :  { %11774 = vst [vmem:[#allocation273_spill] sm:$0xff] %v8770_v9  ;;  %v8774_v33 = vpop.eup %6105  ;;  %6131 = vpow2.f32 %v3934_v44  ;;  %v3956_v23 = vsub.f32 %v8610_v38, %v8726_v18  ;;  %v3938_v42 = vmul.f32 1.442695, %v3908_v28  ;;  %v3990_v60 = vadd.f32 %v8592_v7, %v8587_v19  ;;  %v11782_v38 = vld [vmem:[#allocation49_spill] sm:$0xff] }
 0x9bb   :  { %v1675_v49 = vpop.permute.xlu1 %1674  ;;  %11776 = vst [vmem:[#allocation39_spill] sm:$0xff] %v8774_v33  ;;  %v8777_v6 = vpop.eup %6107  ;;  %6133 = vpow2.f32 %v3982_v43  ;;  %v3991_v24 = vadd.f32 %v8570_v52, %v8567_v39  ;;  %v1706_v17 = vmul.f32 %v1669_v32, %v11781_v8  ;;  %v3992_v50 = vadd.f32 %v8612_v56, %v8605_v37  ;;  %v11914_v7 = vld [vmem:[#allocation17_spill] sm:$0xff] }
 0x9bc   :  { %11778 = vst [vmem:[#allocation30_spill] sm:$0xff] %v8777_v6  ;;  %v8783_v51 = vpop.eup %6109  ;;  %6135 = vpow2.f32 %v3842_v15  ;;  %1744 = vrot.lane.b32.xlu0 %v1704_v61, %s6409_s0  ;;  %v1709_v18 = vmul.f32 %v1675_v49, %v11782_v38  ;;  %v4006_v45 = vadd.f32 %v8596_v41, %v3990_v60  ;;  %v3993_v21 = vadd.f32 %v8632_v0, %v8627_v55  ;;  %v11789_v61 = vld [vmem:[#allocation63_spill] sm:$0xff]  ;;  %v11801_v55 = vld [vmem:[#allocation264_spill] sm:$0xff] }
 0x9bd   :  { %11779 = vst [vmem:[#allocation274_spill] sm:$0xff] %v8783_v51  ;;  %v8790_v1 = vpop.eup %6111  ;;  %6137 = vpow2.f32 %v3890_v13  ;;  %1750 = vrot.lane.b32.xlu1 %v1707_v30, %s6409_s0  ;;  %v4007_v43 = vadd.f32 %v8574_v12, %v3991_v24  ;;  %v3988_v15 = vmul.f32 1.442695, %v3957_v48  ;;  %v3986_v28 = vmul.f32 1.442695, %v3956_v23  ;;  %v11791_v24 = vld [vmem:[#allocation260_spill] sm:$0xff] }
 0x9be   :  { %11780 = vst [vmem:[#allocation275_spill] sm:$0xff] %v8790_v1  ;;  %v8797_v2 = vpop.eup %6113  ;;  %6139 = vpow2.f32 %v3844_v34  ;;  %v4008_v49 = vadd.f32 %v8616_v36, %v3992_v50  ;;  %v11787_v34 = vld [vmem:[#allocation71_spill] sm:$0xff]  ;;  %v4009_v8 = vadd.f32 %v11791_v24, %v3993_v21  ;;  %v3994_v23 = vadd.f32 %v8668_v40, %v8662_v26  ;;  %v11798_v21 = vld [vmem:[#allocation261_spill] sm:$0xff] }
 0x9bf   :  { %v1679_v44 = vpop.permute.xlu1 %1678  ;;  %11783 = vst [vmem:[#allocation36_spill] sm:$0xff] %v8797_v2  ;;  %v8803_v32 = vpop.eup %6115  ;;  %6141 = vpow2.f32 %v3892_v63  ;;  %v8811_v14 = vadd.f32 %v11787_v34, %v4006_v45  ;;  %v8814_v60 = vadd.f32 %v11789_v61, %v4007_v43  ;;  %v11793_v63 = vld [vmem:[#allocation80_spill] sm:$0xff]  ;;  %v11797_v45 = vld [vmem:[#allocation42_spill] sm:$0xff] }
 0x9c0   :  { %11784 = vst [vmem:[#allocation49_spill] sm:$0xff] %v8803_v32  ;;  %v8806_v13 = vpop.eup %6117  ;;  %1748 = vrot.lane.b32.xlu0 %v1706_v17, %s6409_s0  ;;  %v1711_v30 = vmul.f32 %v1679_v44, %v11786_v25  ;;  %6143 = vpow2.f32 %v3938_v42  ;;  %v8821_v48 = vadd.f32 %v11793_v63, %v4008_v49  ;;  %v11795_v17 = vld [vmem:[#allocation263_spill] sm:$0xff]  ;;  %v1708_v43 = vmul.f32 %v1673_v5, %v11797_v45 }
 0x9c1   :  { %11785 = vst [vmem:[#allocation276_spill] sm:$0xff] %v8806_v13  ;;  %11788 = vst [vmem:[#allocation52_spill] sm:$0xff] %v8811_v14  ;;  %v8817_v38 = vpop.eup %6119  ;;  %1754 = vrot.lane.b32.xlu1 %v1709_v18, %s6409_s0  ;;  %v3995_v44 = vadd.f32 %v11795_v17, %v8645_v53  ;;  %6145 = vpow2.f32 %v3940_v58  ;;  %v8831_v25 = vadd.f32 %v11798_v21, %v4009_v8  ;;  %v1677_v18 = vpop.permute.xlu0 %1676 }
 0x9c2   :  { %11790 = vst [vmem:[#allocation277_spill] sm:$0xff] %v8814_v60  ;;  %11792 = vst [vmem:[#allocation278_spill] sm:$0xff] %v8817_v38  ;;  %v8827_v50 = vpop.eup %6121  ;;  %6147 = vpow2.f32 %v3986_v28  ;;  %v4010_v49 = vadd.f32 %v8673_v4, %v3994_v23  ;;  %v3996_v58 = vadd.f32 %v8710_v62, %v8704_v11  ;;  %v3997_v5 = vadd.f32 %v8686_v10, %v8683_v31  ;;  %v11804_v28 = vld [vmem:[#allocation257_spill] sm:$0xff] }
 0x9c3   :  { %11794 = vst [vmem:[#allocation279_spill] sm:$0xff] %v8821_v48  ;;  %11796 = vst [vmem:[#allocation280_spill] sm:$0xff] %v8827_v50  ;;  %v8833_v42 = vpop.eup %6123  ;;  %v4011_v37 = vadd.f32 %v11801_v55, %v3995_v44  ;;  %6149 = vpow2.f32 %v3988_v15  ;;  %v11806_v23 = vld [vmem:[#allocation265_spill] sm:$0xff]  ;;  %v3998_v15 = vadd.f32 %v8755_v35, %v8749_v29 }
 0x9c4   :  { %11799 = vst [vmem:[#allocation42_spill] sm:$0xff] %v8831_v25  ;;  %11800 = vst [vmem:[#allocation281_spill] sm:$0xff] %v8833_v42  ;;  %v8837_v26 = vpop.eup %6125  ;;  %1752 = vrot.lane.b32.xlu0 %v1708_v43, %s6409_s0  ;;  %v8848_v45 = vadd.f32 %v11804_v28, %v4010_v49  ;;  %v11809_v43 = vld [vmem:[#allocation44_spill] sm:$0xff]  ;;  %v4012_v11 = vadd.f32 %v8715_v3, %v3996_v58  ;;  %v4013_v48 = vadd.f32 %v8690_v59, %v3997_v5 }
 0x9c5   :  { %11802 = vst [vmem:[#allocation282_spill] sm:$0xff] %v8837_v26  ;;  %v8844_v8 = vpop.eup %6127  ;;  %1758 = vrot.lane.b32.xlu1 %v1711_v30, %s6409_s0  ;;  %v8851_v44 = vadd.f32 %v11806_v23, %v4011_v37  ;;  %v1710_v25 = vmul.f32 %v1677_v18, %v11809_v43  ;;  %v3999_v30 = vadd.f32 %v8734_v54, %v8729_v57 }
 0x9c6   :  { %11803 = vst [vmem:[#allocation283_spill] sm:$0xff] %v8844_v8  ;;  %11805 = vst [vmem:[#allocation284_spill] sm:$0xff] %v8848_v45  ;;  %v8853_v53 = vpop.eup %6129  ;;  %v8868_v37 = vadd.f32 %v8719_v20, %v4012_v11  ;;  %v8871_v18 = vadd.f32 %v8698_v46, %v4013_v48  ;;  %v4014_v5 = vadd.f32 %v8761_v47, %v3998_v15 }
 0x9c7   :  { %11807 = vst [vmem:[#allocation285_spill] sm:$0xff] %v8851_v44  ;;  %11808 = vst [vmem:[#allocation286_spill] sm:$0xff] %v8853_v53  ;;  %v8858_v31 = vpop.eup %6131  ;;  %v4015_v43 = vadd.f32 %v8739_v22, %v3999_v30  ;;  %v4000_v57 = vadd.f32 %v8797_v2, %v8790_v1  ;;  %v4002_v1 = vadd.f32 %v8853_v53, %v8844_v8 }
 0x9c8   :  { %11810 = vst [vmem:[#allocation44_spill] sm:$0xff] %v8858_v31  ;;  %v8864_v49 = vpop.eup %6133  ;;  %1756 = vrot.lane.b32.xlu0 %v1710_v25, %s6409_s0  ;;  %11812 = vst [vmem:[#allocation288_spill] sm:$0xff] %v8868_v37  ;;  %v4001_v25 = vadd.f32 %v8774_v33, %v8770_v9  ;;  %v8886_v11 = vadd.f32 %v8765_v27, %v4014_v5  ;;  %v4003_v9 = vadd.f32 %v8827_v50, %v8817_v38 }
 0x9c9   :  { %11811 = vst [vmem:[#allocation287_spill] sm:$0xff] %v8864_v49  ;;  %11813 = vst [vmem:[#allocation289_spill] sm:$0xff] %v8871_v18  ;;  %v8873_v58 = vpop.eup %6135  ;;  %v8889_v48 = vadd.f32 %v8742_v16, %v4015_v43  ;;  %v4016_v15 = vadd.f32 %v8803_v32, %v4000_v57  ;;  %v4018_v57 = vadd.f32 %v8858_v31, %v4002_v1 }
 0x9ca   :  { %11814 = vst [vmem:[#allocation290_spill] sm:$0xff] %v8873_v58  ;;  %v8877_v29 = vpop.eup %6137  ;;  %11817 = vst [vmem:[#allocation293_spill] sm:$0xff] %v8886_v11  ;;  %v4017_v30 = vadd.f32 %v8777_v6, %v4001_v25  ;;  %v4019_v8 = vadd.f32 %v8833_v42, %v4003_v9 }
 0x9cb   :  { %11815 = vst [vmem:[#allocation291_spill] sm:$0xff] %v8877_v29  ;;  %v8883_v44 = vpop.eup %6139  ;;  %11818 = vst [vmem:[#allocation294_spill] sm:$0xff] %v8889_v48  ;;  %v4004_v37 = vadd.f32 %v8877_v29, %v8873_v58  ;;  %v8904_v43 = vadd.f32 %v8806_v13, %v4016_v15  ;;  %v8919_v45 = vadd.f32 %v8864_v49, %v4018_v57 }
 0x9cc   :  { %11816 = vst [vmem:[#allocation292_spill] sm:$0xff] %v8883_v44  ;;  %v8891_v18 = vpop.eup %6141  ;;  %v8907_v48 = vadd.f32 %v8783_v51, %v4017_v30  ;;  %v8922_v15 = vadd.f32 %v8837_v26, %v4019_v8 }
 0x9cd   :  { %11819 = vst [vmem:[#allocation295_spill] sm:$0xff] %v8891_v18  ;;  %v8901_v5 = vpop.eup %6143  ;;  %11821 = vst [vmem:[#allocation297_spill] sm:$0xff] %v8904_v43  ;;  %v4005_v38 = vadd.f32 %v8891_v18, %v8883_v44 }
 0x9ce   :  { %11820 = vst [vmem:[#allocation296_spill] sm:$0xff] %v8901_v5  ;;  %11822 = vst [vmem:[#allocation298_spill] sm:$0xff] %v8907_v48  ;;  %v8910_v25 = vpop.eup %6145  ;;  %v4020_v11 = vadd.f32 %v8901_v5, %v4004_v37 }
 0x9cf   :  { %11823 = vst [vmem:[#allocation299_spill] sm:$0xff] %v8910_v25  ;;  %v8916_v58 = vpop.eup %6147  ;;  %11825 = vst [vmem:[#allocation301_spill] sm:$0xff] %v8919_v45  ;;  %v4021_v1 = vadd.f32 %v8910_v25, %v4005_v38 }
 0x9d0   :  { %11824 = vst [vmem:[#allocation300_spill] sm:$0xff] %v8916_v58  ;;  %11826 = vst [vmem:[#allocation302_spill] sm:$0xff] %v8922_v15  ;;  %v8925_v30 = vadd.f32 %v8916_v58, %v4020_v11  ;;  %v8928_v48 = vpop.eup %6149 }
 0x9d1   :  { %11828 = vst [vmem:[#allocation304_spill] sm:$0xff] %v8928_v48  ;;  %v8931_v9 = vadd.f32 %v8928_v48, %v4021_v1 }
 0x9d2   :  { %11827 = vst [vmem:[#allocation303_spill] sm:$0xff] %v8925_v30 }
 0x9d3   :  { %11829 = vst [vmem:[#allocation305_spill] sm:$0xff] %v8931_v9 }
 0xa15   :  { %v1731_v37 = vpop.permute.xlu1 %1730 }
 0xa16   :  { %v1779_v44 = vsel %vm271_vm1, %v1731_v37, 0.0 }
 0xa17   :  { %1780 = vadd.xlane.f32.xlu1 %v1779_v44 }
 0xa1e   :  { %v1729_v43 = vpop.permute.xlu0 %1728 }
 0xa1f   :  { %v1776_v57 = vsel %vm271_vm1, %v1729_v43, 0.0  ;;  %v1735_v45 = vpop.permute.xlu1 %1734 }
 0xa20   :  { %1777 = vadd.xlane.f32.xlu0 %v1776_v57  ;;  %v1785_v15 = vsel %vm271_vm1, %v1735_v45, 0.0 }
 0xa22   :  { %v1733_v8 = vpop.permute.xlu0 %1732 }
 0xa23   :  { %v1782_v11 = vsel %vm271_vm1, %v1733_v8, 0.0  ;;  %v1739_v30 = vpop.permute.xlu1 %1738 }
 0xa24   :  { %1783 = vadd.xlane.f32.xlu0 %v1782_v11  ;;  %v1791_v38 = vsel %vm271_vm1, %v1739_v30, 0.0 }
 0xa25   :  { %1792 = vadd.xlane.f32.xlu1 %v1791_v38 }
 0xa26   :  { %v1737_v1 = vpop.permute.xlu0 %1736 }
 0xa27   :  { %v1743_v9 = vpop.permute.xlu1 %1742  ;;  %v1788_v43 = vsel %vm271_vm1, %v1737_v1, 0.0 }
 0xa28   :  { %1786 = vadd.xlane.f32.xlu0 %v1785_v15  ;;  %v1797_v44 = vsel %vm271_vm1, %v1743_v9, 0.0 }
 0xa29   :  { %1798 = vadd.xlane.f32.xlu1 %v1797_v44 }
 0xa2a   :  { %v1741_v37 = vpop.permute.xlu0 %1740 }
 0xa2b   :  { %v1747_v57 = vpop.permute.xlu1 %1746  ;;  %v1794_v30 = vsel %vm271_vm1, %v1741_v37, 0.0 }
 0xa2c   :  { %1789 = vadd.xlane.f32.xlu0 %v1788_v43  ;;  %v1803_v8 = vsel %vm271_vm1, %v1747_v57, 0.0 }
 0xa2d   :  { %1804 = vadd.xlane.f32.xlu1 %v1803_v8 }
 0xa2e   :  { %v1745_v11 = vpop.permute.xlu0 %1744 }
 0xa2f   :  { %v1751_v48 = vpop.permute.xlu1 %1750  ;;  %v1800_v9 = vsel %vm271_vm1, %v1745_v11, 0.0  ;;  %v11830_v11 = vld [vmem:[#allocation6_spill] sm:$0xff] }
 0xa30   :  { %1795 = vadd.xlane.f32.xlu0 %v1794_v30  ;;  %v1809_v45 = vsel %vm271_vm1, %v1751_v48, 0.0 }
 0xa31   :  { %1810 = vadd.xlane.f32.xlu1 %v1809_v45  ;;  %v11831_v45 = vld [vmem:[#allocation190_spill] sm:$0xff] }
 0xa32   :  { %v1749_v15 = vpop.permute.xlu0 %1748 }
 0xa33   :  { %v1755_v38 = vpop.permute.xlu1 %1754  ;;  %v1806_v43 = vsel %vm271_vm1, %v1749_v15, 0.0  ;;  %v11832_v15 = vld [vmem:[#allocation191_spill] sm:$0xff] }
 0xa34   :  { %1801 = vadd.xlane.f32.xlu0 %v1800_v9  ;;  %v1815_v1 = vsel %vm271_vm1, %v1755_v38, 0.0  ;;  %v11833_v9 = vld [vmem:[#allocation187_spill] sm:$0xff] }
 0xa35   :  { %1816 = vadd.xlane.f32.xlu1 %v1815_v1  ;;  %v11834_v38 = vld [vmem:[#allocation195_spill] sm:$0xff]  ;;  %v11835_v1 = vld [vmem:[#allocation198_spill] sm:$0xff] }
 0xa36   :  { %v1753_v44 = vpop.permute.xlu0 %1752 }
 0xa37   :  { %v1759_v57 = vpop.permute.xlu1 %1758  ;;  %v1812_v8 = vsel %vm271_vm1, %v1753_v44, 0.0  ;;  %v11836_v44 = vld [vmem:[#allocation201_spill] sm:$0xff] }
 0xa38   :  { %1807 = vadd.xlane.f32.xlu0 %v1806_v43  ;;  %v1821_v37 = vsel %vm271_vm1, %v1759_v57, 0.0  ;;  %v11837_v43 = vld [vmem:[#allocation204_spill] sm:$0xff]  ;;  %v11838_v57 = vld [vmem:[#allocation207_spill] sm:$0xff] }
 0xa39   :  { %1822 = vadd.xlane.f32.xlu1 %v1821_v37  ;;  %v11839_v37 = vld [vmem:[#allocation209_spill] sm:$0xff] }
 0xa3a   :  { %v1757_v48 = vpop.permute.xlu0 %1756 }
 0xa3b   :  { %v1818_v30 = vsel %vm271_vm1, %v1757_v48, 0.0  ;;  %v11841_v48 = vld [vmem:[#allocation215_spill] sm:$0xff] }
 0xa3c   :  { %1813 = vadd.xlane.f32.xlu0 %v1812_v8  ;;  %v11840_v8 = vld [vmem:[#allocation212_spill] sm:$0xff] }
 0xa40   :  { %1819 = vadd.xlane.f32.xlu0 %v1818_v30  ;;  %v11842_v30 = vld [vmem:[#allocation219_spill] sm:$0xff] }
 0xa4a   :  { %1826 = vrot.lane.b32.xlu1 %v11830_v11, %s6409_s0  ;;  %v11843_v11 = vld [vmem:[#allocation223_spill] sm:$0xff] }
 0xa4e   :  { %1828 = vrot.lane.b32.xlu1 %v11831_v45, %s6409_s0  ;;  %v11844_v45 = vld [vmem:[#allocation227_spill] sm:$0xff] }
 0xa52   :  { %1830 = vrot.lane.b32.xlu1 %v11832_v15, %s6409_s0  ;;  %v11845_v15 = vld [vmem:[#allocation231_spill] sm:$0xff] }
 0xa56   :  { %1824 = vrot.lane.b32.xlu0 %v11833_v9, %s6409_s0  ;;  %1834 = vrot.lane.b32.xlu1 %v11834_v38, %s6409_s0 }
 0xa5a   :  { %1832 = vrot.lane.b32.xlu0 %v11835_v1, %s6409_s0  ;;  %1838 = vrot.lane.b32.xlu1 %v11836_v44, %s6409_s0 }
 0xa5e   :  { %1836 = vrot.lane.b32.xlu0 %v11837_v43, %s6409_s0  ;;  %1842 = vrot.lane.b32.xlu1 %v11838_v57, %s6409_s0 }
 0xa62   :  { %1840 = vrot.lane.b32.xlu0 %v11839_v37, %s6409_s0  ;;  %1846 = vrot.lane.b32.xlu1 %v11840_v8, %s6409_s0 }
 0xa66   :  { %1844 = vrot.lane.b32.xlu0 %v11841_v48, %s6409_s0  ;;  %1850 = vrot.lane.b32.xlu1 %v11842_v30, %s6409_s0 }
 0xa6a   :  { %1848 = vrot.lane.b32.xlu0 %v11843_v11, %s6409_s0  ;;  %1854 = vrot.lane.b32.xlu1 %v11844_v45, %s6409_s0 }
 0xa6e   :  { %1852 = vrot.lane.b32.xlu0 %v11845_v15, %s6409_s0 }
 0xaa0   :  { %v8983_v38 = vpop.xlane.xlu1 %1780 }
 0xaa9   :  { %v8981_v9 = vpop.xlane.xlu0 %1777 }
 0xaad   :  { %v8985_v1 = vpop.xlane.xlu0 %1783 }
 0xaae   :  { %v8987_v44 = vpop.xlane.xlu1 %1792 }
 0xab1   :  { %v8989_v43 = vpop.xlane.xlu0 %1786 }
 0xab2   :  { %v8991_v57 = vpop.xlane.xlu1 %1798 }
 0xab5   :  { %v8993_v37 = vpop.xlane.xlu0 %1789 }
 0xab6   :  { %v8995_v8 = vpop.xlane.xlu1 %1804 }
 0xab7   :  { %11846 = vst [vmem:[#allocation6_spill] sm:$0xff] %v8995_v8 }
 0xab9   :  { %v8997_v48 = vpop.xlane.xlu0 %1795 }
 0xaba   :  { %v8999_v30 = vpop.xlane.xlu1 %1810 }
 0xabb   :  { %11847 = vst [vmem:[#allocation190_spill] sm:$0xff] %v8999_v30 }
 0xabd   :  { %v9001_v11 = vpop.xlane.xlu0 %1801 }
 0xabe   :  { %11848 = vst [vmem:[#allocation191_spill] sm:$0xff] %v9001_v11  ;;  %v9003_v45 = vpop.xlane.xlu1 %1816 }
 0xabf   :  { %11849 = vst [vmem:[#allocation187_spill] sm:$0xff] %v9003_v45 }
 0xac1   :  { %v9005_v15 = vpop.xlane.xlu0 %1807 }
 0xac2   :  { %11850 = vst [vmem:[#allocation195_spill] sm:$0xff] %v9005_v15  ;;  %v9007_v58 = vpop.xlane.xlu1 %1822 }
 0xac3   :  { %11851 = vst [vmem:[#allocation198_spill] sm:$0xff] %v9007_v58  ;;  %v11931_v58 = vld [vmem:[#allocation164_spill] sm:$0xff] }
 0xac5   :  { %v9009_v25 = vpop.xlane.xlu0 %1813 }
 0xac6   :  { %11852 = vst [vmem:[#allocation201_spill] sm:$0xff] %v9009_v25  ;;  %v1827_v5 = vpop.permute.xlu1 %1826  ;;  %v11927_v25 = vld [vmem:[#allocation158_spill] sm:$0xff] }
 0xac7   :  { %v1875_v26 = vsel %vm271_vm1, %v1827_v5, 0.0 }
 0xac8   :  { %1876 = vadd.xlane.f32.xlu1 %v1875_v26 }
 0xac9   :  { %v9012_v18 = vpop.xlane.xlu0 %1819 }
 0xaca   :  { %11853 = vst [vmem:[#allocation204_spill] sm:$0xff] %v9012_v18  ;;  %v1829_v29 = vpop.permute.xlu1 %1828  ;;  %v11923_v18 = vld [vmem:[#allocation138_spill] sm:$0xff] }
 0xacb   :  { %v1878_v51 = vsel %vm271_vm1, %v1829_v29, 0.0 }
 0xacd   :  { %v1825_v49 = vpop.permute.xlu0 %1824 }
 0xace   :  { %v1872_v42 = vsel %vm271_vm1, %v1825_v49, 0.0  ;;  %v1831_v31 = vpop.permute.xlu1 %1830 }
 0xacf   :  { %1873 = vadd.xlane.f32.xlu0 %v1872_v42  ;;  %v1881_v60 = vsel %vm271_vm1, %v1831_v31, 0.0 }
 0xad1   :  { %v1833_v39 = vpop.permute.xlu0 %1832 }
 0xad2   :  { %v1835_v50 = vpop.permute.xlu1 %1834  ;;  %v1884_v49 = vsel %vm271_vm1, %v1833_v39, 0.0 }
 0xad3   :  { %1879 = vadd.xlane.f32.xlu0 %v1878_v51  ;;  %v1887_v53 = vsel %vm271_vm1, %v1835_v50, 0.0 }
 0xad4   :  { %1888 = vadd.xlane.f32.xlu1 %v1887_v53 }
 0xad5   :  { %v1837_v5 = vpop.permute.xlu0 %1836 }
 0xad6   :  { %v1839_v26 = vpop.permute.xlu1 %1838  ;;  %v1890_v51 = vsel %vm271_vm1, %v1837_v5, 0.0 }
 0xad7   :  { %1882 = vadd.xlane.f32.xlu0 %v1881_v60  ;;  %v1893_v13 = vsel %vm271_vm1, %v1839_v26, 0.0 }
 0xad8   :  { %1894 = vadd.xlane.f32.xlu1 %v1893_v13 }
 0xad9   :  { %v1841_v19 = vpop.permute.xlu0 %1840 }
 0xada   :  { %v1843_v42 = vpop.permute.xlu1 %1842  ;;  %v1896_v31 = vsel %vm271_vm1, %v1841_v19, 0.0  ;;  %v11854_v19 = vld [vmem:[#allocation145_spill] sm:$0xff] }
 0xadb   :  { %1885 = vadd.xlane.f32.xlu0 %v1884_v49  ;;  %v1899_v29 = vsel %vm271_vm1, %v1843_v42, 0.0 }
 0xadc   :  { %1900 = vadd.xlane.f32.xlu1 %v1899_v29 }
 0xadd   :  { %v1845_v14 = vpop.permute.xlu0 %1844 }
 0xade   :  { %v1847_v50 = vpop.permute.xlu1 %1846  ;;  %v1902_v26 = vsel %vm271_vm1, %v1845_v14, 0.0  ;;  %v11856_v14 = vld [vmem:[#allocation155_spill] sm:$0xff] }
 0xadf   :  { %1891 = vadd.xlane.f32.xlu0 %v1890_v51  ;;  %v1905_v53 = vsel %vm271_vm1, %v1847_v50, 0.0  ;;  %v11855_v50 = vld [vmem:[#allocation149_spill] sm:$0xff] }
 0xae0   :  { %1906 = vadd.xlane.f32.xlu1 %v1905_v53  ;;  %v11857_v53 = vld [vmem:[#allocation139_spill] sm:$0xff] }
 0xae1   :  { %v1849_v39 = vpop.permute.xlu0 %1848 }
 0xae2   :  { %v1851_v60 = vpop.permute.xlu1 %1850  ;;  %v1908_v42 = vsel %vm271_vm1, %v1849_v39, 0.0  ;;  %v11861_v39 = vld [vmem:[#allocation159_spill] sm:$0xff] }
 0xae3   :  { %1897 = vadd.xlane.f32.xlu0 %v1896_v31  ;;  %v1911_v13 = vsel %vm271_vm1, %v1851_v60, 0.0  ;;  %v11858_v31 = vld [vmem:[#allocation160_spill] sm:$0xff]  ;;  %v11859_v60 = vld [vmem:[#allocation154_spill] sm:$0xff] }
 0xae4   :  { %1912 = vadd.xlane.f32.xlu1 %v1911_v13  ;;  %v11860_v13 = vld [vmem:[#allocation166_spill] sm:$0xff] }
 0xae5   :  { %v1853_v29 = vpop.permute.xlu0 %1852 }
 0xae6   :  { %v1855_v49 = vpop.permute.xlu1 %1854  ;;  %v1914_v51 = vsel %vm271_vm1, %v1853_v29, 0.0  ;;  %v11866_v29 = vld [vmem:[#allocation176_spill] sm:$0xff] }
 0xae7   :  { %1903 = vadd.xlane.f32.xlu0 %v1902_v26  ;;  %v1917_v5 = vsel %vm271_vm1, %v1855_v49, 0.0  ;;  %v11862_v26 = vld [vmem:[#allocation171_spill] sm:$0xff]  ;;  %v11863_v49 = vld [vmem:[#allocation165_spill] sm:$0xff] }
 0xae8   :  { %1918 = vadd.xlane.f32.xlu1 %v1917_v5  ;;  %v11864_v5 = vld [vmem:[#allocation174_spill] sm:$0xff] }
 0xaeb   :  { %1909 = vadd.xlane.f32.xlu0 %v1908_v42  ;;  %v11865_v42 = vld [vmem:[#allocation170_spill] sm:$0xff] }
 0xaef   :  { %1915 = vadd.xlane.f32.xlu0 %v1914_v51  ;;  %v11867_v51 = vld [vmem:[#allocation173_spill] sm:$0xff] }
 0xaf9   :  { %1922 = vrot.lane.b32.xlu1 %v11854_v19, %s6409_s0  ;;  %v11868_v19 = vld [vmem:[#allocation177_spill] sm:$0xff] }
 0xafd   :  { %1924 = vrot.lane.b32.xlu1 %v11855_v50, %s6409_s0  ;;  %v11869_v50 = vld [vmem:[#allocation175_spill] sm:$0xff] }
 0xb01   :  { %1926 = vrot.lane.b32.xlu1 %v11856_v14, %s6409_s0 }
 0xb05   :  { %1920 = vrot.lane.b32.xlu0 %v11857_v53, %s6409_s0  ;;  %1930 = vrot.lane.b32.xlu1 %v11858_v31, %s6409_s0 }
 0xb09   :  { %1928 = vrot.lane.b32.xlu0 %v11859_v60, %s6409_s0  ;;  %1934 = vrot.lane.b32.xlu1 %v11860_v13, %s6409_s0 }
 0xb0d   :  { %1932 = vrot.lane.b32.xlu0 %v11861_v39, %s6409_s0  ;;  %1938 = vrot.lane.b32.xlu1 %v11862_v26, %s6409_s0 }
 0xb11   :  { %1936 = vrot.lane.b32.xlu0 %v11863_v49, %s6409_s0  ;;  %1942 = vrot.lane.b32.xlu1 %v11864_v5, %s6409_s0 }
 0xb15   :  { %1940 = vrot.lane.b32.xlu0 %v11865_v42, %s6409_s0  ;;  %1946 = vrot.lane.b32.xlu1 %v11866_v29, %s6409_s0 }
 0xb19   :  { %1944 = vrot.lane.b32.xlu0 %v11867_v51, %s6409_s0  ;;  %1950 = vrot.lane.b32.xlu1 %v11868_v19, %s6409_s0 }
 0xb1d   :  { %1948 = vrot.lane.b32.xlu0 %v11869_v50, %s6409_s0 }
 0xb51   :  { %v9063_v53 = vpop.xlane.xlu1 %1876 }
 0xb58   :  { %v9061_v14 = vpop.xlane.xlu0 %1873 }
 0xb5c   :  { %v9065_v31 = vpop.xlane.xlu0 %1879 }
 0xb5d   :  { %v9067_v60 = vpop.xlane.xlu1 %1888 }
 0xb60   :  { %v9069_v13 = vpop.xlane.xlu0 %1882 }
 0xb61   :  { %v9071_v39 = vpop.xlane.xlu1 %1894 }
 0xb64   :  { %v9073_v26 = vpop.xlane.xlu0 %1885 }
 0xb65   :  { %v9075_v49 = vpop.xlane.xlu1 %1900 }
 0xb66   :  { %11870 = vst [vmem:[#allocation207_spill] sm:$0xff] %v9075_v49 }
 0xb68   :  { %v9077_v5 = vpop.xlane.xlu0 %1891 }
 0xb69   :  { %v9079_v42 = vpop.xlane.xlu1 %1906 }
 0xb6a   :  { %11871 = vst [vmem:[#allocation209_spill] sm:$0xff] %v9079_v42 }
 0xb6c   :  { %v9081_v29 = vpop.xlane.xlu0 %1897 }
 0xb6d   :  { %11872 = vst [vmem:[#allocation212_spill] sm:$0xff] %v9081_v29  ;;  %v9083_v51 = vpop.xlane.xlu1 %1912 }
 0xb6e   :  { %11873 = vst [vmem:[#allocation215_spill] sm:$0xff] %v9083_v51 }
 0xb70   :  { %v9085_v19 = vpop.xlane.xlu0 %1903 }
 0xb71   :  { %11874 = vst [vmem:[#allocation219_spill] sm:$0xff] %v9085_v19  ;;  %v9087_v50 = vpop.xlane.xlu1 %1918  ;;  %v11968_v19 = vld [vmem:[#allocation89_spill] sm:$0xff] }
 0xb72   :  { %11875 = vst [vmem:[#allocation223_spill] sm:$0xff] %v9087_v50  ;;  %v11934_v50 = vld [vmem:[#allocation99_spill] sm:$0xff] }
 0xb74   :  { %v9089_v6 = vpop.xlane.xlu0 %1909 }
 0xb75   :  { %11876 = vst [vmem:[#allocation227_spill] sm:$0xff] %v9089_v6  ;;  %v1923_v32 = vpop.permute.xlu1 %1922  ;;  %v11930_v6 = vld [vmem:[#allocation41_spill] sm:$0xff] }
 0xb76   :  { %v1971_v16 = vsel %vm271_vm1, %v1923_v32, 0.0 }
 0xb77   :  { %1972 = vadd.xlane.f32.xlu1 %v1971_v16 }
 0xb78   :  { %v9092_v33 = vpop.xlane.xlu0 %1915 }
 0xb79   :  { %11877 = vst [vmem:[#allocation231_spill] sm:$0xff] %v9092_v33  ;;  %v1925_v2 = vpop.permute.xlu1 %1924  ;;  %v11926_v33 = vld [vmem:[#allocation35_spill] sm:$0xff] }
 0xb7a   :  { %v1974_v46 = vsel %vm271_vm1, %v1925_v2, 0.0 }
 0xb7c   :  { %v1921_v27 = vpop.permute.xlu0 %1920 }
 0xb7d   :  { %v1968_v22 = vsel %vm271_vm1, %v1921_v27, 0.0  ;;  %v1927_v47 = vpop.permute.xlu1 %1926 }
 0xb7e   :  { %1969 = vadd.xlane.f32.xlu0 %v1968_v22  ;;  %v1977_v59 = vsel %vm271_vm1, %v1927_v47, 0.0 }
 0xb80   :  { %v1929_v54 = vpop.permute.xlu0 %1928 }
 0xb81   :  { %v1931_v35 = vpop.permute.xlu1 %1930  ;;  %v1980_v27 = vsel %vm271_vm1, %v1929_v54, 0.0 }
 0xb82   :  { %1975 = vadd.xlane.f32.xlu0 %v1974_v46  ;;  %v1983_v20 = vsel %vm271_vm1, %v1931_v35, 0.0 }
 0xb83   :  { %1984 = vadd.xlane.f32.xlu1 %v1983_v20 }
 0xb84   :  { %v1933_v32 = vpop.permute.xlu0 %1932 }
 0xb85   :  { %v1935_v16 = vpop.permute.xlu1 %1934  ;;  %v1986_v46 = vsel %vm271_vm1, %v1933_v32, 0.0 }
 0xb86   :  { %1978 = vadd.xlane.f32.xlu0 %v1977_v59  ;;  %v1989_v3 = vsel %vm271_vm1, %v1935_v16, 0.0 }
 0xb87   :  { %1990 = vadd.xlane.f32.xlu1 %v1989_v3 }
 0xb88   :  { %v1937_v23 = vpop.permute.xlu0 %1936 }
 0xb89   :  { %v1939_v22 = vpop.permute.xlu1 %1938  ;;  %v1992_v59 = vsel %vm271_vm1, %v1937_v23, 0.0  ;;  %v11878_v23 = vld [vmem:[#allocation8_spill] sm:$0xff] }
 0xb8a   :  { %1981 = vadd.xlane.f32.xlu0 %v1980_v27  ;;  %v1995_v2 = vsel %vm271_vm1, %v1939_v22, 0.0 }
 0xb8b   :  { %1996 = vadd.xlane.f32.xlu1 %v1995_v2 }
 0xb8c   :  { %v1941_v10 = vpop.permute.xlu0 %1940 }
 0xb8d   :  { %v1943_v35 = vpop.permute.xlu1 %1942  ;;  %v1998_v16 = vsel %vm271_vm1, %v1941_v10, 0.0  ;;  %v11880_v10 = vld [vmem:[#allocation14_spill] sm:$0xff] }
 0xb8e   :  { %1987 = vadd.xlane.f32.xlu0 %v1986_v46  ;;  %v2001_v20 = vsel %vm271_vm1, %v1943_v35, 0.0  ;;  %v11879_v35 = vld [vmem:[#allocation16_spill] sm:$0xff] }
 0xb8f   :  { %2002 = vadd.xlane.f32.xlu1 %v2001_v20  ;;  %v11881_v20 = vld [vmem:[#allocation10_spill] sm:$0xff] }
 0xb90   :  { %v1945_v54 = vpop.permute.xlu0 %1944 }
 0xb91   :  { %v1947_v47 = vpop.permute.xlu1 %1946  ;;  %v2004_v22 = vsel %vm271_vm1, %v1945_v54, 0.0  ;;  %v11885_v54 = vld [vmem:[#allocation25_spill] sm:$0xff] }
 0xb92   :  { %1993 = vadd.xlane.f32.xlu0 %v1992_v59  ;;  %v2007_v3 = vsel %vm271_vm1, %v1947_v47, 0.0  ;;  %v11882_v59 = vld [vmem:[#allocation22_spill] sm:$0xff]  ;;  %v11883_v47 = vld [vmem:[#allocation19_spill] sm:$0xff] }
 0xb93   :  { %2008 = vadd.xlane.f32.xlu1 %v2007_v3  ;;  %v11884_v3 = vld [vmem:[#allocation28_spill] sm:$0xff] }
 0xb94   :  { %v1949_v2 = vpop.permute.xlu0 %1948 }
 0xb95   :  { %v1951_v27 = vpop.permute.xlu1 %1950  ;;  %v2010_v46 = vsel %vm271_vm1, %v1949_v2, 0.0  ;;  %v11890_v2 = vld [vmem:[#allocation51_spill] sm:$0xff] }
 0xb96   :  { %1999 = vadd.xlane.f32.xlu0 %v1998_v16  ;;  %v2013_v32 = vsel %vm271_vm1, %v1951_v27, 0.0  ;;  %v11886_v16 = vld [vmem:[#allocation34_spill] sm:$0xff]  ;;  %v11887_v27 = vld [vmem:[#allocation31_spill] sm:$0xff] }
 0xb97   :  { %2014 = vadd.xlane.f32.xlu1 %v2013_v32  ;;  %v11888_v32 = vld [vmem:[#allocation40_spill] sm:$0xff] }
 0xb9a   :  { %2005 = vadd.xlane.f32.xlu0 %v2004_v22  ;;  %v11889_v22 = vld [vmem:[#allocation37_spill] sm:$0xff] }
 0xb9e   :  { %2011 = vadd.xlane.f32.xlu0 %v2010_v46  ;;  %v11891_v46 = vld [vmem:[#allocation43_spill] sm:$0xff] }
 0xba8   :  { %2018 = vrot.lane.b32.xlu1 %v11878_v23, %s6409_s0  ;;  %v11892_v23 = vld [vmem:[#allocation53_spill] sm:$0xff] }
 0xbac   :  { %2020 = vrot.lane.b32.xlu1 %v11879_v35, %s6409_s0  ;;  %v11893_v35 = vld [vmem:[#allocation45_spill] sm:$0xff] }
 0xbb0   :  { %2022 = vrot.lane.b32.xlu1 %v11880_v10, %s6409_s0 }
 0xbb4   :  { %2016 = vrot.lane.b32.xlu0 %v11881_v20, %s6409_s0  ;;  %2026 = vrot.lane.b32.xlu1 %v11882_v59, %s6409_s0 }
 0xbb8   :  { %2024 = vrot.lane.b32.xlu0 %v11883_v47, %s6409_s0  ;;  %2030 = vrot.lane.b32.xlu1 %v11884_v3, %s6409_s0 }
 0xbbc   :  { %2028 = vrot.lane.b32.xlu0 %v11885_v54, %s6409_s0  ;;  %2034 = vrot.lane.b32.xlu1 %v11886_v16, %s6409_s0 }
 0xbc0   :  { %2032 = vrot.lane.b32.xlu0 %v11887_v27, %s6409_s0  ;;  %2038 = vrot.lane.b32.xlu1 %v11888_v32, %s6409_s0 }
 0xbc4   :  { %2036 = vrot.lane.b32.xlu0 %v11889_v22, %s6409_s0  ;;  %2042 = vrot.lane.b32.xlu1 %v11890_v2, %s6409_s0 }
 0xbc8   :  { %2040 = vrot.lane.b32.xlu0 %v11891_v46, %s6409_s0  ;;  %2046 = vrot.lane.b32.xlu1 %v11892_v23, %s6409_s0 }
 0xbcc   :  { %2044 = vrot.lane.b32.xlu0 %v11893_v35, %s6409_s0 }
 0xc00   :  { %v9143_v20 = vpop.xlane.xlu1 %1972 }
 0xc07   :  { %v9141_v10 = vpop.xlane.xlu0 %1969 }
 0xc0b   :  { %v9145_v59 = vpop.xlane.xlu0 %1975 }
 0xc0c   :  { %v9147_v47 = vpop.xlane.xlu1 %1984 }
 0xc0f   :  { %v9149_v3 = vpop.xlane.xlu0 %1978 }
 0xc10   :  { %v9151_v54 = vpop.xlane.xlu1 %1990 }
 0xc13   :  { %v9153_v16 = vpop.xlane.xlu0 %1981 }
 0xc14   :  { %v9155_v27 = vpop.xlane.xlu1 %1996 }
 0xc15   :  { %11894 = vst [vmem:[#allocation145_spill] sm:$0xff] %v9155_v27  ;;  %v11977_v27 = vld [vmem:[#allocation118_spill] sm:$0xff] }
 0xc17   :  { %v9157_v32 = vpop.xlane.xlu0 %1987 }
 0xc18   :  { %v9159_v22 = vpop.xlane.xlu1 %2002 }
 0xc19   :  { %11895 = vst [vmem:[#allocation149_spill] sm:$0xff] %v9159_v22 }
 0xc1b   :  { %v9161_v2 = vpop.xlane.xlu0 %1993 }
 0xc1c   :  { %11896 = vst [vmem:[#allocation155_spill] sm:$0xff] %v9161_v2  ;;  %v9163_v46 = vpop.xlane.xlu1 %2008  ;;  %v11974_v2 = vld [vmem:[#allocation110_spill] sm:$0xff] }
 0xc1d   :  { %11897 = vst [vmem:[#allocation139_spill] sm:$0xff] %v9163_v46  ;;  %v11922_v46 = vld [vmem:[#allocation29_spill] sm:$0xff] }
 0xc1f   :  { %v9165_v23 = vpop.xlane.xlu0 %1999 }
 0xc20   :  { %11898 = vst [vmem:[#allocation160_spill] sm:$0xff] %v9165_v23  ;;  %v9167_v35 = vpop.xlane.xlu1 %2014 }
 0xc21   :  { %11899 = vst [vmem:[#allocation154_spill] sm:$0xff] %v9167_v35  ;;  %v11919_v35 = vld [vmem:[#allocation126_spill] sm:$0xff] }
 0xc23   :  { %v9169_v62 = vpop.xlane.xlu0 %2005 }
 0xc24   :  { %11900 = vst [vmem:[#allocation166_spill] sm:$0xff] %v9169_v62  ;;  %v2019_v28 = vpop.permute.xlu1 %2018  ;;  %v11918_v62 = vld [vmem:[#allocation23_spill] sm:$0xff] }
 0xc25   :  { %v2067_v55 = vsel %vm271_vm1, %v2019_v28, 0.0 }
 0xc26   :  { %2068 = vadd.xlane.f32.xlu1 %v2067_v55 }
 0xc27   :  { %v9172_v4 = vpop.xlane.xlu0 %2011 }
 0xc28   :  { %11901 = vst [vmem:[#allocation159_spill] sm:$0xff] %v9172_v4  ;;  %v2021_v21 = vpop.permute.xlu1 %2020 }
 0xc29   :  { %v2070_v24 = vsel %vm271_vm1, %v2021_v21, 0.0 }
 0xc2b   :  { %v2017_v17 = vpop.permute.xlu0 %2016 }
 0xc2c   :  { %v2064_v40 = vsel %vm271_vm1, %v2017_v17, 0.0  ;;  %v2023_v63 = vpop.permute.xlu1 %2022 }
 0xc2d   :  { %2065 = vadd.xlane.f32.xlu0 %v2064_v40  ;;  %v2073_v56 = vsel %vm271_vm1, %v2023_v63, 0.0 }
 0xc2f   :  { %v2025_v36 = vpop.permute.xlu0 %2024 }
 0xc30   :  { %v2027_v61 = vpop.permute.xlu1 %2026  ;;  %v2076_v17 = vsel %vm271_vm1, %v2025_v36, 0.0 }
 0xc31   :  { %2071 = vadd.xlane.f32.xlu0 %v2070_v24  ;;  %v2079_v0 = vsel %vm271_vm1, %v2027_v61, 0.0 }
 0xc32   :  { %2080 = vadd.xlane.f32.xlu1 %v2079_v0 }
 0xc33   :  { %v2029_v28 = vpop.permute.xlu0 %2028 }
 0xc34   :  { %v2031_v55 = vpop.permute.xlu1 %2030  ;;  %v2082_v24 = vsel %vm271_vm1, %v2029_v28, 0.0 }
 0xc35   :  { %2074 = vadd.xlane.f32.xlu0 %v2073_v56  ;;  %v2085_v34 = vsel %vm271_vm1, %v2031_v55, 0.0 }
 0xc36   :  { %2086 = vadd.xlane.f32.xlu1 %v2085_v34 }
 0xc37   :  { %v2033_v12 = vpop.permute.xlu0 %2032 }
 0xc38   :  { %v2035_v40 = vpop.permute.xlu1 %2034  ;;  %v2088_v56 = vsel %vm271_vm1, %v2033_v12, 0.0  ;;  %v11902_v12 = vld [vmem:[#allocation2_spill] sm:$0xff] }
 0xc39   :  { %2077 = vadd.xlane.f32.xlu0 %v2076_v17  ;;  %v2091_v21 = vsel %vm271_vm1, %v2035_v40, 0.0 }
 0xc3a   :  { %2092 = vadd.xlane.f32.xlu1 %v2091_v21 }
 0xc3b   :  { %v2037_v41 = vpop.permute.xlu0 %2036 }
 0xc3c   :  { %v2039_v61 = vpop.permute.xlu1 %2038  ;;  %v2094_v55 = vsel %vm271_vm1, %v2037_v41, 0.0 }
 0xc3d   :  { %2083 = vadd.xlane.f32.xlu0 %v2082_v24  ;;  %v2097_v0 = vsel %vm271_vm1, %v2039_v61, 0.0  ;;  %v11903_v61 = vld [vmem:[#allocation97_spill] sm:$0xff] }
 0xc3e   :  { %2098 = vadd.xlane.f32.xlu1 %v2097_v0  ;;  %v2437_v0 = vmul.f32 %v11903_v61, %v11902_v12  ;;  %v11912_v61 = vld [vmem:[#allocation11_spill] sm:$0xff] }
 0xc3f   :  { %v2041_v36 = vpop.permute.xlu0 %2040 }
 0xc40   :  { %v2043_v63 = vpop.permute.xlu1 %2042  ;;  %v2100_v40 = vsel %vm271_vm1, %v2041_v36, 0.0  ;;  %v11908_v36 = vld [vmem:[#allocation3_spill] sm:$0xff] }
 0xc41   :  { %2089 = vadd.xlane.f32.xlu0 %v2088_v56  ;;  %v2103_v34 = vsel %vm271_vm1, %v2043_v63, 0.0  ;;  %v11904_v56 = vld [vmem:[#allocation5_spill] sm:$0xff] }
 0xc42   :  { %2104 = vadd.xlane.f32.xlu1 %v2103_v34  ;;  %v11905_v63 = vld [vmem:[#allocation93_spill] sm:$0xff]  ;;  %v11906_v34 = vld [vmem:[#allocation4_spill] sm:$0xff] }
 0xc43   :  { %v2045_v21 = vpop.permute.xlu0 %2044  ;;  %v2438_v41 = vmul.f32 %v11905_v63, %v11904_v56  ;;  %v2535_v22 = vmul.f32 %v11968_v19, %v11906_v34  ;;  %v11971_v19 = vld [vmem:[#allocation104_spill] sm:$0xff] }
 0xc44   :  { %v2047_v17 = vpop.permute.xlu1 %2046  ;;  %v2106_v24 = vsel %vm271_vm1, %v2045_v21, 0.0  ;;  %v11910_v21 = vld [vmem:[#allocation7_spill] sm:$0xff] }
 0xc45   :  { %2095 = vadd.xlane.f32.xlu0 %v2094_v55  ;;  %v2109_v28 = vsel %vm271_vm1, %v2047_v17, 0.0  ;;  %v11907_v55 = vld [vmem:[#allocation88_spill] sm:$0xff] }
 0xc46   :  { %2110 = vadd.xlane.f32.xlu1 %v2109_v28  ;;  %v2439_v17 = vmul.f32 %v11907_v55, %v11906_v34  ;;  %v11909_v28 = vld [vmem:[#allocation83_spill] sm:$0xff]  ;;  %v11916_v55 = vld [vmem:[#allocation13_spill] sm:$0xff] }
 0xc49   :  { %2101 = vadd.xlane.f32.xlu0 %v2100_v40  ;;  %v2436_v40 = vmul.f32 %v11909_v28, %v11908_v36 }
 0xc4d   :  { %2107 = vadd.xlane.f32.xlu0 %v2106_v24  ;;  %v11911_v24 = vld [vmem:[#allocation107_spill] sm:$0xff] }
 0xc4e   :  { %v2441_v52 = vmul.f32 %v11911_v24, %v11910_v21  ;;  %v2445_v24 = vmul.f32 %v11919_v35, %v11918_v62  ;;  %v2449_v35 = vmul.f32 %v11927_v25, %v11926_v33  ;;  %v2533_v25 = vmul.f32 %v11934_v50, %v11902_v12 }
 0xc57   :  { %2470 = vrot.lane.b32.xlu1 %v2437_v0, %s6407_s2  ;;  %v11913_v0 = vld [vmem:[#allocation103_spill] sm:$0xff] }
 0xc58   :  { %v2440_v63 = vmul.f32 %v11913_v0, %v11912_v61 }
 0xc5b   :  { %2472 = vrot.lane.b32.xlu1 %v2438_v41, %s6407_s2  ;;  %v11915_v41 = vld [vmem:[#allocation116_spill] sm:$0xff] }
 0xc5c   :  { %v2443_v4 = vmul.f32 %v11915_v41, %v11914_v7  ;;  %v2447_v41 = vmul.f32 %v11923_v18, %v11922_v46  ;;  %v2451_v18 = vmul.f32 %v11931_v58, %v11930_v6 }
 0xc5f   :  { %2474 = vrot.lane.b32.xlu1 %v2439_v17, %s6407_s2  ;;  %v11917_v17 = vld [vmem:[#allocation112_spill] sm:$0xff] }
 0xc60   :  { %v2442_v28 = vmul.f32 %v11917_v17, %v11916_v55 }
 0xc63   :  { %2468 = vrot.lane.b32.xlu0 %v2436_v40, %s6407_s2  ;;  %2478 = vrot.lane.b32.xlu1 %v2441_v52, %s6407_s2  ;;  %v11920_v52 = vld [vmem:[#allocation20_spill] sm:$0xff]  ;;  %v11921_v40 = vld [vmem:[#allocation122_spill] sm:$0xff] }
 0xc64   :  { %v2444_v0 = vmul.f32 %v11921_v40, %v11920_v52 }
 0xc67   :  { %2476 = vrot.lane.b32.xlu0 %v2440_v63, %s6407_s2  ;;  %2482 = vrot.lane.b32.xlu1 %v2443_v4, %s6407_s2  ;;  %v11924_v4 = vld [vmem:[#allocation26_spill] sm:$0xff]  ;;  %v11925_v63 = vld [vmem:[#allocation133_spill] sm:$0xff] }
 0xc68   :  { %v2446_v17 = vmul.f32 %v11925_v63, %v11924_v4 }
 0xc6b   :  { %2480 = vrot.lane.b32.xlu0 %v2442_v28, %s6407_s2  ;;  %2486 = vrot.lane.b32.xlu1 %v2445_v24, %s6407_s2  ;;  %v11928_v28 = vld [vmem:[#allocation32_spill] sm:$0xff] }
 0xc6c   :  { %v11929_v24 = vld [vmem:[#allocation144_spill] sm:$0xff] }
 0xc6d   :  { %v2448_v40 = vmul.f32 %v11929_v24, %v11928_v28  ;;  %v11936_v24 = vld [vmem:[#allocation188_spill] sm:$0xff] }
 0xc6e   :  { %v3066_v58 = vmul.f32 %v11936_v24, %v11916_v55 }
 0xc6f   :  { %2484 = vrot.lane.b32.xlu0 %v2444_v0, %s6407_s2  ;;  %2490 = vrot.lane.b32.xlu1 %v2447_v41, %s6407_s2  ;;  %v11932_v0 = vld [vmem:[#allocation38_spill] sm:$0xff] }
 0xc70   :  { %v11933_v41 = vld [vmem:[#allocation150_spill] sm:$0xff] }
 0xc71   :  { %v2450_v63 = vmul.f32 %v11933_v41, %v11932_v0  ;;  %v11938_v41 = vld [vmem:[#allocation189_spill] sm:$0xff] }
 0xc72   :  { %v3162_v50 = vmul.f32 %v11938_v41, %v11916_v55 }
 0xc73   :  { %2488 = vrot.lane.b32.xlu0 %v2446_v17, %s6407_s2  ;;  %2494 = vrot.lane.b32.xlu1 %v2449_v35, %s6407_s2  ;;  %v11935_v17 = vld [vmem:[#allocation84_spill] sm:$0xff] }
 0xc74   :  { %v2532_v35 = vmul.f32 %v11935_v17, %v11908_v36  ;;  %v11940_v17 = vld [vmem:[#allocation199_spill] sm:$0xff] }
 0xc75   :  { %v3068_v24 = vmul.f32 %v11940_v17, %v11920_v52 }
 0xc77   :  { %2492 = vrot.lane.b32.xlu0 %v2448_v40, %s6407_s2  ;;  %2498 = vrot.lane.b32.xlu1 %v2451_v18, %s6407_s2  ;;  %v11937_v40 = vld [vmem:[#allocation94_spill] sm:$0xff] }
 0xc78   :  { %v2534_v18 = vmul.f32 %v11937_v40, %v11904_v56  ;;  %v11942_v40 = vld [vmem:[#allocation193_spill] sm:$0xff] }
 0xc79   :  { %v3069_v41 = vmul.f32 %v11942_v40, %v11918_v62 }
 0xc7b   :  { %2496 = vrot.lane.b32.xlu0 %v2450_v63, %s6407_s2  ;;  %2566 = vrot.lane.b32.xlu1 %v2533_v25, %s6408_s29  ;;  %v11939_v63 = vld [vmem:[#allocation56_spill] sm:$0xff] }
 0xc7c   :  { %v3067_v25 = vmul.f32 %v11939_v63, %v11914_v7  ;;  %v11944_v63 = vld [vmem:[#allocation200_spill] sm:$0xff] }
 0xc7d   :  { %v3164_v17 = vmul.f32 %v11944_v63, %v11920_v52 }
 0xc7f   :  { %2564 = vrot.lane.b32.xlu0 %v2532_v35, %s6408_s29  ;;  %3104 = vrot.lane.b32.xlu1 %v3066_v58, %s6407_s2  ;;  %v11941_v35 = vld [vmem:[#allocation47_spill] sm:$0xff] }
 0xc80   :  { %v3163_v58 = vmul.f32 %v11941_v35, %v11914_v7 }
 0xc83   :  { %2568 = vrot.lane.b32.xlu0 %v2534_v18, %s6408_s29  ;;  %3200 = vrot.lane.b32.xlu1 %v3162_v50, %s6408_s29  ;;  %v11943_v18 = vld [vmem:[#allocation192_spill] sm:$0xff] }
 0xc84   :  { %v3258_v50 = vmul.f32 %v11943_v18, %v11916_v55 }
 0xc87   :  { %3106 = vrot.lane.b32.xlu0 %v3067_v25, %s6407_s2  ;;  %3108 = vrot.lane.b32.xlu1 %v3068_v24, %s6407_s2  ;;  %v2113_v25 = vld [vmem:[%s10816_s3 + $0x8] sm:$0xff]  ;;  %v11945_v24 = vld [vmem:[#allocation185_spill] sm:$0xff] }
 0xc88   :  { %5759 = vmatprep.subr.mxu1 %v2113_v25  ;;  %5655 = vmatprep.subr.mxu0 %v2113_v25  ;;  %v3259_v35 = vmul.f32 %v11945_v24, %v11914_v7 }
 0xc89   :  { %5760 = vmatpush3.msra.mxu1 %v2113_v25  ;;  %5656 = vmatpush3.msra.mxu0 %v2113_v25 }
 0xc8b   :  { %3202 = vrot.lane.b32.xlu0 %v3163_v58, %s6408_s29  ;;  %3110 = vrot.lane.b32.xlu1 %v3069_v41, %s6407_s2  ;;  %v11946_v58 = vld [vmem:[#allocation210_spill] sm:$0xff] }
 0xc8c   :  { %v3070_v40 = vmul.f32 %v11946_v58, %v11924_v4  ;;  %v11947_v41 = vld [vmem:[#allocation194_spill] sm:$0xff]  ;;  %v11950_v58 = vld [vmem:[#allocation211_spill] sm:$0xff] }
 0xc8d   :  { %v3165_v18 = vmul.f32 %v11947_v41, %v11918_v62  ;;  %v3166_v25 = vmul.f32 %v11950_v58, %v11924_v4  ;;  %v11952_v41 = vld [vmem:[#allocation222_spill] sm:$0xff] }
 0xc8f   :  { %3296 = vrot.lane.b32.xlu0 %v3258_v50, %s6409_s0  ;;  %3204 = vrot.lane.b32.xlu1 %v3164_v17, %s6408_s29  ;;  %v11948_v50 = vld [vmem:[#allocation205_spill] sm:$0xff]  ;;  %v11949_v17 = vld [vmem:[#allocation202_spill] sm:$0xff] }
 0xc90   :  { %v3071_v63 = vmul.f32 %v11948_v50, %v11922_v46  ;;  %v3260_v24 = vmul.f32 %v11949_v17, %v11920_v52  ;;  %v3072_v50 = vmul.f32 %v11952_v41, %v11928_v28  ;;  %v11954_v17 = vld [vmem:[#allocation216_spill] sm:$0xff] }
 0xc91   :  { %v3073_v58 = vmul.f32 %v11954_v17, %v11926_v33 }
 0xc93   :  { %3298 = vrot.lane.b32.xlu0 %v3259_v35, %s6409_s0  ;;  %3112 = vrot.lane.b32.xlu1 %v3070_v40, %s6407_s2  ;;  %v11951_v35 = vld [vmem:[#allocation196_spill] sm:$0xff] }
 0xc94   :  { %v3261_v40 = vmul.f32 %v11951_v35, %v11918_v62  ;;  %v11956_v35 = vld [vmem:[#allocation226_spill] sm:$0xff] }
 0xc95   :  { %v3168_v41 = vmul.f32 %v11956_v35, %v11928_v28 }
 0xc97   :  { %3206 = vrot.lane.b32.xlu0 %v3165_v18, %s6408_s29  ;;  %3114 = vrot.lane.b32.xlu1 %v3071_v63, %s6407_s2  ;;  %v11953_v18 = vld [vmem:[#allocation206_spill] sm:$0xff] }
 0xc98   :  { %v3167_v63 = vmul.f32 %v11953_v18, %v11922_v46  ;;  %v11958_v18 = vld [vmem:[#allocation236_spill] sm:$0xff] }
 0xc99   :  { %v3074_v17 = vmul.f32 %v11958_v18, %v11932_v0 }
 0xc9b   :  { %3300 = vrot.lane.b32.xlu0 %v3260_v24, %s6409_s0  ;;  %3208 = vrot.lane.b32.xlu1 %v3166_v25, %s6408_s29  ;;  %v11955_v24 = vld [vmem:[#allocation213_spill] sm:$0xff] }
 0xc9c   :  { %v3262_v25 = vmul.f32 %v11955_v24, %v11924_v4  ;;  %v11960_v24 = vld [vmem:[#allocation230_spill] sm:$0xff] }
 0xc9d   :  { %v3075_v35 = vmul.f32 %v11960_v24, %v11930_v6 }
 0xc9f   :  { %3302 = vrot.lane.b32.xlu0 %v3261_v40, %s6409_s0  ;;  %3116 = vrot.lane.b32.xlu1 %v3072_v50, %s6407_s2  ;;  %v11957_v40 = vld [vmem:[#allocation208_spill] sm:$0xff] }
 0xca0   :  { %v3263_v50 = vmul.f32 %v11957_v40, %v11922_v46  ;;  %v11962_v40 = vld [vmem:[#allocation240_spill] sm:$0xff] }
 0xca1   :  { %v3170_v18 = vmul.f32 %v11962_v40, %v11932_v0 }
 0xca3   :  { %3210 = vrot.lane.b32.xlu0 %v3167_v63, %s6408_s29  ;;  %3118 = vrot.lane.b32.xlu1 %v3073_v58, %s6407_s2  ;;  %v11959_v63 = vld [vmem:[#allocation218_spill] sm:$0xff] }
 0xca4   :  { %v3169_v58 = vmul.f32 %v11959_v63, %v11926_v33  ;;  %v11964_v63 = vld [vmem:[#allocation242_spill] sm:$0xff] }
 0xca5   :  { %v3266_v24 = vmul.f32 %v11964_v63, %v11932_v0  ;;  %v11967_v0 = vld [vmem:[#allocation100_spill] sm:$0xff] }
 0xca6   :  { %v2629_v15 = vmul.f32 %v11967_v0, %v11902_v12  ;;  %v9365_v0 = vmul.f32 %v11971_v19, %v11912_v61  ;;  %v11976_v19 = vld [vmem:[#allocation241_spill] sm:$0xff] }
 0xca7   :  { %3304 = vrot.lane.b32.xlu0 %v3262_v25, %s6409_s0  ;;  %3212 = vrot.lane.b32.xlu1 %v3168_v41, %s6408_s29  ;;  %v11961_v25 = vld [vmem:[#allocation233_spill] sm:$0xff]  ;;  %v3267_v29 = vmul.f32 %v11976_v19, %v11930_v6  ;;  %v11982_v19 = vld [vmem:[#allocation128_spill] sm:$0xff] }
 0xca8   :  { %v3264_v41 = vmul.f32 %v11961_v25, %v11928_v28 }
 0xcab   :  { %3306 = vrot.lane.b32.xlu0 %v3263_v50, %s6409_s0  ;;  %3120 = vrot.lane.b32.xlu1 %v3074_v17, %s6407_s2  ;;  %v11963_v50 = vld [vmem:[#allocation224_spill] sm:$0xff] }
 0xcac   :  { %v3265_v17 = vmul.f32 %v11963_v50, %v11926_v33 }
 0xcaf   :  { %3214 = vrot.lane.b32.xlu0 %v3169_v58, %s6408_s29  ;;  %3122 = vrot.lane.b32.xlu1 %v3075_v35, %s6407_s2  ;;  %v4584_v58 = vmax.f32 %v8983_v38, %v9063_v53  ;;  %v9335_v35 = vpop.xlane.xlu1 %2068 }
 0xcb1   :  { %v4600_v25 = vmax.f32 %v4584_v58, %v9143_v20 }
 0xcb3   :  { %3308 = vrot.lane.b32.xlu0 %v3264_v41, %s6409_s0  ;;  %3216 = vrot.lane.b32.xlu1 %v3170_v18, %s6408_s29  ;;  %v11965_v41 = vld [vmem:[#allocation238_spill] sm:$0xff]  ;;  %v11966_v18 = vld [vmem:[#allocation85_spill] sm:$0xff] }
 0xcb4   :  { %v3171_v40 = vmul.f32 %v11965_v41, %v11930_v6  ;;  %v2628_v50 = vmul.f32 %v11966_v18, %v11908_v36  ;;  %v4583_v41 = vmax.f32 %v8981_v9, %v9061_v14  ;;  %v4616_v18 = vmax.f32 %v4600_v25, %v9335_v35 }
 0xcb5   :  { %v9375_v25 = vmul.f32 %v11974_v2, %v11910_v21  ;;  %v11979_v2 = vld [vmem:[#allocation119_spill] sm:$0xff]  ;;  %v9404_v6 = vmul.f32 %v11982_v19, %v11918_v62  ;;  %v11986_v19 = vld [vmem:[#allocation130_spill] sm:$0xff] }
 0xcb6   :  { %v9331_v23 = vpop.xlane.xlu0 %2065 }
 0xcb7   :  { %3310 = vrot.lane.b32.xlu0 %v3265_v17, %s6409_s0  ;;  %3312 = vrot.lane.b32.xlu1 %v3266_v24, %s6409_s0  ;;  %v11969_v17 = vld [vmem:[#allocation95_spill] sm:$0xff]  ;;  %v11970_v24 = vld [vmem:[#allocation90_spill] sm:$0xff]  ;;  %11983 = vst [vmem:[#allocation165_spill] sm:$0xff] %v9404_v6  ;;  %v9421_v6 = vmul.f32 %v11986_v19, %v11918_v62 }
 0xcb8   :  { %v9352_v45 = vmul.f32 %v11969_v17, %v11904_v56  ;;  %v2631_v58 = vmul.f32 %v11970_v24, %v11906_v34  ;;  %v11972_v17 = vld [vmem:[#allocation109_spill] sm:$0xff] }
 0xcb9   :  { %v2537_v30 = vmul.f32 %v11972_v17, %v11910_v21  ;;  %v11973_v24 = vld [vmem:[#allocation105_spill] sm:$0xff]  ;;  %v9386_v17 = vmul.f32 %v11977_v27, %v11914_v7  ;;  %v9396_v21 = vmul.f32 %v11979_v2, %v11914_v7  ;;  %v11984_v27 = vld [vmem:[#allocation127_spill] sm:$0xff] }
 0xcba   :  { %v9344_v63 = vpop.xlane.xlu0 %2071  ;;  %v9371_v42 = vmul.f32 %v11973_v24, %v11912_v61  ;;  %v11978_v24 = vld [vmem:[#allocation117_spill] sm:$0xff]  ;;  %v9408_v49 = vmul.f32 %v11984_v27, %v11920_v52  ;;  %v11987_v27 = vld [vmem:[#allocation134_spill] sm:$0xff] }
 0xcbb   :  { %3218 = vrot.lane.b32.xlu0 %v3171_v40, %s6408_s29  ;;  %v9360_v51 = vpop.xlane.xlu1 %2080  ;;  %2660 = vrot.lane.b32.xlu1 %v2628_v50, %s6409_s0  ;;  %v11975_v40 = vld [vmem:[#allocation114_spill] sm:$0xff]  ;;  %v4599_v50 = vmax.f32 %v4583_v41, %v9141_v10  ;;  %v9390_v61 = vmul.f32 %v11978_v24, %v11916_v55  ;;  %v4585_v24 = vmax.f32 %v8985_v1, %v9065_v31 }
 0xcbc   :  { %v9379_v11 = vmul.f32 %v11975_v40, %v11916_v55  ;;  %v11980_v40 = vld [vmem:[#allocation124_spill] sm:$0xff]  ;;  %11985 = vst [vmem:[#allocation174_spill] sm:$0xff] %v9408_v49  ;;  %v4632_v55 = vsub.f32 %v8983_v38, %v4616_v18  ;;  %v11988_v38 = vld [vmem:[#allocation135_spill] sm:$0xff] }
 0xcbd   :  { %v9400_v41 = vmul.f32 %v11980_v40, %v11920_v52  ;;  %v4615_v2 = vmax.f32 %v4599_v50, %v9331_v23  ;;  %v4680_v40 = vsub.f32 %v9063_v53, %v4616_v18  ;;  %v9425_v52 = vmul.f32 %v11987_v27, %v11924_v4  ;;  %v11992_v53 = vld [vmem:[#allocation141_spill] sm:$0xff]  ;;  %v9444_v27 = vld [vmem:[%s10816_s3] sm:$0xff] }
 0xcbe   :  { %v9392_v8 = vpop.xlane.xlu0 %2074  ;;  %v9429_v49 = vmul.f32 %v11988_v38, %v11924_v4  ;;  %v4728_v50 = vsub.f32 %v9143_v20, %v4616_v18  ;;  %v9439_v19 = vmul.f32 %v11992_v53, %v11922_v46  ;;  %11994 = vst [vmem:[#allocation177_spill] sm:$0xff] %v9444_v27  ;;  %v4776_v38 = vsub.f32 %v9335_v35, %v4616_v18  ;;  %v11998_v53 = vld [vmem:[#allocation161_spill] sm:$0xff] }
 0xcbf   :  { %11981 = vst [vmem:[#allocation171_spill] sm:$0xff] %v9400_v41  ;;  %3314 = vrot.lane.b32.xlu0 %v3267_v29, %s6409_s0  ;;  %v9415_v7 = vpop.xlane.xlu1 %2086  ;;  %2570 = vrot.lane.b32.xlu1 %v2535_v22, %s6408_s29  ;;  %v4601_v29 = vmax.f32 %v4585_v24, %v9145_v59  ;;  %v11990_v22 = vld [vmem:[#allocation140_spill] sm:$0xff]  ;;  %v11995_v24 = vld [vmem:[#allocation69_spill] sm:$0xff]  ;;  %v4649_v35 = vmul.f32 1.442695, %v4632_v55  ;;  %v4631_v18 = vsub.f32 %v8981_v9, %v4615_v2 }
 0xcc0   :  { %11989 = vst [vmem:[#allocation170_spill] sm:$0xff] %v9429_v49  ;;  %v9435_v41 = vmul.f32 %v11990_v22, %v11922_v46  ;;  %11993 = vst [vmem:[#allocation173_spill] sm:$0xff] %v9439_v19  ;;  %v9451_v20 = vmul.f32 %v11995_v24, %v11908_v36  ;;  %v11996_v22 = vld [vmem:[#allocation146_spill] sm:$0xff]  ;;  %v9459_v46 = vmul.f32 %v11998_v53, %v11926_v33  ;;  %5681 = vmatprep.subr.mxu1 %v9444_v27  ;;  %v12000_v33 = vld [vmem:[#allocation61_spill] sm:$0xff] }
 0xcc1   :  { %v9455_v62 = vmul.f32 %v11996_v22, %v11928_v28  ;;  %v4588_v19 = vmax.f32 %v8987_v44, %v9067_v60  ;;  %v4617_v49 = vmax.f32 %v4601_v29, %v9344_v63  ;;  %v4586_v22 = vmax.f32 %v8989_v43, %v9069_v13 }
 0xcc2   :  { %11991 = vst [vmem:[#allocation176_spill] sm:$0xff] %v9435_v41  ;;  %v9447_v4 = vpop.xlane.xlu0 %2077  ;;  %11999 = vst [vmem:[#allocation8_spill] sm:$0xff] %v9459_v46  ;;  %v4697_v53 = vmul.f32 1.442695, %v4680_v40  ;;  %v4679_v27 = vsub.f32 %v9061_v14, %v4615_v2  ;;  %v9475_v28 = vmul.f32 %v12000_v33, %v11902_v12  ;;  %v4745_v55 = vmul.f32 1.442695, %v4728_v50 }
 0xcc3   :  { %11997 = vst [vmem:[#allocation175_spill] sm:$0xff] %v9455_v62  ;;  %2662 = vrot.lane.b32.xlu0 %v2629_v15, %s6409_s0  ;;  %v9467_v24 = vpop.xlane.xlu1 %2092  ;;  %2666 = vrot.lane.b32.xlu1 %v2631_v58, %s6409_s0  ;;  %v4604_v9 = vmax.f32 %v4588_v19, %v9147_v47  ;;  %v4727_v29 = vsub.f32 %v9141_v10, %v4615_v2  ;;  %v12001_v15 = vld [vmem:[#allocation217_spill] sm:$0xff]  ;;  %v4793_v58 = vmul.f32 1.442695, %v4776_v38  ;;  %v12002_v40 = vld [vmem:[#allocation220_spill] sm:$0xff] }
 0xcc4   :  { %6151 = vrcp.f32 %v12001_v15  ;;  %v4602_v46 = vmax.f32 %v4586_v22, %v9149_v3  ;;  %v4775_v62 = vsub.f32 %v9331_v23, %v4615_v2  ;;  %v4647_v14 = vmul.f32 1.442695, %v4631_v18 }
 0xcc5   :  { %6153 = vrcp.f32 %v12002_v40  ;;  %v4633_v33 = vsub.f32 %v8985_v1, %v4617_v49  ;;  %v9487_v19 = vmax.f32 %v4604_v9, %v9360_v51  ;;  %v4695_v23 = vmul.f32 1.442695, %v4679_v27 }
 0xcc6   :  { %v9482_v41 = vpop.xlane.xlu0 %2083  ;;  %6155 = vpow2.f32 %v4649_v35  ;;  %v4681_v2 = vsub.f32 %v9065_v31, %v4617_v49  ;;  %v4618_v50 = vmax.f32 %v4602_v46, %v9392_v8  ;;  %v4743_v38 = vmul.f32 1.442695, %v4727_v29  ;;  %v12003_v35 = vld [vmem:[#allocation72_spill] sm:$0xff] }
 0xcc7   :  { %2664 = vrot.lane.b32.xlu0 %v9352_v45, %s6409_s0  ;;  %v9491_v10 = vpop.xlane.xlu1 %2098  ;;  %2574 = vrot.lane.b32.xlu1 %v2537_v30, %s6408_s29  ;;  %6157 = vpow2.f32 %v4697_v53  ;;  %v4729_v1 = vsub.f32 %v9145_v59, %v4617_v49  ;;  %v9499_v18 = vmul.f32 %v12003_v35, %v11908_v36  ;;  %v4791_v45 = vmul.f32 1.442695, %v4775_v62  ;;  %v12004_v30 = vld [vmem:[#allocation64_spill] sm:$0xff]  ;;  %v12005_v53 = vld [vmem:[#allocation77_spill] sm:$0xff] }
 0xcc8   :  { %6159 = vpow2.f32 %v4745_v55  ;;  %v4777_v22 = vsub.f32 %v9344_v63, %v4617_v49  ;;  %v9506_v27 = vmul.f32 %v12004_v30, %v11902_v12  ;;  %v4587_v31 = vmax.f32 %v8993_v37, %v9073_v26 }
 0xcc9   :  { %6161 = vpow2.f32 %v4793_v58  ;;  %v4651_v46 = vmul.f32 1.442695, %v4633_v33  ;;  %v4636_v59 = vsub.f32 %v8987_v44, %v9487_v19  ;;  %v4699_v49 = vmul.f32 1.442695, %v4681_v2  ;;  %v12006_v2 = vld [vmem:[#allocation73_spill] sm:$0xff] }
 0xcca   :  { %v9502_v9 = vpop.xlane.xlu0 %2089  ;;  %6163 = vpow2.f32 %v4647_v14  ;;  %v4634_v63 = vsub.f32 %v8989_v43, %v4618_v50  ;;  %v9521_v55 = vmul.f32 %v12005_v53, %v11904_v56  ;;  %v4603_v29 = vmax.f32 %v4587_v31, %v9153_v16 }
 0xccb   :  { %2572 = vrot.lane.b32.xlu0 %v9365_v0, %s6408_s29  ;;  %v9514_v62 = vpop.xlane.xlu1 %2104  ;;  %2670 = vrot.lane.b32.xlu1 %v9375_v25, %s6409_s0  ;;  %6165 = vpow2.f32 %v4695_v23  ;;  %v4747_v44 = vmul.f32 1.442695, %v4729_v1  ;;  %v4682_v15 = vsub.f32 %v9069_v13, %v4618_v50  ;;  %v4590_v0 = vmax.f32 %v8991_v57, %v9071_v39 }
 0xccc   :  { %6167 = vpow2.f32 %v4743_v38  ;;  %v4795_v58 = vmul.f32 1.442695, %v4777_v22  ;;  %v4730_v25 = vsub.f32 %v9149_v3, %v4618_v50  ;;  %v4778_v43 = vsub.f32 %v9392_v8, %v4618_v50 }
 0xccd   :  { %6169 = vpow2.f32 %v4791_v45  ;;  %v4657_v14 = vmul.f32 1.442695, %v4636_v59  ;;  %v9532_v33 = vmax.f32 %v4603_v29, %v9447_v4  ;;  %v4653_v23 = vmul.f32 1.442695, %v4634_v63 }
 0xcce   :  { %v9528_v40 = vpop.xlane.xlu0 %2095  ;;  %6171 = vpow2.f32 %v4651_v46  ;;  %v4684_v3 = vsub.f32 %v9067_v60, %v9487_v19  ;;  %v9544_v8 = vmul.f32 %v12006_v2, %v11908_v36  ;;  %v4606_v50 = vmax.f32 %v4590_v0, %v9151_v54  ;;  %v12038_v36 = vld [vmem:[#allocation195_spill] sm:$0xff] }
 0xccf   :  { %2668 = vrot.lane.b32.xlu0 %v9371_v42, %s6409_s0  ;;  %v9536_v13 = vpop.xlane.xlu1 %2110  ;;  %2578 = vrot.lane.b32.xlu1 %v9386_v17, %s6408_s29  ;;  %6173 = vpow2.f32 %v4699_v49  ;;  %v4701_v38 = vmul.f32 1.442695, %v4682_v15  ;;  %v4732_v42 = vsub.f32 %v9147_v47, %v9487_v19  ;;  %v4589_v17 = vmax.f32 %v8997_v48, %v9077_v5  ;;  %v12013_v15 = vld [vmem:[#allocation6_spill] sm:$0xff] }
 0xcd0   :  { %6175 = vpow2.f32 %v4747_v44  ;;  %v4749_v35 = vmul.f32 1.442695, %v4730_v25  ;;  %v4780_v60 = vsub.f32 %v9360_v51, %v9487_v19  ;;  %v4797_v30 = vmul.f32 1.442695, %v4778_v43  ;;  %v12012_v44 = vld [vmem:[#allocation207_spill] sm:$0xff] }
 0xcd1   :  { %v9549_v1 = vpop.eup %6151  ;;  %6177 = vpow2.f32 %v4795_v58  ;;  %v4635_v31 = vsub.f32 %v8993_v37, %v9532_v33  ;;  %v9562_v47 = vmax.f32 %v4606_v50, %v9415_v7  ;;  %v4705_v19 = vmul.f32 1.442695, %v4684_v3  ;;  %v12011_v37 = vld [vmem:[#allocation182_spill] sm:$0xff] }
 0xcd2   :  { %12007 = vst [vmem:[#allocation16_spill] sm:$0xff] %v9549_v1  ;;  %v9555_v45 = vpop.xlane.xlu0 %2101  ;;  %v9557_v22 = vpop.eup %6153  ;;  %6179 = vpow2.f32 %v4657_v14  ;;  %v4683_v59 = vsub.f32 %v9073_v26, %v9532_v33  ;;  %v9576_v49 = vmul.f32 %v12011_v37, %v11906_v34  ;;  %v4753_v53 = vmul.f32 1.442695, %v4732_v42  ;;  %v12017_v42 = vld [vmem:[#allocation145_spill] sm:$0xff] }
 0xcd3   :  { %12008 = vst [vmem:[#allocation14_spill] sm:$0xff] %v9557_v22  ;;  %2576 = vrot.lane.b32.xlu0 %v9379_v11, %s6408_s29  ;;  %v9566_v46 = vpop.permute.xlu1 %2470  ;;  %2674 = vrot.lane.b32.xlu1 %v9396_v21, %s6409_s0  ;;  %v9570_v51 = vpop.eup %6155  ;;  %6181 = vpow2.f32 %v4653_v23  ;;  %v4605_v11 = vmax.f32 %v4589_v17, %v9157_v32  ;;  %v4731_v21 = vsub.f32 %v9153_v16, %v9532_v33  ;;  %v4801_v26 = vmul.f32 1.442695, %v4780_v60  ;;  %v12018_v60 = vld [vmem:[#allocation212_spill] sm:$0xff] }
 0xcd4   :  { %12009 = vst [vmem:[#allocation10_spill] sm:$0xff] %v9566_v46  ;;  %12010 = vst [vmem:[#allocation22_spill] sm:$0xff] %v9570_v51  ;;  %v9578_v63 = vpop.eup %6157  ;;  %6183 = vpow2.f32 %v4701_v38  ;;  %v4592_v0 = vmax.f32 %v12013_v15, %v12012_v44  ;;  %v4779_v58 = vsub.f32 %v9447_v4, %v9532_v33  ;;  %v4655_v14 = vmul.f32 1.442695, %v4635_v31 }
 0xcd5   :  { %v9583_v29 = vpop.eup %6159  ;;  %6185 = vpow2.f32 %v4749_v35  ;;  %v4638_v23 = vsub.f32 %v8991_v57, %v9562_v47  ;;  %v9596_v16 = vmax.f32 %v4605_v11, %v9482_v41  ;;  %v4703_v33 = vmul.f32 1.442695, %v4683_v59  ;;  %v12016_v57 = vld [vmem:[#allocation65_spill] sm:$0xff] }
 0xcd6   :  { %v9589_v25 = vpop.xlane.xlu0 %2107  ;;  %v9591_v43 = vpop.eup %6161  ;;  %6187 = vpow2.f32 %v4797_v30  ;;  %v4686_v2 = vsub.f32 %v9071_v39, %v9562_v47  ;;  %v9610_v50 = vmul.f32 %v12016_v57, %v11902_v12  ;;  %v4751_v17 = vmul.f32 1.442695, %v4731_v21  ;;  %v12019_v30 = vld [vmem:[#allocation191_spill] sm:$0xff] }
 0xcd7   :  { %2672 = vrot.lane.b32.xlu0 %v9390_v61, %s6409_s0  ;;  %v9600_v3 = vpop.permute.xlu1 %2472  ;;  %3092 = vrot.lane.b32.xlu1 %v9451_v20, %s6407_s2  ;;  %v9604_v4 = vpop.eup %6163  ;;  %6189 = vpow2.f32 %v4705_v19  ;;  %v4608_v61 = vmax.f32 %v4592_v0, %v12017_v42  ;;  %v4734_v20 = vsub.f32 %v9151_v54, %v9562_v47  ;;  %v4591_v31 = vmax.f32 %v12019_v30, %v12018_v60  ;;  %v12021_v21 = vld [vmem:[#allocation171_spill] sm:$0xff] }
 0xcd8   :  { %12014 = vst [vmem:[#allocation19_spill] sm:$0xff] %v9600_v3  ;;  %12015 = vst [vmem:[#allocation28_spill] sm:$0xff] %v9604_v4  ;;  %v9612_v38 = vpop.eup %6165  ;;  %6191 = vpow2.f32 %v4753_v53  ;;  %v4799_v39 = vmul.f32 1.442695, %v4779_v58  ;;  %v4782_v19 = vsub.f32 %v9415_v7, %v9562_v47  ;;  %v4661_v11 = vmul.f32 1.442695, %v4638_v23 }
 0xcd9   :  { %v9617_v35 = vpop.eup %6167  ;;  %6193 = vpow2.f32 %v4801_v26  ;;  %v4637_v53 = vsub.f32 %v8997_v48, %v9596_v16  ;;  %v9630_v54 = vmax.f32 %v4608_v61, %v9467_v24  ;;  %v4709_v47 = vmul.f32 1.442695, %v4686_v2  ;;  %v12024_v48 = vld [vmem:[#allocation79_spill] sm:$0xff]  ;;  %v12027_v2 = vld [vmem:[#allocation190_spill] sm:$0xff] }
 0xcda   :  { %v9623_v59 = vpop.permute.xlu0 %2468  ;;  %v9625_v37 = vpop.eup %6169  ;;  %6195 = vpow2.f32 %v4655_v14  ;;  %v4685_v26 = vsub.f32 %v9077_v5, %v9596_v16  ;;  %v9644_v58 = vmul.f32 %v12024_v48, %v11904_v56  ;;  %v12025_v23 = vld [vmem:[#allocation155_spill] sm:$0xff]  ;;  %v4757_v61 = vmul.f32 1.442695, %v4734_v20 }
 0xcdb   :  { %12020 = vst [vmem:[#allocation25_spill] sm:$0xff] %v9623_v59  ;;  %2580 = vrot.lane.b32.xlu0 %v12021_v21, %s6408_s29  ;;  %v9634_v0 = vpop.permute.xlu1 %2474  ;;  %3094 = vrot.lane.b32.xlu1 %v9475_v28, %s6407_s2  ;;  %v9638_v7 = vpop.eup %6171  ;;  %6197 = vpow2.f32 %v4703_v33  ;;  %v4607_v57 = vmax.f32 %v4591_v31, %v12025_v23  ;;  %v4733_v28 = vsub.f32 %v9157_v32, %v9596_v16  ;;  %v12026_v33 = vld [vmem:[#allocation209_spill] sm:$0xff]  ;;  %v4805_v5 = vmul.f32 1.442695, %v4782_v19  ;;  %v12034_v19 = vld [vmem:[#allocation187_spill] sm:$0xff] }
 0xcdc   :  { %12022 = vst [vmem:[#allocation34_spill] sm:$0xff] %v9634_v0  ;;  %12023 = vst [vmem:[#allocation31_spill] sm:$0xff] %v9638_v7  ;;  %v9646_v14 = vpop.eup %6173  ;;  %6199 = vpow2.f32 %v4751_v17  ;;  %v4594_v0 = vmax.f32 %v12027_v2, %v12026_v33  ;;  %v4781_v48 = vsub.f32 %v9482_v41, %v9596_v16  ;;  %v4659_v17 = vmul.f32 1.442695, %v4637_v53  ;;  %v12030_v31 = vld [vmem:[#allocation165_spill] sm:$0xff]  ;;  %v12033_v16 = vld [vmem:[#allocation215_spill] sm:$0xff] }
 0xcdd   :  { %v9651_v21 = vpop.eup %6175  ;;  %6201 = vpow2.f32 %v4799_v39  ;;  %v4640_v20 = vsub.f32 %v12013_v15, %v9630_v54  ;;  %v9664_v32 = vmax.f32 %v4607_v57, %v9502_v9  ;;  %v4707_v53 = vmul.f32 1.442695, %v4685_v26  ;;  %v12037_v12 = vld [vmem:[#allocation219_spill] sm:$0xff] }
 0xcde   :  { %v9657_v3 = vpop.permute.xlu0 %2476  ;;  %v9659_v46 = vpop.eup %6177  ;;  %6203 = vpow2.f32 %v4661_v11  ;;  %v4596_v11 = vmax.f32 %v12034_v19, %v12033_v16  ;;  %v4688_v15 = vsub.f32 %v12012_v44, %v9630_v54  ;;  %v4593_v1 = vmax.f32 %v12038_v36, %v12037_v12 }
 0xcdf   :  { %12028 = vst [vmem:[#allocation40_spill] sm:$0xff] %v9657_v3  ;;  %12029 = vst [vmem:[#allocation37_spill] sm:$0xff] %v9659_v46  ;;  %2582 = vrot.lane.b32.xlu0 %v12030_v31, %s6408_s29  ;;  %v9668_v39 = vpop.permute.xlu1 %2478  ;;  %3188 = vrot.lane.b32.xlu1 %v9499_v18, %s6408_s29  ;;  %v9672_v41 = vpop.eup %6179  ;;  %6205 = vpow2.f32 %v4709_v47  ;;  %v12036_v3 = vld [vmem:[#allocation149_spill] sm:$0xff]  ;;  %v4755_v31 = vmul.f32 1.442695, %v4733_v28  ;;  %v4784_v26 = vsub.f32 %v9467_v24, %v9630_v54  ;;  %v12041_v28 = vld [vmem:[#allocation174_spill] sm:$0xff] }
 0xce0   :  { %12031 = vst [vmem:[#allocation51_spill] sm:$0xff] %v9668_v39  ;;  %12032 = vst [vmem:[#allocation43_spill] sm:$0xff] %v9672_v41  ;;  %v9678_v57 = vpop.eup %6181  ;;  %v4610_v59 = vmax.f32 %v4594_v0, %v12036_v3  ;;  %6207 = vpow2.f32 %v4757_v61  ;;  %v4736_v39 = vsub.f32 %v12017_v42, %v9630_v54  ;;  %v4803_v47 = vmul.f32 1.442695, %v4781_v48  ;;  %v12044_v54 = vld [vmem:[#allocation160_spill] sm:$0xff] }
 0xce1   :  { %12035 = vst [vmem:[#allocation53_spill] sm:$0xff] %v9678_v57  ;;  %v9683_v18 = vpop.eup %6183  ;;  %6209 = vpow2.f32 %v4805_v5  ;;  %v4665_v0 = vmul.f32 1.442695, %v4640_v20  ;;  %v4639_v61 = vsub.f32 %v12019_v30, %v9664_v32  ;;  %v4609_v48 = vmax.f32 %v4593_v1, %v12044_v54 }
 0xce2   :  { %v9689_v44 = vpop.permute.xlu0 %2480  ;;  %v9691_v22 = vpop.eup %6185  ;;  %6211 = vpow2.f32 %v4659_v17  ;;  %v9696_v42 = vmax.f32 %v4610_v59, %v9491_v10  ;;  %v4713_v17 = vmul.f32 1.442695, %v4688_v15  ;;  %v4687_v30 = vsub.f32 %v12018_v60, %v9664_v32  ;;  %v12046_v59 = vld [vmem:[#allocation223_spill] sm:$0xff] }
 0xce3   :  { %12039 = vst [vmem:[#allocation45_spill] sm:$0xff] %v9689_v44  ;;  %12040 = vst [vmem:[#allocation97_spill] sm:$0xff] %v9691_v22  ;;  %2676 = vrot.lane.b32.xlu0 %v12041_v28, %s6409_s0  ;;  %v9700_v5 = vpop.permute.xlu1 %2482  ;;  %3190 = vrot.lane.b32.xlu1 %v9506_v27, %s6408_s29  ;;  %v9704_v24 = vpop.eup %6187  ;;  %6213 = vpow2.f32 %v4707_v53  ;;  %v12047_v44 = vld [vmem:[#allocation198_spill] sm:$0xff]  ;;  %v4761_v28 = vmul.f32 1.442695, %v4736_v39  ;;  %v4783_v1 = vsub.f32 %v9502_v9, %v9664_v32 }
 0xce4   :  { %12042 = vst [vmem:[#allocation5_spill] sm:$0xff] %v9700_v5  ;;  %12043 = vst [vmem:[#allocation93_spill] sm:$0xff] %v9704_v24  ;;  %v9709_v20 = vpop.eup %6189  ;;  %v4598_v41 = vmax.f32 %v12047_v44, %v12046_v59  ;;  %6215 = vpow2.f32 %v4755_v31  ;;  %v4735_v5 = vsub.f32 %v12025_v23, %v9664_v32  ;;  %v4809_v24 = vmul.f32 1.442695, %v4784_v26  ;;  %v12052_v31 = vld [vmem:[#allocation201_spill] sm:$0xff]  ;;  %v12055_v32 = vld [vmem:[#allocation231_spill] sm:$0xff] }
 0xce5   :  { %12045 = vst [vmem:[#allocation4_spill] sm:$0xff] %v9709_v20  ;;  %v9715_v27 = vpop.eup %6191  ;;  %6217 = vpow2.f32 %v4803_v47  ;;  %v9720_v53 = vmax.f32 %v4609_v48, %v9528_v40  ;;  %v12051_v20 = vld [vmem:[#allocation227_spill] sm:$0xff]  ;;  %v4663_v22 = vmul.f32 1.442695, %v4639_v61  ;;  %v4642_v23 = vsub.f32 %v12027_v2, %v9696_v42  ;;  %v12056_v26 = vld [vmem:[#allocation204_spill] sm:$0xff] }
 0xce6   :  { %12048 = vst [vmem:[#allocation88_spill] sm:$0xff] %v9715_v27  ;;  %v9722_v60 = vpop.permute.xlu0 %2484  ;;  %v9724_v15 = vpop.eup %6193  ;;  %v4595_v39 = vmax.f32 %v12052_v31, %v12051_v20  ;;  %6219 = vpow2.f32 %v4665_v0  ;;  %v4597_v48 = vmax.f32 %v12056_v26, %v12055_v32  ;;  %v4690_v0 = vsub.f32 %v12026_v33, %v9696_v42  ;;  %v12058_v2 = vld [vmem:[#allocation139_spill] sm:$0xff] }
 0xce7   :  { %12049 = vst [vmem:[#allocation83_spill] sm:$0xff] %v9722_v60  ;;  %12050 = vst [vmem:[#allocation107_spill] sm:$0xff] %v9724_v15  ;;  %2678 = vrot.lane.b32.xlu0 %v9421_v6, %s6409_s0  ;;  %v9732_v47 = vpop.permute.xlu1 %2486  ;;  %3096 = vrot.lane.b32.xlu1 %v9521_v55, %s6407_s2  ;;  %v9736_v9 = vpop.eup %6195  ;;  %6221 = vpow2.f32 %v4713_v17  ;;  %v4711_v60 = vmul.f32 1.442695, %v4687_v30  ;;  %v4612_v15 = vmax.f32 %v4596_v11, %v12058_v2  ;;  %v4759_v6 = vmul.f32 1.442695, %v4735_v5 }
 0xce8   :  { %12053 = vst [vmem:[#allocation103_spill] sm:$0xff] %v9732_v47  ;;  %12054 = vst [vmem:[#allocation116_spill] sm:$0xff] %v9736_v9  ;;  %v9742_v61 = vpop.eup %6197  ;;  %6223 = vpow2.f32 %v4761_v28  ;;  %v4738_v47 = vsub.f32 %v12036_v3, %v9696_v42  ;;  %v4807_v27 = vmul.f32 1.442695, %v4783_v1  ;;  %v4786_v17 = vsub.f32 %v9491_v10, %v9696_v42  ;;  %v12062_v11 = vld [vmem:[#allocation154_spill] sm:$0xff]  ;;  %v12064_v10 = vld [vmem:[#allocation176_spill] sm:$0xff] }
 0xce9   :  { %12057 = vst [vmem:[#allocation112_spill] sm:$0xff] %v9742_v61  ;;  %v9747_v55 = vpop.eup %6199  ;;  %6225 = vpow2.f32 %v4809_v24  ;;  %v4641_v30 = vsub.f32 %v12038_v36, %v9720_v53  ;;  %v4614_v28 = vmax.f32 %v4598_v41, %v12062_v11  ;;  %v4669_v5 = vmul.f32 1.442695, %v4642_v23  ;;  %v12066_v42 = vld [vmem:[#allocation166_spill] sm:$0xff] }
 0xcea   :  { %12059 = vst [vmem:[#allocation126_spill] sm:$0xff] %v9747_v55  ;;  %v9753_v33 = vpop.permute.xlu0 %2488  ;;  %v9755_v46 = vpop.eup %6201  ;;  %6227 = vpow2.f32 %v4663_v22  ;;  %v9759_v3 = vmax.f32 %v4612_v15, %v9514_v62  ;;  %v4611_v1 = vmax.f32 %v4595_v39, %v12066_v42  ;;  %v4689_v22 = vsub.f32 %v12037_v12, %v9720_v53  ;;  %v12067_v15 = vld [vmem:[#allocation159_spill] sm:$0xff] }
 0xceb   :  { %12060 = vst [vmem:[#allocation122_spill] sm:$0xff] %v9753_v33  ;;  %12061 = vst [vmem:[#allocation138_spill] sm:$0xff] %v9755_v46  ;;  %2584 = vrot.lane.b32.xlu0 %v9425_v52, %s6408_s29  ;;  %v9763_v24 = vpop.permute.xlu1 %2490  ;;  %2586 = vrot.lane.b32.xlu1 %v12064_v10, %s6408_s29  ;;  %v9767_v36 = vpop.eup %6203  ;;  %6229 = vpow2.f32 %v4711_v60  ;;  %v4717_v33 = vmul.f32 1.442695, %v4690_v0  ;;  %v4613_v23 = vmax.f32 %v4597_v48, %v12067_v15  ;;  %v4765_v52 = vmul.f32 1.442695, %v4738_v47 }
 0xcec   :  { %12063 = vst [vmem:[#allocation133_spill] sm:$0xff] %v9763_v24  ;;  %12065 = vst [vmem:[#allocation158_spill] sm:$0xff] %v9767_v36  ;;  %v9772_v41 = vpop.eup %6205  ;;  %6231 = vpow2.f32 %v4759_v6  ;;  %v4737_v24 = vsub.f32 %v12044_v54, %v9720_v53  ;;  %v4813_v10 = vmul.f32 1.442695, %v4786_v17  ;;  %v4667_v36 = vmul.f32 1.442695, %v4641_v30 }
 0xced   :  { %v9777_v46 = vpop.eup %6207  ;;  %6233 = vpow2.f32 %v4807_v27  ;;  %v4785_v60 = vsub.f32 %v9528_v40, %v9720_v53  ;;  %v4644_v48 = vsub.f32 %v12034_v19, %v9759_v3  ;;  %v4692_v47 = vsub.f32 %v12033_v16, %v9759_v3  ;;  %v12072_v0 = vld [vmem:[#allocation183_spill] sm:$0xff] }
 0xcee   :  { %12068 = vst [vmem:[#allocation144_spill] sm:$0xff] %v9777_v46  ;;  %v9781_v39 = vpop.permute.xlu0 %2492  ;;  %v9783_v12 = vpop.eup %6209  ;;  %6235 = vpow2.f32 %v4669_v5  ;;  %v4627_v54 = vmax.f32 %v4611_v1, %v9555_v45  ;;  %v4715_v53 = vmul.f32 1.442695, %v4689_v22  ;;  %v4740_v19 = vsub.f32 %v12058_v2, %v9759_v3  ;;  %v12075_v1 = vld [vmem:[#allocation13_spill] sm:$0xff]  ;;  %v12076_v22 = vld [vmem:[#allocation186_spill] sm:$0xff] }
 0xcef   :  { %12069 = vst [vmem:[#allocation164_spill] sm:$0xff] %v9781_v39  ;;  %3284 = vrot.lane.b32.xlu0 %v9544_v8, %s6409_s0  ;;  %v9792_v27 = vpop.permute.xlu1 %2494  ;;  %3286 = vrot.lane.b32.xlu1 %v9610_v50, %s6409_s0  ;;  %v9796_v40 = vpop.eup %6211  ;;  %6237 = vpow2.f32 %v4717_v33  ;;  %v3159_v16 = vmul.f32 %v12072_v0, %v11906_v34  ;;  %v4763_v17 = vmul.f32 1.442695, %v4737_v24  ;;  %v9805_v8 = vmax.f32 %v4614_v28, %v9536_v13 }
 0xcf0   :  { %12070 = vst [vmem:[#allocation150_spill] sm:$0xff] %v9792_v27  ;;  %12071 = vst [vmem:[#allocation99_spill] sm:$0xff] %v9796_v40  ;;  %v9802_v6 = vpop.eup %6213  ;;  %6239 = vpow2.f32 %v4765_v52  ;;  %v9808_v30 = vmax.f32 %v4613_v23, %v9589_v25  ;;  %v4811_v33 = vmul.f32 1.442695, %v4785_v60  ;;  %v4788_v2 = vsub.f32 %v9514_v62, %v9759_v3 }
 0xcf1   :  { %12073 = vst [vmem:[#allocation84_spill] sm:$0xff] %v9802_v6  ;;  %v9810_v50 = vpop.eup %6215  ;;  %6241 = vpow2.f32 %v4813_v10  ;;  %v9818_v0 = vmul.f32 %v12076_v22, %v12075_v1  ;;  %v4673_v28 = vmul.f32 1.442695, %v4644_v48  ;;  %v4721_v52 = vmul.f32 1.442695, %v4692_v47  ;;  %v12082_v22 = vld [vmem:[#allocation57_spill] sm:$0xff] }
 0xcf2   :  { %v9814_v5 = vpop.permute.xlu0 %2496  ;;  %v9820_v24 = vpop.eup %6217  ;;  %6243 = vpow2.f32 %v4667_v36  ;;  %v4643_v23 = vsub.f32 %v12052_v31, %v4627_v54  ;;  %v4769_v3 = vmul.f32 1.442695, %v4740_v19  ;;  %v4691_v60 = vsub.f32 %v12051_v20, %v4627_v54  ;;  %v12081_v20 = vld [vmem:[#allocation11_spill] sm:$0xff] }
 0xcf3   :  { %12074 = vst [vmem:[#allocation188_spill] sm:$0xff] %v9814_v5  ;;  %12077 = vst [vmem:[#allocation94_spill] sm:$0xff] %v9820_v24  ;;  %3098 = vrot.lane.b32.xlu0 %v9576_v49, %s6407_s2  ;;  %v9825_v10 = vpop.permute.xlu1 %2498  ;;  %3192 = vrot.lane.b32.xlu1 %v9644_v58, %s6408_s29  ;;  %v9829_v62 = vpop.eup %6219  ;;  %6245 = vpow2.f32 %v4715_v53  ;;  %v4739_v36 = vsub.f32 %v12066_v42, %v4627_v54  ;;  %v4787_v31 = vsub.f32 %v9555_v45, %v4627_v54 }
 0xcf4   :  { %12078 = vst [vmem:[#allocation189_spill] sm:$0xff] %v9825_v10  ;;  %12079 = vst [vmem:[#allocation56_spill] sm:$0xff] %v9829_v62  ;;  %v9833_v48 = vpop.eup %6221  ;;  %6247 = vpow2.f32 %v4763_v17  ;;  %v4646_v49 = vsub.f32 %v12047_v44, %v9805_v8  ;;  %v4645_v47 = vsub.f32 %v12056_v26, %v9808_v30  ;;  %v4817_v53 = vmul.f32 1.442695, %v4788_v2  ;;  %v12083_v10 = vld [vmem:[#allocation81_spill] sm:$0xff] }
 0xcf5   :  { %v9840_v58 = vpop.eup %6223  ;;  %6249 = vpow2.f32 %v4811_v33  ;;  %v3064_v42 = vmul.f32 %v12082_v22, %v12081_v20  ;;  %v9848_v17 = vmul.f32 %v12083_v10, %v11904_v56  ;;  %v4671_v44 = vmul.f32 1.442695, %v4643_v23  ;;  %v12084_v33 = vld [vmem:[#allocation170_spill] sm:$0xff] }
 0xcf6   :  { %12080 = vst [vmem:[#allocation199_spill] sm:$0xff] %v9840_v58  ;;  %v9842_v19 = vpop.permute.xlu0 %2564  ;;  %v9850_v45 = vpop.eup %6225  ;;  %6251 = vpow2.f32 %v4673_v28  ;;  %v4694_v26 = vsub.f32 %v12046_v59, %v9805_v8  ;;  %v4693_v54 = vsub.f32 %v12055_v32, %v9808_v30  ;;  %v4719_v10 = vmul.f32 1.442695, %v4691_v60 }
 0xcf7   :  { %2680 = vrot.lane.b32.xlu0 %v12084_v33, %s6409_s0  ;;  %v9858_v2 = vpop.permute.xlu1 %2566  ;;  %3194 = vrot.lane.b32.xlu1 %v3159_v16, %s6408_s29  ;;  %v9861_v22 = vpop.eup %6227  ;;  %6253 = vpow2.f32 %v4721_v52  ;;  %v4767_v5 = vmul.f32 1.442695, %v4739_v36  ;;  %v4823_v28 = vadd.f32 %v9612_v38, %v9604_v4  ;;  %v4815_v59 = vmul.f32 1.442695, %v4787_v31 }
 0xcf8   :  { %12085 = vst [vmem:[#allocation47_spill] sm:$0xff] %v9861_v22  ;;  %v9865_v23 = vpop.eup %6229  ;;  %6255 = vpow2.f32 %v4769_v3  ;;  %v4677_v32 = vmul.f32 1.442695, %v4646_v49  ;;  %v4675_v27 = vmul.f32 1.442695, %v4645_v47  ;;  %v4824_v52 = vadd.f32 %v9578_v63, %v9570_v51  ;;  %v12089_v47 = vld [vmem:[#allocation173_spill] sm:$0xff] }
 0xcf9   :  { %12086 = vst [vmem:[#allocation193_spill] sm:$0xff] %v9865_v23  ;;  %v9867_v39 = vpop.eup %6231  ;;  %6257 = vpow2.f32 %v4817_v53  ;;  %v4839_v16 = vadd.f32 %v9617_v35, %v4823_v28  ;;  %v4825_v60 = vadd.f32 %v9646_v14, %v9638_v7  ;;  %v4725_v3 = vmul.f32 1.442695, %v4694_v26 }
 0xcfa   :  { %12087 = vst [vmem:[#allocation192_spill] sm:$0xff] %v9867_v39  ;;  %v9869_v33 = vpop.permute.xlu0 %2568  ;;  %v9876_v36 = vpop.eup %6233  ;;  %6259 = vpow2.f32 %v4671_v44  ;;  %v4723_v31 = vmul.f32 1.442695, %v4693_v54  ;;  %v4741_v49 = vsub.f32 %v12067_v15, %v9808_v30  ;;  %v4742_v7 = vsub.f32 %v12062_v11, %v9805_v8 }
 0xcfb   :  { %12088 = vst [vmem:[#allocation200_spill] sm:$0xff] %v9876_v36  ;;  %2682 = vrot.lane.b32.xlu0 %v12089_v47, %s6409_s0  ;;  %v3105_v53 = vpop.permute.xlu1 %3104  ;;  %3100 = vrot.lane.b32.xlu1 %v3064_v42, %s6407_s2  ;;  %v9883_v28 = vpop.eup %6235  ;;  %6261 = vpow2.f32 %v4719_v10  ;;  %v9888_v51 = vadd.f32 %v9625_v37, %v4839_v16  ;;  %v4840_v44 = vadd.f32 %v9583_v29, %v4824_v52 }
 0xcfc   :  { %12090 = vst [vmem:[#allocation185_spill] sm:$0xff] %v9883_v28  ;;  %v9891_v26 = vpop.eup %6237  ;;  %6263 = vpow2.f32 %v4767_v5  ;;  %v4789_v15 = vsub.f32 %v9589_v25, %v9808_v30  ;;  %v4841_v54 = vadd.f32 %v9651_v21, %v4825_v60  ;;  %v4826_v42 = vadd.f32 %v9683_v18, %v9678_v57  ;;  %v12094_v30 = vld [vmem:[#allocation175_spill] sm:$0xff]  ;;  %v12095_v57 = vld [vmem:[#allocation8_spill] sm:$0xff] }
 0xcfd   :  { %12091 = vst [vmem:[#allocation210_spill] sm:$0xff] %v9888_v51  ;;  %12092 = vst [vmem:[#allocation194_spill] sm:$0xff] %v9891_v26  ;;  %v9898_v10 = vpop.eup %6239  ;;  %v4790_v11 = vsub.f32 %v9536_v13, %v9805_v8  ;;  %6265 = vpow2.f32 %v4675_v27  ;;  %v9903_v52 = vadd.f32 %v9591_v43, %v4840_v44  ;;  %v4827_v5 = vadd.f32 %v9742_v61, %v9736_v9  ;;  %v12096_v13 = vld [vmem:[#allocation37_spill] sm:$0xff] }
 0xcfe   :  { %v3107_v16 = vpop.permute.xlu0 %3106  ;;  %v9907_v47 = vpop.eup %6241  ;;  %6267 = vpow2.f32 %v4723_v31  ;;  %v4771_v25 = vmul.f32 1.442695, %v4741_v49  ;;  %v9914_v27 = vadd.f32 %v12096_v13, %v4841_v54  ;;  %v12098_v8 = vld [vmem:[#allocation97_spill] sm:$0xff]  ;;  %v4773_v9 = vmul.f32 1.442695, %v4742_v7  ;;  %v12106_v13 = vld [vmem:[#allocation43_spill] sm:$0xff] }
 0xcff   :  { %12093 = vst [vmem:[#allocation205_spill] sm:$0xff] %v9903_v52  ;;  %2588 = vrot.lane.b32.xlu0 %v12094_v30, %s6408_s29  ;;  %v3201_v60 = vpop.permute.xlu1 %3200  ;;  %2590 = vrot.lane.b32.xlu1 %v12095_v57, %s6408_s29  ;;  %v4842_v44 = vadd.f32 %v12098_v8, %v4826_v42  ;;  %v9917_v4 = vpop.eup %6243  ;;  %6269 = vpow2.f32 %v4677_v32  ;;  %v12100_v52 = vld [vmem:[#allocation246_spill] sm:$0xff]  ;;  %v4843_v49 = vadd.f32 %v9747_v55, %v4827_v5  ;;  %v4819_v30 = vmul.f32 1.442695, %v4789_v15  ;;  %v12102_v61 = vld [vmem:[#allocation93_spill] sm:$0xff] }
 0xd00   :  { %12097 = vst [vmem:[#allocation202_spill] sm:$0xff] %v9914_v27  ;;  %12099 = vst [vmem:[#allocation211_spill] sm:$0xff] %v9917_v4  ;;  %v3255_v31 = vmul.f32 %v12100_v52, %v11906_v34  ;;  %v9922_v51 = vpop.eup %6245  ;;  %6271 = vpow2.f32 %v4725_v3  ;;  %v3146_v57 = vadd.f32 %v3105_v53, %v9818_v0  ;;  %v12104_v32 = vld [vmem:[#allocation138_spill] sm:$0xff]  ;;  %v12107_v52 = vld [vmem:[#allocation4_spill] sm:$0xff]  ;;  %v4821_v55 = vmul.f32 1.442695, %v4790_v11 }
 0xd01   :  { %12101 = vst [vmem:[#allocation196_spill] sm:$0xff] %v9922_v51  ;;  %v9926_v54 = vadd.f32 %v12102_v61, %v4842_v44  ;;  %v9928_v27 = vpop.eup %6247  ;;  %6273 = vpow2.f32 %v4815_v59  ;;  %v9931_v7 = vadd.f32 %v12104_v32, %v4843_v49  ;;  %v4828_v1 = vadd.f32 %v12107_v52, %v12106_v13  ;;  %v12109_v15 = vld [vmem:[#allocation17_spill] sm:$0xff]  ;;  %v12110_v44 = vld [vmem:[#allocation184_spill] sm:$0xff]  ;;  %v12111_v13 = vld [vmem:[#allocation7_spill] sm:$0xff] }
 0xd02   :  { %v3203_v42 = vpop.permute.xlu0 %3202  ;;  %v9935_v5 = vpop.eup %6249  ;;  %6275 = vpow2.f32 %v4771_v25  ;;  %v3242_v0 = vadd.f32 %v3201_v60, %v3146_v57  ;;  %v4829_v59 = vadd.f32 %v9802_v6, %v9796_v40  ;;  %v3051_v49 = vmul.f32 %v12110_v44, %v12109_v15  ;;  %v12113_v25 = vld [vmem:[#allocation88_spill] sm:$0xff]  ;;  %v12115_v57 = vld [vmem:[#allocation158_spill] sm:$0xff]  ;;  %v12116_v52 = vld [vmem:[#allocation225_spill] sm:$0xff] }
 0xd03   :  { %12103 = vst [vmem:[#allocation222_spill] sm:$0xff] %v9926_v54  ;;  %12105 = vst [vmem:[#allocation206_spill] sm:$0xff] %v9931_v7  ;;  %3288 = vrot.lane.b32.xlu0 %v9848_v17, %s6409_s0  ;;  %v3109_v3 = vpop.permute.xlu1 %3108  ;;  %3290 = vrot.lane.b32.xlu1 %v3255_v31, %s6409_s0  ;;  %v9942_v53 = vpop.eup %6251  ;;  %6277 = vpow2.f32 %v4773_v9  ;;  %v12112_v7 = vld [vmem:[#allocation244_spill] sm:$0xff]  ;;  %v4844_v54 = vadd.f32 %v12113_v25, %v4828_v1  ;;  %v12114_v17 = vld [vmem:[#allocation249_spill] sm:$0xff]  ;;  %v4830_v40 = vadd.f32 %v9772_v41, %v12115_v57 }
 0xd04   :  { %12108 = vst [vmem:[#allocation216_spill] sm:$0xff] %v9942_v53  ;;  %v3065_v11 = vmul.f32 %v12112_v7, %v12111_v13  ;;  %v9949_v32 = vpop.eup %6253  ;;  %6279 = vpow2.f32 %v4819_v30  ;;  %v3160_v60 = vmul.f32 %v12114_v17, %v12081_v20  ;;  %v4845_v31 = vadd.f32 %v9810_v50, %v4829_v59  ;;  %v12117_v7 = vld [vmem:[#allocation107_spill] sm:$0xff] }
 0xd05   :  { %v9956_v9 = vpop.eup %6255  ;;  %v3147_v6 = vadd.f32 %v3107_v16, %v3051_v49  ;;  %6281 = vrcp.f32 %v12116_v52  ;;  %v9960_v61 = vadd.f32 %v12117_v7, %v4844_v54  ;;  %v4831_v1 = vadd.f32 %v9865_v23, %v9861_v22  ;;  %v12122_v54 = vld [vmem:[#allocation32_spill] sm:$0xff]  ;;  %v12123_v57 = vld [vmem:[#allocation147_spill] sm:$0xff] }
 0xd06   :  { %v3297_v44 = vpop.permute.xlu0 %3296  ;;  %v9964_v30 = vpop.eup %6257  ;;  %6283 = vpow2.f32 %v4821_v55  ;;  %v9969_v16 = vadd.f32 %v9820_v24, %v4845_v31  ;;  %v4846_v52 = vadd.f32 %v9777_v46, %v4830_v40  ;;  %v12126_v40 = vld [vmem:[#allocation20_spill] sm:$0xff] }
 0xd07   :  { %12118 = vst [vmem:[#allocation213_spill] sm:$0xff] %v9960_v61  ;;  %12119 = vst [vmem:[#allocation226_spill] sm:$0xff] %v9964_v30  ;;  %v3338_v17 = vadd.f32 %v3297_v44, %v3242_v0  ;;  %3102 = vrot.lane.b32.xlu0 %v3065_v11, %s6407_s2  ;;  %v3111_v59 = vpop.permute.xlu1 %3110  ;;  %3196 = vrot.lane.b32.xlu1 %v3160_v60, %s6408_s29  ;;  %v9972_v49 = vpop.eup %6259  ;;  %v2640_v61 = vmul.f32 %v12123_v57, %v12122_v54  ;;  %v12124_v0 = vld [vmem:[#allocation14_spill] sm:$0xff]  ;;  %v12128_v57 = vld [vmem:[#allocation247_spill] sm:$0xff] }
 0xd08   :  { %12120 = vst [vmem:[#allocation208_spill] sm:$0xff] %v9969_v16  ;;  %12121 = vst [vmem:[#allocation236_spill] sm:$0xff] %v9972_v49  ;;  %v4847_v22 = vadd.f32 %v9867_v39, %v4831_v1  ;;  %v9977_v23 = vpop.eup %6261  ;;  %v3243_v55 = vadd.f32 %v3203_v42, %v3147_v6  ;;  %v9981_v44 = vadd.f32 %v9783_v12, %v4846_v52  ;;  %v12127_v16 = vld [vmem:[#allocation197_spill] sm:$0xff] }
 0xd09   :  { %v3354_v11 = vmul.f32 %v12124_v0, %v3338_v17  ;;  %v4832_v60 = vadd.f32 %v9833_v48, %v9829_v62  ;;  %v9985_v31 = vpop.eup %6263  ;;  %v3052_v24 = vmul.f32 %v12127_v16, %v12126_v40  ;;  %v3161_v1 = vmul.f32 %v12128_v57, %v12111_v13  ;;  %v12131_v0 = vld [vmem:[#allocation229_spill] sm:$0xff]  ;;  %v12132_v62 = vld [vmem:[#allocation23_spill] sm:$0xff] }
 0xd0a   :  { %12125 = vst [vmem:[#allocation218_spill] sm:$0xff] %v9981_v44  ;;  %v3299_v46 = vpop.permute.xlu0 %3298  ;;  %v9992_v39 = vadd.f32 %v9876_v36, %v4847_v22  ;;  %v4833_v6 = vadd.f32 %v9922_v51, %v9917_v4  ;;  %v9996_v42 = vpop.eup %6265  ;;  %6285 = vrcp.f32 %v12131_v0  ;;  %v4834_v57 = vadd.f32 %v9891_v26, %v9883_v28  ;;  %v12134_v44 = vld [vmem:[#allocation35_spill] sm:$0xff]  ;;  %v12135_v36 = vld [vmem:[#allocation162_spill] sm:$0xff]  ;;  %v12137_v0 = vld [vmem:[#allocation16_spill] sm:$0xff] }
 0xd0b   :  { %12130 = vst [vmem:[#allocation233_spill] sm:$0xff] %v9996_v42  ;;  %v3339_v17 = vadd.f32 %v3299_v46, %v3243_v55  ;;  %2684 = vrot.lane.b32.xlu0 %v2640_v61, %s6409_s0  ;;  %5666 = vmatprep.mubr.msk.f32.mxu1 %vm271_vm1, %v3354_v11  ;;  %v3205_v52 = vpop.permute.xlu1 %3204  ;;  %v4848_v16 = vadd.f32 %v9840_v58, %v4832_v60  ;;  %v10004_v22 = vpop.eup %6267 }
 0xd0c   :  { %12129 = vst [vmem:[#allocation230_spill] sm:$0xff] %v9992_v39  ;;  %v12133_v39 = vld [vmem:[#allocation50_spill] sm:$0xff]  ;;  %v2641_v46 = vmul.f32 %v12135_v36, %v12134_v44  ;;  %3198 = vrot.lane.b32.xlu1 %v3161_v1, %s6408_s29  ;;  %v4849_v61 = vadd.f32 %v9928_v27, %v4833_v6  ;;  %v4835_v55 = vadd.f32 %v9977_v23, %v9972_v49  ;;  %v10014_v11 = vpop.eup %6269  ;;  %v12140_v1 = vld [vmem:[#allocation251_spill] sm:$0xff] }
 0xd0d   :  { %v3053_v4 = vmul.f32 %v12133_v39, %v12132_v62  ;;  %12136 = vst [vmem:[#allocation240_spill] sm:$0xff] %v10014_v11  ;;  %v3148_v60 = vadd.f32 %v3109_v3, %v3052_v24  ;;  %v3355_v28 = vmul.f32 %v12137_v0, %v3339_v17  ;;  %v10018_v26 = vadd.f32 %v9850_v45, %v4848_v16  ;;  %v10021_v51 = vpop.eup %6271 }
 0xd0e   :  { %v4850_v39 = vadd.f32 %v9898_v10, %v4834_v57  ;;  %12139 = vst [vmem:[#allocation242_spill] sm:$0xff] %v10021_v51  ;;  %v3207_v36 = vpop.permute.xlu0 %3206  ;;  %v3256_v58 = vmul.f32 %v12140_v1, %v12081_v20  ;;  %v10026_v6 = vadd.f32 %v9935_v5, %v4849_v61  ;;  %v4851_v49 = vadd.f32 %v9985_v31, %v4835_v55  ;;  %v10031_v3 = vpop.eup %6273  ;;  %v12145_v55 = vld [vmem:[#allocation177_spill] sm:$0xff] }
 0xd0f   :  { %12138 = vst [vmem:[#allocation224_spill] sm:$0xff] %v10018_v26  ;;  %v4836_v24 = vadd.f32 %v9949_v32, %v9942_v53  ;;  %12142 = vst [vmem:[#allocation85_spill] sm:$0xff] %v10031_v3  ;;  %2686 = vrot.lane.b32.xlu0 %v2641_v46, %s6409_s0  ;;  %5667 = vmatmul.mubr.msk.f32.vlgmr.msra.gmra.mxu1 %vm271_vm1, %v3355_v28  ;;  %v3244_v17 = vadd.f32 %v3205_v52, %v3148_v60  ;;  %v3113_v16 = vpop.permute.xlu1 %3112  ;;  %v10040_v0 = vpop.eup %6275  ;;  %v12147_v60 = vld [vmem:[#allocation38_spill] sm:$0xff]  ;;  %v12151_v26 = vld [vmem:[#allocation168_spill] sm:$0xff] }
 0xd10   :  { %12141 = vst [vmem:[#allocation238_spill] sm:$0xff] %v10026_v6  ;;  %v10036_v57 = vadd.f32 %v9907_v47, %v4850_v39  ;;  %v4837_v61 = vadd.f32 %v10004_v22, %v9996_v42  ;;  %12144 = vst [vmem:[#allocation89_spill] sm:$0xff] %v10040_v0  ;;  %3292 = vrot.lane.b32.xlu1 %v3256_v58, %s6409_s0  ;;  %5682 = vmatpush3.msra.mxu1 %v12145_v55  ;;  %v10048_v28 = vpop.eup %6277  ;;  %v12148_v39 = vld [vmem:[#allocation152_spill] sm:$0xff]  ;;  %v12150_v55 = vld [vmem:[#allocation41_spill] sm:$0xff] }
 0xd11   :  { %v10045_v1 = vadd.f32 %v10031_v3, %v4851_v49  ;;  %v4852_v46 = vadd.f32 %v9956_v9, %v4836_v24  ;;  %v3149_v52 = vadd.f32 %v3111_v59, %v3053_v4  ;;  %v2546_v53 = vmul.f32 %v12148_v39, %v12147_v60  ;;  %v10055_v6 = vpop.eup %6279  ;;  %v12153_v59 = vld [vmem:[#allocation232_spill] sm:$0xff] }
 0xd12   :  { %12143 = vst [vmem:[#allocation100_spill] sm:$0xff] %v10036_v57  ;;  %v4853_v57 = vadd.f32 %v10040_v0, %v4837_v61  ;;  %v4838_v42 = vadd.f32 %v10021_v51, %v10014_v11  ;;  %12149 = vst [vmem:[#allocation90_spill] sm:$0xff] %v10055_v6  ;;  %v3301_v58 = vpop.permute.xlu0 %3300  ;;  %v2547_v49 = vmul.f32 %v12151_v26, %v12150_v55  ;;  %v6282_v24 = vpop.eup %6281  ;;  %6287 = vrcp.f32 %v12153_v59  ;;  %v12160_v59 = vld [vmem:[#allocation59_spill] sm:$0xff] }
 0xd13   :  { %12146 = vst [vmem:[#allocation95_spill] sm:$0xff] %v10045_v1  ;;  %v10060_v1 = vadd.f32 %v9964_v30, %v4852_v46  ;;  %v3340_v3 = vadd.f32 %v3301_v58, %v3244_v17  ;;  %2592 = vrot.lane.b32.xlu0 %v2546_v53, %s6408_s29  ;;  %v3115_v4 = vpop.permute.xlu1 %3114  ;;  %v10068_v11 = vpop.eup %6283  ;;  %v3245_v26 = vadd.f32 %v3207_v36, %v3149_v52  ;;  %v12156_v46 = vld [vmem:[#allocation3_spill] sm:$0xff]  ;;  %v12159_v58 = vld [vmem:[#allocation2_spill] sm:$0xff] }
 0xd14   :  { %v10065_v61 = vadd.f32 %v10055_v6, %v4853_v57  ;;  %v4854_v39 = vadd.f32 %v10048_v28, %v4838_v42  ;;  %12155 = vst [vmem:[#allocation105_spill] sm:$0xff] %v10068_v11  ;;  %2594 = vrot.lane.b32.xlu1 %v2547_v49, %s6408_s29  ;;  %v4071_v30 = vmul.f32 %v12160_v59, %v12159_v58  ;;  %v12161_v57 = vld [vmem:[#allocation26_spill] sm:$0xff] }
 0xd15   :  { %12152 = vst [vmem:[#allocation104_spill] sm:$0xff] %v10060_v1  ;;  %v3356_v0 = vmul.f32 %v6282_v24, %v3340_v3  ;;  %v12157_v1 = vld [vmem:[#allocation67_spill] sm:$0xff]  ;;  %v12164_v24 = vld [vmem:[#allocation254_spill] sm:$0xff] }
 0xd16   :  { %12154 = vst [vmem:[#allocation109_spill] sm:$0xff] %v10065_v61  ;;  %v4070_v51 = vmul.f32 %v12157_v1, %v12156_v46  ;;  %v10074_v17 = vadd.f32 %v10068_v11, %v4854_v39  ;;  %v3303_v53 = vpop.permute.xlu0 %3302  ;;  %v12162_v61 = vld [vmem:[#allocation179_spill] sm:$0xff]  ;;  %v3257_v39 = vmul.f32 %v12164_v24, %v12111_v13  ;;  %v12170_v11 = vld [vmem:[#allocation237_spill] sm:$0xff] }
 0xd17   :  { %v3054_v6 = vmul.f32 %v12162_v61, %v12161_v57  ;;  %v3341_v42 = vadd.f32 %v3303_v53, %v3245_v26  ;;  %5669 = vmatprep.mubr.msk.f32.mxu1 %vm271_vm1, %v3356_v0  ;;  %v3209_v36 = vpop.permute.xlu1 %3208  ;;  %v12163_v3 = vld [vmem:[#allocation235_spill] sm:$0xff]  ;;  %v6286_v52 = vpop.eup %6285  ;;  %v12166_v26 = vld [vmem:[#allocation29_spill] sm:$0xff] }
 0xd18   :  { %12158 = vst [vmem:[#allocation110_spill] sm:$0xff] %v10074_v17  ;;  %4102 = vrot.lane.b32.xlu0 %v4070_v51, %s6407_s2  ;;  %6289 = vrcp.f32 %v12163_v3  ;;  %4104 = vrot.lane.b32.xlu1 %v4071_v30, %s6407_s2  ;;  %v12165_v17 = vld [vmem:[#allocation66_spill] sm:$0xff]  ;;  %v12167_v53 = vld [vmem:[#allocation203_spill] sm:$0xff] }
 0xd19   :  { %v3150_v1 = vadd.f32 %v3113_v16, %v3054_v6  ;;  %v3357_v49 = vmul.f32 %v6286_v52, %v3341_v42  ;;  %v4166_v61 = vmul.f32 %v12165_v17, %v12156_v46  ;;  %v3055_v51 = vmul.f32 %v12167_v53, %v12166_v26  ;;  %v12168_v6 = vld [vmem:[#allocation153_spill] sm:$0xff] }
 0xd1a   :  { %v3211_v59 = vpop.permute.xlu0 %3210  ;;  %v2642_v16 = vmul.f32 %v12168_v6, %v12147_v60  ;;  %v12169_v52 = vld [vmem:[#allocation169_spill] sm:$0xff]  ;;  %6291 = vrcp.f32 %v12170_v11 }
 0xd1b   :  { %5670 = vmatmul.mubr.msk.f32.gmra.mxu1 %vm271_vm1, %v3357_v49  ;;  %v3246_v0 = vadd.f32 %v3209_v36, %v3150_v1  ;;  %v3117_v3 = vpop.permute.xlu1 %3116  ;;  %v3151_v30 = vadd.f32 %v3115_v4, %v3055_v51  ;;  %v2643_v24 = vmul.f32 %v12169_v52, %v12150_v55  ;;  %v4903_v4 = vmul.f32 %v9612_v38, %v12156_v46  ;;  %v12171_v51 = vld [vmem:[#allocation221_spill] sm:$0xff] }
 0xd1c   :  { %3294 = vrot.lane.b32.xlu0 %v3257_v39, %s6409_s0  ;;  %4198 = vrot.lane.b32.xlu1 %v4166_v61, %s6408_s29  ;;  %v4904_v61 = vmul.f32 %v9578_v63, %v12159_v58 }
 0xd1d   :  { %v3247_v36 = vadd.f32 %v3211_v59, %v3151_v30 }
 0xd1e   :  { %v3305_v42 = vpop.permute.xlu0 %3304 }
 0xd1f   :  { %v3342_v17 = vadd.f32 %v3305_v42, %v3246_v0  ;;  %v3119_v53 = vpop.permute.xlu1 %3118  ;;  %v6288_v39 = vpop.eup %6287  ;;  %v3056_v0 = vmul.f32 %v12171_v51, %v12122_v54  ;;  %v12173_v42 = vld [vmem:[#allocation58_spill] sm:$0xff] }
 0xd20   :  { %2688 = vrot.lane.b32.xlu0 %v2642_v16, %s6409_s0  ;;  %2690 = vrot.lane.b32.xlu1 %v2643_v24, %s6409_s0  ;;  %v12172_v16 = vld [vmem:[#allocation239_spill] sm:$0xff]  ;;  %v4167_v52 = vmul.f32 %v12173_v42, %v12159_v58 }
 0xd21   :  { %v3358_v1 = vmul.f32 %v6288_v39, %v3342_v17  ;;  %6293 = vrcp.f32 %v12172_v16  ;;  %v3152_v30 = vadd.f32 %v3117_v3, %v3056_v0  ;;  %v12174_v24 = vld [vmem:[#allocation71_spill] sm:$0xff]  ;;  %v12175_v39 = vld [vmem:[#allocation214_spill] sm:$0xff]  ;;  %v12176_v3 = vld [vmem:[#allocation245_spill] sm:$0xff] }
 0xd22   :  { %v3307_v49 = vpop.permute.xlu0 %3306  ;;  %v4262_v17 = vmul.f32 %v12174_v24, %v12156_v46  ;;  %6295 = vrcp.f32 %v12176_v3  ;;  %v4999_v24 = vmul.f32 %v9617_v35, %v12156_v46 }
 0xd23   :  { %v3343_v6 = vadd.f32 %v3307_v49, %v3247_v36  ;;  %5672 = vmatprep.mubr.msk.f32.mxu1 %vm271_vm1, %v3358_v1  ;;  %v3213_v11 = vpop.permute.xlu1 %3212  ;;  %v3057_v36 = vmul.f32 %v12175_v39, %v12134_v44 }
 0xd24   :  { %4935 = vrot.lane.b32.xlu0 %v4903_v4, %s6407_s2  ;;  %4937 = vrot.lane.b32.xlu1 %v4904_v61, %s6407_s2  ;;  %v3248_v1 = vadd.f32 %v3213_v11, %v3152_v30  ;;  %v12177_v61 = vld [vmem:[#allocation75_spill] sm:$0xff]  ;;  %v12180_v30 = vld [vmem:[#allocation86_spill] sm:$0xff] }
 0xd25   :  { %v6290_v59 = vpop.eup %6289  ;;  %v3153_v49 = vadd.f32 %v3119_v53, %v3057_v36  ;;  %v4072_v51 = vmul.f32 %v12177_v61, %v11904_v56  ;;  %v10135_v36 = vld [vmem:[%s10816_s3 + $0x10] sm:$0xff] }
 0xd26   :  { %v3359_v38 = vmul.f32 %v6290_v59, %v3343_v6  ;;  %v3215_v63 = vpop.permute.xlu0 %3214  ;;  %v12178_v6 = vld [vmem:[#allocation259_spill] sm:$0xff]  ;;  %5707 = vmatprep.subr.mxu0 %v10135_v36 }
 0xd27   :  { %v3121_v4 = vpop.permute.xlu1 %3120  ;;  %v4073_v16 = vmul.f32 %v12178_v6, %v11906_v34  ;;  %v6292_v11 = vpop.eup %6291 }
 0xd28   :  { %4200 = vrot.lane.b32.xlu0 %v4167_v52, %s6408_s29  ;;  %5673 = vmatmul.mubr.msk.f32.gmra.mxu1 %vm271_vm1, %v3359_v38  ;;  %v12179_v52 = vld [vmem:[#allocation243_spill] sm:$0xff]  ;;  %v3249_v38 = vadd.f32 %v3215_v63, %v3153_v49 }
 0xd29   :  { %4294 = vrot.lane.b32.xlu1 %v4262_v17, %s6409_s0  ;;  %6297 = vrcp.f32 %v12179_v52  ;;  %v12181_v17 = vld [vmem:[#allocation228_spill] sm:$0xff]  ;;  %v12184_v52 = vld [vmem:[#allocation63_spill] sm:$0xff] }
 0xd2a   :  { %v3309_v0 = vpop.permute.xlu0 %3308  ;;  %6299 = vrcp.f32 %v12180_v30  ;;  %v3059_v39 = vmul.f32 %v12181_v17, %v12150_v55 }
 0xd2b   :  { %v3344_v59 = vadd.f32 %v3309_v0, %v3248_v1  ;;  %v3123_v42 = vpop.permute.xlu1 %3122  ;;  %v12182_v1 = vld [vmem:[#allocation234_spill] sm:$0xff]  ;;  %v12183_v0 = vld [vmem:[#allocation101_spill] sm:$0xff] }
 0xd2c   :  { %4106 = vrot.lane.b32.xlu0 %v4072_v51, %s6407_s2  ;;  %v3058_v3 = vmul.f32 %v12182_v1, %v12147_v60  ;;  %v5000_v51 = vmul.f32 %v9583_v29, %v12159_v58  ;;  %v3155_v35 = vadd.f32 %v3123_v42, %v3059_v39  ;;  %6301 = vrcp.f32 %v12183_v0  ;;  %v12185_v29 = vld [vmem:[#allocation82_spill] sm:$0xff]  ;;  %v12187_v39 = vld [vmem:[#allocation25_spill] sm:$0xff] }
 0xd2d   :  { %4108 = vrot.lane.b32.xlu1 %v4073_v16, %s6407_s2  ;;  %v3360_v53 = vmul.f32 %v6292_v11, %v3344_v59  ;;  %v4263_v11 = vmul.f32 %v12184_v52, %v12159_v58  ;;  %v2420_v30 = vmul.f32 %v12185_v29, %v12156_v46 }
 0xd2e   :  { %v3311_v61 = vpop.permute.xlu0 %3310  ;;  %v6294_v6 = vpop.eup %6293  ;;  %v3154_v16 = vadd.f32 %v3121_v4, %v3058_v3 }
 0xd2f   :  { %v3345_v63 = vadd.f32 %v3311_v61, %v3249_v38  ;;  %5675 = vmatprep.mubr.msk.f32.mxu1 %vm271_vm1, %v3360_v53  ;;  %v3217_v49 = vpop.permute.xlu1 %3216  ;;  %v4905_v53 = vmul.f32 %v9646_v14, %v11904_v56  ;;  %v2516_v1 = vadd.f32 %v12187_v39, %v2420_v30  ;;  %v12188_v61 = vld [vmem:[#allocation91_spill] sm:$0xff]  ;;  %v12190_v14 = vld [vmem:[#allocation74_spill] sm:$0xff] }
 0xd30   :  { %5031 = vrot.lane.b32.xlu0 %v4999_v24, %s6408_s29  ;;  %v3250_v17 = vadd.f32 %v3217_v49, %v3154_v16  ;;  %v12186_v24 = vld [vmem:[#allocation98_spill] sm:$0xff] }
 0xd31   :  { %5033 = vrot.lane.b32.xlu1 %v5000_v51, %s6408_s29  ;;  %v3361_v59 = vmul.f32 %v6294_v6, %v3345_v63  ;;  %6303 = vrcp.f32 %v12186_v24  ;;  %v6296_v51 = vpop.eup %6295  ;;  %v12189_v63 = vld [vmem:[#allocation96_spill] sm:$0xff]  ;;  %v2612_v0 = vadd.f32 %v9842_v19, %v2516_v1 }
 0xd32   :  { %v3219_v38 = vpop.permute.xlu0 %3218  ;;  %6305 = vrcp.f32 %v12188_v61  ;;  %v2421_v49 = vmul.f32 %v12189_v63, %v12159_v58  ;;  %v12193_v19 = vld [vmem:[#allocation92_spill] sm:$0xff] }
 0xd33   :  { %v3251_v42 = vadd.f32 %v3219_v38, %v3155_v35  ;;  %5676 = vmatmul.mubr.msk.f32.gmra.mxu1 %vm271_vm1, %v3361_v59  ;;  %v3313_v4 = vpop.permute.xlu1 %3312  ;;  %v4168_v35 = vmul.f32 %v12190_v14, %v11904_v56  ;;  %v12191_v59 = vld [vmem:[#allocation260_spill] sm:$0xff]  ;;  %v2422_v24 = vmul.f32 %v12193_v19, %v11904_v56  ;;  %v12195_v14 = vld [vmem:[#allocation19_spill] sm:$0xff] }
 0xd34   :  { %4296 = vrot.lane.b32.xlu0 %v4263_v11, %s6409_s0  ;;  %v3346_v3 = vadd.f32 %v3313_v4, %v3250_v17  ;;  %v4169_v52 = vmul.f32 %v12191_v59, %v11906_v34  ;;  %v12192_v11 = vld [vmem:[#allocation10_spill] sm:$0xff] }
 0xd35   :  { %4939 = vrot.lane.b32.xlu1 %v4905_v53, %s6407_s2  ;;  %v2517_v29 = vadd.f32 %v12192_v11, %v2421_v49  ;;  %v5096_v49 = vmul.f32 %v9591_v43, %v12159_v58 }
 0xd36   :  { %v3315_v6 = vpop.permute.xlu0 %3314  ;;  %v3362_v16 = vmul.f32 %v6296_v51, %v3346_v3  ;;  %v6298_v17 = vpop.eup %6297  ;;  %v5095_v3 = vmul.f32 %v9625_v37, %v12156_v46  ;;  %v12197_v37 = vld [vmem:[#allocation34_spill] sm:$0xff] }
 0xd37   :  { %v3347_v30 = vadd.f32 %v3315_v6, %v3251_v42  ;;  %v2661_v38 = vpop.permute.xlu1 %2660  ;;  %v6300_v4 = vpop.eup %6299  ;;  %v2613_v39 = vadd.f32 %v9858_v2, %v2517_v29  ;;  %v12194_v42 = vld [vmem:[#allocation87_spill] sm:$0xff]  ;;  %v12196_v6 = vld [vmem:[#allocation108_spill] sm:$0xff]  ;;  %v4906_v29 = vmul.f32 %v9683_v18, %v11906_v34 }
 0xd38   :  { %4202 = vrot.lane.b32.xlu0 %v4168_v35, %s6408_s29  ;;  %v2708_v53 = vadd.f32 %v2661_v38, %v2612_v0  ;;  %5678 = vmatprep.mubr.msk.f32.mxu1 %vm271_vm1, %v3362_v16  ;;  %v2423_v61 = vmul.f32 %v12194_v42, %v11906_v34  ;;  %v2518_v35 = vadd.f32 %v12195_v14, %v2422_v24  ;;  %6307 = vrcp.f32 %v12196_v6  ;;  %v2115_v24 = vld [vmem:[%s10816_s3 + $0x18] sm:$0xff]  ;;  %v12204_v6 = vld [vmem:[#allocation40_spill] sm:$0xff] }
 0xd39   :  { %4204 = vrot.lane.b32.xlu1 %v4169_v52, %s6408_s29  ;;  %v3363_v1 = vmul.f32 %v6298_v17, %v3347_v30  ;;  %v6302_v16 = vpop.eup %6301  ;;  %v12198_v52 = vld [vmem:[#allocation113_spill] sm:$0xff]  ;;  %v12199_v17 = vld [vmem:[#allocation80_spill] sm:$0xff]  ;;  %5733 = vmatprep.subr.mxu1 %v2115_v24 }
 0xd3a   :  { %v2663_v51 = vpop.permute.xlu0 %2662  ;;  %v2724_v63 = vmul.f32 %v6300_v4, %v2708_v53  ;;  %v2519_v59 = vadd.f32 %v12197_v37, %v2423_v61  ;;  %6309 = vrcp.f32 %v12198_v52  ;;  %v2614_v43 = vadd.f32 %v9869_v33, %v2518_v35  ;;  %v12201_v61 = vld [vmem:[#allocation267_spill] sm:$0xff] }
 0xd3b   :  { %v2709_v0 = vadd.f32 %v2663_v51, %v2613_v39  ;;  %5679 = vmatmul.mubr.msk.f32.gmra.mxu1 %vm271_vm1, %v3363_v1  ;;  %v2571_v2 = vpop.permute.xlu1 %2570  ;;  %v4264_v53 = vmul.f32 %v12199_v17, %v11904_v56  ;;  %v12200_v1 = vld [vmem:[#allocation102_spill] sm:$0xff]  ;;  %v4074_v51 = vmul.f32 %v12201_v61, %v12081_v20  ;;  %v12206_v52 = vld [vmem:[#allocation51_spill] sm:$0xff] }
 0xd3c   :  { %5127 = vrot.lane.b32.xlu0 %v5095_v3, %s6409_s0  ;;  %5683 = vmatprep.mubr.msk.f32.mxu1 %vm271_vm1, %v2724_v63  ;;  %v2615_v38 = vadd.f32 %v2571_v2, %v2519_v59  ;;  %v2424_v3 = vmul.f32 %v12200_v1, %v12081_v20  ;;  %v12202_v63 = vld [vmem:[#allocation106_spill] sm:$0xff]  ;;  %v12205_v59 = vld [vmem:[#allocation120_spill] sm:$0xff]  ;;  %v12209_v1 = vld [vmem:[#allocation111_spill] sm:$0xff] }
 0xd3d   :  { %5129 = vrot.lane.b32.xlu1 %v5096_v49, %s6409_s0  ;;  %v2725_v11 = vmul.f32 %v6302_v16, %v2709_v0  ;;  %v2425_v49 = vmul.f32 %v12202_v63, %v12111_v13  ;;  %v12203_v0 = vld [vmem:[#allocation263_spill] sm:$0xff]  ;;  %6311 = vrcp.f32 %v12205_v59 }
 0xd3e   :  { %v2665_v30 = vpop.permute.xlu0 %2664  ;;  %v6304_v33 = vpop.eup %6303  ;;  %v4075_v2 = vmul.f32 %v12203_v0, %v12111_v13  ;;  %v2520_v16 = vadd.f32 %v12204_v6, %v2424_v3  ;;  %v12213_v0 = vld [vmem:[#allocation45_spill] sm:$0xff] }
 0xd3f   :  { %v2710_v4 = vadd.f32 %v2665_v30, %v2614_v43  ;;  %5684 = vmatmul.mubr.msk.f32.vlgmr.msra.gmra.mxu1 %vm271_vm1, %v2725_v11  ;;  %v2667_v19 = vpop.permute.xlu1 %2666  ;;  %v6306_v18 = vpop.eup %6305  ;;  %v2521_v43 = vadd.f32 %v12206_v52, %v2425_v49  ;;  %v12207_v11 = vld [vmem:[#allocation123_spill] sm:$0xff]  ;;  %v5001_v30 = vmul.f32 %v9651_v21, %v11904_v56  ;;  %v12210_v21 = vld [vmem:[#allocation261_spill] sm:$0xff]  ;;  %v12215_v52 = vld [vmem:[#allocation258_spill] sm:$0xff] }
 0xd40   :  { %4941 = vrot.lane.b32.xlu0 %v4906_v29, %s6407_s2  ;;  %v2711_v39 = vadd.f32 %v2667_v19, %v2615_v38  ;;  %5734 = vmatpush3.msra.mxu1 %v2115_v24  ;;  %6313 = vrcp.f32 %v12207_v11  ;;  %v4265_v61 = vmul.f32 %v12210_v21, %v11906_v34 }
 0xd41   :  { %4298 = vrot.lane.b32.xlu1 %v4264_v53, %s6409_s0  ;;  %v2726_v42 = vmul.f32 %v6304_v33, %v2710_v4  ;;  %v5002_v53 = vmul.f32 %v12098_v8, %v11906_v34 }
 0xd42   :  { %v2573_v14 = vpop.permute.xlu0 %2572  ;;  %v2727_v35 = vmul.f32 %v6306_v18, %v2711_v39  ;;  %v12208_v18 = vld [vmem:[#allocation13_spill] sm:$0xff] }
 0xd43   :  { %5686 = vmatprep.mubr.msk.f32.mxu1 %vm271_vm1, %v2726_v42  ;;  %v2575_v37 = vpop.permute.xlu1 %2574  ;;  %v2616_v29 = vadd.f32 %v2573_v14, %v2520_v16  ;;  %v2426_v3 = vmul.f32 %v12209_v1, %v12208_v18  ;;  %v12212_v14 = vld [vmem:[#allocation112_spill] sm:$0xff]  ;;  %v12214_v16 = vld [vmem:[#allocation5_spill] sm:$0xff] }
 0xd44   :  { %4110 = vrot.lane.b32.xlu0 %v4074_v51, %s6407_s2  ;;  %5687 = vmatmul.mubr.msk.f32.gmra.mxu1 %vm271_vm1, %v2727_v35  ;;  %v2617_v17 = vadd.f32 %v2575_v37, %v2521_v43  ;;  %v12211_v51 = vld [vmem:[#allocation115_spill] sm:$0xff]  ;;  %v4907_v35 = vmul.f32 %v12212_v14, %v12081_v20  ;;  %v4170_v43 = vmul.f32 %v12215_v52, %v12081_v20  ;;  %v12218_v1 = vld [vmem:[#allocation37_spill] sm:$0xff] }
 0xd45   :  { %4112 = vrot.lane.b32.xlu1 %v4075_v2, %s6407_s2  ;;  %v6308_v24 = vpop.eup %6307  ;;  %v2427_v63 = vmul.f32 %v12211_v51, %v12109_v15  ;;  %v2522_v2 = vadd.f32 %v12213_v0, %v2426_v3  ;;  %v5097_v3 = vmul.f32 %v12218_v1, %v11904_v56  ;;  %v12229_v1 = vld [vmem:[#allocation248_spill] sm:$0xff] }
 0xd46   :  { %v2669_v38 = vpop.permute.xlu0 %2668 }
 0xd47   :  { %v2712_v4 = vadd.f32 %v2669_v38, %v2616_v29  ;;  %v2671_v19 = vpop.permute.xlu1 %2670  ;;  %v6310_v39 = vpop.eup %6309  ;;  %v2523_v37 = vadd.f32 %v12214_v16, %v2427_v63 }
 0xd48   :  { %5035 = vrot.lane.b32.xlu0 %v5001_v30, %s6408_s29  ;;  %v2713_v33 = vadd.f32 %v2671_v19, %v2617_v17  ;;  %v12216_v30 = vld [vmem:[#allocation264_spill] sm:$0xff] }
 0xd49   :  { %5037 = vrot.lane.b32.xlu1 %v5002_v53, %s6408_s29  ;;  %v2728_v42 = vmul.f32 %v6308_v24, %v2712_v4  ;;  %v4171_v38 = vmul.f32 %v12216_v30, %v12111_v13  ;;  %v12217_v4 = vld [vmem:[#allocation129_spill] sm:$0xff] }
 0xd4a   :  { %v2577_v8 = vpop.permute.xlu0 %2576  ;;  %v2729_v49 = vmul.f32 %v6310_v39, %v2713_v33  ;;  %6315 = vrcp.f32 %v12217_v4  ;;  %v6312_v19 = vpop.eup %6311  ;;  %v12226_v30 = vld [vmem:[#allocation21_spill] sm:$0xff] }
 0xd4b   :  { %5689 = vmatprep.mubr.msk.f32.mxu1 %vm271_vm1, %v2728_v42  ;;  %v2579_v6 = vpop.permute.xlu1 %2578  ;;  %v2618_v59 = vadd.f32 %v2577_v8, %v2522_v2  ;;  %v12220_v8 = vld [vmem:[#allocation131_spill] sm:$0xff] }
 0xd4c   :  { %4300 = vrot.lane.b32.xlu0 %v4265_v61, %s6409_s0  ;;  %5690 = vmatmul.mubr.msk.f32.gmra.mxu1 %vm271_vm1, %v2729_v49  ;;  %v2619_v29 = vadd.f32 %v2579_v6, %v2523_v37  ;;  %v12219_v61 = vld [vmem:[#allocation93_spill] sm:$0xff]  ;;  %6317 = vrcp.f32 %v12220_v8  ;;  %v12224_v37 = vld [vmem:[#allocation83_spill] sm:$0xff] }
 0xd4d   :  { %4943 = vrot.lane.b32.xlu1 %v4907_v35, %s6407_s2  ;;  %v6314_v33 = vpop.eup %6313  ;;  %v5098_v51 = vmul.f32 %v12219_v61, %v11906_v34  ;;  %v12221_v49 = vld [vmem:[#allocation121_spill] sm:$0xff]  ;;  %v12222_v35 = vld [vmem:[#allocation4_spill] sm:$0xff]  ;;  %6319 = vrcp.f32 %v12229_v1  ;;  %v12230_v61 = vld [vmem:[#allocation126_spill] sm:$0xff] }
 0xd4e   :  { %v2673_v11 = vpop.permute.xlu0 %2672  ;;  %v2428_v14 = vmul.f32 %v12221_v49, %v12126_v40  ;;  %v4908_v0 = vmul.f32 %v12222_v35, %v12111_v13  ;;  %v12223_v6 = vld [vmem:[#allocation257_spill] sm:$0xff]  ;;  %v5004_v49 = vmul.f32 %v12113_v25, %v12111_v13  ;;  %v12234_v25 = vld [vmem:[#allocation84_spill] sm:$0xff] }
 0xd4f   :  { %v2714_v17 = vadd.f32 %v2673_v11, %v2618_v59  ;;  %v2675_v53 = vpop.permute.xlu1 %2674  ;;  %v4266_v16 = vmul.f32 %v12223_v6, %v12081_v20  ;;  %v12231_v6 = vld [vmem:[#allocation250_spill] sm:$0xff] }
 0xd50   :  { %4206 = vrot.lane.b32.xlu0 %v4170_v43, %s6408_s29  ;;  %v2715_v24 = vadd.f32 %v2675_v53, %v2619_v29  ;;  %v2524_v59 = vadd.f32 %v12224_v37, %v2428_v14  ;;  %v12225_v43 = vld [vmem:[#allocation125_spill] sm:$0xff]  ;;  %v12227_v53 = vld [vmem:[#allocation54_spill] sm:$0xff]  ;;  %6321 = vrcp.f32 %v12231_v6 }
 0xd51   :  { %4208 = vrot.lane.b32.xlu1 %v4171_v38, %s6408_s29  ;;  %v2730_v39 = vmul.f32 %v6312_v19, %v2714_v17  ;;  %v2429_v11 = vmul.f32 %v12225_v43, %v12132_v62  ;;  %v4076_v38 = vmul.f32 %v12226_v30, %v12208_v18  ;;  %v4077_v4 = vmul.f32 %v12227_v53, %v12109_v15  ;;  %v12228_v19 = vld [vmem:[#allocation103_spill] sm:$0xff] }
 0xd52   :  { %v2581_v42 = vpop.permute.xlu0 %2580  ;;  %v2731_v21 = vmul.f32 %v6314_v33, %v2715_v24 }
 0xd53   :  { %5692 = vmatprep.mubr.msk.f32.mxu1 %vm271_vm1, %v2730_v39  ;;  %v3093_v63 = vpop.permute.xlu1 %3092  ;;  %v2620_v29 = vadd.f32 %v2581_v42, %v2524_v59  ;;  %v2525_v24 = vadd.f32 %v12228_v19, %v2429_v11  ;;  %v12233_v59 = vld [vmem:[#allocation265_spill] sm:$0xff] }
 0xd54   :  { %5131 = vrot.lane.b32.xlu0 %v5097_v3, %s6409_s0  ;;  %5693 = vmatmul.mubr.msk.f32.gmra.mxu1 %vm271_vm1, %v2731_v21  ;;  %v4267_v43 = vmul.f32 %v12233_v59, %v12111_v13  ;;  %v12242_v59 = vld [vmem:[#allocation122_spill] sm:$0xff] }
 0xd55   :  { %5133 = vrot.lane.b32.xlu1 %v5098_v51, %s6409_s0  ;;  %v5003_v51 = vmul.f32 %v12230_v61, %v12081_v20  ;;  %v12239_v61 = vld [vmem:[#allocation142_spill] sm:$0xff] }
 0xd56   :  { %v2583_v2 = vpop.permute.xlu0 %2582 }
 0xd57   :  { %v3095_v52 = vpop.permute.xlu1 %3094  ;;  %v6316_v3 = vpop.eup %6315  ;;  %v2621_v21 = vadd.f32 %v2583_v2, %v2525_v24  ;;  %v12232_v2 = vld [vmem:[#allocation68_spill] sm:$0xff] }
 0xd58   :  { %4945 = vrot.lane.b32.xlu0 %v4908_v0, %s6407_s2  ;;  %v12237_v24 = vld [vmem:[#allocation60_spill] sm:$0xff] }
 0xd59   :  { %4302 = vrot.lane.b32.xlu1 %v4266_v16, %s6409_s0  ;;  %v6318_v0 = vpop.eup %6317  ;;  %v3044_v16 = vmul.f32 %v12232_v2, %v12156_v46 }
 0xd5a   :  { %v2677_v17 = vpop.permute.xlu0 %2676 }
 0xd5b   :  { %v2716_v33 = vadd.f32 %v2677_v17, %v2620_v29  ;;  %v3189_v39 = vpop.permute.xlu1 %3188  ;;  %v4909_v29 = vmul.f32 %v12234_v25, %v12208_v18  ;;  %v3140_v30 = vadd.f32 %v3093_v63, %v3044_v16  ;;  %v12235_v17 = vld [vmem:[#allocation136_spill] sm:$0xff] }
 0xd5c   :  { %4114 = vrot.lane.b32.xlu0 %v4076_v38, %s6407_s2  ;;  %6323 = vrcp.f32 %v12235_v17 }
 0xd5d   :  { %4116 = vrot.lane.b32.xlu1 %v4077_v4, %s6407_s2  ;;  %v2732_v42 = vmul.f32 %v6316_v3, %v2716_v33  ;;  %v3236_v53 = vadd.f32 %v3189_v39, %v3140_v30  ;;  %v12236_v4 = vld [vmem:[#allocation48_spill] sm:$0xff]  ;;  %v3045_v33 = vmul.f32 %v12237_v24, %v12159_v58  ;;  %v12238_v3 = vld [vmem:[#allocation9_spill] sm:$0xff]  ;;  %6325 = vrcp.f32 %v12239_v61 }
 0xd5e   :  { %v2679_v8 = vpop.permute.xlu0 %2678  ;;  %v4172_v19 = vmul.f32 %v12236_v4, %v12208_v18  ;;  %v4173_v63 = vmul.f32 %v12238_v3, %v12109_v15  ;;  %v12240_v39 = vld [vmem:[#allocation132_spill] sm:$0xff]  ;;  %v12243_v30 = vld [vmem:[#allocation137_spill] sm:$0xff] }
 0xd5f   :  { %v2717_v14 = vadd.f32 %v2679_v8, %v2621_v21  ;;  %5695 = vmatprep.mubr.msk.f32.mxu1 %vm271_vm1, %v2732_v42  ;;  %v3191_v35 = vpop.permute.xlu1 %3190  ;;  %v3141_v8 = vadd.f32 %v3095_v52, %v3045_v33  ;;  %v2431_v17 = vmul.f32 %v12243_v30, %v12166_v26  ;;  %v12245_v33 = vld [vmem:[#allocation133_spill] sm:$0xff] }
 0xd60   :  { %5039 = vrot.lane.b32.xlu0 %v5003_v51, %s6408_s29  ;;  %v6320_v51 = vpop.eup %6319 }
 0xd61   :  { %5041 = vrot.lane.b32.xlu1 %v5004_v49, %s6408_s29  ;;  %v2733_v37 = vmul.f32 %v6318_v0, %v2717_v14  ;;  %v2430_v49 = vmul.f32 %v12240_v39, %v12161_v57  ;;  %v12241_v0 = vld [vmem:[#allocation138_spill] sm:$0xff]  ;;  %v3237_v2 = vadd.f32 %v3191_v35, %v3141_v8  ;;  %v4910_v35 = vmul.f32 %v9772_v41, %v12109_v15 }
 0xd62   :  { %v2585_v11 = vpop.permute.xlu0 %2584  ;;  %v5099_v6 = vmul.f32 %v12241_v0, %v12081_v20 }
 0xd63   :  { %5696 = vmatmul.mubr.msk.f32.gmra.mxu1 %vm271_vm1, %v2733_v37  ;;  %v3097_v38 = vpop.permute.xlu1 %3096  ;;  %v5100_v37 = vmul.f32 %v12117_v7, %v12111_v13 }
 0xd64   :  { %4304 = vrot.lane.b32.xlu0 %v4267_v43, %s6409_s0  ;;  %v2526_v43 = vadd.f32 %v12242_v59, %v2430_v49  ;;  %v12248_v49 = vld [vmem:[#allocation27_spill] sm:$0xff] }
 0xd65   :  { %4947 = vrot.lane.b32.xlu1 %v4909_v29, %s6407_s2  ;;  %v6322_v29 = vpop.eup %6321 }
 0xd66   :  { %v3285_v1 = vpop.permute.xlu0 %3284 }
 0xd67   :  { %v3332_v21 = vadd.f32 %v3285_v1, %v3236_v53  ;;  %v2587_v42 = vpop.permute.xlu1 %2586  ;;  %v2622_v53 = vadd.f32 %v2585_v11, %v2526_v43  ;;  %v2527_v1 = vadd.f32 %v12245_v33, %v2431_v17  ;;  %v12255_v33 = vld [vmem:[#allocation193_spill] sm:$0xff] }
 0xd68   :  { %4210 = vrot.lane.b32.xlu0 %v4172_v19, %s6408_s29  ;;  %v12244_v19 = vld [vmem:[#allocation268_spill] sm:$0xff] }
 0xd69   :  { %4212 = vrot.lane.b32.xlu1 %v4173_v63, %s6408_s29  ;;  %v3348_v14 = vmul.f32 %v6320_v51, %v3332_v21  ;;  %v4268_v24 = vmul.f32 %v12244_v19, %v12208_v18  ;;  %v12246_v21 = vld [vmem:[#allocation252_spill] sm:$0xff]  ;;  %v6324_v61 = vpop.eup %6323  ;;  %v2623_v11 = vadd.f32 %v2587_v42, %v2527_v1  ;;  %v12247_v51 = vld [vmem:[#allocation33_spill] sm:$0xff] }
 0xd6a   :  { %v3099_v16 = vpop.permute.xlu0 %3098  ;;  %6327 = vrcp.f32 %v12246_v21  ;;  %v4078_v8 = vmul.f32 %v12247_v51, %v12126_v40  ;;  %v12249_v42 = vld [vmem:[#allocation253_spill] sm:$0xff]  ;;  %v12256_v21 = vld [vmem:[#allocation167_spill] sm:$0xff] }
 0xd6b   :  { %5657 = vmatprep.mubr.msk.f32.mxu0 %vm271_vm1, %v3348_v14  ;;  %v3287_v52 = vpop.permute.xlu1 %3286  ;;  %v4079_v14 = vmul.f32 %v12248_v49, %v12132_v62  ;;  %6329 = vrcp.f32 %v12249_v42  ;;  %v12260_v42 = vld [vmem:[#allocation164_spill] sm:$0xff] }
 0xd6c   :  { %5135 = vrot.lane.b32.xlu0 %v5099_v6, %s6409_s0  ;;  %v3333_v25 = vadd.f32 %v3287_v52, %v3237_v2  ;;  %v6326_v2 = vpop.eup %6325 }
 0xd6d   :  { %5137 = vrot.lane.b32.xlu1 %v5100_v37, %s6409_s0  ;;  %v12250_v37 = vld [vmem:[#allocation76_spill] sm:$0xff] }
 0xd6e   :  { %v2681_v4 = vpop.permute.xlu0 %2680  ;;  %v3349_v7 = vmul.f32 %v6322_v29, %v3333_v25  ;;  %v3046_v59 = vmul.f32 %v12250_v37, %v11904_v56  ;;  %v12251_v25 = vld [vmem:[#allocation144_spill] sm:$0xff] }
 0xd6f   :  { %v2718_v3 = vadd.f32 %v2681_v4, %v2622_v53  ;;  %v3193_v63 = vpop.permute.xlu1 %3192  ;;  %v5006_v29 = vmul.f32 %v12251_v25, %v12109_v15  ;;  %v12252_v53 = vld [vmem:[#allocation151_spill] sm:$0xff]  ;;  %v12253_v4 = vld [vmem:[#allocation12_spill] sm:$0xff]  ;;  %v12262_v25 = vld [vmem:[#allocation157_spill] sm:$0xff] }
 0xd70   :  { %4949 = vrot.lane.b32.xlu0 %v4910_v35, %s6407_s2  ;;  %5658 = vmatmul.mubr.msk.f32.vlgmr.msra.gmra.mxu0 %vm271_vm1, %v3349_v7  ;;  %v3142_v30 = vadd.f32 %v3097_v38, %v3046_v59  ;;  %6331 = vrcp.f32 %v12252_v53  ;;  %v4269_v7 = vmul.f32 %v12253_v4, %v12109_v15  ;;  %v4911_v38 = vmul.f32 %v12255_v33, %v12126_v40 }
 0xd71   :  { %4306 = vrot.lane.b32.xlu1 %v4268_v24, %s6409_s0  ;;  %v2734_v41 = vmul.f32 %v6324_v61, %v2718_v3  ;;  %5708 = vmatpush3.msra.mxu0 %v10135_v36  ;;  %v5005_v36 = vmul.f32 %v9810_v50, %v12208_v18  ;;  %v12254_v50 = vld [vmem:[#allocation181_spill] sm:$0xff]  ;;  %6333 = vrcp.f32 %v12256_v21  ;;  %v4912_v21 = vmul.f32 %v9833_v48, %v12132_v62 }
 0xd72   :  { %v2683_v39 = vpop.permute.xlu0 %2682  ;;  %v3238_v35 = vadd.f32 %v3193_v63, %v3142_v30  ;;  %v3047_v19 = vmul.f32 %v12254_v50, %v11906_v34  ;;  %v12257_v63 = vld [vmem:[#allocation143_spill] sm:$0xff]  ;;  %v12263_v30 = vld [vmem:[#allocation94_spill] sm:$0xff] }
 0xd73   :  { %v2719_v0 = vadd.f32 %v2683_v39, %v2623_v11  ;;  %5698 = vmatprep.mubr.msk.f32.mxu1 %vm271_vm1, %v2734_v41  ;;  %v3195_v6 = vpop.permute.xlu1 %3194  ;;  %v2432_v41 = vmul.f32 %v12257_v63, %v12122_v54  ;;  %v5101_v53 = vmul.f32 %v12263_v30, %v12208_v18  ;;  %v12264_v50 = vld [vmem:[#allocation150_spill] sm:$0xff]  ;;  %v12266_v63 = vld [vmem:[#allocation272_spill] sm:$0xff] }
 0xd74   :  { %4118 = vrot.lane.b32.xlu0 %v4078_v8, %s6407_s2  ;;  %v3143_v11 = vadd.f32 %v3099_v16, %v3047_v19  ;;  %v12258_v8 = vld [vmem:[#allocation24_spill] sm:$0xff] }
 0xd75   :  { %4120 = vrot.lane.b32.xlu1 %v4079_v14, %s6407_s2  ;;  %v2735_v43 = vmul.f32 %v6326_v2, %v2719_v0  ;;  %v4174_v39 = vmul.f32 %v12258_v8, %v12126_v40  ;;  %v12259_v0 = vld [vmem:[#allocation18_spill] sm:$0xff]  ;;  %v2528_v37 = vadd.f32 %v12260_v42, %v2432_v41  ;;  %v4270_v41 = vmul.f32 %v12266_v63, %v12126_v40  ;;  %v12272_v30 = vld [vmem:[#allocation192_spill] sm:$0xff] }
 0xd76   :  { %v2589_v52 = vpop.permute.xlu0 %2588  ;;  %v3239_v49 = vadd.f32 %v3195_v6, %v3143_v11  ;;  %v4175_v2 = vmul.f32 %v12259_v0, %v12132_v62  ;;  %v2433_v6 = vmul.f32 %v12262_v25, %v12134_v44  ;;  %v12268_v0 = vld [vmem:[#allocation36_spill] sm:$0xff] }
 0xd77   :  { %5699 = vmatmul.mubr.msk.f32.gmra.mxu1 %vm271_vm1, %v2735_v43  ;;  %v3101_v17 = vpop.permute.xlu1 %3100  ;;  %v6328_v61 = vpop.eup %6327  ;;  %v12261_v43 = vld [vmem:[#allocation255_spill] sm:$0xff]  ;;  %v12278_v63 = vld [vmem:[#allocation188_spill] sm:$0xff] }
 0xd78   :  { %5043 = vrot.lane.b32.xlu0 %v5005_v36, %s6408_s29  ;;  %6335 = vrcp.f32 %v12261_v43  ;;  %v6330_v36 = vpop.eup %6329  ;;  %v2529_v19 = vadd.f32 %v12264_v50, %v2433_v6  ;;  %v12271_v6 = vld [vmem:[#allocation180_spill] sm:$0xff] }
 0xd79   :  { %5045 = vrot.lane.b32.xlu1 %v5006_v29, %s6408_s29  ;;  %v2624_v29 = vadd.f32 %v2589_v52, %v2528_v37 }
 0xd7a   :  { %v3289_v24 = vpop.permute.xlu0 %3288 }
 0xd7b   :  { %v3334_v1 = vadd.f32 %v3289_v24, %v3238_v35  ;;  %v2591_v3 = vpop.permute.xlu1 %2590 }
 0xd7c   :  { %4308 = vrot.lane.b32.xlu0 %v4269_v7, %s6409_s0  ;;  %v5102_v7 = vmul.f32 %v9783_v12, %v12109_v15  ;;  %v2625_v52 = vadd.f32 %v2591_v3, %v2529_v19 }
 0xd7d   :  { %4951 = vrot.lane.b32.xlu1 %v4911_v38, %s6407_s2  ;;  %v3350_v51 = vmul.f32 %v6328_v61, %v3334_v1  ;;  %v6332_v38 = vpop.eup %6331  ;;  %v12265_v61 = vld [vmem:[#allocation178_spill] sm:$0xff] }
 0xd7e   :  { %v3103_v14 = vpop.permute.xlu0 %3102  ;;  %v3048_v11 = vmul.f32 %v12265_v61, %v12081_v20  ;;  %v6334_v3 = vpop.eup %6333 }
 0xd7f   :  { %5660 = vmatprep.mubr.msk.f32.mxu0 %vm271_vm1, %v3350_v51  ;;  %v3291_v16 = vpop.permute.xlu1 %3290 }
 0xd80   :  { %4214 = vrot.lane.b32.xlu0 %v4174_v39, %s6408_s29  ;;  %v3335_v59 = vadd.f32 %v3291_v16, %v3239_v49  ;;  %v12267_v39 = vld [vmem:[#allocation256_spill] sm:$0xff]  ;;  %v3144_v49 = vadd.f32 %v3101_v17, %v3048_v11  ;;  %v12269_v16 = vld [vmem:[#allocation39_spill] sm:$0xff] }
 0xd81   :  { %4216 = vrot.lane.b32.xlu1 %v4175_v2, %s6408_s29  ;;  %6337 = vrcp.f32 %v12267_v39  ;;  %v4080_v2 = vmul.f32 %v12268_v0, %v12161_v57 }
 0xd82   :  { %v2685_v35 = vpop.permute.xlu0 %2684  ;;  %v3351_v4 = vmul.f32 %v6330_v36, %v3335_v59  ;;  %v4081_v59 = vmul.f32 %v12269_v16, %v12166_v26  ;;  %v12270_v36 = vld [vmem:[#allocation156_spill] sm:$0xff] }
 0xd83   :  { %v2720_v24 = vadd.f32 %v2685_v35, %v2624_v29  ;;  %v3197_v33 = vpop.permute.xlu1 %3196  ;;  %6339 = vrcp.f32 %v12270_v36  ;;  %v3049_v29 = vmul.f32 %v12271_v6, %v12111_v13  ;;  %v12282_v6 = vld [vmem:[#allocation189_spill] sm:$0xff] }
 0xd84   :  { %5139 = vrot.lane.b32.xlu0 %v5101_v53, %s6409_s0  ;;  %5661 = vmatmul.mubr.msk.f32.gmra.mxu0 %vm271_vm1, %v3351_v4  ;;  %v3240_v42 = vadd.f32 %v3197_v33, %v3144_v49  ;;  %v5007_v53 = vmul.f32 %v12272_v30, %v12126_v40  ;;  %v12274_v33 = vld [vmem:[#allocation172_spill] sm:$0xff] }
 0xd85   :  { %5141 = vrot.lane.b32.xlu1 %v5102_v7, %s6409_s0  ;;  %v2736_v1 = vmul.f32 %v6332_v38, %v2720_v24  ;;  %v6336_v17 = vpop.eup %6335  ;;  %v12273_v7 = vld [vmem:[#allocation199_spill] sm:$0xff]  ;;  %v3145_v19 = vadd.f32 %v3103_v14, %v3049_v29  ;;  %6341 = vrcp.f32 %v12274_v33  ;;  %v12275_v38 = vld [vmem:[#allocation148_spill] sm:$0xff] }
 0xd86   :  { %v2687_v12 = vpop.permute.xlu0 %2686  ;;  %v5008_v50 = vmul.f32 %v12273_v7, %v12132_v62  ;;  %v12283_v29 = vld [vmem:[#allocation52_spill] sm:$0xff] }
 0xd87   :  { %v2721_v51 = vadd.f32 %v2687_v12, %v2625_v52  ;;  %5701 = vmatprep.mubr.msk.f32.mxu1 %vm271_vm1, %v2736_v1  ;;  %v3199_v8 = vpop.permute.xlu1 %3198  ;;  %v2434_v52 = vmul.f32 %v12275_v38, %v12147_v60  ;;  %v12277_v12 = vld [vmem:[#allocation196_spill] sm:$0xff]  ;;  %6343 = vrcp.f32 %v12283_v29 }
 0xd88   :  { %4953 = vrot.lane.b32.xlu0 %v4912_v21, %s6407_s2  ;;  %v3241_v1 = vadd.f32 %v3199_v8, %v3145_v19  ;;  %v12276_v21 = vld [vmem:[#allocation270_spill] sm:$0xff]  ;;  %v4913_v14 = vmul.f32 %v12277_v12, %v12161_v57  ;;  %v12279_v8 = vld [vmem:[#allocation49_spill] sm:$0xff]  ;;  %v5104_v19 = vmul.f32 %v9850_v45, %v12132_v62 }
 0xd89   :  { %4310 = vrot.lane.b32.xlu1 %v4270_v41, %s6409_s0  ;;  %v2737_v48 = vmul.f32 %v6334_v3, %v2721_v51  ;;  %v4271_v61 = vmul.f32 %v12276_v21, %v12132_v62  ;;  %v2530_v41 = vadd.f32 %v12278_v63, %v2434_v52  ;;  %v4176_v0 = vmul.f32 %v12279_v8, %v12161_v57 }
 0xd8a   :  { %v2593_v37 = vpop.permute.xlu0 %2592 }
 0xd8b   :  { %5702 = vmatmul.mubr.msk.f32.gmra.mxu1 %vm271_vm1, %v2737_v48  ;;  %v3293_v43 = vpop.permute.xlu1 %3292  ;;  %v2626_v49 = vadd.f32 %v2593_v37, %v2530_v41  ;;  %v12288_v41 = vld [vmem:[#allocation277_spill] sm:$0xff] }
 0xd8c   :  { %4122 = vrot.lane.b32.xlu0 %v4080_v2, %s6407_s2  ;;  %v3336_v25 = vadd.f32 %v3293_v43, %v3240_v42  ;;  %v12280_v2 = vld [vmem:[#allocation163_spill] sm:$0xff]  ;;  %6345 = vrcp.f32 %v12288_v41 }
 0xd8d   :  { %4124 = vrot.lane.b32.xlu1 %v4081_v59, %s6407_s2  ;;  %v2435_v42 = vmul.f32 %v12280_v2, %v12150_v55  ;;  %v12281_v59 = vld [vmem:[#allocation30_spill] sm:$0xff]  ;;  %v12298_v41 = vld [vmem:[#allocation279_spill] sm:$0xff] }
 0xd8e   :  { %v4103_v35 = vpop.permute.xlu0 %4102  ;;  %v3352_v4 = vmul.f32 %v6336_v17, %v3336_v25  ;;  %v6338_v3 = vpop.eup %6337  ;;  %v4177_v43 = vmul.f32 %v12281_v59, %v12166_v26 }
 0xd8f   :  { %v2595_v24 = vpop.permute.xlu1 %2594  ;;  %v2531_v37 = vadd.f32 %v12282_v6, %v2435_v42 }
 0xd90   :  { %5047 = vrot.lane.b32.xlu0 %v5007_v53, %s6408_s29  ;;  %5663 = vmatprep.mubr.msk.f32.mxu0 %vm271_vm1, %v3352_v4  ;;  %v6340_v17 = vpop.eup %6339  ;;  %v12284_v53 = vld [vmem:[#allocation200_spill] sm:$0xff] }
 0xd91   :  { %5049 = vrot.lane.b32.xlu1 %v5008_v50, %s6408_s29  ;;  %v5103_v4 = vmul.f32 %v12284_v53, %v12126_v40  ;;  %v2627_v7 = vadd.f32 %v2595_v24, %v2531_v37 }
 0xd92   :  { %v3295_v11 = vpop.permute.xlu0 %3294  ;;  %v6342_v52 = vpop.eup %6341 }
 0xd93   :  { %v3337_v51 = vadd.f32 %v3295_v11, %v3241_v1  ;;  %v4105_v39 = vpop.permute.xlu1 %4104  ;;  %v12285_v1 = vld [vmem:[#allocation194_spill] sm:$0xff] }
 0xd94   :  { %4312 = vrot.lane.b32.xlu0 %v4271_v61, %s6409_s0  ;;  %v4914_v21 = vmul.f32 %v12285_v1, %v12166_v26  ;;  %v12286_v61 = vld [vmem:[#allocation62_spill] sm:$0xff]  ;;  %v6344_v59 = vpop.eup %6343 }
 0xd95   :  { %4955 = vrot.lane.b32.xlu1 %v4913_v14, %s6407_s2  ;;  %v3353_v48 = vmul.f32 %v6338_v3, %v3337_v51  ;;  %v4054_v11 = vmul.f32 %v12286_v61, %v12156_v46  ;;  %v12287_v14 = vld [vmem:[#allocation276_spill] sm:$0xff]  ;;  %v12289_v3 = vld [vmem:[#allocation286_spill] sm:$0xff] }
 0xd96   :  { %v2689_v16 = vpop.permute.xlu0 %2688  ;;  %v4272_v45 = vmul.f32 %v12287_v14, %v12161_v57  ;;  %v12296_v61 = vld [vmem:[#allocation44_spill] sm:$0xff] }
 0xd97   :  { %v2722_v36 = vadd.f32 %v2689_v16, %v2626_v49  ;;  %5664 = vmatmul.mubr.msk.f32.gmra.mxu0 %vm271_vm1, %v3353_v48  ;;  %v4199_v25 = vpop.permute.xlu1 %4198  ;;  %v4150_v51 = vadd.f32 %v4103_v35, %v4054_v11  ;;  %v4082_v49 = vmul.f32 %v12289_v3, %v12122_v54  ;;  %v12291_v35 = vld [vmem:[#allocation46_spill] sm:$0xff]  ;;  %v4178_v11 = vmul.f32 %v12296_v61, %v12122_v54 }
 0xd98   :  { %4218 = vrot.lane.b32.xlu0 %v4176_v0, %s6408_s29  ;;  %v12290_v0 = vld [vmem:[#allocation280_spill] sm:$0xff]  ;;  %v12299_v3 = vld [vmem:[#allocation22_spill] sm:$0xff] }
 0xd99   :  { %4220 = vrot.lane.b32.xlu1 %v4177_v43, %s6408_s29  ;;  %v2738_v30 = vmul.f32 %v6340_v17, %v2722_v36  ;;  %v4246_v48 = vadd.f32 %v4199_v25, %v4150_v51  ;;  %v4083_v2 = vmul.f32 %v12290_v0, %v12134_v44  ;;  %v4055_v43 = vmul.f32 %v12291_v35, %v12159_v58 }
 0xd9a   :  { %v4936_v50 = vpop.permute.xlu0 %4935  ;;  %v5009_v36 = vmul.f32 %v9928_v27, %v12161_v57  ;;  %v5010_v25 = vmul.f32 %v9898_v10, %v12166_v26  ;;  %v5105_v51 = vmul.f32 %v9935_v5, %v12161_v57  ;;  %v4916_v35 = vmul.f32 %v9949_v32, %v12134_v44  ;;  %v12300_v5 = vld [vmem:[#allocation70_spill] sm:$0xff] }
 0xd9b   :  { %5704 = vmatprep.mubr.msk.f32.mxu1 %vm271_vm1, %v2738_v30  ;;  %v2691_v33 = vpop.permute.xlu1 %2690  ;;  %v4151_v37 = vadd.f32 %v4105_v39, %v4055_v43  ;;  %v12292_v30 = vld [vmem:[#allocation210_spill] sm:$0xff]  ;;  %v4056_v43 = vmul.f32 %v12300_v5, %v11904_v56 }
 0xd9c   :  { %5143 = vrot.lane.b32.xlu0 %v5103_v4, %s6409_s0  ;;  %v2723_v38 = vadd.f32 %v2691_v33, %v2627_v7  ;;  %6347 = vrcp.f32 %v12292_v30  ;;  %v12293_v4 = vld [vmem:[#allocation274_spill] sm:$0xff]  ;;  %v6346_v33 = vpop.eup %6345  ;;  %v12303_v30 = vld [vmem:[#allocation291_spill] sm:$0xff] }
 0xd9d   :  { %5145 = vrot.lane.b32.xlu1 %v5104_v19, %s6409_s0  ;;  %v4273_v27 = vmul.f32 %v12293_v4, %v12166_v26  ;;  %v4915_v19 = vmul.f32 %v9977_v23, %v12122_v54 }
 0xd9e   :  { %v4201_v24 = vpop.permute.xlu0 %4200  ;;  %v2739_v12 = vmul.f32 %v6342_v52, %v2723_v38  ;;  %v12294_v38 = vld [vmem:[#allocation205_spill] sm:$0xff]  ;;  %v12295_v52 = vld [vmem:[#allocation28_spill] sm:$0xff] }
 0xd9f   :  { %v4938_v63 = vpop.permute.xlu1 %4937  ;;  %v4247_v53 = vadd.f32 %v4201_v24, %v4151_v37  ;;  %6349 = vrcp.f32 %v12294_v38  ;;  %v4887_v1 = vmul.f32 %v12295_v52, %v12156_v46  ;;  %v12305_v38 = vld [vmem:[#allocation78_spill] sm:$0xff] }
 0xda0   :  { %4957 = vrot.lane.b32.xlu0 %v4914_v21, %s6407_s2  ;;  %5705 = vmatmul.mubr.msk.f32.gmra.mxu1 %vm271_vm1, %v2739_v12  ;;  %v12297_v12 = vld [vmem:[#allocation281_spill] sm:$0xff]  ;;  %6351 = vrcp.f32 %v12298_v41  ;;  %v4057_v52 = vmul.f32 %v12305_v38, %v11906_v34 }
 0xda1   :  { %4314 = vrot.lane.b32.xlu1 %v4272_v45, %s6409_s0  ;;  %v4179_v23 = vmul.f32 %v12297_v12, %v12134_v44  ;;  %v4983_v14 = vadd.f32 %v4936_v50, %v4887_v1  ;;  %v5106_v50 = vmul.f32 %v9907_v47, %v12166_v26  ;;  %v5011_v1 = vmul.f32 %v9985_v31, %v12122_v54  ;;  %v12307_v31 = vld [vmem:[#allocation282_spill] sm:$0xff] }
 0xda2   :  { %v4107_v8 = vpop.permute.xlu0 %4106  ;;  %v4275_v41 = vmul.f32 %v12307_v31, %v12134_v44 }
 0xda3   :  { %v4295_v42 = vpop.permute.xlu1 %4294 }
 0xda4   :  { %4126 = vrot.lane.b32.xlu0 %v4082_v49, %s6407_s2  ;;  %v4342_v16 = vadd.f32 %v4295_v42, %v4246_v48  ;;  %v4888_v49 = vmul.f32 %v12299_v3, %v12159_v58 }
 0xda5   :  { %4128 = vrot.lane.b32.xlu1 %v4083_v2, %s6407_s2 }
 0xda6   :  { %v5032_v17 = vpop.permute.xlu0 %5031  ;;  %v4358_v6 = vmul.f32 %v6344_v59, %v4342_v16  ;;  %v4984_v16 = vadd.f32 %v4938_v63, %v4888_v49  ;;  %v12302_v63 = vld [vmem:[#allocation42_spill] sm:$0xff] }
 0xda7   :  { %v10443_v29 = vpop.permute.xlu1 %4108  ;;  %v5079_v46 = vadd.f32 %v5032_v17, %v4983_v14  ;;  %v12301_v17 = vld [vmem:[#allocation287_spill] sm:$0xff]  ;;  %6353 = vrcp.f32 %v12302_v63  ;;  %v12308_v49 = vld [vmem:[#allocation222_spill] sm:$0xff] }
 0xda8   :  { %5051 = vrot.lane.b32.xlu0 %v5009_v36, %s6408_s29  ;;  %5709 = vmatprep.mubr.msk.f32.mxu0 %vm271_vm1, %v4358_v6  ;;  %v4274_v47 = vmul.f32 %v12301_v17, %v12122_v54 }
 0xda9   :  { %5053 = vrot.lane.b32.xlu1 %v5010_v25, %s6408_s29  ;;  %v6348_v42 = vpop.eup %6347  ;;  %v4152_v25 = vadd.f32 %v4107_v8, %v4056_v43  ;;  %v12312_v43 = vld [vmem:[#allocation284_spill] sm:$0xff] }
 0xdaa   :  { %v4297_v7 = vpop.permute.xlu0 %4296 }
 0xdab   :  { %v4343_v10 = vadd.f32 %v4297_v7, %v4247_v53  ;;  %v5034_v39 = vpop.permute.xlu1 %5033  ;;  %v4084_v53 = vmul.f32 %v12303_v30, %v12147_v60 }
 0xdac   :  { %4316 = vrot.lane.b32.xlu0 %v4273_v27, %s6409_s0  ;;  %v5080_v58 = vadd.f32 %v5034_v39, %v4984_v16  ;;  %v6350_v32 = vpop.eup %6349 }
 0xdad   :  { %4959 = vrot.lane.b32.xlu1 %v4915_v19, %s6407_s2  ;;  %v4359_v21 = vmul.f32 %v6346_v33, %v4343_v10  ;;  %v12304_v19 = vld [vmem:[#allocation295_spill] sm:$0xff]  ;;  %v6352_v8 = vpop.eup %6351 }
 0xdae   :  { %v4203_v24 = vpop.permute.xlu0 %4202  ;;  %v4085_v10 = vmul.f32 %v12304_v19, %v12150_v55 }
 0xdaf   :  { %5710 = vmatmul.mubr.msk.f32.vlgmr.msra.gmra.mxu0 %vm271_vm1, %v4359_v21  ;;  %v10463_v45 = vpop.permute.xlu1 %4939  ;;  %v4248_v4 = vadd.f32 %v4203_v24, %v4152_v25  ;;  %v4153_v24 = vadd.f32 %v10443_v29, %v4057_v52  ;;  %v12315_v25 = vld [vmem:[#allocation226_spill] sm:$0xff] }
 0xdb0   :  { %4222 = vrot.lane.b32.xlu0 %v4178_v11, %s6408_s29  ;;  %v5012_v11 = vmul.f32 %v9956_v9, %v12134_v44  ;;  %v4917_v9 = vmul.f32 %v10004_v22, %v12147_v60 }
 0xdb1   :  { %4224 = vrot.lane.b32.xlu1 %v4179_v23, %s6408_s29  ;;  %v12306_v23 = vld [vmem:[#allocation202_spill] sm:$0xff] }
 0xdb2   :  { %v5128_v48 = vpop.permute.xlu0 %5127  ;;  %6355 = vrcp.f32 %v12306_v23 }
 0xdb3   :  { %v5175_v0 = vadd.f32 %v5128_v48, %v5079_v46  ;;  %v4205_v2 = vpop.permute.xlu1 %4204  ;;  %6357 = vrcp.f32 %v12308_v49  ;;  %v12309_v48 = vld [vmem:[#allocation31_spill] sm:$0xff] }
 0xdb4   :  { %5147 = vrot.lane.b32.xlu0 %v5105_v51, %s6409_s0  ;;  %v4249_v14 = vadd.f32 %v4205_v2, %v4153_v24  ;;  %v6354_v3 = vpop.eup %6353  ;;  %v12310_v2 = vld [vmem:[#allocation296_spill] sm:$0xff]  ;;  %6359 = vrcp.f32 %v12312_v43 }
 0xdb5   :  { %5149 = vrot.lane.b32.xlu1 %v5106_v50, %s6409_s0  ;;  %v5191_v59 = vmul.f32 %v6348_v42, %v5175_v0  ;;  %v4889_v50 = vmul.f32 %v12309_v48, %v11904_v56  ;;  %v4180_v42 = vmul.f32 %v12310_v2, %v12147_v60 }
 0xdb6   :  { %v4942_v36 = vpop.permute.xlu0 %4941 }
 0xdb7   :  { %5735 = vmatprep.mubr.msk.f32.mxu1 %vm271_vm1, %v5191_v59  ;;  %v5130_v6 = vpop.permute.xlu1 %5129  ;;  %v12311_v59 = vld [vmem:[#allocation299_spill] sm:$0xff] }
 0xdb8   :  { %4961 = vrot.lane.b32.xlu0 %v4916_v35, %s6407_s2  ;;  %v5176_v37 = vadd.f32 %v5130_v6, %v5080_v58  ;;  %v4181_v22 = vmul.f32 %v12311_v59, %v12150_v55  ;;  %v4985_v35 = vadd.f32 %v10463_v45, %v4889_v50  ;;  %v12313_v58 = vld [vmem:[#allocation85_spill] sm:$0xff]  ;;  %v5108_v45 = vmul.f32 %v12315_v25, %v12134_v44 }
 0xdb9   :  { %4318 = vrot.lane.b32.xlu1 %v4274_v47, %s6409_s0  ;;  %v5107_v17 = vmul.f32 %v12313_v58, %v12122_v54  ;;  %v12314_v47 = vld [vmem:[#allocation53_spill] sm:$0xff] }
 0xdba   :  { %v4111_v27 = vpop.permute.xlu0 %4110  ;;  %v5192_v7 = vmul.f32 %v6350_v32, %v5176_v37  ;;  %v4890_v6 = vmul.f32 %v12314_v47, %v11906_v34  ;;  %v12327_v47 = vld [vmem:[#allocation116_spill] sm:$0xff] }
 0xdbb   :  { %v4299_v39 = vpop.permute.xlu1 %4298 }
 0xdbc   :  { %4130 = vrot.lane.b32.xlu0 %v4084_v53, %s6407_s2  ;;  %v4344_v33 = vadd.f32 %v4299_v39, %v4248_v4  ;;  %5736 = vmatmul.mubr.msk.f32.vlgmr.msra.gmra.mxu1 %vm271_vm1, %v5192_v7  ;;  %v4986_v53 = vadd.f32 %v4942_v36, %v4890_v6  ;;  %v12316_v7 = vld [vmem:[#allocation242_spill] sm:$0xff]  ;;  %v12319_v36 = vld [vmem:[#allocation285_spill] sm:$0xff]  ;;  %v4891_v6 = vmul.f32 %v12327_v47, %v12081_v20 }
 0xdbd   :  { %4132 = vrot.lane.b32.xlu1 %v4085_v10, %s6407_s2  ;;  %v4918_v19 = vmul.f32 %v12316_v7, %v12150_v55  ;;  %v12317_v10 = vld [vmem:[#allocation266_spill] sm:$0xff]  ;;  %6361 = vrcp.f32 %v12319_v36 }
 0xdbe   :  { %v5036_v21 = vpop.permute.xlu0 %5035  ;;  %v4360_v61 = vmul.f32 %v6352_v8, %v4344_v33  ;;  %v4058_v39 = vmul.f32 %v12317_v10, %v12081_v20  ;;  %v12318_v8 = vld [vmem:[#allocation89_spill] sm:$0xff] }
 0xdbf   :  { %v10500_v12 = vpop.permute.xlu1 %4112  ;;  %v5081_v56 = vadd.f32 %v5036_v21, %v4985_v35  ;;  %v6356_v30 = vpop.eup %6355  ;;  %v5013_v38 = vmul.f32 %v12318_v8, %v12147_v60 }
 0xdc0   :  { %5055 = vrot.lane.b32.xlu0 %v5011_v1, %s6408_s29  ;;  %5712 = vmatprep.mubr.msk.f32.mxu0 %vm271_vm1, %v4360_v61  ;;  %v4154_v1 = vadd.f32 %v4111_v27, %v4058_v39  ;;  %v6358_v61 = vpop.eup %6357 }
 0xdc1   :  { %5057 = vrot.lane.b32.xlu1 %v5012_v11, %s6408_s29  ;;  %v12320_v11 = vld [vmem:[#allocation300_spill] sm:$0xff]  ;;  %v6360_v27 = vpop.eup %6359 }
 0xdc2   :  { %v4301_v46 = vpop.permute.xlu0 %4300  ;;  %v4276_v24 = vmul.f32 %v12320_v11, %v12147_v60 }
 0xdc3   :  { %v4345_v51 = vadd.f32 %v4301_v46, %v4249_v14  ;;  %v5038_v29 = vpop.permute.xlu1 %5037 }
 0xdc4   :  { %4320 = vrot.lane.b32.xlu0 %v4275_v41, %s6409_s0  ;;  %v5082_v34 = vadd.f32 %v5038_v29, %v4986_v53  ;;  %v5014_v41 = vmul.f32 %v10048_v28, %v12150_v55  ;;  %v12329_v53 = vld [vmem:[#allocation43_spill] sm:$0xff] }
 0xdc5   :  { %4963 = vrot.lane.b32.xlu1 %v4917_v9, %s6407_s2  ;;  %v4361_v0 = vmul.f32 %v6354_v3, %v4345_v51  ;;  %v12321_v51 = vld [vmem:[#allocation262_spill] sm:$0xff]  ;;  %v12322_v3 = vld [vmem:[#allocation304_spill] sm:$0xff] }
 0xdc6   :  { %v4207_v16 = vpop.permute.xlu0 %4206  ;;  %v4059_v29 = vmul.f32 %v12321_v51, %v12111_v13  ;;  %v4277_v49 = vmul.f32 %v12322_v3, %v12150_v55 }
 0xdc7   :  { %5713 = vmatmul.mubr.msk.f32.gmra.mxu0 %vm271_vm1, %v4361_v0  ;;  %v4944_v5 = vpop.permute.xlu1 %4943  ;;  %v4250_v23 = vadd.f32 %v4207_v16, %v4154_v1  ;;  %v12323_v0 = vld [vmem:[#allocation105_spill] sm:$0xff]  ;;  %v12324_v16 = vld [vmem:[#allocation206_spill] sm:$0xff] }
 0xdc8   :  { %4226 = vrot.lane.b32.xlu0 %v4180_v42, %s6408_s29  ;;  %v5110_v28 = vmul.f32 %v12323_v0, %v12150_v55  ;;  %v4155_v2 = vadd.f32 %v10500_v12, %v4059_v29  ;;  %6363 = vrcp.f32 %v12324_v16  ;;  %v12326_v12 = vld [vmem:[#allocation213_spill] sm:$0xff]  ;;  %v12332_v29 = vld [vmem:[#allocation55_spill] sm:$0xff] }
 0xdc9   :  { %4228 = vrot.lane.b32.xlu1 %v4181_v22, %s6408_s29  ;;  %v12325_v22 = vld [vmem:[#allocation90_spill] sm:$0xff]  ;;  %6365 = vrcp.f32 %v12326_v12  ;;  %v4061_v3 = vmul.f32 %v12332_v29, %v12109_v15  ;;  %v12340_v29 = vld [vmem:[#allocation269_spill] sm:$0xff] }
 0xdca   :  { %v5132_v63 = vpop.permute.xlu0 %5131  ;;  %v5109_v35 = vmul.f32 %v12325_v22, %v12147_v60 }
 0xdcb   :  { %v5177_v37 = vadd.f32 %v5132_v63, %v5081_v56  ;;  %v4209_v32 = vpop.permute.xlu1 %4208 }
 0xdcc   :  { %5151 = vrot.lane.b32.xlu0 %v5107_v17, %s6409_s0  ;;  %v4251_v59 = vadd.f32 %v4209_v32, %v4155_v2  ;;  %v6362_v17 = vpop.eup %6361  ;;  %v12328_v32 = vld [vmem:[#allocation288_spill] sm:$0xff] }
 0xdcd   :  { %5153 = vrot.lane.b32.xlu1 %v5108_v45, %s6409_s0  ;;  %v5193_v4 = vmul.f32 %v6356_v30, %v5177_v37  ;;  %v4987_v45 = vadd.f32 %v4944_v5, %v4891_v6  ;;  %6367 = vrcp.f32 %v12328_v32 }
 0xdce   :  { %v4946_v33 = vpop.permute.xlu0 %4945 }
 0xdcf   :  { %5738 = vmatprep.mubr.msk.f32.mxu1 %vm271_vm1, %v5193_v4  ;;  %v5134_v52 = vpop.permute.xlu1 %5133  ;;  %v4892_v4 = vmul.f32 %v12329_v53, %v12111_v13 }
 0xdd0   :  { %4965 = vrot.lane.b32.xlu0 %v4918_v19, %s6407_s2  ;;  %v5178_v21 = vadd.f32 %v5134_v52, %v5082_v34  ;;  %v10569_v19 = vpop.f32.mrf.mxu1 }
 0xdd1   :  { %5059 = vrot.lane.b32.xlu1 %v5013_v38, %s6408_s29  ;;  %v4988_v8 = vadd.f32 %v4946_v33, %v4892_v4  ;;  %v12330_v38 = vld [vmem:[#allocation15_spill] sm:$0xff] }
 0xdd2   :  { %v4115_v14 = vpop.permute.xlu0 %4114  ;;  %v5194_v31 = vmul.f32 %v6358_v61, %v5178_v21  ;;  %v4060_v5 = vmul.f32 %v12330_v38, %v12208_v18  ;;  %v10573_v1 = vpop.f32.mrf.mxu1  ;;  %v12331_v61 = vld [vmem:[#allocation289_spill] sm:$0xff] }
 0xdd3   :  { %v4303_v46 = vpop.permute.xlu1 %4302  ;;  %6369 = vrcp.f32 %v12331_v61  ;;  %v12339_v61 = vld [vmem:[#allocation294_spill] sm:$0xff] }
 0xdd4   :  { %4322 = vrot.lane.b32.xlu0 %v4276_v24, %s6409_s0  ;;  %v4346_v9 = vadd.f32 %v4303_v46, %v4250_v23  ;;  %5739 = vmatmul.mubr.msk.f32.gmra.mxu1 %vm271_vm1, %v5194_v31  ;;  %v4156_v13 = vadd.f32 %v4115_v14, %v4060_v5 }
 0xdd5   :  { %5061 = vrot.lane.b32.xlu1 %v5014_v41, %s6408_s29  ;;  %v6364_v34 = vpop.eup %6363 }
 0xdd6   :  { %v5040_v48 = vpop.permute.xlu0 %5039  ;;  %v4362_v50 = vmul.f32 %v6360_v27, %v4346_v9  ;;  %v6366_v24 = vpop.eup %6365 }
 0xdd7   :  { %v4117_v42 = vpop.permute.xlu1 %4116  ;;  %v5083_v30 = vadd.f32 %v5040_v48, %v4987_v45 }
 0xdd8   :  { %4324 = vrot.lane.b32.xlu0 %v4277_v49, %s6409_s0  ;;  %5715 = vmatprep.mubr.msk.f32.mxu0 %vm271_vm1, %v4362_v50  ;;  %v4157_v14 = vadd.f32 %v4117_v42, %v4061_v3  ;;  %v4063_v3 = vmul.f32 %v12340_v29, %v12132_v62 }
 0xdd9   :  { %5157 = vrot.lane.b32.xlu1 %v5110_v28, %s6409_s0  ;;  %v12333_v28 = vld [vmem:[#allocation208_spill] sm:$0xff] }
 0xdda   :  { %v4305_v43 = vpop.permute.xlu0 %4304  ;;  %v6368_v27 = vpop.eup %6367  ;;  %6371 = vrcp.f32 %v12333_v28 }
 0xddb   :  { %v4347_v56 = vadd.f32 %v4305_v43, %v4251_v59  ;;  %v5042_v58 = vpop.permute.xlu1 %5041  ;;  %v10577_v23 = vpop.f32.mrf.mxu1 }
 0xddc   :  { %5155 = vrot.lane.b32.xlu0 %v5109_v35, %s6409_s0  ;;  %v5084_v52 = vadd.f32 %v5042_v58, %v4988_v8  ;;  %v12335_v58 = vld [vmem:[#allocation99_spill] sm:$0xff] }
 0xddd   :  { %v4363_v63 = vmul.f32 %v6362_v17, %v4347_v56  ;;  %v10580_v51 = vpop.f32.mrf.mxu1  ;;  %v12334_v56 = vld [vmem:[#allocation218_spill] sm:$0xff]  ;;  %v4893_v17 = vmul.f32 %v12335_v58, %v12208_v18 }
 0xdde   :  { %v4211_v25 = vpop.permute.xlu0 %4210  ;;  %6373 = vrcp.f32 %v12334_v56 }
 0xddf   :  { %5716 = vmatmul.mubr.msk.f32.gmra.mxu0 %vm271_vm1, %v4363_v63  ;;  %v4948_v37 = vpop.permute.xlu1 %4947  ;;  %v4252_v31 = vadd.f32 %v4211_v25, %v4156_v13  ;;  %v12336_v25 = vld [vmem:[#allocation293_spill] sm:$0xff] }
 0xde0   :  { %v6370_v43 = vpop.eup %6369  ;;  %v4989_v6 = vadd.f32 %v4948_v37, %v4893_v17  ;;  %6375 = vrcp.f32 %v12336_v25  ;;  %v12338_v37 = vld [vmem:[#allocation271_spill] sm:$0xff] }
 0xde1   :  { %6377 = vrcp.f32 %v12339_v61 }
 0xde2   :  { %v5136_v7 = vpop.permute.xlu0 %5135 }
 0xde3   :  { %v5179_v10 = vadd.f32 %v5136_v7, %v5083_v30  ;;  %v4213_v39 = vpop.permute.xlu1 %4212  ;;  %v12337_v30 = vld [vmem:[#allocation158_spill] sm:$0xff] }
 0xde4   :  { %v4253_v2 = vadd.f32 %v4213_v39, %v4157_v14  ;;  %v4894_v53 = vmul.f32 %v12337_v30, %v12109_v15 }
 0xde5   :  { %v5195_v20 = vmul.f32 %v6364_v34, %v5179_v10 }
 0xde6   :  { %v4950_v36 = vpop.permute.xlu0 %4949 }
 0xde7   :  { %5741 = vmatprep.mubr.msk.f32.mxu1 %vm271_vm1, %v5195_v20  ;;  %v5138_v21 = vpop.permute.xlu1 %5137  ;;  %v6372_v39 = vpop.eup %6371  ;;  %v4990_v34 = vadd.f32 %v4950_v36, %v4894_v53  ;;  %v4062_v20 = vmul.f32 %v12338_v37, %v12126_v40 }
 0xde8   :  { %v5180_v11 = vadd.f32 %v5138_v21, %v5084_v52  ;;  %v10584_v50 = vpop.f32.mrf.mxu1 }
 0xdea   :  { %v4119_v33 = vpop.permute.xlu0 %4118  ;;  %v5196_v41 = vmul.f32 %v6366_v24, %v5180_v11  ;;  %v10588_v59 = vpop.f32.mrf.mxu1 }
 0xdeb   :  { %v4307_v46 = vpop.permute.xlu1 %4306  ;;  %v4158_v15 = vadd.f32 %v4119_v33, %v4062_v20  ;;  %v6374_v11 = vpop.eup %6373 }
 0xdec   :  { %v4348_v9 = vadd.f32 %v4307_v46, %v4252_v31  ;;  %5742 = vmatmul.mubr.msk.f32.gmra.mxu1 %vm271_vm1, %v5196_v41 }
 0xdee   :  { %v5044_v49 = vpop.permute.xlu0 %5043  ;;  %v4364_v48 = vmul.f32 %v6368_v27, %v4348_v9  ;;  %v6376_v27 = vpop.eup %6375 }
 0xdef   :  { %v4121_v0 = vpop.permute.xlu1 %4120  ;;  %v5085_v45 = vadd.f32 %v5044_v49, %v4989_v6  ;;  %v6378_v58 = vpop.eup %6377 }
 0xdf0   :  { %5718 = vmatprep.mubr.msk.f32.mxu0 %vm271_vm1, %v4364_v48  ;;  %v4159_v33 = vadd.f32 %v4121_v0, %v4063_v3 }
 0xdf2   :  { %v4309_v16 = vpop.permute.xlu0 %4308 }
 0xdf3   :  { %v4349_v22 = vadd.f32 %v4309_v16, %v4253_v2  ;;  %v5046_v35 = vpop.permute.xlu1 %5045  ;;  %v10593_v12 = vpop.f32.mrf.mxu1  ;;  %v12341_v2 = vld [vmem:[#allocation230_spill] sm:$0xff] }
 0xdf4   :  { %v5086_v38 = vadd.f32 %v5046_v35, %v4990_v34  ;;  %6379 = vrcp.f32 %v12341_v2 }
 0xdf5   :  { %v4365_v42 = vmul.f32 %v6370_v43, %v4349_v22  ;;  %v10597_v32 = vpop.f32.mrf.mxu1 }
 0xdf6   :  { %v4215_v47 = vpop.permute.xlu0 %4214 }
 0xdf7   :  { %5719 = vmatmul.mubr.msk.f32.gmra.mxu0 %vm271_vm1, %v4365_v42  ;;  %v4952_v63 = vpop.permute.xlu1 %4951  ;;  %v4254_v24 = vadd.f32 %v4215_v47, %v4158_v15  ;;  %v12342_v42 = vld [vmem:[#allocation224_spill] sm:$0xff]  ;;  %v12343_v47 = vld [vmem:[#allocation47_spill] sm:$0xff] }
 0xdf8   :  { %6381 = vrcp.f32 %v12342_v42  ;;  %v4895_v6 = vmul.f32 %v12343_v47, %v12126_v40  ;;  %v12349_v42 = vld [vmem:[#allocation238_spill] sm:$0xff] }
 0xdfa   :  { %v5140_v4 = vpop.permute.xlu0 %5139  ;;  %v4991_v30 = vadd.f32 %v4952_v63, %v4895_v6  ;;  %v12346_v63 = vld [vmem:[#allocation275_spill] sm:$0xff] }
 0xdfb   :  { %v5181_v7 = vadd.f32 %v5140_v4, %v5085_v45  ;;  %v10601_v10 = vpop.f32.mrf.mxu1  ;;  %v4217_v18 = vpop.permute.xlu1 %4216  ;;  %v12344_v4 = vld [vmem:[#allocation297_spill] sm:$0xff]  ;;  %v4064_v15 = vmul.f32 %v12346_v63, %v12161_v57 }
 0xdfc   :  { %v4255_v22 = vadd.f32 %v4217_v18, %v4159_v33  ;;  %6383 = vrcp.f32 %v12344_v4  ;;  %v12345_v18 = vld [vmem:[#allocation56_spill] sm:$0xff]  ;;  %v12353_v63 = vld [vmem:[#allocation185_spill] sm:$0xff] }
 0xdfd   :  { %v5197_v8 = vmul.f32 %v6372_v39, %v5181_v7  ;;  %v10605_v52 = vpop.f32.mrf.mxu1  ;;  %v4896_v39 = vmul.f32 %v12345_v18, %v12132_v62  ;;  %v12350_v4 = vld [vmem:[#allocation100_spill] sm:$0xff] }
 0xdfe   :  { %v4954_v5 = vpop.permute.xlu0 %4953 }
 0xdff   :  { %5744 = vmatprep.mubr.msk.f32.mxu1 %vm271_vm1, %v5197_v8  ;;  %v5142_v21 = vpop.permute.xlu1 %5141  ;;  %v10609_v41 = vpop.f32.mrf.mxu1 }
 0xe00   :  { %v5182_v13 = vadd.f32 %v5142_v21, %v5086_v38  ;;  %v4992_v38 = vadd.f32 %v4954_v5, %v4896_v39 }
 0xe01   :  { %v10614_v49 = vpop.f32.mrf.mxu1  ;;  %v6380_v40 = vpop.eup %6379 }
 0xe02   :  { %v4123_v31 = vpop.permute.xlu0 %4122  ;;  %v5198_v36 = vmul.f32 %v6374_v11, %v5182_v13 }
 0xe03   :  { %v4311_v46 = vpop.permute.xlu1 %4310 }
 0xe04   :  { %v4350_v9 = vadd.f32 %v4311_v46, %v4254_v24  ;;  %5745 = vmatmul.mubr.msk.f32.gmra.mxu1 %vm271_vm1, %v5198_v36  ;;  %v10617_v16 = vpop.f32.mrf.mxu1  ;;  %v12347_v46 = vld [vmem:[#allocation298_spill] sm:$0xff] }
 0xe05   :  { %6385 = vrcp.f32 %v12347_v46  ;;  %v6382_v5 = vpop.eup %6381 }
 0xe06   :  { %v5048_v48 = vpop.permute.xlu0 %5047  ;;  %v4366_v14 = vmul.f32 %v6376_v27, %v4350_v9  ;;  %v10620_v17 = vpop.f32.mrf.mxu1  ;;  %v4160_v9 = vadd.f32 %v4123_v31, %v4064_v15  ;;  %6387 = vrcp.f32 %v12349_v42  ;;  %v4898_v15 = vmul.f32 %v12353_v63, %v12166_v26 }
 0xe07   :  { %v4125_v28 = vpop.permute.xlu1 %4124  ;;  %v5087_v7 = vadd.f32 %v5048_v48, %v4991_v30  ;;  %6389 = vrcp.f32 %v12350_v4 }
 0xe08   :  { %5721 = vmatprep.mubr.msk.f32.mxu0 %vm271_vm1, %v4366_v14 }
 0xe09   :  { %v6384_v2 = vpop.eup %6383 }
 0xe0a   :  { %v4313_v35 = vpop.permute.xlu0 %4312 }
 0xe0b   :  { %v4351_v43 = vadd.f32 %v4313_v35, %v4255_v22  ;;  %v5050_v56 = vpop.permute.xlu1 %5049  ;;  %v12348_v22 = vld [vmem:[#allocation273_spill] sm:$0xff] }
 0xe0c   :  { %v10625_v45 = vpop.f32.mrf.mxu1  ;;  %v5088_v13 = vadd.f32 %v5050_v56, %v4992_v38  ;;  %v4065_v35 = vmul.f32 %v12348_v22, %v12166_v26  ;;  %v12352_v38 = vld [vmem:[#allocation301_spill] sm:$0xff] }
 0xe0d   :  { %v4367_v0 = vmul.f32 %v6378_v58, %v4351_v43  ;;  %6391 = vrcp.f32 %v12352_v38 }
 0xe0e   :  { %v4219_v25 = vpop.permute.xlu0 %4218  ;;  %v10631_v8 = vpop.f32.mrf.mxu1  ;;  %v4161_v56 = vadd.f32 %v4125_v28, %v4065_v35 }
 0xe0f   :  { %5722 = vmatmul.mubr.msk.f32.gmra.mxu0 %vm271_vm1, %v4367_v0  ;;  %v4956_v53 = vpop.permute.xlu1 %4955  ;;  %v4256_v29 = vadd.f32 %v4219_v25, %v4160_v9 }
 0xe12   :  { %v5144_v34 = vpop.permute.xlu0 %5143  ;;  %v6386_v30 = vpop.eup %6385 }
 0xe13   :  { %v5183_v37 = vadd.f32 %v5144_v34, %v5087_v7  ;;  %v4221_v20 = vpop.permute.xlu1 %4220  ;;  %v12351_v7 = vld [vmem:[#allocation211_spill] sm:$0xff] }
 0xe14   :  { %v10633_v21 = vpop.f32.mrf.mxu1  ;;  %v4257_v31 = vadd.f32 %v4221_v20, %v4161_v56  ;;  %v4897_v18 = vmul.f32 %v12351_v7, %v12161_v57  ;;  %v6388_v57 = vpop.eup %6387  ;;  %v12356_v56 = vld [vmem:[#allocation278_spill] sm:$0xff] }
 0xe15   :  { %v5199_v61 = vmul.f32 %v6380_v40, %v5183_v37  ;;  %v4067_v42 = vmul.f32 %v12356_v56, %v12134_v44 }
 0xe16   :  { %v4958_v11 = vpop.permute.xlu0 %4957  ;;  %v3701_v24 = vpop.f32.mrf.mxu1  ;;  %v4993_v40 = vadd.f32 %v4956_v53, %v4897_v18 }
 0xe17   :  { %5747 = vmatprep.mubr.msk.f32.mxu1 %vm271_vm1, %v5199_v61  ;;  %v10639_v62 = vadd.f32 %v3701_v24, %v10573_v1  ;;  %v5146_v36 = vpop.permute.xlu1 %5145  ;;  %v4994_v46 = vadd.f32 %v4958_v11, %v4898_v15  ;;  %v12360_v15 = vld [vmem:[#allocation303_spill] sm:$0xff] }
 0xe18   :  { %v5184_v27 = vadd.f32 %v5146_v36, %v5088_v13 }
 0xe1a   :  { %v4127_v3 = vpop.permute.xlu0 %4126  ;;  %v5200_v48 = vmul.f32 %v6382_v5, %v5184_v27 }
 0xe1b   :  { %v4315_v14 = vpop.permute.xlu1 %4314 }
 0xe1c   :  { %v4352_v33 = vadd.f32 %v4315_v14, %v4256_v29  ;;  %5748 = vmatmul.mubr.msk.f32.gmra.mxu1 %vm271_vm1, %v5200_v48  ;;  %v12355_v48 = vld [vmem:[#allocation302_spill] sm:$0xff] }
 0xe1d   :  { %6393 = vrcp.f32 %v12355_v48 }
 0xe1e   :  { %v5052_v43 = vpop.permute.xlu0 %5051  ;;  %v4368_v1 = vmul.f32 %v6384_v2, %v4352_v33  ;;  %v6390_v2 = vpop.eup %6389 }
 0xe1f   :  { %v4129_v58 = vpop.permute.xlu1 %4128  ;;  %v5089_v61 = vadd.f32 %v5052_v43, %v4993_v40  ;;  %v6392_v11 = vpop.eup %6391 }
 0xe20   :  { %5724 = vmatprep.mubr.msk.f32.mxu0 %vm271_vm1, %v4368_v1 }
 0xe22   :  { %v4317_v47 = vpop.permute.xlu0 %4316 }
 0xe23   :  { %v4353_v6 = vadd.f32 %v4317_v47, %v4257_v31  ;;  %v10647_v0 = vpop.f32.mrf.mxu1  ;;  %v5054_v25 = vpop.permute.xlu1 %5053 }
 0xe24   :  { %v5090_v5 = vadd.f32 %v5054_v25, %v4994_v46 }
 0xe25   :  { %v4369_v39 = vmul.f32 %v6386_v30, %v4353_v6  ;;  %v3711_v34 = vpop.f32.mrf.mxu1  ;;  %v4163_v6 = vadd.f32 %v4129_v58, %v4067_v42  ;;  %v12357_v30 = vld [vmem:[#allocation95_spill] sm:$0xff] }
 0xe26   :  { %v10653_v28 = vadd.f32 %v3711_v34, %v10580_v51  ;;  %v4223_v37 = vpop.permute.xlu0 %4222  ;;  %v12354_v51 = vld [vmem:[#allocation283_spill] sm:$0xff]  ;;  %6395 = vrcp.f32 %v12357_v30  ;;  %v12358_v34 = vld [vmem:[#allocation104_spill] sm:$0xff] }
 0xe27   :  { %5725 = vmatmul.mubr.msk.f32.gmra.mxu0 %vm271_vm1, %v4369_v39  ;;  %v4960_v20 = vpop.permute.xlu1 %4959  ;;  %v4066_v27 = vmul.f32 %v12354_v51, %v12122_v54  ;;  %6397 = vrcp.f32 %v12358_v34  ;;  %v12362_v51 = vld [vmem:[#allocation305_spill] sm:$0xff] }
 0xe28   :  { %6399 = vrcp.f32 %v12360_v15 }
 0xe29   :  { %v4162_v14 = vadd.f32 %v4127_v3, %v4066_v27  ;;  %6401 = vrcp.f32 %v12362_v51 }
 0xe2a   :  { %v5148_v13 = vpop.permute.xlu0 %5147  ;;  %v6394_v39 = vpop.eup %6393 }
 0xe2b   :  { %v5185_v24 = vadd.f32 %v5148_v13, %v5089_v61  ;;  %v4225_v36 = vpop.permute.xlu1 %4224  ;;  %v4258_v26 = vadd.f32 %v4223_v37, %v4162_v14  ;;  %v12359_v37 = vld [vmem:[#allocation236_spill] sm:$0xff] }
 0xe2c   :  { %v4259_v3 = vadd.f32 %v4225_v36, %v4163_v6  ;;  %v4899_v40 = vmul.f32 %v12359_v37, %v12122_v54  ;;  %v12363_v54 = vld [vmem:[#allocation290_spill] sm:$0xff] }
 0xe2d   :  { %v5201_v9 = vmul.f32 %v6388_v57, %v5185_v24  ;;  %v12361_v24 = vld [vmem:[#allocation216_spill] sm:$0xff] }
 0xe2e   :  { %v4962_v53 = vpop.permute.xlu0 %4961  ;;  %v4995_v63 = vadd.f32 %v4960_v20, %v4899_v40  ;;  %v4900_v36 = vmul.f32 %v12361_v24, %v12134_v44 }
 0xe2f   :  { %5750 = vmatprep.mubr.msk.f32.mxu1 %vm271_vm1, %v5201_v9  ;;  %v5150_v29 = vpop.permute.xlu1 %5149 }
 0xe30   :  { %v5186_v33 = vadd.f32 %v5150_v29, %v5090_v5  ;;  %v4996_v5 = vadd.f32 %v4962_v53, %v4900_v36  ;;  %v4068_v29 = vmul.f32 %v12363_v54, %v12147_v60  ;;  %v5659_v51 = vpop.f32.mrf.mxu0 }
 0xe32   :  { %v4131_v22 = vpop.permute.xlu0 %4130  ;;  %v5202_v35 = vmul.f32 %v6390_v2, %v5186_v33 }
 0xe33   :  { %v4319_v43 = vpop.permute.xlu1 %4318  ;;  %v6396_v27 = vpop.eup %6395  ;;  %v4164_v33 = vadd.f32 %v4131_v22, %v4068_v29 }
 0xe34   :  { %v4354_v1 = vadd.f32 %v4319_v43, %v4258_v26  ;;  %5751 = vmatmul.mubr.msk.f32.gmra.mxu1 %vm271_vm1, %v5202_v35  ;;  %v12364_v26 = vld [vmem:[#allocation109_spill] sm:$0xff]  ;;  %v12365_v35 = vld [vmem:[#allocation110_spill] sm:$0xff]  ;;  %v6398_v43 = vpop.eup %6397 }
 0xe35   :  { %6403 = vrcp.f32 %v12364_v26 }
 0xe36   :  { %v5056_v31 = vpop.permute.xlu0 %5055  ;;  %v4370_v47 = vmul.f32 %v6392_v11, %v4354_v1  ;;  %6405 = vrcp.f32 %v12365_v35  ;;  %v12366_v1 = vld [vmem:[#allocation292_spill] sm:$0xff]  ;;  %v3677_v35 = vadd.f32 %v10609_v41, %v5659_v51 }
 0xe37   :  { %v4133_v25 = vpop.permute.xlu1 %4132  ;;  %v5091_v13 = vadd.f32 %v5056_v31, %v4995_v63  ;;  %v4069_v11 = vmul.f32 %v12366_v1, %v12150_v55 }
 0xe38   :  { %5727 = vmatprep.mubr.msk.f32.mxu0 %vm271_vm1, %v4370_v47  ;;  %v12367_v47 = vld [vmem:[#allocation233_spill] sm:$0xff] }
 0xe39   :  { %v4165_v31 = vadd.f32 %v4133_v25, %v4069_v11  ;;  %v4901_v6 = vmul.f32 %v12367_v47, %v12147_v60 }
 0xe3a   :  { %v4321_v4 = vpop.permute.xlu0 %4320 }
 0xe3b   :  { %v4355_v7 = vadd.f32 %v4321_v4, %v4259_v3  ;;  %v5058_v18 = vpop.permute.xlu1 %5057  ;;  %v6400_v3 = vpop.eup %6399 }
 0xe3c   :  { %v5092_v48 = vadd.f32 %v5058_v18, %v4996_v5  ;;  %v10692_v5 = vpop.f32.mrf.mxu1 }
 0xe3d   :  { %v4371_v38 = vmul.f32 %v6394_v39, %v4355_v7  ;;  %v12368_v39 = vld [vmem:[#allocation240_spill] sm:$0xff] }
 0xe3e   :  { %v4227_v61 = vpop.permute.xlu0 %4226  ;;  %v4902_v34 = vmul.f32 %v12368_v39, %v12150_v55  ;;  %v10694_v29 = vpop.f32.mrf.mxu1 }
 0xe3f   :  { %5728 = vmatmul.mubr.msk.f32.gmra.mxu0 %vm271_vm1, %v4371_v38  ;;  %v4964_v58 = vpop.permute.xlu1 %4963  ;;  %v4260_v53 = vadd.f32 %v4227_v61, %v4164_v33  ;;  %v6402_v61 = vpop.eup %6401 }
 0xe40   :  { %v4997_v4 = vadd.f32 %v4964_v58, %v4901_v6 }
 0xe42   :  { %v5152_v57 = vpop.permute.xlu0 %5151  ;;  %v6404_v36 = vpop.eup %6403 }
 0xe43   :  { %v5187_v46 = vadd.f32 %v5152_v57, %v5091_v13  ;;  %v4229_v9 = vpop.permute.xlu1 %4228 }
 0xe44   :  { %v4261_v7 = vadd.f32 %v4229_v9, %v4165_v31 }
 0xe45   :  { %v5203_v20 = vmul.f32 %v6396_v27, %v5187_v46  ;;  %v6406_v46 = vpop.eup %6405  ;;  %v3478_v27 = vpop.f32.mrf.mxu0 }
 0xe46   :  { %v4966_v14 = vpop.permute.xlu0 %4965  ;;  %v3672_v11 = vadd.f32 %v10614_v49, %v3478_v27 }
 0xe47   :  { %5753 = vmatprep.mubr.msk.f32.mxu1 %vm271_vm1, %v5203_v20  ;;  %v5154_v2 = vpop.permute.xlu1 %5153  ;;  %v4998_v63 = vadd.f32 %v4966_v14, %v4902_v34  ;;  %v5662_v54 = vpop.f32.mrf.mxu0 }
 0xe48   :  { %v5188_v44 = vadd.f32 %v5154_v2, %v5092_v48 }
 0xe49   :  { %v3488_v20 = vpop.f32.mrf.mxu0 }
 0xe4a   :  { %v4323_v56 = vpop.permute.xlu0 %4322  ;;  %v5204_v42 = vmul.f32 %v6398_v43, %v5188_v44 }
 0xe4b   :  { %v4356_v22 = vadd.f32 %v4323_v56, %v4260_v53  ;;  %v5060_v30 = vpop.permute.xlu1 %5059  ;;  %v10696_v48 = vpop.f32.mrf.mxu1 }
 0xe4c   :  { %5754 = vmatmul.mubr.msk.f32.gmra.mxu1 %vm271_vm1, %v5204_v42  ;;  %v5093_v38 = vadd.f32 %v5060_v30, %v4997_v4  ;;  %v10709_v42 = vld [vmem:[%s10817_s4] ss:$0 sm:$0xff] }
 0xe4d   :  { %v4372_v18 = vmul.f32 %v6400_v3, %v4356_v22  ;;  %v10698_v33 = vpop.f32.mrf.mxu1  ;;  %v3687_v3 = vadd.f32 %v10617_v16, %v5662_v54 }
 0xe4e   :  { %v4325_v37 = vpop.permute.xlu0 %4324 }
 0xe4f   :  { %v4357_v40 = vadd.f32 %v4325_v37, %v4261_v7  ;;  %5730 = vmatprep.mubr.msk.f32.mxu0 %vm271_vm1, %v4372_v18  ;;  %v5062_v25 = vpop.permute.xlu1 %5061  ;;  %v3682_v7 = vadd.f32 %v10620_v17, %v3488_v20 }
 0xe50   :  { %v5094_v13 = vadd.f32 %v5062_v25, %v4998_v63 }
 0xe51   :  { %v4373_v60 = vmul.f32 %v6402_v61, %v4357_v40 }
 0xe52   :  { %v5156_v15 = vpop.permute.xlu0 %5155 }
 0xe53   :  { %v5189_v24 = vadd.f32 %v5156_v15, %v5093_v38  ;;  %5731 = vmatmul.mubr.msk.f32.gmra.mxu0 %vm271_vm1, %v4373_v60  ;;  %v5158_v58 = vpop.permute.xlu1 %5157 }
 0xe54   :  { %v5190_v57 = vadd.f32 %v5158_v58, %v5094_v13 }
 0xe55   :  { %v5205_v9 = vmul.f32 %v6404_v36, %v5189_v24 }
 0xe56   :  { %v5206_v55 = vmul.f32 %v6406_v46, %v5190_v57 }
 0xe57   :  { %5756 = vmatprep.mubr.msk.f32.mxu1 %vm271_vm1, %v5205_v9  ;;  %v5665_v14 = vpop.f32.mrf.mxu0 }
 0xe58   :  { %5757 = vmatmul.mubr.msk.f32.gmra.mxu1 %vm271_vm1, %v5206_v55  ;;  %v3697_v17 = vadd.f32 %v10625_v45, %v5665_v14 }
 0xe59   :  { %v3498_v2 = vpop.f32.mrf.mxu0 }
 0xe5a   :  { %v3692_v60 = vadd.f32 %v10631_v8, %v3498_v2  ;;  %v3707_v8 = vadd.f32 %v10633_v21, %v10569_v19  ;;  %v3717_v21 = vadd.f32 %v10647_v0, %v10577_v23  ;;  %v3727_v0 = vadd.f32 %v10692_v5, %v10584_v50 }
 0xe60   :  { %v10700_v26 = vpop.f32.mrf.mxu1 }
 0xe62   :  { %v10703_v43 = vpop.f32.mrf.mxu1 }
 0xe6f   :  { %v5711_v44 = vpop.f32.mrf.mxu0 }
 0xe70   :  { %v4568_v53 = vadd.f32 %v5711_v44, %v3677_v35 }
 0xe71   :  { %v4488_v1 = vpop.f32.mrf.mxu0 }
 0xe72   :  { %v4567_v31 = vadd.f32 %v4488_v1, %v3672_v11 }
 0xe7c   :  { %v5737_v56 = vpop.f32.mrf.mxu1 }
 0xe7d   :  { %v5401_v47 = vadd.f32 %v5737_v56, %v4568_v53 }
 0xe7e   :  { %v5321_v6 = vpop.f32.mrf.mxu1 }
 0xe7f   :  { %v5424_v22 = vadd.f32 %v10709_v42, %v5401_v47  ;;  %v5400_v30 = vadd.f32 %v5321_v6, %v4567_v31 }
 0xe81   :  { %5440 = vst.msk [vmem:[%s10818_s5 + $0x8] sm:$0xff] %vm271_vm1, %v5424_v22  ;;  %v5423_v41 = vadd.f32 %v10709_v42, %v5400_v30  ;;  %v3722_v30 = vadd.f32 %v10694_v29, %v10588_v59  ;;  %v3737_v59 = vadd.f32 %v10696_v48, %v10593_v12  ;;  %v3732_v29 = vadd.f32 %v10698_v33, %v10597_v32 }
 0xe82   :  { %v3747_v32 = vadd.f32 %v10700_v26, %v10601_v10  ;;  %v3742_v33 = vadd.f32 %v10703_v43, %v10605_v52 }
 0xe83   :  { %5439 = vst.msk [vmem:[%s10818_s5] sm:$0xff] %vm271_vm1, %v5423_v41 }
 0xe87   :  { %v5714_v49 = vpop.f32.mrf.mxu0 }
 0xe88   :  { %v4570_v18 = vadd.f32 %v5714_v49, %v3687_v3 }
 0xe89   :  { %v4498_v4 = vpop.f32.mrf.mxu0 }
 0xe8a   :  { %v4569_v34 = vadd.f32 %v4498_v4, %v3682_v7 }
 0xe94   :  { %v5740_v39 = vpop.f32.mrf.mxu1 }
 0xe95   :  { %v5403_v37 = vadd.f32 %v5740_v39, %v4570_v18 }
 0xe96   :  { %v5331_v40 = vpop.f32.mrf.mxu1 }
 0xe97   :  { %v5426_v38 = vadd.f32 %v10709_v42, %v5403_v37  ;;  %v5402_v25 = vadd.f32 %v5331_v40, %v4569_v34 }
 0xe99   :  { %5442 = vst.msk [vmem:[%s10818_s5 + $0x18] sm:$0xff] %vm271_vm1, %v5426_v38  ;;  %v5425_v61 = vadd.f32 %v10709_v42, %v5402_v25 }
 0xe9b   :  { %5441 = vst.msk [vmem:[%s10818_s5 + $0x10] sm:$0xff] %vm271_vm1, %v5425_v61 }
 0xe9f   :  { %v5717_v16 = vpop.f32.mrf.mxu0 }
 0xea0   :  { %v4572_v15 = vadd.f32 %v5717_v16, %v3697_v17 }
 0xea1   :  { %v4508_v63 = vpop.f32.mrf.mxu0 }
 0xea2   :  { %v4571_v24 = vadd.f32 %v4508_v63, %v3692_v60 }
 0xeac   :  { %v5743_v13 = vpop.f32.mrf.mxu1 }
 0xead   :  { %v5405_v58 = vadd.f32 %v5743_v13, %v4572_v15 }
 0xeae   :  { %v5341_v36 = vpop.f32.mrf.mxu1 }
 0xeaf   :  { %v5428_v57 = vadd.f32 %v10709_v42, %v5405_v58  ;;  %v5404_v46 = vadd.f32 %v5341_v36, %v4571_v24 }
 0xeb1   :  { %5444 = vst.msk [vmem:[%s10818_s5 + $0x28] sm:$0xff] %vm271_vm1, %v5428_v57  ;;  %v5427_v9 = vadd.f32 %v10709_v42, %v5404_v46 }
 0xeb3   :  { %5443 = vst.msk [vmem:[%s10818_s5 + $0x20] sm:$0xff] %vm271_vm1, %v5427_v9 }
 0xeb7   :  { %v5720_v45 = vpop.f32.mrf.mxu0 }
 0xeb8   :  { %v4574_v51 = vadd.f32 %v5720_v45, %v3707_v8 }
 0xeb9   :  { %v4518_v55 = vpop.f32.mrf.mxu0 }
 0xeba   :  { %v4573_v54 = vadd.f32 %v4518_v55, %v10639_v62 }
 0xec4   :  { %v5746_v27 = vpop.f32.mrf.mxu1 }
 0xec5   :  { %v5407_v20 = vadd.f32 %v5746_v27, %v4574_v51 }
 0xec6   :  { %v5351_v14 = vpop.f32.mrf.mxu1 }
 0xec7   :  { %v5430_v2 = vadd.f32 %v10709_v42, %v5407_v20  ;;  %v5406_v44 = vadd.f32 %v5351_v14, %v4573_v54 }
 0xec9   :  { %5446 = vst.msk [vmem:[%s10818_s5 + $0x38] sm:$0xff] %vm271_vm1, %v5430_v2  ;;  %v5429_v35 = vadd.f32 %v10709_v42, %v5406_v44 }
 0xecb   :  { %5445 = vst.msk [vmem:[%s10818_s5 + $0x30] sm:$0xff] %vm271_vm1, %v5429_v35 }
 0xecf   :  { %v5723_v19 = vpop.f32.mrf.mxu0 }
 0xed0   :  { %v4576_v1 = vadd.f32 %v5723_v19, %v3717_v21 }
 0xed1   :  { %v4528_v62 = vpop.f32.mrf.mxu0 }
 0xed2   :  { %v4575_v53 = vadd.f32 %v4528_v62, %v10653_v28 }
 0xedc   :  { %v5749_v11 = vpop.f32.mrf.mxu1 }
 0xedd   :  { %v5409_v56 = vadd.f32 %v5749_v11, %v4576_v1 }
 0xede   :  { %v5361_v31 = vpop.f32.mrf.mxu1 }
 0xedf   :  { %v5432_v47 = vadd.f32 %v10709_v42, %v5409_v56  ;;  %v5408_v6 = vadd.f32 %v5361_v31, %v4575_v53 }
 0xee1   :  { %5448 = vst.msk [vmem:[%s10818_s5 + $0x48] sm:$0xff] %vm271_vm1, %v5432_v47  ;;  %v5431_v22 = vadd.f32 %v10709_v42, %v5408_v6 }
 0xee3   :  { %5447 = vst.msk [vmem:[%s10818_s5 + $0x40] sm:$0xff] %vm271_vm1, %v5431_v22 }
 0xee7   :  { %v5726_v23 = vpop.f32.mrf.mxu0 }
 0xee8   :  { %v4578_v41 = vadd.f32 %v5726_v23, %v3727_v0 }
 0xee9   :  { %v4538_v28 = vpop.f32.mrf.mxu0 }
 0xeea   :  { %v4577_v3 = vadd.f32 %v4538_v28, %v3722_v30 }
 0xef4   :  { %v5752_v49 = vpop.f32.mrf.mxu1 }
 0xef5   :  { %v5411_v4 = vadd.f32 %v5752_v49, %v4578_v41 }
 0xef6   :  { %v5371_v7 = vpop.f32.mrf.mxu1 }
 0xef7   :  { %v5434_v18 = vadd.f32 %v10709_v42, %v5411_v4  ;;  %v5410_v39 = vadd.f32 %v5371_v7, %v4577_v3 }
 0xef9   :  { %5450 = vst.msk [vmem:[%s10818_s5 + $0x58] sm:$0xff] %vm271_vm1, %v5434_v18  ;;  %v5433_v34 = vadd.f32 %v10709_v42, %v5410_v39 }
 0xefb   :  { %5449 = vst.msk [vmem:[%s10818_s5 + $0x50] sm:$0xff] %vm271_vm1, %v5433_v34 }
 0xeff   :  { %v5729_v50 = vpop.f32.mrf.mxu0 }
 0xf00   :  { %v4580_v37 = vadd.f32 %v5729_v50, %v3737_v59 }
 0xf01   :  { %v4548_v5 = vpop.f32.mrf.mxu0 }
 0xf02   :  { %v4579_v38 = vadd.f32 %v4548_v5, %v3732_v29 }
 0xf0c   :  { %v5755_v40 = vpop.f32.mrf.mxu1 }
 0xf0d   :  { %v5413_v25 = vadd.f32 %v5755_v40, %v4580_v37 }
 0xf0e   :  { %v5381_v61 = vpop.f32.mrf.mxu1 }
 0xf0f   :  { %v5436_v16 = vadd.f32 %v10709_v42, %v5413_v25  ;;  %v5412_v17 = vadd.f32 %v5381_v61, %v4579_v38 }
 0xf11   :  { %5452 = vst.msk [vmem:[%s10818_s5 + $0x68] sm:$0xff] %vm271_vm1, %v5436_v16  ;;  %v5435_v63 = vadd.f32 %v10709_v42, %v5412_v17 }
 0xf13   :  { %v5732_v12 = vpop.f32.mrf.mxu0  ;;  %5451 = vst.msk [vmem:[%s10818_s5 + $0x60] sm:$0xff] %vm271_vm1, %v5435_v63 }
 0xf14   :  { %v4582_v60 = vadd.f32 %v5732_v12, %v3747_v32 }
 0xf15   :  { %v4558_v48 = vpop.f32.mrf.mxu0 }
 0xf16   :  { %v4581_v13 = vadd.f32 %v4558_v48, %v3742_v33 }
 0xf18   :  { %v5758_v15 = vpop.f32.mrf.mxu1 }
 0xf19   :  { %v5415_v24 = vadd.f32 %v5758_v15, %v4582_v60 }
 0xf1a   :  { %v5391_v58 = vpop.f32.mrf.mxu1 }
 0xf1b   :  { %v5438_v36 = vadd.f32 %v10709_v42, %v5415_v24  ;;  %v5414_v57 = vadd.f32 %v5391_v58, %v4581_v13 }
 0xf1d   :  { %5454 = vst.msk [vmem:[%s10818_s5 + $0x78] sm:$0xff] %vm271_vm1, %v5438_v36  ;;  %v5437_v46 = vadd.f32 %v10709_v42, %v5414_v57 }
 0xf1f   :  { %5453 = vst.msk [vmem:[%s10818_s5 + $0x70] sm:$0xff] %vm271_vm1, %v5437_v46 }

</bundles_post_ra>
